<compile_context>
chip_gen: v7x
topology: tpu7x:2x2x1
jax: 0.10.0
libtpu: 0.0.40
codegen_flags: <defaults>
</compile_context>

<pallas_src>
import functools

import numpy as np
import jax
import jax.numpy as jnp
from jax.experimental import pallas as pl
from jax.experimental.pallas import tpu as pltpu


# ------------------------------ small helpers ------------------------------ #

def _round_up(x, m):
    return -(-x // m) * m


def _is_pow2(m):
    return m > 0 and (m & (m - 1)) == 0


def _mod_const(x, m):
    if _is_pow2(m):
        return jnp.bitwise_and(x, m - 1)
    return jnp.remainder(x, m)


def _div_const(x, m):
    if _is_pow2(m):
        return jnp.right_shift(x, m.bit_length() - 1)
    return x // m


# ------------------------------ Pallas kernel ------------------------------- #

def _make_fused_kernel(cfg):
    """Build the fused discriminator kernel.

    cfg: static tuple of per-layer (H, W, Cin, Cout, pad_rows, pool, act).
    Kernel refs: (x, w0..w5, b0..b5, out, s0..s5) where s_l is layer l's
    zero-padded flattened-spatial activation scratch.
    """
    n_layers = len(cfg)

    def kernel(*refs):
        x_ref = refs[0]
        w_refs = refs[1:1 + n_layers]
        b_refs = refs[1 + n_layers:1 + 2 * n_layers]
        o_ref = refs[1 + 2 * n_layers]
        s_refs = refs[2 + 2 * n_layers:]

        # Stage this image's flattened (H*W, Cin) input into the zero-padded
        # layer-0 activation buffer.
        h0, w0, c0, _, pad0, _, _ = cfg[0]
        m0 = h0 * w0
        s0 = s_refs[0]
        s0[0:pad0, :] = jnp.zeros((pad0, c0), jnp.float32)
        s0[pad0 + m0:s0.shape[0], :] = jnp.zeros(
            (s0.shape[0] - pad0 - m0, c0), jnp.float32)
        s0[pad0:pad0 + m0, :] = x_ref[0]

        for l in range(n_layers):
            hl, wl, cin, cout, pad, pool, act = cfg[l]
            m = hl * wl
            a_ref = s_refs[l]
            w_ref = w_refs[l]

            need_mask = (hl > 1) or (wl > 1)
            if need_mask:
                row = jax.lax.broadcasted_iota(jnp.int32, (m, 1), 0)
                jj = _mod_const(row, wl)          # column index j of each row

            # conv3x3 (stride 1, pad 1): 9 accumulating GEMMs over shifted,
            # masked views of the padded activation buffer (im2col in VMEM).
            # The bias is folded into the accumulator init.
            acc = jnp.broadcast_to(b_refs[l][...], (m, cout)).astype(jnp.float32)
            for dy in (-1, 0, 1):
                if hl == 1 and dy != 0:
                    continue                       # tap sees only zero padding
                for dx in (-1, 0, 1):
                    if wl == 1 and dx != 0:
                        continue
                    tap = (dy + 1) * 3 + (dx + 1)
                    shift = dy * wl + dx
                    xs = a_ref[pad + shift:pad + shift + m, :]
                    if dy != 0 or dx != 0:
                        conds = []
                        if dy < 0:
                            conds.append(row >= (-dy) * wl)
                        if dy > 0:
                            conds.append(row < (hl - dy) * wl)
                        if dx < 0:
                            conds.append(jj >= -dx)
                        if dx > 0:
                            conds.append(jj < wl - dx)
                        valid = conds[0]
                        for c in conds[1:]:
                            valid = jnp.logical_and(valid, c)
                        xs = jnp.where(valid, xs, jnp.zeros_like(xs))
                    acc = acc + jnp.dot(
                        xs.astype(jnp.bfloat16),
                        w_ref[tap * cin:(tap + 1) * cin, :],
                        preferred_element_type=jnp.float32)

            out = acc                                         # (m, cout) f32
            if act == "leaky":
                out = jnp.where(out >= 0.0, out, 0.1 * out)   # LeakyReLU(0.1)
            else:
                out = 1.0 / (1.0 + jnp.exp(-out))             # final Sigmoid

            if pool:
                # AvgPool2d(2): 0/0.25 selection matrix built from iotas.
                ho, wo = hl // 2, wl // 2
                mo = ho * wo
                ro = jax.lax.broadcasted_iota(jnp.int32, (mo, m), 0)
                ri = jax.lax.broadcasted_iota(jnp.int32, (mo, m), 1)
                jo = _mod_const(ro, wo)
                io = _div_const(ro, wo)
                base = 2 * io * wl + 2 * jo        # top-left row of 2x2 window
                sel = ((ri == base) | (ri == base + 1) |
                       (ri == base + wl) | (ri == base + wl + 1))
                pmat = jnp.where(sel, jnp.float32(0.25), jnp.float32(0.0))
                out = jnp.dot(pmat, out, preferred_element_type=jnp.float32)
                m_out = mo
            else:
                m_out = m

            if l + 1 < n_layers:
                _, _, cnext, _, pnext, _, _ = cfg[l + 1]
                nref = s_refs[l + 1]
                total = nref.shape[0]
                nref[0:pnext, :] = jnp.zeros((pnext, cnext), jnp.float32)
                nref[pnext + m_out:total, :] = jnp.zeros(
                    (total - pnext - m_out, cnext), jnp.float32)
                nref[pnext:pnext + m_out, :] = out
            else:
                o_ref[0] = out.astype(o_ref.dtype)

    return kernel


# -------------------------- Parameter construction ------------------------- #

_CHANNELS = lambda cin, cout: [(cin, 64), (64, 128), (128, 256),
                               (256, 256), (256, 256), (256, cout)]
_HAS_BN = [False, False, True, True, True, False]
_ACTS = ["leaky", "leaky", "leaky", "leaky", "leaky", "sigmoid"]
_POOLS = [True, True, True, True, False, False]


def init_params(key, in_channels, out_channels):
    """Deterministic synthetic parameters; BN folded, bf16 weights."""
    eps = 1e-5
    cin0_pad = _round_up(in_channels, 8)                # sublane-aligned taps
    cout_last_pad = _round_up(max(out_channels, 128), 128)  # lane-dense output
    weights, biases = [], []
    for i, (ci, co) in enumerate(_CHANNELS(in_channels, out_channels)):
        key, kw, kb, kg, kbt, km, kv = jax.random.split(key, 7)
        w = jax.random.normal(kw, (co, ci, 3, 3), jnp.float32) / np.sqrt(9.0 * ci)
        b = 0.05 * jax.random.normal(kb, (co,), jnp.float32)
        if _HAS_BN[i]:
            # TODO(synk): BatchNorm2d is eval-mode only (running stats folded
            # into the conv); training-mode batch statistics are not computed.
            gamma = 1.0 + 0.1 * jax.random.normal(kg, (co,), jnp.float32)
            beta = 0.1 * jax.random.normal(kbt, (co,), jnp.float32)
            run_mean = 0.1 * jax.random.normal(km, (co,), jnp.float32)
            run_var = 1.0 + 0.1 * jnp.abs(jax.random.normal(kv, (co,), jnp.float32))
            scale = gamma / jnp.sqrt(run_var + eps)
            shift = beta - run_mean * scale
            w = w * scale[:, None, None, None]           # fold BN into conv
            b = b * scale + shift
        # (Cout, Cin, 3, 3) -> tap-major im2col layout (9*Cin, Cout) == HWIO.
        w_im2col = jnp.transpose(w, (2, 3, 1, 0)).reshape(9 * ci, co)
        if i == 0 and cin0_pad != ci:
            w_im2col = w_im2col.reshape(9, ci, co)
            w_im2col = jnp.pad(w_im2col, ((0, 0), (0, cin0_pad - ci), (0, 0)))
            w_im2col = w_im2col.reshape(9 * cin0_pad, co)
        if i == len(_HAS_BN) - 1 and cout_last_pad != co:
            w_im2col = jnp.pad(w_im2col, ((0, 0), (0, cout_last_pad - co)))
            b = jnp.pad(b, (0, cout_last_pad - co))
        weights.append(w_im2col.astype(jnp.bfloat16))
        biases.append(b.reshape(1, -1).astype(jnp.float32))
    return weights, biases


# ------------------------------- Forward ----------------------------------- #

def discriminator_forward(params, x_nchw, y_nchw, out_channels):
    """Equivalent of Discriminator.forward(x, y); NCHW in, NCHW out."""
    weights, biases = params
    inp = jnp.concatenate([x_nchw, y_nchw], axis=1)       # torch.cat(dim=1)
    n, cin, h, w = inp.shape
    x = jnp.transpose(inp, (0, 2, 3, 1)).reshape(n, h * w, cin)  # (N, H*W, C)

    cin0 = weights[0].shape[0] // 9
    if cin0 != cin:
        x = jnp.pad(x, ((0, 0), (0, 0), (0, cin0 - cin)))  # zero channels

    # Static per-layer geometry (dims entering each layer).
    cfg = []
    hl, wl = h, w
    for i, wgt in enumerate(weights):
        ci = wgt.shape[0] // 9
        co = wgt.shape[1]
        pad = _round_up(wl + 1, 8)        # covers the max |shift| = W+1
        cfg.append((hl, wl, ci, co, pad, _POOLS[i], _ACTS[i]))
        if _POOLS[i]:
            hl, wl = hl // 2, wl // 2
    hf, wf = hl, wl
    mf = hf * wf
    co_last = weights[-1].shape[1]

    kernel = _make_fused_kernel(tuple(cfg))

    in_specs = [pl.BlockSpec((1, h * w, cin0), lambda i: (i, 0, 0))]
    for wgt in weights:                    # resident weights: constant blocks
        in_specs.append(pl.BlockSpec(wgt.shape, lambda i: (0, 0)))
    for b in biases:
        in_specs.append(pl.BlockSpec(b.shape, lambda i: (0, 0)))

    scratch_shapes = [
        pltpu.VMEM((c[0] * c[1] + 2 * c[4], c[2]), jnp.float32) for c in cfg
    ]

    out = pl.pallas_call(
        kernel,
        out_shape=jax.ShapeDtypeStruct((n, mf, co_last), jnp.float32),
        grid=(n,),
        in_specs=in_specs,
        out_specs=pl.BlockSpec((1, mf, co_last), lambda i: (i, 0, 0)),
        scratch_shapes=scratch_shapes,
        compiler_params=pltpu.CompilerParams(
            dimension_semantics=("parallel",),
            vmem_limit_bytes=32 * 1024 * 1024),
    )(x, *weights, *biases)

    out = out[:, :, :out_channels]                         # drop lane padding
    out = out.reshape(n, hf, wf, out_channels)
    return jnp.transpose(out, (0, 3, 1, 2))                # NHWC -> NCHW


# --------------------------- Pure-JAX reference ----------------------------- #

def reference_forward(params, x_nchw, y_nchw, out_channels):
    """Reference using lax.conv + reshape-mean pooling (same folded params)."""
    weights, biases = params
    inp = jnp.concatenate([x_nchw, y_nchw], axis=1)
    x = jnp.transpose(inp, (0, 2, 3, 1))                   # NHWC
    cin0 = weights[0].shape[0] // 9
    if cin0 != x.shape[-1]:
        x = jnp.pad(x, ((0, 0), (0, 0), (0, 0), (0, cin0 - x.shape[-1])))
    for i, (wgt, b) in enumerate(zip(weights, biases)):
        ci = wgt.shape[0] // 9
        co = wgt.shape[1]
        w_hwio = wgt.astype(jnp.float32).reshape(3, 3, ci, co)
        x = jax.lax.conv_general_dilated(
            x, w_hwio, window_strides=(1, 1), padding="SAME",
            dimension_numbers=("NHWC", "HWIO", "NHWC"))
        x = x + b.astype(jnp.float32).reshape(1, 1, 1, co)
        if _ACTS[i] == "leaky":
            x = jnp.where(x >= 0.0, x, 0.1 * x)
        else:
            x = jax.nn.sigmoid(x)
        if _POOLS[i]:
            nb, hh, ww, cc = x.shape
            x = x.reshape(nb, hh // 2, 2, ww // 2, 2, cc).mean(axis=(2, 4))
    x = x[..., :out_channels]
    return jnp.transpose(x, (0, 3, 1, 2))                  # NHWC -> NCHW


# --------------------------------- Main ------------------------------------ #

if __name__ == "__main__":
    key = jax.random.PRNGKey(0)
    kx, ky, kp = jax.random.split(key, 3)

    # in_channels = C_x + C_y = 4, out_channels = 1, spatial 16x16, batch 2.
    batch, cx, cy, hw = 2, 2, 2, 16
    in_channels, out_channels = cx + cy, 1

    x = jax.random.normal(kx, (batch, cx, hw, hw), jnp.float32)
    y = jax.random.normal(ky, (batch, cy, hw, hw), jnp.float32)

    params = init_params(kp, in_channels, out_channels)

    fwd = jax.jit(functools.partial(discriminator_forward,
                                    out_channels=out_channels))
    out = fwd(params, x, y)
    out = jax.block_until_ready(out)

    assert out.shape == (batch, out_channels, 1, 1), out.shape
    assert bool(jnp.all(jnp.isfinite(out)))
    assert bool(jnp.all((out > 0.0) & (out < 1.0)))        # sigmoid range

    # Numerical check against a pure-JAX reference (kernel uses bf16 MXU
    # operands with f32 accumulation, so allow a generous tolerance).
    ref = jax.block_until_ready(
        reference_forward(params, x, y, out_channels))
    max_err = float(jnp.max(jnp.abs(out - ref)))
    assert max_err < 5e-2, f"max abs err vs reference: {max_err}"

    print("KERNEL_OK")
</pallas_src>

<mosaic_0001>
module attributes {stable_mosaic.version = 11 : i64} {
  func.func @kernel(%arg0: i32, %arg1: memref<1x256x8xf32, #tpu.memory_space<vmem>>, %arg2: memref<72x64xbf16, #tpu.memory_space<vmem>>, %arg3: memref<576x128xbf16, #tpu.memory_space<vmem>>, %arg4: memref<1152x256xbf16, #tpu.memory_space<vmem>>, %arg5: memref<2304x256xbf16, #tpu.memory_space<vmem>>, %arg6: memref<2304x256xbf16, #tpu.memory_space<vmem>>, %arg7: memref<2304x128xbf16, #tpu.memory_space<vmem>>, %arg8: memref<1x64xf32, #tpu.memory_space<vmem>>, %arg9: memref<1x128xf32, #tpu.memory_space<vmem>>, %arg10: memref<1x256xf32, #tpu.memory_space<vmem>>, %arg11: memref<1x256xf32, #tpu.memory_space<vmem>>, %arg12: memref<1x256xf32, #tpu.memory_space<vmem>>, %arg13: memref<1x128xf32, #tpu.memory_space<vmem>>, %arg14: memref<1x1x128xf32, #tpu.memory_space<vmem>>, %arg15: memref<304x8xf32, #tpu.memory_space<vmem>>, %arg16: memref<96x64xf32, #tpu.memory_space<vmem>>, %arg17: memref<32x128xf32, #tpu.memory_space<vmem>>, %arg18: memref<20x256xf32, #tpu.memory_space<vmem>>, %arg19: memref<17x256xf32, #tpu.memory_space<vmem>>, %arg20: memref<17x256xf32, #tpu.memory_space<vmem>>) attributes {dimension_semantics = [#tpu.dimension_semantics<parallel>], iteration_bounds = array<i64: 2>, scalar_prefetch = 0 : i64, scratch_operands = 6 : i64, tpu.core_type = #tpu.core_type<tc>, window_params = [{transform_indices = @transform_0, window_bounds = array<i64: 1, 256, 8>}, {pipeline_mode = #tpu.pipeline_mode<synchronous>, transform_indices = @transform_1, window_bounds = array<i64: 72, 64>}, {pipeline_mode = #tpu.pipeline_mode<synchronous>, transform_indices = @transform_2, window_bounds = array<i64: 576, 128>}, {pipeline_mode = #tpu.pipeline_mode<synchronous>, transform_indices = @transform_3, window_bounds = array<i64: 1152, 256>}, {pipeline_mode = #tpu.pipeline_mode<synchronous>, transform_indices = @transform_4, window_bounds = array<i64: 2304, 256>}, {pipeline_mode = #tpu.pipeline_mode<synchronous>, transform_indices = @transform_5, window_bounds = array<i64: 2304, 256>}, {pipeline_mode = #tpu.pipeline_mode<synchronous>, transform_indices = @transform_6, window_bounds = array<i64: 2304, 128>}, {pipeline_mode = #tpu.pipeline_mode<synchronous>, transform_indices = @transform_7, window_bounds = array<i64: 1, 64>}, {pipeline_mode = #tpu.pipeline_mode<synchronous>, transform_indices = @transform_8, window_bounds = array<i64: 1, 128>}, {pipeline_mode = #tpu.pipeline_mode<synchronous>, transform_indices = @transform_9, window_bounds = array<i64: 1, 256>}, {pipeline_mode = #tpu.pipeline_mode<synchronous>, transform_indices = @transform_10, window_bounds = array<i64: 1, 256>}, {pipeline_mode = #tpu.pipeline_mode<synchronous>, transform_indices = @transform_11, window_bounds = array<i64: 1, 256>}, {pipeline_mode = #tpu.pipeline_mode<synchronous>, transform_indices = @transform_12, window_bounds = array<i64: 1, 128>}, {transform_indices = @transform_13, window_bounds = array<i64: 1, 1, 128>}]} {
    %cst = arith.constant 0.000000e+00 : f32
    %0 = vector.broadcast %cst : f32 to vector<24x8xf32>
    %c0 = arith.constant 0 : index
    %c0_0 = arith.constant 0 : index
    %1 = vector.load %arg15[%c0, %c0_0] : memref<304x8xf32, #tpu.memory_space<vmem>>, vector<24x8xf32>
    tpu.vector_store %arg15[%c0, %c0_0], %0 {strides = array<i32>} : memref<304x8xf32, #tpu.memory_space<vmem>>, vector<24x8xf32>,
    %cst_1 = arith.constant 0.000000e+00 : f32
    %2 = vector.broadcast %cst_1 : f32 to vector<24x8xf32>
    %c280 = arith.constant 280 : index
    %c0_2 = arith.constant 0 : index
    %3 = vector.load %arg15[%c280, %c0_2] : memref<304x8xf32, #tpu.memory_space<vmem>>, vector<24x8xf32>
    tpu.vector_store %arg15[%c280, %c0_2], %2 {strides = array<i32>} : memref<304x8xf32, #tpu.memory_space<vmem>>, vector<24x8xf32>,
    %c0_3 = arith.constant 0 : index
    %c0_4 = arith.constant 0 : index
    %c0_5 = arith.constant 0 : index
    %4 = vector.load %arg1[%c0_3, %c0_4, %c0_5] : memref<1x256x8xf32, #tpu.memory_space<vmem>>, vector<1x256x8xf32>
    %5 = vector.shape_cast %4 : vector<1x256x8xf32> to vector<256x8xf32>
    %c24 = arith.constant 24 : index
    %c0_6 = arith.constant 0 : index
    %6 = vector.load %arg15[%c24, %c0_6] : memref<304x8xf32, #tpu.memory_space<vmem>>, vector<256x8xf32>
    tpu.vector_store %arg15[%c24, %c0_6], %5 {strides = array<i32>} : memref<304x8xf32, #tpu.memory_space<vmem>>, vector<256x8xf32>,
    %7 = tpu.iota {dimensions = array<i32: 0>} : vector<256x1xi32>
    %c15_i32 = arith.constant 15 : i32
    %8 = vector.broadcast %c15_i32 : i32 to vector<256x1xi32>
    %9 = arith.andi %7, %8 : vector<256x1xi32>
    %c0_7 = arith.constant 0 : index
    %c0_8 = arith.constant 0 : index
    %10 = vector.load %arg8[%c0_7, %c0_8] : memref<1x64xf32, #tpu.memory_space<vmem>>, vector<1x64xf32>
    %11 = vector.shape_cast %10 : vector<1x64xf32> to vector<1x64xf32>
    %12 = vector.broadcast %11 : vector<1x64xf32> to vector<256x64xf32>
    %c7 = arith.constant 7 : index
    %c0_9 = arith.constant 0 : index
    %13 = vector.load %arg15[%c7, %c0_9] : memref<304x8xf32, #tpu.memory_space<vmem>>, vector<256x8xf32>
    %c16_i32 = arith.constant 16 : i32
    %14 = vector.broadcast %c16_i32 : i32 to vector<256x1xi32>
    %15 = arith.cmpi sge, %7, %14 : vector<256x1xi32>
    %c1_i32 = arith.constant 1 : i32
    %16 = vector.broadcast %c1_i32 : i32 to vector<256x1xi32>
    %17 = arith.cmpi sge, %9, %16 : vector<256x1xi32>
    %18 = arith.andi %15, %17 : vector<256x1xi1>
    %cst_10 = arith.constant 0.000000e+00 : f32
    %19 = vector.broadcast %cst_10 : f32 to vector<256x8xf32>
    %20 = vector.shape_cast %18 : vector<256x1xi1> to vector<256x1xi1>
    %21 = vector.broadcast %20 : vector<256x1xi1> to vector<256x8xi1>
    %22 = arith.select %21, %13, %19 : vector<256x8xi1>, vector<256x8xf32>
    %23 = arith.truncf %22 : vector<256x8xf32> to vector<256x8xbf16>
    %c0_11 = arith.constant 0 : index
    %c0_12 = arith.constant 0 : index
    %24 = vector.load %arg2[%c0_11, %c0_12] : memref<72x64xbf16, #tpu.memory_space<vmem>>, vector<8x64xbf16>
    %cst_13 = arith.constant dense<0.000000e+00> : vector<256x64xf32>
    %25 = tpu.matmul %23, %24, %cst_13 {dimension_numbers = #tpu.dot_dimension_numbers<[1], [0], [0], [1], [0, 0, 1, 1], [], []>} : vector<256x8xbf16>, vector<8x64xbf16>, vector<256x64xf32> -> vector<256x64xf32>
    %26 = arith.addf %12, %25 : vector<256x64xf32>
    %c8 = arith.constant 8 : index
    %c0_14 = arith.constant 0 : index
    %27 = vector.load %arg15[%c8, %c0_14] : memref<304x8xf32, #tpu.memory_space<vmem>>, vector<256x8xf32>
    %c16_i32_15 = arith.constant 16 : i32
    %28 = vector.broadcast %c16_i32_15 : i32 to vector<256x1xi32>
    %29 = arith.cmpi sge, %7, %28 : vector<256x1xi32>
    %cst_16 = arith.constant 0.000000e+00 : f32
    %30 = vector.broadcast %cst_16 : f32 to vector<256x8xf32>
    %31 = vector.shape_cast %29 : vector<256x1xi1> to vector<256x1xi1>
    %32 = vector.broadcast %31 : vector<256x1xi1> to vector<256x8xi1>
    %33 = arith.select %32, %27, %30 : vector<256x8xi1>, vector<256x8xf32>
    %34 = arith.truncf %33 : vector<256x8xf32> to vector<256x8xbf16>
    %c8_17 = arith.constant 8 : index
    %c0_18 = arith.constant 0 : index
    %35 = vector.load %arg2[%c8_17, %c0_18] : memref<72x64xbf16, #tpu.memory_space<vmem>>, vector<8x64xbf16>
    %cst_19 = arith.constant dense<0.000000e+00> : vector<256x64xf32>
    %36 = tpu.matmul %34, %35, %cst_19 {dimension_numbers = #tpu.dot_dimension_numbers<[1], [0], [0], [1], [0, 0, 1, 1], [], []>} : vector<256x8xbf16>, vector<8x64xbf16>, vector<256x64xf32> -> vector<256x64xf32>
    %37 = arith.addf %26, %36 : vector<256x64xf32>
    %c9 = arith.constant 9 : index
    %c0_20 = arith.constant 0 : index
    %38 = vector.load %arg15[%c9, %c0_20] : memref<304x8xf32, #tpu.memory_space<vmem>>, vector<256x8xf32>
    %c16_i32_21 = arith.constant 16 : i32
    %39 = vector.broadcast %c16_i32_21 : i32 to vector<256x1xi32>
    %40 = arith.cmpi sge, %7, %39 : vector<256x1xi32>
    %c15_i32_22 = arith.constant 15 : i32
    %41 = vector.broadcast %c15_i32_22 : i32 to vector<256x1xi32>
    %42 = arith.cmpi slt, %9, %41 : vector<256x1xi32>
    %43 = arith.andi %40, %42 : vector<256x1xi1>
    %cst_23 = arith.constant 0.000000e+00 : f32
    %44 = vector.broadcast %cst_23 : f32 to vector<256x8xf32>
    %45 = vector.shape_cast %43 : vector<256x1xi1> to vector<256x1xi1>
    %46 = vector.broadcast %45 : vector<256x1xi1> to vector<256x8xi1>
    %47 = arith.select %46, %38, %44 : vector<256x8xi1>, vector<256x8xf32>
    %48 = arith.truncf %47 : vector<256x8xf32> to vector<256x8xbf16>
    %c16 = arith.constant 16 : index
    %c0_24 = arith.constant 0 : index
    %49 = vector.load %arg2[%c16, %c0_24] : memref<72x64xbf16, #tpu.memory_space<vmem>>, vector<8x64xbf16>
    %cst_25 = arith.constant dense<0.000000e+00> : vector<256x64xf32>
    %50 = tpu.matmul %48, %49, %cst_25 {dimension_numbers = #tpu.dot_dimension_numbers<[1], [0], [0], [1], [0, 0, 1, 1], [], []>} : vector<256x8xbf16>, vector<8x64xbf16>, vector<256x64xf32> -> vector<256x64xf32>
    %51 = arith.addf %37, %50 : vector<256x64xf32>
    %c23 = arith.constant 23 : index
    %c0_26 = arith.constant 0 : index
    %52 = vector.load %arg15[%c23, %c0_26] : memref<304x8xf32, #tpu.memory_space<vmem>>, vector<256x8xf32>
    %c1_i32_27 = arith.constant 1 : i32
    %53 = vector.broadcast %c1_i32_27 : i32 to vector<256x1xi32>
    %54 = arith.cmpi sge, %9, %53 : vector<256x1xi32>
    %cst_28 = arith.constant 0.000000e+00 : f32
    %55 = vector.broadcast %cst_28 : f32 to vector<256x8xf32>
    %56 = vector.shape_cast %54 : vector<256x1xi1> to vector<256x1xi1>
    %57 = vector.broadcast %56 : vector<256x1xi1> to vector<256x8xi1>
    %58 = arith.select %57, %52, %55 : vector<256x8xi1>, vector<256x8xf32>
    %59 = arith.truncf %58 : vector<256x8xf32> to vector<256x8xbf16>
    %c24_29 = arith.constant 24 : index
    %c0_30 = arith.constant 0 : index
    %60 = vector.load %arg2[%c24_29, %c0_30] : memref<72x64xbf16, #tpu.memory_space<vmem>>, vector<8x64xbf16>
    %cst_31 = arith.constant dense<0.000000e+00> : vector<256x64xf32>
    %61 = tpu.matmul %59, %60, %cst_31 {dimension_numbers = #tpu.dot_dimension_numbers<[1], [0], [0], [1], [0, 0, 1, 1], [], []>} : vector<256x8xbf16>, vector<8x64xbf16>, vector<256x64xf32> -> vector<256x64xf32>
    %62 = arith.addf %51, %61 : vector<256x64xf32>
    %c24_32 = arith.constant 24 : index
    %c0_33 = arith.constant 0 : index
    %63 = vector.load %arg15[%c24_32, %c0_33] : memref<304x8xf32, #tpu.memory_space<vmem>>, vector<256x8xf32>
    %64 = arith.truncf %63 : vector<256x8xf32> to vector<256x8xbf16>
    %c32 = arith.constant 32 : index
    %c0_34 = arith.constant 0 : index
    %65 = vector.load %arg2[%c32, %c0_34] : memref<72x64xbf16, #tpu.memory_space<vmem>>, vector<8x64xbf16>
    %cst_35 = arith.constant dense<0.000000e+00> : vector<256x64xf32>
    %66 = tpu.matmul %64, %65, %cst_35 {dimension_numbers = #tpu.dot_dimension_numbers<[1], [0], [0], [1], [0, 0, 1, 1], [], []>} : vector<256x8xbf16>, vector<8x64xbf16>, vector<256x64xf32> -> vector<256x64xf32>
    %67 = arith.addf %62, %66 : vector<256x64xf32>
    %c25 = arith.constant 25 : index
    %c0_36 = arith.constant 0 : index
    %68 = vector.load %arg15[%c25, %c0_36] : memref<304x8xf32, #tpu.memory_space<vmem>>, vector<256x8xf32>
    %c15_i32_37 = arith.constant 15 : i32
    %69 = vector.broadcast %c15_i32_37 : i32 to vector<256x1xi32>
    %70 = arith.cmpi slt, %9, %69 : vector<256x1xi32>
    %cst_38 = arith.constant 0.000000e+00 : f32
    %71 = vector.broadcast %cst_38 : f32 to vector<256x8xf32>
    %72 = vector.shape_cast %70 : vector<256x1xi1> to vector<256x1xi1>
    %73 = vector.broadcast %72 : vector<256x1xi1> to vector<256x8xi1>
    %74 = arith.select %73, %68, %71 : vector<256x8xi1>, vector<256x8xf32>
    %75 = arith.truncf %74 : vector<256x8xf32> to vector<256x8xbf16>
    %c40 = arith.constant 40 : index
    %c0_39 = arith.constant 0 : index
    %76 = vector.load %arg2[%c40, %c0_39] : memref<72x64xbf16, #tpu.memory_space<vmem>>, vector<8x64xbf16>
    %cst_40 = arith.constant dense<0.000000e+00> : vector<256x64xf32>
    %77 = tpu.matmul %75, %76, %cst_40 {dimension_numbers = #tpu.dot_dimension_numbers<[1], [0], [0], [1], [0, 0, 1, 1], [], []>} : vector<256x8xbf16>, vector<8x64xbf16>, vector<256x64xf32> -> vector<256x64xf32>
    %78 = arith.addf %67, %77 : vector<256x64xf32>
    %c39 = arith.constant 39 : index
    %c0_41 = arith.constant 0 : index
    %79 = vector.load %arg15[%c39, %c0_41] : memref<304x8xf32, #tpu.memory_space<vmem>>, vector<256x8xf32>
    %c240_i32 = arith.constant 240 : i32
    %80 = vector.broadcast %c240_i32 : i32 to vector<256x1xi32>
    %81 = arith.cmpi slt, %7, %80 : vector<256x1xi32>
    %c1_i32_42 = arith.constant 1 : i32
    %82 = vector.broadcast %c1_i32_42 : i32 to vector<256x1xi32>
    %83 = arith.cmpi sge, %9, %82 : vector<256x1xi32>
    %84 = arith.andi %81, %83 : vector<256x1xi1>
    %cst_43 = arith.constant 0.000000e+00 : f32
    %85 = vector.broadcast %cst_43 : f32 to vector<256x8xf32>
    %86 = vector.shape_cast %84 : vector<256x1xi1> to vector<256x1xi1>
    %87 = vector.broadcast %86 : vector<256x1xi1> to vector<256x8xi1>
    %88 = arith.select %87, %79, %85 : vector<256x8xi1>, vector<256x8xf32>
    %89 = arith.truncf %88 : vector<256x8xf32> to vector<256x8xbf16>
    %c48 = arith.constant 48 : index
    %c0_44 = arith.constant 0 : index
    %90 = vector.load %arg2[%c48, %c0_44] : memref<72x64xbf16, #tpu.memory_space<vmem>>, vector<8x64xbf16>
    %cst_45 = arith.constant dense<0.000000e+00> : vector<256x64xf32>
    %91 = tpu.matmul %89, %90, %cst_45 {dimension_numbers = #tpu.dot_dimension_numbers<[1], [0], [0], [1], [0, 0, 1, 1], [], []>} : vector<256x8xbf16>, vector<8x64xbf16>, vector<256x64xf32> -> vector<256x64xf32>
    %92 = arith.addf %78, %91 : vector<256x64xf32>
    %c40_46 = arith.constant 40 : index
    %c0_47 = arith.constant 0 : index
    %93 = vector.load %arg15[%c40_46, %c0_47] : memref<304x8xf32, #tpu.memory_space<vmem>>, vector<256x8xf32>
    %c240_i32_48 = arith.constant 240 : i32
    %94 = vector.broadcast %c240_i32_48 : i32 to vector<256x1xi32>
    %95 = arith.cmpi slt, %7, %94 : vector<256x1xi32>
    %cst_49 = arith.constant 0.000000e+00 : f32
    %96 = vector.broadcast %cst_49 : f32 to vector<256x8xf32>
    %97 = vector.shape_cast %95 : vector<256x1xi1> to vector<256x1xi1>
    %98 = vector.broadcast %97 : vector<256x1xi1> to vector<256x8xi1>
    %99 = arith.select %98, %93, %96 : vector<256x8xi1>, vector<256x8xf32>
    %100 = arith.truncf %99 : vector<256x8xf32> to vector<256x8xbf16>
    %c56 = arith.constant 56 : index
    %c0_50 = arith.constant 0 : index
    %101 = vector.load %arg2[%c56, %c0_50] : memref<72x64xbf16, #tpu.memory_space<vmem>>, vector<8x64xbf16>
    %cst_51 = arith.constant dense<0.000000e+00> : vector<256x64xf32>
    %102 = tpu.matmul %100, %101, %cst_51 {dimension_numbers = #tpu.dot_dimension_numbers<[1], [0], [0], [1], [0, 0, 1, 1], [], []>} : vector<256x8xbf16>, vector<8x64xbf16>, vector<256x64xf32> -> vector<256x64xf32>
    %103 = arith.addf %92, %102 : vector<256x64xf32>
    %c41 = arith.constant 41 : index
    %c0_52 = arith.constant 0 : index
    %104 = vector.load %arg15[%c41, %c0_52] : memref<304x8xf32, #tpu.memory_space<vmem>>, vector<256x8xf32>
    %c240_i32_53 = arith.constant 240 : i32
    %105 = vector.broadcast %c240_i32_53 : i32 to vector<256x1xi32>
    %106 = arith.cmpi slt, %7, %105 : vector<256x1xi32>
    %c15_i32_54 = arith.constant 15 : i32
    %107 = vector.broadcast %c15_i32_54 : i32 to vector<256x1xi32>
    %108 = arith.cmpi slt, %9, %107 : vector<256x1xi32>
    %109 = arith.andi %106, %108 : vector<256x1xi1>
    %cst_55 = arith.constant 0.000000e+00 : f32
    %110 = vector.broadcast %cst_55 : f32 to vector<256x8xf32>
    %111 = vector.shape_cast %109 : vector<256x1xi1> to vector<256x1xi1>
    %112 = vector.broadcast %111 : vector<256x1xi1> to vector<256x8xi1>
    %113 = arith.select %112, %104, %110 : vector<256x8xi1>, vector<256x8xf32>
    %114 = arith.truncf %113 : vector<256x8xf32> to vector<256x8xbf16>
    %c64 = arith.constant 64 : index
    %c0_56 = arith.constant 0 : index
    %115 = vector.load %arg2[%c64, %c0_56] : memref<72x64xbf16, #tpu.memory_space<vmem>>, vector<8x64xbf16>
    %cst_57 = arith.constant dense<0.000000e+00> : vector<256x64xf32>
    %116 = tpu.matmul %114, %115, %cst_57 {dimension_numbers = #tpu.dot_dimension_numbers<[1], [0], [0], [1], [0, 0, 1, 1], [], []>} : vector<256x8xbf16>, vector<8x64xbf16>, vector<256x64xf32> -> vector<256x64xf32>
    %117 = arith.addf %103, %116 : vector<256x64xf32>
    %cst_58 = arith.constant 0.000000e+00 : f32
    %118 = vector.broadcast %cst_58 : f32 to vector<256x64xf32>
    %119 = arith.cmpf oge, %117, %118 : vector<256x64xf32>
    %cst_59 = arith.constant 1.000000e-01 : f32
    %120 = vector.broadcast %cst_59 : f32 to vector<256x64xf32>
    %121 = arith.mulf %120, %117 : vector<256x64xf32>
    %122 = arith.select %119, %117, %121 : vector<256x64xi1>, vector<256x64xf32>
    %123 = tpu.iota {dimensions = array<i32: 0>} : vector<64x256xi32>
    %124 = tpu.iota {dimensions = array<i32: 1>} : vector<64x256xi32>
    %c7_i32 = arith.constant 7 : i32
    %125 = vector.broadcast %c7_i32 : i32 to vector<64x256xi32>
    %126 = arith.andi %123, %125 : vector<64x256xi32>
    %c3_i32 = arith.constant 3 : i32
    %127 = vector.broadcast %c3_i32 : i32 to vector<64x256xi32>
    %128 = arith.shrsi %123, %127 : vector<64x256xi32>
    %c2_i32 = arith.constant 2 : i32
    %129 = vector.broadcast %c2_i32 : i32 to vector<64x256xi32>
    %130 = arith.muli %129, %128 : vector<64x256xi32>
    %c16_i32_60 = arith.constant 16 : i32
    %131 = vector.broadcast %c16_i32_60 : i32 to vector<64x256xi32>
    %132 = arith.muli %130, %131 : vector<64x256xi32>
    %c2_i32_61 = arith.constant 2 : i32
    %133 = vector.broadcast %c2_i32_61 : i32 to vector<64x256xi32>
    %134 = arith.muli %133, %126 : vector<64x256xi32>
    %135 = arith.addi %132, %134 : vector<64x256xi32>
    %136 = arith.cmpi eq, %124, %135 : vector<64x256xi32>
    %c1_i32_62 = arith.constant 1 : i32
    %137 = vector.broadcast %c1_i32_62 : i32 to vector<64x256xi32>
    %138 = arith.addi %135, %137 : vector<64x256xi32>
    %139 = arith.cmpi eq, %124, %138 : vector<64x256xi32>
    %140 = arith.ori %136, %139 : vector<64x256xi1>
    %c16_i32_63 = arith.constant 16 : i32
    %141 = vector.broadcast %c16_i32_63 : i32 to vector<64x256xi32>
    %142 = arith.addi %135, %141 : vector<64x256xi32>
    %143 = arith.cmpi eq, %124, %142 : vector<64x256xi32>
    %144 = arith.ori %140, %143 : vector<64x256xi1>
    %c16_i32_64 = arith.constant 16 : i32
    %145 = vector.broadcast %c16_i32_64 : i32 to vector<64x256xi32>
    %146 = arith.addi %135, %145 : vector<64x256xi32>
    %c1_i32_65 = arith.constant 1 : i32
    %147 = vector.broadcast %c1_i32_65 : i32 to vector<64x256xi32>
    %148 = arith.addi %146, %147 : vector<64x256xi32>
    %149 = arith.cmpi eq, %124, %148 : vector<64x256xi32>
    %150 = arith.ori %144, %149 : vector<64x256xi1>
    %cst_66 = arith.constant 2.500000e-01 : f32
    %cst_67 = arith.constant 0.000000e+00 : f32
    %151 = vector.broadcast %cst_66 : f32 to vector<64x256xf32>
    %152 = vector.broadcast %cst_67 : f32 to vector<64x256xf32>
    %153 = arith.select %150, %151, %152 : vector<64x256xi1>, vector<64x256xf32>
    %cst_68 = arith.constant dense<0.000000e+00> : vector<64x64xf32>
    %154 = tpu.matmul %153, %122, %cst_68 {dimension_numbers = #tpu.dot_dimension_numbers<[1], [0], [0], [1], [0, 0, 1, 1], [], []>} : vector<64x256xf32>, vector<256x64xf32>, vector<64x64xf32> -> vector<64x64xf32>
    %cst_69 = arith.constant 0.000000e+00 : f32
    %155 = vector.broadcast %cst_69 : f32 to vector<16x64xf32>
    %c0_70 = arith.constant 0 : index
    %c0_71 = arith.constant 0 : index
    %156 = vector.load %arg16[%c0_70, %c0_71] : memref<96x64xf32, #tpu.memory_space<vmem>>, vector<16x64xf32>
    tpu.vector_store %arg16[%c0_70, %c0_71], %155 {strides = array<i32>} : memref<96x64xf32, #tpu.memory_space<vmem>>, vector<16x64xf32>,
    %cst_72 = arith.constant 0.000000e+00 : f32
    %157 = vector.broadcast %cst_72 : f32 to vector<16x64xf32>
    %c80 = arith.constant 80 : index
    %c0_73 = arith.constant 0 : index
    %158 = vector.load %arg16[%c80, %c0_73] : memref<96x64xf32, #tpu.memory_space<vmem>>, vector<16x64xf32>
    tpu.vector_store %arg16[%c80, %c0_73], %157 {strides = array<i32>} : memref<96x64xf32, #tpu.memory_space<vmem>>, vector<16x64xf32>,
    %c16_74 = arith.constant 16 : index
    %c0_75 = arith.constant 0 : index
    %159 = vector.load %arg16[%c16_74, %c0_75] : memref<96x64xf32, #tpu.memory_space<vmem>>, vector<64x64xf32>
    tpu.vector_store %arg16[%c16_74, %c0_75], %154 {strides = array<i32>} : memref<96x64xf32, #tpu.memory_space<vmem>>, vector<64x64xf32>,
    %160 = tpu.iota {dimensions = array<i32: 0>} : vector<64x1xi32>
    %c7_i32_76 = arith.constant 7 : i32
    %161 = vector.broadcast %c7_i32_76 : i32 to vector<64x1xi32>
    %162 = arith.andi %160, %161 : vector<64x1xi32>
    %c0_77 = arith.constant 0 : index
    %c0_78 = arith.constant 0 : index
    %163 = vector.load %arg9[%c0_77, %c0_78] : memref<1x128xf32, #tpu.memory_space<vmem>>, vector<1x128xf32>
    %164 = vector.shape_cast %163 : vector<1x128xf32> to vector<1x128xf32>
    %165 = vector.broadcast %164 : vector<1x128xf32> to vector<64x128xf32>
    %c7_79 = arith.constant 7 : index
    %c0_80 = arith.constant 0 : index
    %166 = vector.load %arg16[%c7_79, %c0_80] : memref<96x64xf32, #tpu.memory_space<vmem>>, vector<64x64xf32>
    %c8_i32 = arith.constant 8 : i32
    %167 = vector.broadcast %c8_i32 : i32 to vector<64x1xi32>
    %168 = arith.cmpi sge, %160, %167 : vector<64x1xi32>
    %c1_i32_81 = arith.constant 1 : i32
    %169 = vector.broadcast %c1_i32_81 : i32 to vector<64x1xi32>
    %170 = arith.cmpi sge, %162, %169 : vector<64x1xi32>
    %171 = arith.andi %168, %170 : vector<64x1xi1>
    %cst_82 = arith.constant 0.000000e+00 : f32
    %172 = vector.broadcast %cst_82 : f32 to vector<64x64xf32>
    %173 = vector.shape_cast %171 : vector<64x1xi1> to vector<64x1xi1>
    %174 = vector.broadcast %173 : vector<64x1xi1> to vector<64x64xi1>
    %175 = arith.select %174, %166, %172 : vector<64x64xi1>, vector<64x64xf32>
    %176 = arith.truncf %175 : vector<64x64xf32> to vector<64x64xbf16>
    %c0_83 = arith.constant 0 : index
    %c0_84 = arith.constant 0 : index
    %177 = vector.load %arg3[%c0_83, %c0_84] : memref<576x128xbf16, #tpu.memory_space<vmem>>, vector<64x128xbf16>
    %cst_85 = arith.constant dense<0.000000e+00> : vector<64x128xf32>
    %178 = tpu.matmul %176, %177, %cst_85 {dimension_numbers = #tpu.dot_dimension_numbers<[1], [0], [0], [1], [0, 0, 1, 1], [], []>} : vector<64x64xbf16>, vector<64x128xbf16>, vector<64x128xf32> -> vector<64x128xf32>
    %179 = arith.addf %165, %178 : vector<64x128xf32>
    %c8_86 = arith.constant 8 : index
    %c0_87 = arith.constant 0 : index
    %180 = vector.load %arg16[%c8_86, %c0_87] : memref<96x64xf32, #tpu.memory_space<vmem>>, vector<64x64xf32>
    %c8_i32_88 = arith.constant 8 : i32
    %181 = vector.broadcast %c8_i32_88 : i32 to vector<64x1xi32>
    %182 = arith.cmpi sge, %160, %181 : vector<64x1xi32>
    %cst_89 = arith.constant 0.000000e+00 : f32
    %183 = vector.broadcast %cst_89 : f32 to vector<64x64xf32>
    %184 = vector.shape_cast %182 : vector<64x1xi1> to vector<64x1xi1>
    %185 = vector.broadcast %184 : vector<64x1xi1> to vector<64x64xi1>
    %186 = arith.select %185, %180, %183 : vector<64x64xi1>, vector<64x64xf32>
    %187 = arith.truncf %186 : vector<64x64xf32> to vector<64x64xbf16>
    %c64_90 = arith.constant 64 : index
    %c0_91 = arith.constant 0 : index
    %188 = vector.load %arg3[%c64_90, %c0_91] : memref<576x128xbf16, #tpu.memory_space<vmem>>, vector<64x128xbf16>
    %cst_92 = arith.constant dense<0.000000e+00> : vector<64x128xf32>
    %189 = tpu.matmul %187, %188, %cst_92 {dimension_numbers = #tpu.dot_dimension_numbers<[1], [0], [0], [1], [0, 0, 1, 1], [], []>} : vector<64x64xbf16>, vector<64x128xbf16>, vector<64x128xf32> -> vector<64x128xf32>
    %190 = arith.addf %179, %189 : vector<64x128xf32>
    %c9_93 = arith.constant 9 : index
    %c0_94 = arith.constant 0 : index
    %191 = vector.load %arg16[%c9_93, %c0_94] : memref<96x64xf32, #tpu.memory_space<vmem>>, vector<64x64xf32>
    %c8_i32_95 = arith.constant 8 : i32
    %192 = vector.broadcast %c8_i32_95 : i32 to vector<64x1xi32>
    %193 = arith.cmpi sge, %160, %192 : vector<64x1xi32>
    %c7_i32_96 = arith.constant 7 : i32
    %194 = vector.broadcast %c7_i32_96 : i32 to vector<64x1xi32>
    %195 = arith.cmpi slt, %162, %194 : vector<64x1xi32>
    %196 = arith.andi %193, %195 : vector<64x1xi1>
    %cst_97 = arith.constant 0.000000e+00 : f32
    %197 = vector.broadcast %cst_97 : f32 to vector<64x64xf32>
    %198 = vector.shape_cast %196 : vector<64x1xi1> to vector<64x1xi1>
    %199 = vector.broadcast %198 : vector<64x1xi1> to vector<64x64xi1>
    %200 = arith.select %199, %191, %197 : vector<64x64xi1>, vector<64x64xf32>
    %201 = arith.truncf %200 : vector<64x64xf32> to vector<64x64xbf16>
    %c128 = arith.constant 128 : index
    %c0_98 = arith.constant 0 : index
    %202 = vector.load %arg3[%c128, %c0_98] : memref<576x128xbf16, #tpu.memory_space<vmem>>, vector<64x128xbf16>
    %cst_99 = arith.constant dense<0.000000e+00> : vector<64x128xf32>
    %203 = tpu.matmul %201, %202, %cst_99 {dimension_numbers = #tpu.dot_dimension_numbers<[1], [0], [0], [1], [0, 0, 1, 1], [], []>} : vector<64x64xbf16>, vector<64x128xbf16>, vector<64x128xf32> -> vector<64x128xf32>
    %204 = arith.addf %190, %203 : vector<64x128xf32>
    %c15 = arith.constant 15 : index
    %c0_100 = arith.constant 0 : index
    %205 = vector.load %arg16[%c15, %c0_100] : memref<96x64xf32, #tpu.memory_space<vmem>>, vector<64x64xf32>
    %c1_i32_101 = arith.constant 1 : i32
    %206 = vector.broadcast %c1_i32_101 : i32 to vector<64x1xi32>
    %207 = arith.cmpi sge, %162, %206 : vector<64x1xi32>
    %cst_102 = arith.constant 0.000000e+00 : f32
    %208 = vector.broadcast %cst_102 : f32 to vector<64x64xf32>
    %209 = vector.shape_cast %207 : vector<64x1xi1> to vector<64x1xi1>
    %210 = vector.broadcast %209 : vector<64x1xi1> to vector<64x64xi1>
    %211 = arith.select %210, %205, %208 : vector<64x64xi1>, vector<64x64xf32>
    %212 = arith.truncf %211 : vector<64x64xf32> to vector<64x64xbf16>
    %c192 = arith.constant 192 : index
    %c0_103 = arith.constant 0 : index
    %213 = vector.load %arg3[%c192, %c0_103] : memref<576x128xbf16, #tpu.memory_space<vmem>>, vector<64x128xbf16>
    %cst_104 = arith.constant dense<0.000000e+00> : vector<64x128xf32>
    %214 = tpu.matmul %212, %213, %cst_104 {dimension_numbers = #tpu.dot_dimension_numbers<[1], [0], [0], [1], [0, 0, 1, 1], [], []>} : vector<64x64xbf16>, vector<64x128xbf16>, vector<64x128xf32> -> vector<64x128xf32>
    %215 = arith.addf %204, %214 : vector<64x128xf32>
    %c16_105 = arith.constant 16 : index
    %c0_106 = arith.constant 0 : index
    %216 = vector.load %arg16[%c16_105, %c0_106] : memref<96x64xf32, #tpu.memory_space<vmem>>, vector<64x64xf32>
    %217 = arith.truncf %216 : vector<64x64xf32> to vector<64x64xbf16>
    %c256 = arith.constant 256 : index
    %c0_107 = arith.constant 0 : index
    %218 = vector.load %arg3[%c256, %c0_107] : memref<576x128xbf16, #tpu.memory_space<vmem>>, vector<64x128xbf16>
    %cst_108 = arith.constant dense<0.000000e+00> : vector<64x128xf32>
    %219 = tpu.matmul %217, %218, %cst_108 {dimension_numbers = #tpu.dot_dimension_numbers<[1], [0], [0], [1], [0, 0, 1, 1], [], []>} : vector<64x64xbf16>, vector<64x128xbf16>, vector<64x128xf32> -> vector<64x128xf32>
    %220 = arith.addf %215, %219 : vector<64x128xf32>
    %c17 = arith.constant 17 : index
    %c0_109 = arith.constant 0 : index
    %221 = vector.load %arg16[%c17, %c0_109] : memref<96x64xf32, #tpu.memory_space<vmem>>, vector<64x64xf32>
    %c7_i32_110 = arith.constant 7 : i32
    %222 = vector.broadcast %c7_i32_110 : i32 to vector<64x1xi32>
    %223 = arith.cmpi slt, %162, %222 : vector<64x1xi32>
    %cst_111 = arith.constant 0.000000e+00 : f32
    %224 = vector.broadcast %cst_111 : f32 to vector<64x64xf32>
    %225 = vector.shape_cast %223 : vector<64x1xi1> to vector<64x1xi1>
    %226 = vector.broadcast %225 : vector<64x1xi1> to vector<64x64xi1>
    %227 = arith.select %226, %221, %224 : vector<64x64xi1>, vector<64x64xf32>
    %228 = arith.truncf %227 : vector<64x64xf32> to vector<64x64xbf16>
    %c320 = arith.constant 320 : index
    %c0_112 = arith.constant 0 : index
    %229 = vector.load %arg3[%c320, %c0_112] : memref<576x128xbf16, #tpu.memory_space<vmem>>, vector<64x128xbf16>
    %cst_113 = arith.constant dense<0.000000e+00> : vector<64x128xf32>
    %230 = tpu.matmul %228, %229, %cst_113 {dimension_numbers = #tpu.dot_dimension_numbers<[1], [0], [0], [1], [0, 0, 1, 1], [], []>} : vector<64x64xbf16>, vector<64x128xbf16>, vector<64x128xf32> -> vector<64x128xf32>
    %231 = arith.addf %220, %230 : vector<64x128xf32>
    %c23_114 = arith.constant 23 : index
    %c0_115 = arith.constant 0 : index
    %232 = vector.load %arg16[%c23_114, %c0_115] : memref<96x64xf32, #tpu.memory_space<vmem>>, vector<64x64xf32>
    %c56_i32 = arith.constant 56 : i32
    %233 = vector.broadcast %c56_i32 : i32 to vector<64x1xi32>
    %234 = arith.cmpi slt, %160, %233 : vector<64x1xi32>
    %c1_i32_116 = arith.constant 1 : i32
    %235 = vector.broadcast %c1_i32_116 : i32 to vector<64x1xi32>
    %236 = arith.cmpi sge, %162, %235 : vector<64x1xi32>
    %237 = arith.andi %234, %236 : vector<64x1xi1>
    %cst_117 = arith.constant 0.000000e+00 : f32
    %238 = vector.broadcast %cst_117 : f32 to vector<64x64xf32>
    %239 = vector.shape_cast %237 : vector<64x1xi1> to vector<64x1xi1>
    %240 = vector.broadcast %239 : vector<64x1xi1> to vector<64x64xi1>
    %241 = arith.select %240, %232, %238 : vector<64x64xi1>, vector<64x64xf32>
    %242 = arith.truncf %241 : vector<64x64xf32> to vector<64x64xbf16>
    %c384 = arith.constant 384 : index
    %c0_118 = arith.constant 0 : index
    %243 = vector.load %arg3[%c384, %c0_118] : memref<576x128xbf16, #tpu.memory_space<vmem>>, vector<64x128xbf16>
    %cst_119 = arith.constant dense<0.000000e+00> : vector<64x128xf32>
    %244 = tpu.matmul %242, %243, %cst_119 {dimension_numbers = #tpu.dot_dimension_numbers<[1], [0], [0], [1], [0, 0, 1, 1], [], []>} : vector<64x64xbf16>, vector<64x128xbf16>, vector<64x128xf32> -> vector<64x128xf32>
    %245 = arith.addf %231, %244 : vector<64x128xf32>
    %c24_120 = arith.constant 24 : index
    %c0_121 = arith.constant 0 : index
    %246 = vector.load %arg16[%c24_120, %c0_121] : memref<96x64xf32, #tpu.memory_space<vmem>>, vector<64x64xf32>
    %c56_i32_122 = arith.constant 56 : i32
    %247 = vector.broadcast %c56_i32_122 : i32 to vector<64x1xi32>
    %248 = arith.cmpi slt, %160, %247 : vector<64x1xi32>
    %cst_123 = arith.constant 0.000000e+00 : f32
    %249 = vector.broadcast %cst_123 : f32 to vector<64x64xf32>
    %250 = vector.shape_cast %248 : vector<64x1xi1> to vector<64x1xi1>
    %251 = vector.broadcast %250 : vector<64x1xi1> to vector<64x64xi1>
    %252 = arith.select %251, %246, %249 : vector<64x64xi1>, vector<64x64xf32>
    %253 = arith.truncf %252 : vector<64x64xf32> to vector<64x64xbf16>
    %c448 = arith.constant 448 : index
    %c0_124 = arith.constant 0 : index
    %254 = vector.load %arg3[%c448, %c0_124] : memref<576x128xbf16, #tpu.memory_space<vmem>>, vector<64x128xbf16>
    %cst_125 = arith.constant dense<0.000000e+00> : vector<64x128xf32>
    %255 = tpu.matmul %253, %254, %cst_125 {dimension_numbers = #tpu.dot_dimension_numbers<[1], [0], [0], [1], [0, 0, 1, 1], [], []>} : vector<64x64xbf16>, vector<64x128xbf16>, vector<64x128xf32> -> vector<64x128xf32>
    %256 = arith.addf %245, %255 : vector<64x128xf32>
    %c25_126 = arith.constant 25 : index
    %c0_127 = arith.constant 0 : index
    %257 = vector.load %arg16[%c25_126, %c0_127] : memref<96x64xf32, #tpu.memory_space<vmem>>, vector<64x64xf32>
    %c56_i32_128 = arith.constant 56 : i32
    %258 = vector.broadcast %c56_i32_128 : i32 to vector<64x1xi32>
    %259 = arith.cmpi slt, %160, %258 : vector<64x1xi32>
    %c7_i32_129 = arith.constant 7 : i32
    %260 = vector.broadcast %c7_i32_129 : i32 to vector<64x1xi32>
    %261 = arith.cmpi slt, %162, %260 : vector<64x1xi32>
    %262 = arith.andi %259, %261 : vector<64x1xi1>
    %cst_130 = arith.constant 0.000000e+00 : f32
    %263 = vector.broadcast %cst_130 : f32 to vector<64x64xf32>
    %264 = vector.shape_cast %262 : vector<64x1xi1> to vector<64x1xi1>
    %265 = vector.broadcast %264 : vector<64x1xi1> to vector<64x64xi1>
    %266 = arith.select %265, %257, %263 : vector<64x64xi1>, vector<64x64xf32>
    %267 = arith.truncf %266 : vector<64x64xf32> to vector<64x64xbf16>
    %c512 = arith.constant 512 : index
    %c0_131 = arith.constant 0 : index
    %268 = vector.load %arg3[%c512, %c0_131] : memref<576x128xbf16, #tpu.memory_space<vmem>>, vector<64x128xbf16>
    %cst_132 = arith.constant dense<0.000000e+00> : vector<64x128xf32>
    %269 = tpu.matmul %267, %268, %cst_132 {dimension_numbers = #tpu.dot_dimension_numbers<[1], [0], [0], [1], [0, 0, 1, 1], [], []>} : vector<64x64xbf16>, vector<64x128xbf16>, vector<64x128xf32> -> vector<64x128xf32>
    %270 = arith.addf %256, %269 : vector<64x128xf32>
    %cst_133 = arith.constant 0.000000e+00 : f32
    %271 = vector.broadcast %cst_133 : f32 to vector<64x128xf32>
    %272 = arith.cmpf oge, %270, %271 : vector<64x128xf32>
    %cst_134 = arith.constant 1.000000e-01 : f32
    %273 = vector.broadcast %cst_134 : f32 to vector<64x128xf32>
    %274 = arith.mulf %273, %270 : vector<64x128xf32>
    %275 = arith.select %272, %270, %274 : vector<64x128xi1>, vector<64x128xf32>
    %276 = tpu.iota {dimensions = array<i32: 0>} : vector<16x64xi32>
    %277 = tpu.iota {dimensions = array<i32: 1>} : vector<16x64xi32>
    %c3_i32_135 = arith.constant 3 : i32
    %278 = vector.broadcast %c3_i32_135 : i32 to vector<16x64xi32>
    %279 = arith.andi %276, %278 : vector<16x64xi32>
    %c2_i32_136 = arith.constant 2 : i32
    %280 = vector.broadcast %c2_i32_136 : i32 to vector<16x64xi32>
    %281 = arith.shrsi %276, %280 : vector<16x64xi32>
    %c2_i32_137 = arith.constant 2 : i32
    %282 = vector.broadcast %c2_i32_137 : i32 to vector<16x64xi32>
    %283 = arith.muli %282, %281 : vector<16x64xi32>
    %c8_i32_138 = arith.constant 8 : i32
    %284 = vector.broadcast %c8_i32_138 : i32 to vector<16x64xi32>
    %285 = arith.muli %283, %284 : vector<16x64xi32>
    %c2_i32_139 = arith.constant 2 : i32
    %286 = vector.broadcast %c2_i32_139 : i32 to vector<16x64xi32>
    %287 = arith.muli %286, %279 : vector<16x64xi32>
    %288 = arith.addi %285, %287 : vector<16x64xi32>
    %289 = arith.cmpi eq, %277, %288 : vector<16x64xi32>
    %c1_i32_140 = arith.constant 1 : i32
    %290 = vector.broadcast %c1_i32_140 : i32 to vector<16x64xi32>
    %291 = arith.addi %288, %290 : vector<16x64xi32>
    %292 = arith.cmpi eq, %277, %291 : vector<16x64xi32>
    %293 = arith.ori %289, %292 : vector<16x64xi1>
    %c8_i32_141 = arith.constant 8 : i32
    %294 = vector.broadcast %c8_i32_141 : i32 to vector<16x64xi32>
    %295 = arith.addi %288, %294 : vector<16x64xi32>
    %296 = arith.cmpi eq, %277, %295 : vector<16x64xi32>
    %297 = arith.ori %293, %296 : vector<16x64xi1>
    %c8_i32_142 = arith.constant 8 : i32
    %298 = vector.broadcast %c8_i32_142 : i32 to vector<16x64xi32>
    %299 = arith.addi %288, %298 : vector<16x64xi32>
    %c1_i32_143 = arith.constant 1 : i32
    %300 = vector.broadcast %c1_i32_143 : i32 to vector<16x64xi32>
    %301 = arith.addi %299, %300 : vector<16x64xi32>
    %302 = arith.cmpi eq, %277, %301 : vector<16x64xi32>
    %303 = arith.ori %297, %302 : vector<16x64xi1>
    %cst_144 = arith.constant 2.500000e-01 : f32
    %cst_145 = arith.constant 0.000000e+00 : f32
    %304 = vector.broadcast %cst_144 : f32 to vector<16x64xf32>
    %305 = vector.broadcast %cst_145 : f32 to vector<16x64xf32>
    %306 = arith.select %303, %304, %305 : vector<16x64xi1>, vector<16x64xf32>
    %cst_146 = arith.constant dense<0.000000e+00> : vector<16x128xf32>
    %307 = tpu.matmul %306, %275, %cst_146 {dimension_numbers = #tpu.dot_dimension_numbers<[1], [0], [0], [1], [0, 0, 1, 1], [], []>} : vector<16x64xf32>, vector<64x128xf32>, vector<16x128xf32> -> vector<16x128xf32>
    %cst_147 = arith.constant 0.000000e+00 : f32
    %308 = vector.broadcast %cst_147 : f32 to vector<8x128xf32>
    %c0_148 = arith.constant 0 : index
    %c0_149 = arith.constant 0 : index
    %309 = vector.load %arg17[%c0_148, %c0_149] : memref<32x128xf32, #tpu.memory_space<vmem>>, vector<8x128xf32>
    tpu.vector_store %arg17[%c0_148, %c0_149], %308 {strides = array<i32>} : memref<32x128xf32, #tpu.memory_space<vmem>>, vector<8x128xf32>,
    %cst_150 = arith.constant 0.000000e+00 : f32
    %310 = vector.broadcast %cst_150 : f32 to vector<8x128xf32>
    %c24_151 = arith.constant 24 : index
    %c0_152 = arith.constant 0 : index
    %311 = vector.load %arg17[%c24_151, %c0_152] : memref<32x128xf32, #tpu.memory_space<vmem>>, vector<8x128xf32>
    tpu.vector_store %arg17[%c24_151, %c0_152], %310 {strides = array<i32>} : memref<32x128xf32, #tpu.memory_space<vmem>>, vector<8x128xf32>,
    %c8_153 = arith.constant 8 : index
    %c0_154 = arith.constant 0 : index
    %312 = vector.load %arg17[%c8_153, %c0_154] : memref<32x128xf32, #tpu.memory_space<vmem>>, vector<16x128xf32>
    tpu.vector_store %arg17[%c8_153, %c0_154], %307 {strides = array<i32>} : memref<32x128xf32, #tpu.memory_space<vmem>>, vector<16x128xf32>,
    %313 = tpu.iota {dimensions = array<i32: 0>} : vector<16x1xi32>
    %c3_i32_155 = arith.constant 3 : i32
    %314 = vector.broadcast %c3_i32_155 : i32 to vector<16x1xi32>
    %315 = arith.andi %313, %314 : vector<16x1xi32>
    %c0_156 = arith.constant 0 : index
    %c0_157 = arith.constant 0 : index
    %316 = vector.load %arg10[%c0_156, %c0_157] : memref<1x256xf32, #tpu.memory_space<vmem>>, vector<1x256xf32>
    %317 = vector.shape_cast %316 : vector<1x256xf32> to vector<1x256xf32>
    %318 = vector.broadcast %317 : vector<1x256xf32> to vector<16x256xf32>
    %c3 = arith.constant 3 : index
    %c0_158 = arith.constant 0 : index
    %319 = vector.load %arg17[%c3, %c0_158] : memref<32x128xf32, #tpu.memory_space<vmem>>, vector<16x128xf32>
    %c4_i32 = arith.constant 4 : i32
    %320 = vector.broadcast %c4_i32 : i32 to vector<16x1xi32>
    %321 = arith.cmpi sge, %313, %320 : vector<16x1xi32>
    %c1_i32_159 = arith.constant 1 : i32
    %322 = vector.broadcast %c1_i32_159 : i32 to vector<16x1xi32>
    %323 = arith.cmpi sge, %315, %322 : vector<16x1xi32>
    %324 = arith.andi %321, %323 : vector<16x1xi1>
    %cst_160 = arith.constant 0.000000e+00 : f32
    %325 = vector.broadcast %cst_160 : f32 to vector<16x128xf32>
    %326 = vector.shape_cast %324 : vector<16x1xi1> to vector<16x1xi1>
    %327 = vector.broadcast %326 : vector<16x1xi1> to vector<16x128xi1>
    %328 = arith.select %327, %319, %325 : vector<16x128xi1>, vector<16x128xf32>
    %329 = arith.truncf %328 : vector<16x128xf32> to vector<16x128xbf16>
    %c0_161 = arith.constant 0 : index
    %c0_162 = arith.constant 0 : index
    %330 = vector.load %arg4[%c0_161, %c0_162] : memref<1152x256xbf16, #tpu.memory_space<vmem>>, vector<128x256xbf16>
    %cst_163 = arith.constant dense<0.000000e+00> : vector<16x256xf32>
    %331 = tpu.matmul %329, %330, %cst_163 {dimension_numbers = #tpu.dot_dimension_numbers<[1], [0], [0], [1], [0, 0, 1, 1], [], []>} : vector<16x128xbf16>, vector<128x256xbf16>, vector<16x256xf32> -> vector<16x256xf32>
    %332 = arith.addf %318, %331 : vector<16x256xf32>
    %c4 = arith.constant 4 : index
    %c0_164 = arith.constant 0 : index
    %333 = vector.load %arg17[%c4, %c0_164] : memref<32x128xf32, #tpu.memory_space<vmem>>, vector<16x128xf32>
    %c4_i32_165 = arith.constant 4 : i32
    %334 = vector.broadcast %c4_i32_165 : i32 to vector<16x1xi32>
    %335 = arith.cmpi sge, %313, %334 : vector<16x1xi32>
    %cst_166 = arith.constant 0.000000e+00 : f32
    %336 = vector.broadcast %cst_166 : f32 to vector<16x128xf32>
    %337 = vector.shape_cast %335 : vector<16x1xi1> to vector<16x1xi1>
    %338 = vector.broadcast %337 : vector<16x1xi1> to vector<16x128xi1>
    %339 = arith.select %338, %333, %336 : vector<16x128xi1>, vector<16x128xf32>
    %340 = arith.truncf %339 : vector<16x128xf32> to vector<16x128xbf16>
    %c128_167 = arith.constant 128 : index
    %c0_168 = arith.constant 0 : index
    %341 = vector.load %arg4[%c128_167, %c0_168] : memref<1152x256xbf16, #tpu.memory_space<vmem>>, vector<128x256xbf16>
    %cst_169 = arith.constant dense<0.000000e+00> : vector<16x256xf32>
    %342 = tpu.matmul %340, %341, %cst_169 {dimension_numbers = #tpu.dot_dimension_numbers<[1], [0], [0], [1], [0, 0, 1, 1], [], []>} : vector<16x128xbf16>, vector<128x256xbf16>, vector<16x256xf32> -> vector<16x256xf32>
    %343 = arith.addf %332, %342 : vector<16x256xf32>
    %c5 = arith.constant 5 : index
    %c0_170 = arith.constant 0 : index
    %344 = vector.load %arg17[%c5, %c0_170] : memref<32x128xf32, #tpu.memory_space<vmem>>, vector<16x128xf32>
    %c4_i32_171 = arith.constant 4 : i32
    %345 = vector.broadcast %c4_i32_171 : i32 to vector<16x1xi32>
    %346 = arith.cmpi sge, %313, %345 : vector<16x1xi32>
    %c3_i32_172 = arith.constant 3 : i32
    %347 = vector.broadcast %c3_i32_172 : i32 to vector<16x1xi32>
    %348 = arith.cmpi slt, %315, %347 : vector<16x1xi32>
    %349 = arith.andi %346, %348 : vector<16x1xi1>
    %cst_173 = arith.constant 0.000000e+00 : f32
    %350 = vector.broadcast %cst_173 : f32 to vector<16x128xf32>
    %351 = vector.shape_cast %349 : vector<16x1xi1> to vector<16x1xi1>
    %352 = vector.broadcast %351 : vector<16x1xi1> to vector<16x128xi1>
    %353 = arith.select %352, %344, %350 : vector<16x128xi1>, vector<16x128xf32>
    %354 = arith.truncf %353 : vector<16x128xf32> to vector<16x128xbf16>
    %c256_174 = arith.constant 256 : index
    %c0_175 = arith.constant 0 : index
    %355 = vector.load %arg4[%c256_174, %c0_175] : memref<1152x256xbf16, #tpu.memory_space<vmem>>, vector<128x256xbf16>
    %cst_176 = arith.constant dense<0.000000e+00> : vector<16x256xf32>
    %356 = tpu.matmul %354, %355, %cst_176 {dimension_numbers = #tpu.dot_dimension_numbers<[1], [0], [0], [1], [0, 0, 1, 1], [], []>} : vector<16x128xbf16>, vector<128x256xbf16>, vector<16x256xf32> -> vector<16x256xf32>
    %357 = arith.addf %343, %356 : vector<16x256xf32>
    %c7_177 = arith.constant 7 : index
    %c0_178 = arith.constant 0 : index
    %358 = vector.load %arg17[%c7_177, %c0_178] : memref<32x128xf32, #tpu.memory_space<vmem>>, vector<16x128xf32>
    %c1_i32_179 = arith.constant 1 : i32
    %359 = vector.broadcast %c1_i32_179 : i32 to vector<16x1xi32>
    %360 = arith.cmpi sge, %315, %359 : vector<16x1xi32>
    %cst_180 = arith.constant 0.000000e+00 : f32
    %361 = vector.broadcast %cst_180 : f32 to vector<16x128xf32>
    %362 = vector.shape_cast %360 : vector<16x1xi1> to vector<16x1xi1>
    %363 = vector.broadcast %362 : vector<16x1xi1> to vector<16x128xi1>
    %364 = arith.select %363, %358, %361 : vector<16x128xi1>, vector<16x128xf32>
    %365 = arith.truncf %364 : vector<16x128xf32> to vector<16x128xbf16>
    %c384_181 = arith.constant 384 : index
    %c0_182 = arith.constant 0 : index
    %366 = vector.load %arg4[%c384_181, %c0_182] : memref<1152x256xbf16, #tpu.memory_space<vmem>>, vector<128x256xbf16>
    %cst_183 = arith.constant dense<0.000000e+00> : vector<16x256xf32>
    %367 = tpu.matmul %365, %366, %cst_183 {dimension_numbers = #tpu.dot_dimension_numbers<[1], [0], [0], [1], [0, 0, 1, 1], [], []>} : vector<16x128xbf16>, vector<128x256xbf16>, vector<16x256xf32> -> vector<16x256xf32>
    %368 = arith.addf %357, %367 : vector<16x256xf32>
    %c8_184 = arith.constant 8 : index
    %c0_185 = arith.constant 0 : index
    %369 = vector.load %arg17[%c8_184, %c0_185] : memref<32x128xf32, #tpu.memory_space<vmem>>, vector<16x128xf32>
    %370 = arith.truncf %369 : vector<16x128xf32> to vector<16x128xbf16>
    %c512_186 = arith.constant 512 : index
    %c0_187 = arith.constant 0 : index
    %371 = vector.load %arg4[%c512_186, %c0_187] : memref<1152x256xbf16, #tpu.memory_space<vmem>>, vector<128x256xbf16>
    %cst_188 = arith.constant dense<0.000000e+00> : vector<16x256xf32>
    %372 = tpu.matmul %370, %371, %cst_188 {dimension_numbers = #tpu.dot_dimension_numbers<[1], [0], [0], [1], [0, 0, 1, 1], [], []>} : vector<16x128xbf16>, vector<128x256xbf16>, vector<16x256xf32> -> vector<16x256xf32>
    %373 = arith.addf %368, %372 : vector<16x256xf32>
    %c9_189 = arith.constant 9 : index
    %c0_190 = arith.constant 0 : index
    %374 = vector.load %arg17[%c9_189, %c0_190] : memref<32x128xf32, #tpu.memory_space<vmem>>, vector<16x128xf32>
    %c3_i32_191 = arith.constant 3 : i32
    %375 = vector.broadcast %c3_i32_191 : i32 to vector<16x1xi32>
    %376 = arith.cmpi slt, %315, %375 : vector<16x1xi32>
    %cst_192 = arith.constant 0.000000e+00 : f32
    %377 = vector.broadcast %cst_192 : f32 to vector<16x128xf32>
    %378 = vector.shape_cast %376 : vector<16x1xi1> to vector<16x1xi1>
    %379 = vector.broadcast %378 : vector<16x1xi1> to vector<16x128xi1>
    %380 = arith.select %379, %374, %377 : vector<16x128xi1>, vector<16x128xf32>
    %381 = arith.truncf %380 : vector<16x128xf32> to vector<16x128xbf16>
    %c640 = arith.constant 640 : index
    %c0_193 = arith.constant 0 : index
    %382 = vector.load %arg4[%c640, %c0_193] : memref<1152x256xbf16, #tpu.memory_space<vmem>>, vector<128x256xbf16>
    %cst_194 = arith.constant dense<0.000000e+00> : vector<16x256xf32>
    %383 = tpu.matmul %381, %382, %cst_194 {dimension_numbers = #tpu.dot_dimension_numbers<[1], [0], [0], [1], [0, 0, 1, 1], [], []>} : vector<16x128xbf16>, vector<128x256xbf16>, vector<16x256xf32> -> vector<16x256xf32>
    %384 = arith.addf %373, %383 : vector<16x256xf32>
    %c11 = arith.constant 11 : index
    %c0_195 = arith.constant 0 : index
    %385 = vector.load %arg17[%c11, %c0_195] : memref<32x128xf32, #tpu.memory_space<vmem>>, vector<16x128xf32>
    %c12_i32 = arith.constant 12 : i32
    %386 = vector.broadcast %c12_i32 : i32 to vector<16x1xi32>
    %387 = arith.cmpi slt, %313, %386 : vector<16x1xi32>
    %c1_i32_196 = arith.constant 1 : i32
    %388 = vector.broadcast %c1_i32_196 : i32 to vector<16x1xi32>
    %389 = arith.cmpi sge, %315, %388 : vector<16x1xi32>
    %390 = arith.andi %387, %389 : vector<16x1xi1>
    %cst_197 = arith.constant 0.000000e+00 : f32
    %391 = vector.broadcast %cst_197 : f32 to vector<16x128xf32>
    %392 = vector.shape_cast %390 : vector<16x1xi1> to vector<16x1xi1>
    %393 = vector.broadcast %392 : vector<16x1xi1> to vector<16x128xi1>
    %394 = arith.select %393, %385, %391 : vector<16x128xi1>, vector<16x128xf32>
    %395 = arith.truncf %394 : vector<16x128xf32> to vector<16x128xbf16>
    %c768 = arith.constant 768 : index
    %c0_198 = arith.constant 0 : index
    %396 = vector.load %arg4[%c768, %c0_198] : memref<1152x256xbf16, #tpu.memory_space<vmem>>, vector<128x256xbf16>
    %cst_199 = arith.constant dense<0.000000e+00> : vector<16x256xf32>
    %397 = tpu.matmul %395, %396, %cst_199 {dimension_numbers = #tpu.dot_dimension_numbers<[1], [0], [0], [1], [0, 0, 1, 1], [], []>} : vector<16x128xbf16>, vector<128x256xbf16>, vector<16x256xf32> -> vector<16x256xf32>
    %398 = arith.addf %384, %397 : vector<16x256xf32>
    %c12 = arith.constant 12 : index
    %c0_200 = arith.constant 0 : index
    %399 = vector.load %arg17[%c12, %c0_200] : memref<32x128xf32, #tpu.memory_space<vmem>>, vector<16x128xf32>
    %c12_i32_201 = arith.constant 12 : i32
    %400 = vector.broadcast %c12_i32_201 : i32 to vector<16x1xi32>
    %401 = arith.cmpi slt, %313, %400 : vector<16x1xi32>
    %cst_202 = arith.constant 0.000000e+00 : f32
    %402 = vector.broadcast %cst_202 : f32 to vector<16x128xf32>
    %403 = vector.shape_cast %401 : vector<16x1xi1> to vector<16x1xi1>
    %404 = vector.broadcast %403 : vector<16x1xi1> to vector<16x128xi1>
    %405 = arith.select %404, %399, %402 : vector<16x128xi1>, vector<16x128xf32>
    %406 = arith.truncf %405 : vector<16x128xf32> to vector<16x128xbf16>
    %c896 = arith.constant 896 : index
    %c0_203 = arith.constant 0 : index
    %407 = vector.load %arg4[%c896, %c0_203] : memref<1152x256xbf16, #tpu.memory_space<vmem>>, vector<128x256xbf16>
    %cst_204 = arith.constant dense<0.000000e+00> : vector<16x256xf32>
    %408 = tpu.matmul %406, %407, %cst_204 {dimension_numbers = #tpu.dot_dimension_numbers<[1], [0], [0], [1], [0, 0, 1, 1], [], []>} : vector<16x128xbf16>, vector<128x256xbf16>, vector<16x256xf32> -> vector<16x256xf32>
    %409 = arith.addf %398, %408 : vector<16x256xf32>
    %c13 = arith.constant 13 : index
    %c0_205 = arith.constant 0 : index
    %410 = vector.load %arg17[%c13, %c0_205] : memref<32x128xf32, #tpu.memory_space<vmem>>, vector<16x128xf32>
    %c12_i32_206 = arith.constant 12 : i32
    %411 = vector.broadcast %c12_i32_206 : i32 to vector<16x1xi32>
    %412 = arith.cmpi slt, %313, %411 : vector<16x1xi32>
    %c3_i32_207 = arith.constant 3 : i32
    %413 = vector.broadcast %c3_i32_207 : i32 to vector<16x1xi32>
    %414 = arith.cmpi slt, %315, %413 : vector<16x1xi32>
    %415 = arith.andi %412, %414 : vector<16x1xi1>
    %cst_208 = arith.constant 0.000000e+00 : f32
    %416 = vector.broadcast %cst_208 : f32 to vector<16x128xf32>
    %417 = vector.shape_cast %415 : vector<16x1xi1> to vector<16x1xi1>
    %418 = vector.broadcast %417 : vector<16x1xi1> to vector<16x128xi1>
    %419 = arith.select %418, %410, %416 : vector<16x128xi1>, vector<16x128xf32>
    %420 = arith.truncf %419 : vector<16x128xf32> to vector<16x128xbf16>
    %c1024 = arith.constant 1024 : index
    %c0_209 = arith.constant 0 : index
    %421 = vector.load %arg4[%c1024, %c0_209] : memref<1152x256xbf16, #tpu.memory_space<vmem>>, vector<128x256xbf16>
    %cst_210 = arith.constant dense<0.000000e+00> : vector<16x256xf32>
    %422 = tpu.matmul %420, %421, %cst_210 {dimension_numbers = #tpu.dot_dimension_numbers<[1], [0], [0], [1], [0, 0, 1, 1], [], []>} : vector<16x128xbf16>, vector<128x256xbf16>, vector<16x256xf32> -> vector<16x256xf32>
    %423 = arith.addf %409, %422 : vector<16x256xf32>
    %cst_211 = arith.constant 0.000000e+00 : f32
    %424 = vector.broadcast %cst_211 : f32 to vector<16x256xf32>
    %425 = arith.cmpf oge, %423, %424 : vector<16x256xf32>
    %cst_212 = arith.constant 1.000000e-01 : f32
    %426 = vector.broadcast %cst_212 : f32 to vector<16x256xf32>
    %427 = arith.mulf %426, %423 : vector<16x256xf32>
    %428 = arith.select %425, %423, %427 : vector<16x256xi1>, vector<16x256xf32>
    %429 = tpu.iota {dimensions = array<i32: 0>} : vector<4x16xi32>
    %430 = tpu.iota {dimensions = array<i32: 1>} : vector<4x16xi32>
    %c1_i32_213 = arith.constant 1 : i32
    %431 = vector.broadcast %c1_i32_213 : i32 to vector<4x16xi32>
    %432 = arith.andi %429, %431 : vector<4x16xi32>
    %c1_i32_214 = arith.constant 1 : i32
    %433 = vector.broadcast %c1_i32_214 : i32 to vector<4x16xi32>
    %434 = arith.shrsi %429, %433 : vector<4x16xi32>
    %c2_i32_215 = arith.constant 2 : i32
    %435 = vector.broadcast %c2_i32_215 : i32 to vector<4x16xi32>
    %436 = arith.muli %435, %434 : vector<4x16xi32>
    %c4_i32_216 = arith.constant 4 : i32
    %437 = vector.broadcast %c4_i32_216 : i32 to vector<4x16xi32>
    %438 = arith.muli %436, %437 : vector<4x16xi32>
    %c2_i32_217 = arith.constant 2 : i32
    %439 = vector.broadcast %c2_i32_217 : i32 to vector<4x16xi32>
    %440 = arith.muli %439, %432 : vector<4x16xi32>
    %441 = arith.addi %438, %440 : vector<4x16xi32>
    %442 = arith.cmpi eq, %430, %441 : vector<4x16xi32>
    %c1_i32_218 = arith.constant 1 : i32
    %443 = vector.broadcast %c1_i32_218 : i32 to vector<4x16xi32>
    %444 = arith.addi %441, %443 : vector<4x16xi32>
    %445 = arith.cmpi eq, %430, %444 : vector<4x16xi32>
    %446 = arith.ori %442, %445 : vector<4x16xi1>
    %c4_i32_219 = arith.constant 4 : i32
    %447 = vector.broadcast %c4_i32_219 : i32 to vector<4x16xi32>
    %448 = arith.addi %441, %447 : vector<4x16xi32>
    %449 = arith.cmpi eq, %430, %448 : vector<4x16xi32>
    %450 = arith.ori %446, %449 : vector<4x16xi1>
    %c4_i32_220 = arith.constant 4 : i32
    %451 = vector.broadcast %c4_i32_220 : i32 to vector<4x16xi32>
    %452 = arith.addi %441, %451 : vector<4x16xi32>
    %c1_i32_221 = arith.constant 1 : i32
    %453 = vector.broadcast %c1_i32_221 : i32 to vector<4x16xi32>
    %454 = arith.addi %452, %453 : vector<4x16xi32>
    %455 = arith.cmpi eq, %430, %454 : vector<4x16xi32>
    %456 = arith.ori %450, %455 : vector<4x16xi1>
    %cst_222 = arith.constant 2.500000e-01 : f32
    %cst_223 = arith.constant 0.000000e+00 : f32
    %457 = vector.broadcast %cst_222 : f32 to vector<4x16xf32>
    %458 = vector.broadcast %cst_223 : f32 to vector<4x16xf32>
    %459 = arith.select %456, %457, %458 : vector<4x16xi1>, vector<4x16xf32>
    %cst_224 = arith.constant dense<0.000000e+00> : vector<4x256xf32>
    %460 = tpu.matmul %459, %428, %cst_224 {dimension_numbers = #tpu.dot_dimension_numbers<[1], [0], [0], [1], [0, 0, 1, 1], [], []>} : vector<4x16xf32>, vector<16x256xf32>, vector<4x256xf32> -> vector<4x256xf32>
    %cst_225 = arith.constant 0.000000e+00 : f32
    %461 = vector.broadcast %cst_225 : f32 to vector<8x256xf32>
    %c0_226 = arith.constant 0 : index
    %c0_227 = arith.constant 0 : index
    %462 = vector.load %arg18[%c0_226, %c0_227] : memref<20x256xf32, #tpu.memory_space<vmem>>, vector<8x256xf32>
    tpu.vector_store %arg18[%c0_226, %c0_227], %461 {strides = array<i32>} : memref<20x256xf32, #tpu.memory_space<vmem>>, vector<8x256xf32>,
    %cst_228 = arith.constant 0.000000e+00 : f32
    %463 = vector.broadcast %cst_228 : f32 to vector<8x256xf32>
    %c12_229 = arith.constant 12 : index
    %c0_230 = arith.constant 0 : index
    %464 = vector.load %arg18[%c12_229, %c0_230] : memref<20x256xf32, #tpu.memory_space<vmem>>, vector<8x256xf32>
    tpu.vector_store %arg18[%c12_229, %c0_230], %463 {strides = array<i32>} : memref<20x256xf32, #tpu.memory_space<vmem>>, vector<8x256xf32>,
    %c8_231 = arith.constant 8 : index
    %c0_232 = arith.constant 0 : index
    %465 = vector.load %arg18[%c8_231, %c0_232] : memref<20x256xf32, #tpu.memory_space<vmem>>, vector<4x256xf32>
    tpu.vector_store %arg18[%c8_231, %c0_232], %460 {strides = array<i32>} : memref<20x256xf32, #tpu.memory_space<vmem>>, vector<4x256xf32>,
    %466 = tpu.iota {dimensions = array<i32: 0>} : vector<4x1xi32>
    %c1_i32_233 = arith.constant 1 : i32
    %467 = vector.broadcast %c1_i32_233 : i32 to vector<4x1xi32>
    %468 = arith.andi %466, %467 : vector<4x1xi32>
    %c0_234 = arith.constant 0 : index
    %c0_235 = arith.constant 0 : index
    %469 = vector.load %arg11[%c0_234, %c0_235] : memref<1x256xf32, #tpu.memory_space<vmem>>, vector<1x256xf32>
    %470 = vector.shape_cast %469 : vector<1x256xf32> to vector<1x256xf32>
    %471 = vector.broadcast %470 : vector<1x256xf32> to vector<4x256xf32>
    %c5_236 = arith.constant 5 : index
    %c0_237 = arith.constant 0 : index
    %472 = vector.load %arg18[%c5_236, %c0_237] : memref<20x256xf32, #tpu.memory_space<vmem>>, vector<4x256xf32>
    %c2_i32_238 = arith.constant 2 : i32
    %473 = vector.broadcast %c2_i32_238 : i32 to vector<4x1xi32>
    %474 = arith.cmpi sge, %466, %473 : vector<4x1xi32>
    %c1_i32_239 = arith.constant 1 : i32
    %475 = vector.broadcast %c1_i32_239 : i32 to vector<4x1xi32>
    %476 = arith.cmpi sge, %468, %475 : vector<4x1xi32>
    %477 = arith.andi %474, %476 : vector<4x1xi1>
    %cst_240 = arith.constant 0.000000e+00 : f32
    %478 = vector.broadcast %cst_240 : f32 to vector<4x256xf32>
    %479 = vector.shape_cast %477 : vector<4x1xi1> to vector<4x1xi1>
    %480 = vector.broadcast %479 : vector<4x1xi1> to vector<4x256xi1>
    %481 = arith.select %480, %472, %478 : vector<4x256xi1>, vector<4x256xf32>
    %482 = arith.truncf %481 : vector<4x256xf32> to vector<4x256xbf16>
    %c0_241 = arith.constant 0 : index
    %c0_242 = arith.constant 0 : index
    %483 = vector.load %arg5[%c0_241, %c0_242] : memref<2304x256xbf16, #tpu.memory_space<vmem>>, vector<256x256xbf16>
    %cst_243 = arith.constant dense<0.000000e+00> : vector<4x256xf32>
    %484 = tpu.matmul %482, %483, %cst_243 {dimension_numbers = #tpu.dot_dimension_numbers<[1], [0], [0], [1], [0, 0, 1, 1], [], []>} : vector<4x256xbf16>, vector<256x256xbf16>, vector<4x256xf32> -> vector<4x256xf32>
    %485 = arith.addf %471, %484 : vector<4x256xf32>
    %c6 = arith.constant 6 : index
    %c0_244 = arith.constant 0 : index
    %486 = vector.load %arg18[%c6, %c0_244] : memref<20x256xf32, #tpu.memory_space<vmem>>, vector<4x256xf32>
    %c2_i32_245 = arith.constant 2 : i32
    %487 = vector.broadcast %c2_i32_245 : i32 to vector<4x1xi32>
    %488 = arith.cmpi sge, %466, %487 : vector<4x1xi32>
    %cst_246 = arith.constant 0.000000e+00 : f32
    %489 = vector.broadcast %cst_246 : f32 to vector<4x256xf32>
    %490 = vector.shape_cast %488 : vector<4x1xi1> to vector<4x1xi1>
    %491 = vector.broadcast %490 : vector<4x1xi1> to vector<4x256xi1>
    %492 = arith.select %491, %486, %489 : vector<4x256xi1>, vector<4x256xf32>
    %493 = arith.truncf %492 : vector<4x256xf32> to vector<4x256xbf16>
    %c256_247 = arith.constant 256 : index
    %c0_248 = arith.constant 0 : index
    %494 = vector.load %arg5[%c256_247, %c0_248] : memref<2304x256xbf16, #tpu.memory_space<vmem>>, vector<256x256xbf16>
    %cst_249 = arith.constant dense<0.000000e+00> : vector<4x256xf32>
    %495 = tpu.matmul %493, %494, %cst_249 {dimension_numbers = #tpu.dot_dimension_numbers<[1], [0], [0], [1], [0, 0, 1, 1], [], []>} : vector<4x256xbf16>, vector<256x256xbf16>, vector<4x256xf32> -> vector<4x256xf32>
    %496 = arith.addf %485, %495 : vector<4x256xf32>
    %c7_250 = arith.constant 7 : index
    %c0_251 = arith.constant 0 : index
    %497 = vector.load %arg18[%c7_250, %c0_251] : memref<20x256xf32, #tpu.memory_space<vmem>>, vector<4x256xf32>
    %c2_i32_252 = arith.constant 2 : i32
    %498 = vector.broadcast %c2_i32_252 : i32 to vector<4x1xi32>
    %499 = arith.cmpi sge, %466, %498 : vector<4x1xi32>
    %c1_i32_253 = arith.constant 1 : i32
    %500 = vector.broadcast %c1_i32_253 : i32 to vector<4x1xi32>
    %501 = arith.cmpi slt, %468, %500 : vector<4x1xi32>
    %502 = arith.andi %499, %501 : vector<4x1xi1>
    %cst_254 = arith.constant 0.000000e+00 : f32
    %503 = vector.broadcast %cst_254 : f32 to vector<4x256xf32>
    %504 = vector.shape_cast %502 : vector<4x1xi1> to vector<4x1xi1>
    %505 = vector.broadcast %504 : vector<4x1xi1> to vector<4x256xi1>
    %506 = arith.select %505, %497, %503 : vector<4x256xi1>, vector<4x256xf32>
    %507 = arith.truncf %506 : vector<4x256xf32> to vector<4x256xbf16>
    %c512_255 = arith.constant 512 : index
    %c0_256 = arith.constant 0 : index
    %508 = vector.load %arg5[%c512_255, %c0_256] : memref<2304x256xbf16, #tpu.memory_space<vmem>>, vector<256x256xbf16>
    %cst_257 = arith.constant dense<0.000000e+00> : vector<4x256xf32>
    %509 = tpu.matmul %507, %508, %cst_257 {dimension_numbers = #tpu.dot_dimension_numbers<[1], [0], [0], [1], [0, 0, 1, 1], [], []>} : vector<4x256xbf16>, vector<256x256xbf16>, vector<4x256xf32> -> vector<4x256xf32>
    %510 = arith.addf %496, %509 : vector<4x256xf32>
    %c7_258 = arith.constant 7 : index
    %c0_259 = arith.constant 0 : index
    %511 = vector.load %arg18[%c7_258, %c0_259] : memref<20x256xf32, #tpu.memory_space<vmem>>, vector<4x256xf32>
    %c1_i32_260 = arith.constant 1 : i32
    %512 = vector.broadcast %c1_i32_260 : i32 to vector<4x1xi32>
    %513 = arith.cmpi sge, %468, %512 : vector<4x1xi32>
    %cst_261 = arith.constant 0.000000e+00 : f32
    %514 = vector.broadcast %cst_261 : f32 to vector<4x256xf32>
    %515 = vector.shape_cast %513 : vector<4x1xi1> to vector<4x1xi1>
    %516 = vector.broadcast %515 : vector<4x1xi1> to vector<4x256xi1>
    %517 = arith.select %516, %511, %514 : vector<4x256xi1>, vector<4x256xf32>
    %518 = arith.truncf %517 : vector<4x256xf32> to vector<4x256xbf16>
    %c768_262 = arith.constant 768 : index
    %c0_263 = arith.constant 0 : index
    %519 = vector.load %arg5[%c768_262, %c0_263] : memref<2304x256xbf16, #tpu.memory_space<vmem>>, vector<256x256xbf16>
    %cst_264 = arith.constant dense<0.000000e+00> : vector<4x256xf32>
    %520 = tpu.matmul %518, %519, %cst_264 {dimension_numbers = #tpu.dot_dimension_numbers<[1], [0], [0], [1], [0, 0, 1, 1], [], []>} : vector<4x256xbf16>, vector<256x256xbf16>, vector<4x256xf32> -> vector<4x256xf32>
    %521 = arith.addf %510, %520 : vector<4x256xf32>
    %c8_265 = arith.constant 8 : index
    %c0_266 = arith.constant 0 : index
    %522 = vector.load %arg18[%c8_265, %c0_266] : memref<20x256xf32, #tpu.memory_space<vmem>>, vector<4x256xf32>
    %523 = arith.truncf %522 : vector<4x256xf32> to vector<4x256xbf16>
    %c1024_267 = arith.constant 1024 : index
    %c0_268 = arith.constant 0 : index
    %524 = vector.load %arg5[%c1024_267, %c0_268] : memref<2304x256xbf16, #tpu.memory_space<vmem>>, vector<256x256xbf16>
    %cst_269 = arith.constant dense<0.000000e+00> : vector<4x256xf32>
    %525 = tpu.matmul %523, %524, %cst_269 {dimension_numbers = #tpu.dot_dimension_numbers<[1], [0], [0], [1], [0, 0, 1, 1], [], []>} : vector<4x256xbf16>, vector<256x256xbf16>, vector<4x256xf32> -> vector<4x256xf32>
    %526 = arith.addf %521, %525 : vector<4x256xf32>
    %c9_270 = arith.constant 9 : index
    %c0_271 = arith.constant 0 : index
    %527 = vector.load %arg18[%c9_270, %c0_271] : memref<20x256xf32, #tpu.memory_space<vmem>>, vector<4x256xf32>
    %c1_i32_272 = arith.constant 1 : i32
    %528 = vector.broadcast %c1_i32_272 : i32 to vector<4x1xi32>
    %529 = arith.cmpi slt, %468, %528 : vector<4x1xi32>
    %cst_273 = arith.constant 0.000000e+00 : f32
    %530 = vector.broadcast %cst_273 : f32 to vector<4x256xf32>
    %531 = vector.shape_cast %529 : vector<4x1xi1> to vector<4x1xi1>
    %532 = vector.broadcast %531 : vector<4x1xi1> to vector<4x256xi1>
    %533 = arith.select %532, %527, %530 : vector<4x256xi1>, vector<4x256xf32>
    %534 = arith.truncf %533 : vector<4x256xf32> to vector<4x256xbf16>
    %c1280 = arith.constant 1280 : index
    %c0_274 = arith.constant 0 : index
    %535 = vector.load %arg5[%c1280, %c0_274] : memref<2304x256xbf16, #tpu.memory_space<vmem>>, vector<256x256xbf16>
    %cst_275 = arith.constant dense<0.000000e+00> : vector<4x256xf32>
    %536 = tpu.matmul %534, %535, %cst_275 {dimension_numbers = #tpu.dot_dimension_numbers<[1], [0], [0], [1], [0, 0, 1, 1], [], []>} : vector<4x256xbf16>, vector<256x256xbf16>, vector<4x256xf32> -> vector<4x256xf32>
    %537 = arith.addf %526, %536 : vector<4x256xf32>
    %c9_276 = arith.constant 9 : index
    %c0_277 = arith.constant 0 : index
    %538 = vector.load %arg18[%c9_276, %c0_277] : memref<20x256xf32, #tpu.memory_space<vmem>>, vector<4x256xf32>
    %c2_i32_278 = arith.constant 2 : i32
    %539 = vector.broadcast %c2_i32_278 : i32 to vector<4x1xi32>
    %540 = arith.cmpi slt, %466, %539 : vector<4x1xi32>
    %c1_i32_279 = arith.constant 1 : i32
    %541 = vector.broadcast %c1_i32_279 : i32 to vector<4x1xi32>
    %542 = arith.cmpi sge, %468, %541 : vector<4x1xi32>
    %543 = arith.andi %540, %542 : vector<4x1xi1>
    %cst_280 = arith.constant 0.000000e+00 : f32
    %544 = vector.broadcast %cst_280 : f32 to vector<4x256xf32>
    %545 = vector.shape_cast %543 : vector<4x1xi1> to vector<4x1xi1>
    %546 = vector.broadcast %545 : vector<4x1xi1> to vector<4x256xi1>
    %547 = arith.select %546, %538, %544 : vector<4x256xi1>, vector<4x256xf32>
    %548 = arith.truncf %547 : vector<4x256xf32> to vector<4x256xbf16>
    %c1536 = arith.constant 1536 : index
    %c0_281 = arith.constant 0 : index
    %549 = vector.load %arg5[%c1536, %c0_281] : memref<2304x256xbf16, #tpu.memory_space<vmem>>, vector<256x256xbf16>
    %cst_282 = arith.constant dense<0.000000e+00> : vector<4x256xf32>
    %550 = tpu.matmul %548, %549, %cst_282 {dimension_numbers = #tpu.dot_dimension_numbers<[1], [0], [0], [1], [0, 0, 1, 1], [], []>} : vector<4x256xbf16>, vector<256x256xbf16>, vector<4x256xf32> -> vector<4x256xf32>
    %551 = arith.addf %537, %550 : vector<4x256xf32>
    %c10 = arith.constant 10 : index
    %c0_283 = arith.constant 0 : index
    %552 = vector.load %arg18[%c10, %c0_283] : memref<20x256xf32, #tpu.memory_space<vmem>>, vector<4x256xf32>
    %c2_i32_284 = arith.constant 2 : i32
    %553 = vector.broadcast %c2_i32_284 : i32 to vector<4x1xi32>
    %554 = arith.cmpi slt, %466, %553 : vector<4x1xi32>
    %cst_285 = arith.constant 0.000000e+00 : f32
    %555 = vector.broadcast %cst_285 : f32 to vector<4x256xf32>
    %556 = vector.shape_cast %554 : vector<4x1xi1> to vector<4x1xi1>
    %557 = vector.broadcast %556 : vector<4x1xi1> to vector<4x256xi1>
    %558 = arith.select %557, %552, %555 : vector<4x256xi1>, vector<4x256xf32>
    %559 = arith.truncf %558 : vector<4x256xf32> to vector<4x256xbf16>
    %c1792 = arith.constant 1792 : index
    %c0_286 = arith.constant 0 : index
    %560 = vector.load %arg5[%c1792, %c0_286] : memref<2304x256xbf16, #tpu.memory_space<vmem>>, vector<256x256xbf16>
    %cst_287 = arith.constant dense<0.000000e+00> : vector<4x256xf32>
    %561 = tpu.matmul %559, %560, %cst_287 {dimension_numbers = #tpu.dot_dimension_numbers<[1], [0], [0], [1], [0, 0, 1, 1], [], []>} : vector<4x256xbf16>, vector<256x256xbf16>, vector<4x256xf32> -> vector<4x256xf32>
    %562 = arith.addf %551, %561 : vector<4x256xf32>
    %c11_288 = arith.constant 11 : index
    %c0_289 = arith.constant 0 : index
    %563 = vector.load %arg18[%c11_288, %c0_289] : memref<20x256xf32, #tpu.memory_space<vmem>>, vector<4x256xf32>
    %c2_i32_290 = arith.constant 2 : i32
    %564 = vector.broadcast %c2_i32_290 : i32 to vector<4x1xi32>
    %565 = arith.cmpi slt, %466, %564 : vector<4x1xi32>
    %c1_i32_291 = arith.constant 1 : i32
    %566 = vector.broadcast %c1_i32_291 : i32 to vector<4x1xi32>
    %567 = arith.cmpi slt, %468, %566 : vector<4x1xi32>
    %568 = arith.andi %565, %567 : vector<4x1xi1>
    %cst_292 = arith.constant 0.000000e+00 : f32
    %569 = vector.broadcast %cst_292 : f32 to vector<4x256xf32>
    %570 = vector.shape_cast %568 : vector<4x1xi1> to vector<4x1xi1>
    %571 = vector.broadcast %570 : vector<4x1xi1> to vector<4x256xi1>
    %572 = arith.select %571, %563, %569 : vector<4x256xi1>, vector<4x256xf32>
    %573 = arith.truncf %572 : vector<4x256xf32> to vector<4x256xbf16>
    %c2048 = arith.constant 2048 : index
    %c0_293 = arith.constant 0 : index
    %574 = vector.load %arg5[%c2048, %c0_293] : memref<2304x256xbf16, #tpu.memory_space<vmem>>, vector<256x256xbf16>
    %cst_294 = arith.constant dense<0.000000e+00> : vector<4x256xf32>
    %575 = tpu.matmul %573, %574, %cst_294 {dimension_numbers = #tpu.dot_dimension_numbers<[1], [0], [0], [1], [0, 0, 1, 1], [], []>} : vector<4x256xbf16>, vector<256x256xbf16>, vector<4x256xf32> -> vector<4x256xf32>
    %576 = arith.addf %562, %575 : vector<4x256xf32>
    %cst_295 = arith.constant 0.000000e+00 : f32
    %577 = vector.broadcast %cst_295 : f32 to vector<4x256xf32>
    %578 = arith.cmpf oge, %576, %577 : vector<4x256xf32>
    %cst_296 = arith.constant 1.000000e-01 : f32
    %579 = vector.broadcast %cst_296 : f32 to vector<4x256xf32>
    %580 = arith.mulf %579, %576 : vector<4x256xf32>
    %581 = arith.select %578, %576, %580 : vector<4x256xi1>, vector<4x256xf32>
    %582 = tpu.iota {dimensions = array<i32: 0>} : vector<1x4xi32>
    %583 = tpu.iota {dimensions = array<i32: 1>} : vector<1x4xi32>
    %c0_i32 = arith.constant 0 : i32
    %584 = vector.broadcast %c0_i32 : i32 to vector<1x4xi32>
    %585 = arith.andi %582, %584 : vector<1x4xi32>
    %c0_i32_297 = arith.constant 0 : i32
    %586 = vector.broadcast %c0_i32_297 : i32 to vector<1x4xi32>
    %587 = arith.shrsi %582, %586 : vector<1x4xi32>
    %c2_i32_298 = arith.constant 2 : i32
    %588 = vector.broadcast %c2_i32_298 : i32 to vector<1x4xi32>
    %589 = arith.muli %588, %587 : vector<1x4xi32>
    %c2_i32_299 = arith.constant 2 : i32
    %590 = vector.broadcast %c2_i32_299 : i32 to vector<1x4xi32>
    %591 = arith.muli %589, %590 : vector<1x4xi32>
    %c2_i32_300 = arith.constant 2 : i32
    %592 = vector.broadcast %c2_i32_300 : i32 to vector<1x4xi32>
    %593 = arith.muli %592, %585 : vector<1x4xi32>
    %594 = arith.addi %591, %593 : vector<1x4xi32>
    %595 = arith.cmpi eq, %583, %594 : vector<1x4xi32>
    %c1_i32_301 = arith.constant 1 : i32
    %596 = vector.broadcast %c1_i32_301 : i32 to vector<1x4xi32>
    %597 = arith.addi %594, %596 : vector<1x4xi32>
    %598 = arith.cmpi eq, %583, %597 : vector<1x4xi32>
    %599 = arith.ori %595, %598 : vector<1x4xi1>
    %c2_i32_302 = arith.constant 2 : i32
    %600 = vector.broadcast %c2_i32_302 : i32 to vector<1x4xi32>
    %601 = arith.addi %594, %600 : vector<1x4xi32>
    %602 = arith.cmpi eq, %583, %601 : vector<1x4xi32>
    %603 = arith.ori %599, %602 : vector<1x4xi1>
    %c2_i32_303 = arith.constant 2 : i32
    %604 = vector.broadcast %c2_i32_303 : i32 to vector<1x4xi32>
    %605 = arith.addi %594, %604 : vector<1x4xi32>
    %c1_i32_304 = arith.constant 1 : i32
    %606 = vector.broadcast %c1_i32_304 : i32 to vector<1x4xi32>
    %607 = arith.addi %605, %606 : vector<1x4xi32>
    %608 = arith.cmpi eq, %583, %607 : vector<1x4xi32>
    %609 = arith.ori %603, %608 : vector<1x4xi1>
    %cst_305 = arith.constant 2.500000e-01 : f32
    %cst_306 = arith.constant 0.000000e+00 : f32
    %610 = vector.broadcast %cst_305 : f32 to vector<1x4xf32>
    %611 = vector.broadcast %cst_306 : f32 to vector<1x4xf32>
    %612 = arith.select %609, %610, %611 : vector<1x4xi1>, vector<1x4xf32>
    %cst_307 = arith.constant dense<0.000000e+00> : vector<1x256xf32>
    %613 = tpu.matmul %612, %581, %cst_307 {dimension_numbers = #tpu.dot_dimension_numbers<[1], [0], [0], [1], [0, 0, 1, 1], [], []>} : vector<1x4xf32>, vector<4x256xf32>, vector<1x256xf32> -> vector<1x256xf32>
    %cst_308 = arith.constant 0.000000e+00 : f32
    %614 = vector.broadcast %cst_308 : f32 to vector<8x256xf32>
    %c0_309 = arith.constant 0 : index
    %c0_310 = arith.constant 0 : index
    %615 = vector.load %arg19[%c0_309, %c0_310] : memref<17x256xf32, #tpu.memory_space<vmem>>, vector<8x256xf32>
    tpu.vector_store %arg19[%c0_309, %c0_310], %614 {strides = array<i32>} : memref<17x256xf32, #tpu.memory_space<vmem>>, vector<8x256xf32>,
    %cst_311 = arith.constant 0.000000e+00 : f32
    %616 = vector.broadcast %cst_311 : f32 to vector<8x256xf32>
    %c9_312 = arith.constant 9 : index
    %c0_313 = arith.constant 0 : index
    %617 = vector.load %arg19[%c9_312, %c0_313] : memref<17x256xf32, #tpu.memory_space<vmem>>, vector<8x256xf32>
    tpu.vector_store %arg19[%c9_312, %c0_313], %616 {strides = array<i32>} : memref<17x256xf32, #tpu.memory_space<vmem>>, vector<8x256xf32>,
    %c8_314 = arith.constant 8 : index
    %c0_315 = arith.constant 0 : index
    %618 = vector.load %arg19[%c8_314, %c0_315] : memref<17x256xf32, #tpu.memory_space<vmem>>, vector<1x256xf32>
    tpu.vector_store %arg19[%c8_314, %c0_315], %613 {strides = array<i32>} : memref<17x256xf32, #tpu.memory_space<vmem>>, vector<1x256xf32>,
    %c0_316 = arith.constant 0 : index
    %c0_317 = arith.constant 0 : index
    %619 = vector.load %arg12[%c0_316, %c0_317] : memref<1x256xf32, #tpu.memory_space<vmem>>, vector<1x256xf32>
    %c8_318 = arith.constant 8 : index
    %c0_319 = arith.constant 0 : index
    %620 = vector.load %arg19[%c8_318, %c0_319] : memref<17x256xf32, #tpu.memory_space<vmem>>, vector<1x256xf32>
    %621 = arith.truncf %620 : vector<1x256xf32> to vector<1x256xbf16>
    %c1024_320 = arith.constant 1024 : index
    %c0_321 = arith.constant 0 : index
    %622 = vector.load %arg6[%c1024_320, %c0_321] : memref<2304x256xbf16, #tpu.memory_space<vmem>>, vector<256x256xbf16>
    %cst_322 = arith.constant dense<0.000000e+00> : vector<1x256xf32>
    %623 = tpu.matmul %621, %622, %cst_322 {dimension_numbers = #tpu.dot_dimension_numbers<[1], [0], [0], [1], [0, 0, 1, 1], [], []>} : vector<1x256xbf16>, vector<256x256xbf16>, vector<1x256xf32> -> vector<1x256xf32>
    %624 = arith.addf %619, %623 : vector<1x256xf32>
    %cst_323 = arith.constant 0.000000e+00 : f32
    %625 = vector.broadcast %cst_323 : f32 to vector<1x256xf32>
    %626 = arith.cmpf oge, %624, %625 : vector<1x256xf32>
    %cst_324 = arith.constant 1.000000e-01 : f32
    %627 = vector.broadcast %cst_324 : f32 to vector<1x256xf32>
    %628 = arith.mulf %627, %624 : vector<1x256xf32>
    %629 = arith.select %626, %624, %628 : vector<1x256xi1>, vector<1x256xf32>
    %cst_325 = arith.constant 0.000000e+00 : f32
    %630 = vector.broadcast %cst_325 : f32 to vector<8x256xf32>
    %c0_326 = arith.constant 0 : index
    %c0_327 = arith.constant 0 : index
    %631 = vector.load %arg20[%c0_326, %c0_327] : memref<17x256xf32, #tpu.memory_space<vmem>>, vector<8x256xf32>
    tpu.vector_store %arg20[%c0_326, %c0_327], %630 {strides = array<i32>} : memref<17x256xf32, #tpu.memory_space<vmem>>, vector<8x256xf32>,
    %cst_328 = arith.constant 0.000000e+00 : f32
    %632 = vector.broadcast %cst_328 : f32 to vector<8x256xf32>
    %c9_329 = arith.constant 9 : index
    %c0_330 = arith.constant 0 : index
    %633 = vector.load %arg20[%c9_329, %c0_330] : memref<17x256xf32, #tpu.memory_space<vmem>>, vector<8x256xf32>
    tpu.vector_store %arg20[%c9_329, %c0_330], %632 {strides = array<i32>} : memref<17x256xf32, #tpu.memory_space<vmem>>, vector<8x256xf32>,
    %c8_331 = arith.constant 8 : index
    %c0_332 = arith.constant 0 : index
    %634 = vector.load %arg20[%c8_331, %c0_332] : memref<17x256xf32, #tpu.memory_space<vmem>>, vector<1x256xf32>
    tpu.vector_store %arg20[%c8_331, %c0_332], %629 {strides = array<i32>} : memref<17x256xf32, #tpu.memory_space<vmem>>, vector<1x256xf32>,
    %c0_333 = arith.constant 0 : index
    %c0_334 = arith.constant 0 : index
    %635 = vector.load %arg13[%c0_333, %c0_334] : memref<1x128xf32, #tpu.memory_space<vmem>>, vector<1x128xf32>
    %c8_335 = arith.constant 8 : index
    %c0_336 = arith.constant 0 : index
    %636 = vector.load %arg20[%c8_335, %c0_336] : memref<17x256xf32, #tpu.memory_space<vmem>>, vector<1x256xf32>
    %637 = arith.truncf %636 : vector<1x256xf32> to vector<1x256xbf16>
    %c1024_337 = arith.constant 1024 : index
    %c0_338 = arith.constant 0 : index
    %638 = vector.load %arg7[%c1024_337, %c0_338] : memref<2304x128xbf16, #tpu.memory_space<vmem>>, vector<256x128xbf16>
    %cst_339 = arith.constant dense<0.000000e+00> : vector<1x128xf32>
    %639 = tpu.matmul %637, %638, %cst_339 {dimension_numbers = #tpu.dot_dimension_numbers<[1], [0], [0], [1], [0, 0, 1, 1], [], []>} : vector<1x256xbf16>, vector<256x128xbf16>, vector<1x128xf32> -> vector<1x128xf32>
    %640 = arith.addf %635, %639 : vector<1x128xf32>
    %cst_340 = arith.constant 0.000000e+00 : f32
    %641 = vector.broadcast %cst_340 : f32 to vector<1x128xf32>
    %642 = arith.subf %641, %640 : vector<1x128xf32>
    %643 = math.exp %642 : vector<1x128xf32>
    %cst_341 = arith.constant 1.000000e+00 : f32
    %644 = vector.broadcast %cst_341 : f32 to vector<1x128xf32>
    %645 = arith.addf %644, %643 : vector<1x128xf32>
    %cst_342 = arith.constant 1.000000e+00 : f32
    %646 = vector.broadcast %cst_342 : f32 to vector<1x128xf32>
    %647 = arith.divf %646, %645 : vector<1x128xf32>
    %c0_343 = arith.constant 0 : index
    %c0_344 = arith.constant 0 : index
    %c0_345 = arith.constant 0 : index
    %648 = vector.load %arg14[%c0_343, %c0_344, %c0_345] : memref<1x1x128xf32, #tpu.memory_space<vmem>>, vector<1x1x128xf32>
    %649 = vector.shape_cast %648 : vector<1x1x128xf32> to vector<1x128xf32>
    %650 = vector.shape_cast %647 : vector<1x128xf32> to vector<1x1x128xf32>
    tpu.vector_store %arg14[%c0_343, %c0_344, %c0_345], %650 {strides = array<i32>} : memref<1x1x128xf32, #tpu.memory_space<vmem>>, vector<1x1x128xf32>,
    return
  }
  func.func @transform_0(%arg0: i32) -> (i32, i32, i32) {
    %c0_i32 = arith.constant 0 : i32
    %c0_i32_0 = arith.constant 0 : i32
    %c0_i32_1 = arith.constant 0 : i32
    return %arg0, %c0_i32, %c0_i32_0 : i32, i32, i32
  }
  func.func @transform_1(%arg0: i32) -> (i32, i32) {
    %c0_i32 = arith.constant 0 : i32
    %c0_i32_0 = arith.constant 0 : i32
    %c0_i32_1 = arith.constant 0 : i32
    return %c0_i32, %c0_i32_0 : i32, i32
  }
  func.func @transform_2(%arg0: i32) -> (i32, i32) {
    %c0_i32 = arith.constant 0 : i32
    %c0_i32_0 = arith.constant 0 : i32
    %c0_i32_1 = arith.constant 0 : i32
    return %c0_i32, %c0_i32_0 : i32, i32
  }
  func.func @transform_3(%arg0: i32) -> (i32, i32) {
    %c0_i32 = arith.constant 0 : i32
    %c0_i32_0 = arith.constant 0 : i32
    %c0_i32_1 = arith.constant 0 : i32
    return %c0_i32, %c0_i32_0 : i32, i32
  }
  func.func @transform_4(%arg0: i32) -> (i32, i32) {
    %c0_i32 = arith.constant 0 : i32
    %c0_i32_0 = arith.constant 0 : i32
    %c0_i32_1 = arith.constant 0 : i32
    return %c0_i32, %c0_i32_0 : i32, i32
  }
  func.func @transform_5(%arg0: i32) -> (i32, i32) {
    %c0_i32 = arith.constant 0 : i32
    %c0_i32_0 = arith.constant 0 : i32
    %c0_i32_1 = arith.constant 0 : i32
    return %c0_i32, %c0_i32_0 : i32, i32
  }
  func.func @transform_6(%arg0: i32) -> (i32, i32) {
    %c0_i32 = arith.constant 0 : i32
    %c0_i32_0 = arith.constant 0 : i32
    %c0_i32_1 = arith.constant 0 : i32
    return %c0_i32, %c0_i32_0 : i32, i32
  }
  func.func @transform_7(%arg0: i32) -> (i32, i32) {
    %c0_i32 = arith.constant 0 : i32
    %c0_i32_0 = arith.constant 0 : i32
    %c0_i32_1 = arith.constant 0 : i32
    return %c0_i32, %c0_i32_0 : i32, i32
  }
  func.func @transform_8(%arg0: i32) -> (i32, i32) {
    %c0_i32 = arith.constant 0 : i32
    %c0_i32_0 = arith.constant 0 : i32
    %c0_i32_1 = arith.constant 0 : i32
    return %c0_i32, %c0_i32_0 : i32, i32
  }
  func.func @transform_9(%arg0: i32) -> (i32, i32) {
    %c0_i32 = arith.constant 0 : i32
    %c0_i32_0 = arith.constant 0 : i32
    %c0_i32_1 = arith.constant 0 : i32
    return %c0_i32, %c0_i32_0 : i32, i32
  }
  func.func @transform_10(%arg0: i32) -> (i32, i32) {
    %c0_i32 = arith.constant 0 : i32
    %c0_i32_0 = arith.constant 0 : i32
    %c0_i32_1 = arith.constant 0 : i32
    return %c0_i32, %c0_i32_0 : i32, i32
  }
  func.func @transform_11(%arg0: i32) -> (i32, i32) {
    %c0_i32 = arith.constant 0 : i32
    %c0_i32_0 = arith.constant 0 : i32
    %c0_i32_1 = arith.constant 0 : i32
    return %c0_i32, %c0_i32_0 : i32, i32
  }
  func.func @transform_12(%arg0: i32) -> (i32, i32) {
    %c0_i32 = arith.constant 0 : i32
    %c0_i32_0 = arith.constant 0 : i32
    %c0_i32_1 = arith.constant 0 : i32
    return %c0_i32, %c0_i32_0 : i32, i32
  }
  func.func @transform_13(%arg0: i32) -> (i32, i32, i32) {
    %c0_i32 = arith.constant 0 : i32
    %c0_i32_0 = arith.constant 0 : i32
    %c0_i32_1 = arith.constant 0 : i32
    return %arg0, %c0_i32, %c0_i32_0 : i32, i32, i32
  }
}

</mosaic_0001>

<bundles_post_ra>
// kernel: discriminator_forward.1
= control target key start
LH: loop header
LB: loop body
LE: loop exit
PB: predicated region body
PF: predicated region fallthrough
CT: control target
= control target key end

     0   :  { %s17112_s0 = inlined_call_operand.vmem [shape: f32[2,256,8], index: 0, kind: input, shape index: {}]   ;;  %s17113_s1 = inlined_call_operand.vmem [shape: bf16[72,64], index: 1, kind: input, shape index: {}]   ;;  %s17114_s2 = inlined_call_operand.hbm [shape: bf16[576,128], index: 2, kind: input, shape index: {}]   ;;  %s17115_s3 = inlined_call_operand.vmem [shape: bf16[1152,256], index: 3, kind: input, shape index: {}]   ;;  %s17116_s4 = inlined_call_operand.hbm [shape: bf16[2304,256], index: 4, kind: input, shape index: {}]   ;;  %s17117_s5 = inlined_call_operand.hbm [shape: bf16[2304,256], index: 5, kind: input, shape index: {}]   ;;  %s17118_s6 = inlined_call_operand.hbm [shape: bf16[2304,128], index: 6, kind: input, shape index: {}]   ;;  %s17119_s7 = inlined_call_operand.hbm [shape: f32[1,64], index: 7, kind: input, shape index: {}]   ;;  %s17120_s8 = inlined_call_operand.hbm [shape: f32[1,128], index: 8, kind: input, shape index: {}]   ;;  %s17121_s9 = inlined_call_operand.hbm [shape: f32[1,256], index: 9, kind: input, shape index: {}]   ;;  %s17122_s10 = inlined_call_operand.hbm [shape: f32[1,256], index: 10, kind: input, shape index: {}]   ;;  %s17123_s11 = inlined_call_operand.hbm [shape: f32[1,256], index: 11, kind: input, shape index: {}]   ;;  %s17124_s12 = inlined_call_operand.hbm [shape: f32[1,128], index: 12, kind: input, shape index: {}]   ;;  %s17125_s13 = inlined_call_operand.vmem [shape: f32[2,1,128], index: 13, kind: output, shape index: {}]  }
   0x1   :  { %17223 = sst [smem:[#allocation61_spill]] %s17125_s13 }
   0x2   :  { %18 = vsyncpa [#allocation9], 0 }
   0x3   :  { %19 = vsyncpa [#allocation11], 0 }
   0x4   :  { %20 = vsyncpa [#allocation14], 0 }
   0x5   :  { %21 = vsyncpa [#allocation17], 0 }
   0x6   :  { %22 = vsyncpa [#allocation20], 0 }
   0x7   :  { %23 = vsyncpa [#allocation23], 0  ;;  %s14267_s25 = smov 0  }
   0x8 LB: > { %17224 = sst [smem:[#allocation30_spill]] %s14175_s25  ;;  %s14177_s26 = smov [#allocation10]   ;;  %s14175_s25 = sphi %s14267_s25, %s29_s25  }
   0x9   : > { %s369_s27 = sshll.u32 %s14177_s26, 4  ;;  %s14273_s28 = sadd.s32 4294967295, %s14175_s25   ;;  %s14278_s27 = int_to_ptr.vmem [resolvable:$true] %s369_s27 }
   0xa   : > { %p10873_p0 = scmp.ge.s32.totalorder %s14175_s25, 1  ;;  %p338_p1 = scmp.lt.s32.totalorder %s14175_s25, 3 }
   0xb   : > { %p17129_p2 = scmp.eq.s32.totalorder %s14273_s28, 0  ;;  %s14178_s14 = smov [#allocation13]  }
   0xc   : > { %p14280_p3 = pnand %p10873_p0, %p338_p1  ;;  %s395_s15 = sshll.u32 %s14178_s14, 4  ;;  %s14292_s15 = int_to_ptr.vmem [resolvable:$true] %s395_s15 }
   0xd   : > { %s14179_s16 = smov [#allocation16]   ;;  %s13865_s20 = scalar_lea.hbm %s17116_s4, 36864 }
   0xe   : > { %s17225_s29 = scalar_select %p14280_p3, 1, 0 }
   0xf   : > { %p13001_p4 = pneg %p14280_p3  ;;  %s420_s17 = sshll.u32 %s14179_s16, 4  ;;  %s14294_s17 = int_to_ptr.vmem [resolvable:$true] %s420_s17 }
  0x10   : > { %p13866_p6 = scmp.ne.s32.totalorder %s17116_s4, %s13865_s20  ;;  %p13872_p10 = scmp.lt.u32.totalorder %s13865_s20, %s17116_s4 }
  0x11   : > { %p14288_p5 = pnand %p17129_p2, %p13001_p4 }
  0x13   : > { %p14304_p7 = pneg %p14288_p5 }
  0x15   : > { %p13868_p8 = pnand %p14304_p7, %p13866_p6 }
  0x17   : > { %p13869_p9 = pneg %p13868_p8 }
  0x19   : > { %p13874_p11 = pnand %p13872_p10, %p13869_p9 }
  0x1b   : > { %13877 = shalt.err (!%p13874_p11)
}
  0x1c   : > { %s13878_s14 = scalar_lea.vmem %s14278_s27, 36864  ;;  %p13886_p1 = scmp.lt.s32.totalorder %s14278_s27, %s14278_s27 }
  0x1d   : > { %p13879_p12 = scmp.ne.s32.totalorder %s14278_s27, %s13878_s14  ;;  %p13887_p4 = scmp.lt.s32.totalorder %s13878_s14, %s13878_s14 }
  0x1f   : > { %p13881_p13 = pnand %p13879_p12, %p14304_p7  ;;  %p13888_p6 = por %p13887_p4, %p13886_p1 }
  0x21   : > { %p13882_p0 = pneg %p13881_p13 }
  0x23   : > { %p13889_p8 = pnand %p13888_p6, %p13882_p0 }
  0x25   : > { %13892 = shalt.err (!%p13889_p8)
}
  0x26   : > { %s17127_s16 = smov 128   ;;  %s17128_s18 = smov 8  }
  0x27   : > { %13007 = dma.hbm_to_vmem [thread:$0]  (!%p14288_p5), %s17116_s4, 36864, %s14278_s27, [#allocation11], %s17127_s16, %s17127_s16, %s17128_s18  }
  0x28   : > { %s13893_s24 = scalar_lea.hbm %s17118_s6, 18432 }
  0x29   : > { %p13894_p9 = scmp.ne.s32.totalorder %s17118_s6, %s13893_s24  ;;  %p13900_p12 = scmp.lt.u32.totalorder %s13893_s24, %s17118_s6 }
  0x2b   : > { %p13896_p10 = pnand %p13894_p9, %p14304_p7 }
  0x2d   : > { %p13897_p11 = pneg %p13896_p10 }
  0x2f   : > { %p13902_p13 = pnand %p13900_p12, %p13897_p11 }
  0x31   : > { %13905 = shalt.err (!%p13902_p13)
}
  0x32   : > { %s13906_s27 = scalar_lea.vmem %s14292_s15, 18432  ;;  %p13914_p6 = scmp.lt.s32.totalorder %s14292_s15, %s14292_s15 }
  0x33   : > { %p13907_p0 = scmp.ne.s32.totalorder %s14292_s15, %s13906_s27  ;;  %p13915_p8 = scmp.lt.s32.totalorder %s13906_s27, %s13906_s27 }
  0x35   : > { %p13909_p1 = pnand %p13907_p0, %p14304_p7  ;;  %p13916_p9 = por %p13915_p8, %p13914_p6 }
  0x37   : > { %p13910_p4 = pneg %p13909_p1 }
  0x39   : > { %p13917_p10 = pnand %p13916_p9, %p13910_p4 }
  0x3b   : > { %13920 = shalt.err (!%p13917_p10)
}
  0x3c   : > { %s14182_s19 = smov 64   ;;  %s14183_s13 = smov 4  }
  0x3d   : > { %13013 = dma.hbm_to_vmem [thread:$0]  (!%p14288_p5), %s17118_s6, 18432, %s14292_s15, [#allocation14], %s14182_s19, %s14182_s19, %s14183_s13  }
  0x3e   : > { %s13921_s24 = scalar_lea.hbm %s17120_s8, 16 }
  0x3f   : > { %p13922_p11 = scmp.ne.s32.totalorder %s17120_s8, %s13921_s24  ;;  %p13928_p0 = scmp.lt.u32.totalorder %s13921_s24, %s17120_s8 }
  0x41   : > { %p13924_p12 = pnand %p13922_p11, %p14304_p7 }
  0x43   : > { %p13925_p13 = pneg %p13924_p12 }
  0x45   : > { %p13930_p1 = pnand %p13928_p0, %p13925_p13 }
  0x47   : > { %13933 = shalt.err (!%p13930_p1)
}
  0x48   : > { %s13934_s15 = scalar_lea.vmem %s14294_s17, 16  ;;  %s13941_s25 = scalar_lea.vmem %s14294_s17, 32 }
  0x49   : > { %p13935_p4 = scmp.ne.s32.totalorder %s14294_s17, %s13934_s15  ;;  %p13942_p9 = scmp.lt.s32.totalorder %s14294_s17, %s14294_s17 }
  0x4a   : > { %p13943_p10 = scmp.lt.s32.totalorder %s13941_s25, %s13934_s15 }
  0x4b   : > { %p13937_p6 = pnand %p13935_p4, %p14304_p7 }
  0x4c   : > { %p13944_p11 = por %p13943_p10, %p13942_p9 }
  0x4d   : > { %p13938_p8 = pneg %p13937_p6 }
  0x4f   : > { %p13945_p12 = pnand %p13944_p11, %p13938_p8 }
  0x51   : > { %13948 = shalt.err (!%p13945_p12)
}
  0x52   : > { %13019 = dma.hbm_to_vmem [thread:$0]  (!%p14288_p5), %s17120_s8, 16, %s14294_s17, [#allocation17]  }
  0x53   : > { %s14184_s21 = smov [#allocation19]   ;;  %s14185_s24 = smov [#allocation8]  }
  0x54   : > { %s442_s22 = sshll.u32 %s14184_s21, 4  ;;  %s353_s26 = sshll.u32 %s14185_s24, 4  ;;  %s443_s22 = int_to_ptr.vmem [resolvable:$true] %s442_s22  ;;  %s14378_s26 = int_to_ptr.vmem [resolvable:$true] %s353_s26 }
  0x55   : > { %s13949_s15 = scalar_lea.hbm %s17122_s10, 32 }
  0x56   : > { %p13950_p13 = scmp.ne.s32.totalorder %s17122_s10, %s13949_s15  ;;  %p13956_p4 = scmp.lt.u32.totalorder %s13949_s15, %s17122_s10 }
  0x58   : > { %p13952_p0 = pnand %p13950_p13, %p14304_p7 }
  0x5a   : > { %p13953_p1 = pneg %p13952_p0 }
  0x5c   : > { %p13958_p6 = pnand %p13956_p4, %p13953_p1 }
  0x5e   : > { %13961 = shalt.err (!%p13958_p6)
}
  0x5f   : > { %s13962_s20 = scalar_lea.vmem %s443_s22, 32  ;;  %p13970_p11 = scmp.lt.s32.totalorder %s443_s22, %s443_s22 }
  0x60   : > { %p13963_p8 = scmp.ne.s32.totalorder %s443_s22, %s13962_s20  ;;  %p13971_p12 = scmp.lt.s32.totalorder %s13962_s20, %s13962_s20 }
  0x62   : > { %p13965_p9 = pnand %p13963_p8, %p14304_p7  ;;  %p13972_p2 = por %p13971_p12, %p13970_p11 }
  0x64   : > { %p13966_p10 = pneg %p13965_p9 }
  0x66   : > { %p13973_p3 = pnand %p13972_p2, %p13966_p10 }
  0x68   : > { %13976 = shalt.err (!%p13973_p3)
}
  0x69   : > { %13025 = dma.hbm_to_vmem [thread:$0]  (!%p14288_p5), %s17122_s10, 32, %s443_s22, [#allocation20]  }
  0x6a   : > { %s13977_s27 = scalar_lea.hbm %s17114_s2, 4608 }
  0x6b   : > { %p13978_p13 = scmp.ne.s32.totalorder %s17114_s2, %s13977_s27  ;;  %p13984_p2 = scmp.lt.u32.totalorder %s13977_s27, %s17114_s2 }
  0x6d   : > { %p13980_p0 = pnand %p13978_p13, %p14304_p7 }
  0x6f   : > { %p13981_p1 = pneg %p13980_p0 }
  0x71   : > { %p13986_p3 = pnand %p13984_p2, %p13981_p1 }
  0x73   : > { %13989 = shalt.err (!%p13986_p3)
}
  0x74   : > { %s13990_s22 = scalar_lea.vmem %s14378_s26, 4608  ;;  %p13998_p9 = scmp.lt.s32.totalorder %s14378_s26, %s14378_s26 }
  0x75   : > { %p13991_p4 = scmp.ne.s32.totalorder %s14378_s26, %s13990_s22  ;;  %p13999_p10 = scmp.lt.s32.totalorder %s13990_s22, %s13990_s22 }
  0x77   : > { %p13993_p6 = pnand %p13991_p4, %p14304_p7  ;;  %p14000_p11 = por %p13999_p10, %p13998_p9 }
  0x79   : > { %p13994_p8 = pneg %p13993_p6 }
  0x7b   : > { %p14001_p12 = pnand %p14000_p11, %p13994_p8 }
  0x7d   : > { %14004 = shalt.err (!%p14001_p12)
}
  0x7e   : > { %13004 = dma.hbm_to_vmem [thread:$0]  (!%p14288_p5), %s17114_s2, 4608, %s14378_s26, [#allocation9], %s14182_s19, %s14182_s19, %s14183_s13  }
  0x7f   : > { %s14186_s21 = smov [#allocation12]   ;;  %s14187_s14 = smov [#allocation15]  }
  0x80   : > { %s382_s24 = sshll.u32 %s14186_s21, 4  ;;  %s409_s27 = sshll.u32 %s14187_s14, 4  ;;  %s383_s24 = int_to_ptr.vmem [resolvable:$true] %s382_s24  ;;  %s14424_s27 = int_to_ptr.vmem [resolvable:$true] %s409_s27 }
  0x81   : > { %s14005_s16 = scalar_lea.hbm %s17117_s5, 36864 }
  0x82   : > { %p14006_p13 = scmp.ne.s32.totalorder %s17117_s5, %s14005_s16  ;;  %p14012_p2 = scmp.lt.u32.totalorder %s14005_s16, %s17117_s5 }
  0x84   : > { %p14008_p0 = pnand %p14006_p13, %p14304_p7 }
  0x86   : > { %p14009_p1 = pneg %p14008_p0 }
  0x88   : > { %p14014_p3 = pnand %p14012_p2, %p14009_p1 }
  0x8a   : > { %14017 = shalt.err (!%p14014_p3)
}
  0x8b   : > { %s14018_s13 = scalar_lea.vmem %s383_s24, 36864  ;;  %p14026_p9 = scmp.lt.s32.totalorder %s383_s24, %s383_s24 }
  0x8c   : > { %p14019_p4 = scmp.ne.s32.totalorder %s383_s24, %s14018_s13  ;;  %p14027_p10 = scmp.lt.s32.totalorder %s14018_s13, %s14018_s13 }
  0x8e   : > { %p14021_p6 = pnand %p14019_p4, %p14304_p7  ;;  %p14028_p11 = por %p14027_p10, %p14026_p9 }
  0x90   : > { %p14022_p8 = pneg %p14021_p6 }
  0x92   : > { %p14029_p12 = pnand %p14028_p11, %p14022_p8 }
  0x94   : > { %14032 = shalt.err (!%p14029_p12)
}
  0x95   : > { %s17228_s26 = smov 8   ;;  %s17229_s18 = smov 128  }
  0x96   : > { %13010 = dma.hbm_to_vmem [thread:$0]  (!%p14288_p5), %s17117_s5, 36864, %s383_s24, [#allocation11], %s17229_s18, %s17229_s18, %s17228_s26  }
  0x97   : > { %s14033_s16 = scalar_lea.hbm %s17119_s7, 16 }
  0x98   : > { %p14034_p13 = scmp.ne.s32.totalorder %s17119_s7, %s14033_s16  ;;  %p14040_p2 = scmp.lt.u32.totalorder %s14033_s16, %s17119_s7 }
  0x9a   : > { %p14036_p0 = pnand %p14034_p13, %p14304_p7 }
  0x9c   : > { %p14037_p1 = pneg %p14036_p0 }
  0x9e   : > { %p14042_p3 = pnand %p14040_p2, %p14037_p1 }
  0xa0   : > { %14045 = shalt.err (!%p14042_p3)
}
  0xa1   : > { %s14046_s24 = scalar_lea.vmem %s14424_s27, 16  ;;  %s14053_s13 = scalar_lea.vmem %s14424_s27, 32 }
  0xa2   : > { %p14047_p4 = scmp.ne.s32.totalorder %s14424_s27, %s14046_s24  ;;  %p14054_p9 = scmp.lt.s32.totalorder %s14424_s27, %s14424_s27 }
  0xa3   : > { %p14055_p10 = scmp.lt.s32.totalorder %s14053_s13, %s14046_s24 }
  0xa4   : > { %p14049_p6 = pnand %p14047_p4, %p14304_p7 }
  0xa5   : > { %p14056_p11 = por %p14055_p10, %p14054_p9 }
  0xa6   : > { %p14050_p8 = pneg %p14049_p6 }
  0xa8   : > { %p14057_p12 = pnand %p14056_p11, %p14050_p8 }
  0xaa   : > { %14060 = shalt.err (!%p14057_p12)
}
  0xab   : > { %13016 = dma.hbm_to_vmem [thread:$0]  (!%p14288_p5), %s17119_s7, 16, %s14424_s27, [#allocation14]  }
  0xac   : > { %s14188_s21 = smov [#allocation18]   ;;  %s14189_s15 = smov [#allocation21]  }
  0xad   : > { %s431_s14 = sshll.u32 %s14188_s21, 4  ;;  %s453_s25 = sshll.u32 %s14189_s15, 4  ;;  %s432_s14 = int_to_ptr.vmem [resolvable:$true] %s431_s14  ;;  %s14471_s25 = int_to_ptr.vmem [resolvable:$true] %s453_s25 }
  0xae   : > { %s14061_s22 = scalar_lea.hbm %s17121_s9, 32 }
  0xaf   : > { %p14062_p13 = scmp.ne.s32.totalorder %s17121_s9, %s14061_s22  ;;  %p14068_p2 = scmp.lt.u32.totalorder %s14061_s22, %s17121_s9 }
  0xb1   : > { %p14064_p0 = pnand %p14062_p13, %p14304_p7 }
  0xb3   : > { %p14065_p1 = pneg %p14064_p0 }
  0xb5   : > { %p14070_p3 = pnand %p14068_p2, %p14065_p1 }
  0xb7   : > { %14073 = shalt.err (!%p14070_p3)
}
  0xb8   : > { %s14074_s13 = scalar_lea.vmem %s432_s14, 32  ;;  %p14082_p9 = scmp.lt.s32.totalorder %s432_s14, %s432_s14 }
  0xb9   : > { %p14075_p4 = scmp.ne.s32.totalorder %s432_s14, %s14074_s13  ;;  %p14083_p10 = scmp.lt.s32.totalorder %s14074_s13, %s14074_s13 }
  0xbb   : > { %p14077_p6 = pnand %p14075_p4, %p14304_p7  ;;  %p14084_p11 = por %p14083_p10, %p14082_p9 }
  0xbd   : > { %p14078_p8 = pneg %p14077_p6 }
  0xbf   : > { %p14085_p12 = pnand %p14084_p11, %p14078_p8 }
  0xc1   : > { %14088 = shalt.err (!%p14085_p12)
}
  0xc2   : > { %13022 = dma.hbm_to_vmem [thread:$0]  (!%p14288_p5), %s17121_s9, 32, %s432_s14, [#allocation17]  }
  0xc3   : > { %s14089_s16 = scalar_lea.hbm %s17123_s11, 32 }
  0xc4   : > { %p14090_p13 = scmp.ne.s32.totalorder %s17123_s11, %s14089_s16  ;;  %p14096_p2 = scmp.lt.u32.totalorder %s14089_s16, %s17123_s11 }
  0xc6   : > { %p14092_p0 = pnand %p14090_p13, %p14304_p7 }
  0xc8   : > { %p14093_p1 = pneg %p14092_p0 }
  0xca   : > { %p14098_p3 = pnand %p14096_p2, %p14093_p1 }
  0xcc   : > { %14101 = shalt.err (!%p14098_p3)
}
  0xcd   : > { %s14102_s14 = scalar_lea.vmem %s14471_s25, 32  ;;  %p14110_p9 = scmp.lt.s32.totalorder %s14471_s25, %s14471_s25 }
  0xce   : > { %p14103_p4 = scmp.ne.s32.totalorder %s14471_s25, %s14102_s14  ;;  %p14111_p10 = scmp.lt.s32.totalorder %s14102_s14, %s14102_s14 }
  0xd0   : > { %p14105_p6 = pnand %p14103_p4, %p14304_p7  ;;  %p14112_p11 = por %p14111_p10, %p14110_p9 }
  0xd2   : > { %p14106_p8 = pneg %p14105_p6 }
  0xd4   : > { %p14113_p12 = pnand %p14112_p11, %p14106_p8 }
  0xd6   : > { %14116 = shalt.err (!%p14113_p12)
}
  0xd7   : > { %13028 = dma.hbm_to_vmem [thread:$0]  (!%p14288_p5), %s17123_s11, 32, %s14471_s25, [#allocation20]  }
  0xd8   : > { %s14190_s13 = smov [#allocation22]   ;;  %s14117_s15 = scalar_lea.hbm %s17124_s12, 16 }
  0xd9   : > { %s464_s26 = sshll.u32 %s14190_s13, 4  ;;  %p14118_p13 = scmp.ne.s32.totalorder %s17124_s12, %s14117_s15  ;;  %s465_s26 = int_to_ptr.vmem [resolvable:$true] %s464_s26 }
  0xda   : > { %p14124_p2 = scmp.lt.u32.totalorder %s14117_s15, %s17124_s12 }
  0xdb   : > { %p14120_p0 = pnand %p14118_p13, %p14304_p7 }
  0xdd   : > { %p14121_p1 = pneg %p14120_p0 }
  0xdf   : > { %p14126_p3 = pnand %p14124_p2, %p14121_p1 }
  0xe1   : > { %14129 = shalt.err (!%p14126_p3)
}
  0xe2   : > { %s14130_s25 = scalar_lea.vmem %s465_s26, 16  ;;  %s14137_s19 = scalar_lea.vmem %s465_s26, 32 }
  0xe3   : > { %p14131_p4 = scmp.ne.s32.totalorder %s465_s26, %s14130_s25  ;;  %p14138_p9 = scmp.lt.s32.totalorder %s465_s26, %s465_s26 }
  0xe4   : > { %p14139_p10 = scmp.lt.s32.totalorder %s14137_s19, %s14130_s25 }
  0xe5   : > { %p14133_p6 = pnand %p14131_p4, %p14304_p7 }
  0xe6   : > { %p14140_p11 = por %p14139_p10, %p14138_p9 }
  0xe7   : > { %p14134_p8 = pneg %p14133_p6 }
  0xe9   : > { %p14141_p12 = pnand %p14140_p11, %p14134_p8 }
  0xeb   : > { %14144 = shalt.err (!%p14141_p12)
}
  0xec   : > { %13031 = dma.hbm_to_vmem [thread:$0]  (!%p14288_p5), %s17124_s12, 16, %s465_s26, [#allocation23]  }
  0xed   : > { %p17230_p13 = scmp.ne.s32.totalorder %s17225_s29, 0 }
  0xef   : > { %485 = sbr.rel (%p17230_p13) target bundleno = 3857 (0xf11), region = 72 }
  0xf6   : > { %p17231_p0 = scmp.eq.s32.totalorder %s14273_s28, 0 }
  0xf8   : > { %14150 = dma.done.wait (%p17231_p0), [#allocation9], 4608   ;;  %p17232_p7 = pmov %p17231_p0 }
  0xf9   : > { %p17233_p1 = pmov %p17231_p0 }
  0xfa   : > { %14152 = vsyncadd (%p17232_p7), [#allocation9], 4294962688 }
  0xfb   : > { %14154 = dma.done.wait (%p17233_p1), [#allocation11], 73728   ;;  %p17234_p2 = pmov %p17231_p0 }
  0xfc   : > { %p17235_p3 = pmov %p17231_p0 }
  0xfd   : > { %14156 = vsyncadd (%p17234_p2), [#allocation11], 4294893568 }
  0xfe   : > { %14158 = dma.done.wait (%p17235_p3), [#allocation14], 18448   ;;  %p17236_p5 = pmov %p17231_p0 }
  0xff   : > { %p17237_p4 = pmov %p17231_p0 }
 0x100   : > { %14160 = vsyncadd (%p17236_p5), [#allocation14], 4294948848 }
 0x101   : > { %14162 = dma.done.wait (%p17237_p4), [#allocation17], 48   ;;  %p17238_p6 = pmov %p17231_p0 }
 0x102   : > { %p17239_p8 = pmov %p17231_p0 }
 0x103   : > { %14164 = vsyncadd (%p17238_p6), [#allocation17], 4294967248 }
 0x104   : > { %14166 = dma.done.wait (%p17239_p8), [#allocation20], 64   ;;  %p17240_p9 = pmov %p17231_p0 }
 0x105   : > { %p17241_p10 = pmov %p17231_p0 }
 0x106   : > { %14168 = vsyncadd (%p17240_p9), [#allocation20], 4294967232 }
 0x107   : > { %14170 = dma.done.wait (%p17241_p10), [#allocation23], 16   ;;  %p17242_p11 = pmov %p17231_p0 }
 0x108   : > { %p563_p12 = scmp.lt.s32.totalorder %s14273_s28, 1  ;;  %vm17134_vm0 = vcmask 64512   ;;  %v17131_v0 = vlaneseq  ;;  %v17137_v1 = vmov 0.0|0.0   ;;  %vm17133_vm1 = vcmask 523264   ;;  %v955_v6 = vld [vmem:[%s17113_s1] sm:$0xf] }
 0x109   : > { %14172 = vsyncadd (%p17242_p11), [#allocation23], 4294967280  ;;  %12002 = vmatprep.mubr.bf16.mxu0 %v17137_v1  ;;  %v14192_v2 = vmov 0.0   ;;  %vm17136_vm2 = vcmask 1043456   ;;  %v1345_v32 = vld [vmem:[%s17113_s1 + $0x4] sm:$0xf] }
 0x10a   : > { %s17629_s28 = smov (!%p563_p12, %s14273_s28), 1  ;;  %575 = vst.msk [vmem:[#allocation2 + $0x10] sm:$0xff] %vm17134_vm0, %v14192_v2  ;;  %v14565_v3 = vshrl.u32 %v17131_v0, 7  ;;  %10225 = vst [vmem:[#allocation6] sm:$0xff] %v14192_v2  ;;  %12951 = vmatprep.subr.msk.bf16.mxu0 %vm17136_vm2, %v955_v6  ;;  %v1006_v9 = vsel %vm17136_vm2, %v955_v6, 0  ;;  %12952 = vmatprep.subr.msk.bf16.mxu1 %vm17136_vm2, %v955_v6  ;;  %v17249_v33 = vmov 0 }
 0x10b   : > { %576 = vst.msk [vmem:[#allocation2 + $0x118] sm:$0xff] %vm17134_vm0, %v14192_v2  ;;  %6357 = vst [vmem:[#allocation4] sm:$0xff] %v14192_v2  ;;  %s11686_s29 = sshll.u32 %s17629_s28, 8  ;;  %12001 = vmatpush3.bf16.msra.mxu0 %v1006_v9  ;;  %12522 = vmatpush3.bf16.msra.mxu1 %v1006_v9  ;;  %v17252_v46 = vmov 0  ;;  %v1395_v47 = vsel %vm17136_vm2, %v1345_v32, 0  ;;  %v17256_v57 = vmov 0 }
 0x10c   : > { %17243 = vst [vmem:[#allocation31_spill] sm:$0xff] %v14565_v3  ;;  %4783 = vst.msk [vmem:[#allocation3 + $0x8] sm:$0xff] %vm17133_vm1, %v14192_v2  ;;  %s14574_s27 = scalar_lea.vmem %s17112_s0, %s11686_s29  ;;  %v14577_v4 = vadd.s32 16, %v14565_v3  ;;  %v14580_v5 = vadd.s32 32, %v14565_v3  ;;  %v14595_v13 = vadd.s32 48, %v14565_v3  ;;  %v652_v19 = vadd.s32 64, %v14565_v3  ;;  %12953 = vmatprep.subr.msk.bf16.mxu0 %vm17136_vm2, %v1345_v32 }
 0x10d   : > { %4784 = vst.msk [vmem:[#allocation3 + $0x50] sm:$0xff] %vm17133_vm1, %v14192_v2  ;;  %6358 = vst [vmem:[#allocation4 + $0x18] sm:$0xff] %v14192_v2  ;;  %v579_v7 = vld [vmem:[%s14574_s27] sm:$0xff]  ;;  %v580_v8 = vld [vmem:[%s14574_s27 + $0x8] sm:$0xff]  ;;  %v654_v40 = vadd.s32 80, %v14565_v3  ;;  %v656_v41 = vadd.s32 96, %v14565_v3 }
 0x10e   : > { %7855 = vst [vmem:[#allocation5] sm:$0xff] %v14192_v2  ;;  %7856 = vst [vmem:[#allocation5 + $0x8] sm:$0xff] %v14192_v2  ;;  %v581_v10 = vld [vmem:[%s14574_s27 + $0x10] sm:$0xff]  ;;  %v582_v11 = vld [vmem:[%s14574_s27 + $0x18] sm:$0xff]  ;;  %v678_v15 = vand.u32 15, %v14577_v4  ;;  %v680_v18 = vand.u32 15, %v14580_v5 }
 0x10f   : > { %7857 = vst [vmem:[#allocation5 + $0x10] sm:$0xf0] %v14192_v2  ;;  %7858 = vst [vmem:[#allocation5 + $0x18] sm:$0xf0] %v14192_v2  ;;  %v583_v12 = vld [vmem:[%s14574_s27 + $0x20] sm:$0xff]  ;;  %v584_v14 = vld [vmem:[%s14574_s27 + $0x28] sm:$0xff] }
 0x110   : > { %17244 = vst [vmem:[#allocation32_spill] sm:$0xff] %v14577_v4  ;;  %17245 = vst [vmem:[#allocation33_spill] sm:$0xff] %v14580_v5  ;;  %v585_v16 = vld [vmem:[%s14574_s27 + $0x30] sm:$0xff]  ;;  %v586_v17 = vld [vmem:[%s14574_s27 + $0x38] sm:$0xff]  ;;  %v682_v26 = vand.u32 15, %v14595_v13  ;;  %vm14626_vm3 = vcmp.ge.s32.totalorder %v678_v15, 1 }
 0x111   : > { %611 = vst.msk [vmem:[#allocation2 + $0x18] sm:$0xff] %vm17134_vm0, %v579_v7  ;;  %612 = vst.msk [vmem:[#allocation2 + $0x20] sm:$0xff] %vm17134_vm0, %v580_v8  ;;  %v587_v20 = vld [vmem:[%s14574_s27 + $0x40] sm:$0xff]  ;;  %v588_v21 = vld [vmem:[%s14574_s27 + $0x48] sm:$0xff]  ;;  %vm14637_vm4 = vcmp.ge.s32.totalorder %v680_v18, 1  ;;  %v684_v34 = vand.u32 15, %v652_v19 }
 0x112   : > { %17246 = vst [vmem:[#allocation34_spill] sm:$0xff] %v14595_v13  ;;  %613 = vst.msk [vmem:[#allocation2 + $0x28] sm:$0xff] %vm17134_vm0, %v581_v10  ;;  %v589_v22 = vld [vmem:[%s14574_s27 + $0x50] sm:$0xff]  ;;  %v590_v23 = vld [vmem:[%s14574_s27 + $0x58] sm:$0xff]  ;;  %v17250_v33 = vsel %vm14637_vm4, 4294967295, %v17249_v33  ;;  %vm14660_vm5 = vcmp.ge.s32.totalorder %v682_v26, 1 }
 0x113   : > { %614 = vst.msk [vmem:[#allocation2 + $0x30] sm:$0xff] %vm17134_vm0, %v582_v11  ;;  %615 = vst.msk [vmem:[#allocation2 + $0x38] sm:$0xff] %vm17134_vm0, %v583_v12  ;;  %v591_v24 = vld [vmem:[%s14574_s27 + $0x60] sm:$0xff]  ;;  %v592_v25 = vld [vmem:[%s14574_s27 + $0x68] sm:$0xff]  ;;  %v17253_v46 = vsel %vm14660_vm5, 4294967295, %v17252_v46  ;;  %vm14682_vm6 = vcmp.ge.s32.totalorder %v684_v34, 1 }
 0x114   : > { %616 = vst.msk [vmem:[#allocation2 + $0x40] sm:$0xff] %vm17134_vm0, %v584_v14  ;;  %617 = vst.msk [vmem:[#allocation2 + $0x48] sm:$0xff] %vm17134_vm0, %v585_v16  ;;  %v593_v27 = vld [vmem:[%s14574_s27 + $0x70] sm:$0xff]  ;;  %v594_v28 = vld [vmem:[%s14574_s27 + $0x78] sm:$0xff]  ;;  %v17257_v57 = vsel %vm14682_vm6, 4294967295, %v17256_v57  ;;  %v686_v62 = vand.u32 15, %v654_v40 }
 0x115   : > { %618 = vst.msk [vmem:[#allocation2 + $0x50] sm:$0xff] %vm17134_vm0, %v586_v17  ;;  %619 = vst.msk [vmem:[#allocation2 + $0x58] sm:$0xff] %vm17134_vm0, %v587_v20  ;;  %v595_v29 = vld [vmem:[%s14574_s27 + $0x80] sm:$0xff]  ;;  %v596_v31 = vld [vmem:[%s14574_s27 + $0x88] sm:$0xff]  ;;  %v688_v63 = vand.u32 15, %v656_v41  ;;  %v17259_v8 = vmov 0 }
 0x116   : > { %620 = vst.msk [vmem:[#allocation2 + $0x60] sm:$0xff] %vm17134_vm0, %v588_v21  ;;  %621 = vst.msk [vmem:[#allocation2 + $0x68] sm:$0xff] %vm17134_vm0, %v589_v22  ;;  %v597_v35 = vld [vmem:[%s14574_s27 + $0x90] sm:$0xff]  ;;  %v598_v36 = vld [vmem:[%s14574_s27 + $0x98] sm:$0xff]  ;;  %vm14707_vm7 = vcmp.ge.s32.totalorder %v686_v62, 1  ;;  %v658_v9 = vadd.s32 112, %v14565_v3 }
 0x117   : > { %622 = vst.msk [vmem:[#allocation2 + $0x70] sm:$0xff] %vm17134_vm0, %v590_v23  ;;  %623 = vst.msk [vmem:[#allocation2 + $0x78] sm:$0xff] %vm17134_vm0, %v591_v24  ;;  %v599_v37 = vld [vmem:[%s14574_s27 + $0xa0] sm:$0xff]  ;;  %v14689_v58 = vld [vmem:[%s17113_s1 + $0x8] sm:$0xf]  ;;  %v17260_v8 = vsel %vm14707_vm7, 4294967295, %v17259_v8 }
 0x118   : > { %624 = vst.msk [vmem:[#allocation2 + $0x80] sm:$0xff] %vm17134_vm0, %v592_v25  ;;  %625 = vst.msk [vmem:[#allocation2 + $0x88] sm:$0xff] %vm17134_vm0, %v593_v27  ;;  %v14646_v38 = vld [vmem:[#allocation2 + $0x17] sm:$0xff]  ;;  %v14648_v39 = vld [vmem:[#allocation2 + $0x1f] sm:$0xff]  ;;  %vm14714_vm8 = vcmp.ge.s32.totalorder %v688_v63, 1  ;;  %v17262_v11 = vmov 0 }
 0x119   : > { %626 = vst.msk [vmem:[#allocation2 + $0x90] sm:$0xff] %vm17134_vm0, %v594_v28  ;;  %627 = vst.msk [vmem:[#allocation2 + $0x98] sm:$0xff] %vm17134_vm0, %v595_v29  ;;  %v909_v42 = vsel %vm14626_vm3, %v14646_v38, 0.0  ;;  %v2045_v43 = vld [vmem:[#allocation2 + $0x27] sm:$0xff]  ;;  %v17263_v11 = vsel %vm14714_vm8, 4294967295, %v17262_v11  ;;  %v660_v12 = vadd.s32 128, %v14565_v3 }
 0x11a   : > { %17251 = vst [vmem:[#allocation35_spill] sm:$0xff] %v17250_v33  ;;  %628 = vst.msk [vmem:[#allocation2 + $0xa0] sm:$0xff] %vm17134_vm0, %v596_v31  ;;  %v2046_v44 = vld [vmem:[#allocation2 + $0x2f] sm:$0xff]  ;;  %v14658_v45 = vld [vmem:[#allocation2 + $0x37] sm:$0xff]  ;;  %v940_v48 = vpack.c.bf16 %v14648_v39, %v909_v42  ;;  %v2141_v49 = vsel %vm14626_vm3, %v2045_v43, 0.0  ;;  %v911_v52 = vsel %vm14637_vm4, %v2045_v43, 0.0 }
 0x11b   : > { %629 = vst.msk [vmem:[#allocation2 + $0xa8] sm:$0xff] %vm17134_vm0, %v597_v35  ;;  %630 = vst.msk [vmem:[#allocation2 + $0xb0] sm:$0xff] %vm17134_vm0, %v598_v36  ;;  %v14668_v50 = vld [vmem:[#allocation2 + $0x3f] sm:$0xff]  ;;  %v3276_v51 = vsel %vm14626_vm3, %v14658_v45, 0.0  ;;  %v14675_v53 = vpack.c.bf16 %v2046_v44, %v2141_v49  ;;  %v941_v55 = vpack.c.bf16 %v2046_v44, %v911_v52  ;;  %v14680_v56 = vld [vmem:[#allocation2 + $0x47] sm:$0xff]  ;;  %v913_v59 = vsel %vm14660_vm5, %v14658_v45, 0.0 }
 0x11c   : > { %631 = vst.msk [vmem:[#allocation2 + $0xb8] sm:$0xff] %vm17134_vm0, %v599_v37  ;;  %17254 = vst [vmem:[#allocation36_spill] sm:$0xff] %v17253_v46  ;;  %v14678_v54 = vpack.c.bf16 %v14668_v50, %v3276_v51  ;;  %12003 = vmatmul.mubr.msk.bf16.vlgmr.msra.gmra.mrb[0].mxu0 %vm17134_vm0, %v940_v48  ;;  %v14696_v60 = vld [vmem:[#allocation2 + $0x4f] sm:$0xff]  ;;  %v915_v61 = vsel %vm14682_vm6, %v14680_v56, 0.0  ;;  %v942_v2 = vpack.c.bf16 %v14668_v50, %v913_v59  ;;  %v14705_v7 = vld [vmem:[#allocation2 + $0x57] sm:$0xff]  ;;  %v690_v21 = vand.u32 15, %v658_v9 }
 0x11d   : > { %17258 = vst [vmem:[#allocation38_spill] sm:$0xff] %v17257_v57  ;;  %12006 = vmatprep.mubr.msk.bf16.mxu0 %vm17134_vm0, %v941_v55  ;;  %12035 = vmatpush3.bf16.msra.mxu0 %v1395_v47  ;;  %v943_v6 = vpack.c.bf16 %v14696_v60, %v915_v61  ;;  %17261 = vst [vmem:[#allocation39_spill] sm:$0xff] %v17260_v8  ;;  %v14712_v10 = vld [vmem:[#allocation2 + $0x67] sm:$0xff]  ;;  %v14720_v14 = vld [vmem:[#allocation2 + $0x5f] sm:$0xff]  ;;  %v917_v16 = vsel %vm14707_vm7, %v14705_v7, 0.0  ;;  %v692_v25 = vand.u32 15, %v660_v12 }
 0x11e   : > { %17255 = vst [vmem:[#allocation37_spill] sm:$0xff] %v14678_v54  ;;  %12954 = vmatprep.subr.msk.bf16.mxu0 %vm17136_vm2, %v14689_v58  ;;  %17264 = vst [vmem:[#allocation40_spill] sm:$0xff] %v17263_v11  ;;  %v600_v15 = vld [vmem:[%s14574_s27 + $0xa8] sm:$0xff]  ;;  %v601_v18 = vld [vmem:[%s14574_s27 + $0xb0] sm:$0xff]  ;;  %v919_v20 = vsel %vm14714_vm8, %v14712_v10, 0.0  ;;  %v944_v29 = vpack.c.bf16 %v14720_v14, %v917_v16  ;;  %vm14753_vm9 = vcmp.ge.s32.totalorder %v690_v21, 1 }
 0x11f   : > { %v14727_v17 = vld [vmem:[#allocation2 + $0x6f] sm:$0xff]  ;;  %632 = vst.msk [vmem:[#allocation2 + $0xc0] sm:$0xff] %vm17134_vm0, %v600_v15  ;;  %v602_v19 = vld [vmem:[%s14574_s27 + $0xb8] sm:$0xff]  ;;  %633 = vst.msk [vmem:[#allocation2 + $0xc8] sm:$0xff] %vm17134_vm0, %v601_v18  ;;  %v17265_v32 = vmov 0  ;;  %v662_v34 = vadd.s32 144, %v14565_v3 }
 0x120   : > { %634 = vst.msk [vmem:[#allocation2 + $0xd0] sm:$0xff] %vm17134_vm0, %v602_v19  ;;  %v603_v22 = vld [vmem:[%s14574_s27 + $0xc0] sm:$0xff]  ;;  %v604_v23 = vld [vmem:[%s14574_s27 + $0xc8] sm:$0xff]  ;;  %v605_v24 = vld [vmem:[%s14574_s27 + $0xd0] sm:$0xff]  ;;  %v945_v30 = vpack.c.bf16 %v14727_v17, %v919_v20  ;;  %v17266_v32 = vsel %vm14753_vm9, 4294967295, %v17265_v32  ;;  %vm14760_vm10 = vcmp.ge.s32.totalorder %v692_v25, 1 }
 0x121   : > { %635 = vst.msk [vmem:[#allocation2 + $0xd8] sm:$0xff] %vm17134_vm0, %v603_v22  ;;  %636 = vst.msk [vmem:[#allocation2 + $0xe0] sm:$0xff] %vm17134_vm0, %v604_v23  ;;  %v606_v26 = vld [vmem:[%s14574_s27 + $0xd8] sm:$0xff]  ;;  %v607_v27 = vld [vmem:[%s14574_s27 + $0xe0] sm:$0xff]  ;;  %v17268_v36 = vmov 0  ;;  %v694_v43 = vand.u32 15, %v662_v34 }
 0x122   : > { %637 = vst.msk [vmem:[#allocation2 + $0xe8] sm:$0xff] %vm17134_vm0, %v605_v24  ;;  %v608_v28 = vld [vmem:[%s14574_s27 + $0xe8] sm:$0xff]  ;;  %638 = vst.msk [vmem:[#allocation2 + $0xf0] sm:$0xff] %vm17134_vm0, %v606_v26  ;;  %v14751_v31 = vld [vmem:[#allocation2 + $0x77] sm:$0xff]  ;;  %v17269_v36 = vsel %vm14760_vm10, 4294967295, %v17268_v36  ;;  %v17271_v49 = vmov 0 }
 0x123   : > { %639 = vst.msk [vmem:[#allocation2 + $0xf8] sm:$0xff] %vm17134_vm0, %v607_v27  ;;  %640 = vst.msk [vmem:[#allocation2 + $0x100] sm:$0xff] %vm17134_vm0, %v608_v28  ;;  %v14758_v35 = vld [vmem:[#allocation2 + $0x87] sm:$0xff]  ;;  %v14766_v37 = vld [vmem:[#allocation2 + $0x7f] sm:$0xff]  ;;  %v921_v40 = vsel %vm14753_vm9, %v14751_v31, 0.0  ;;  %vm14780_vm11 = vcmp.ge.s32.totalorder %v694_v43, 1 }
 0x124   : > { %12007 = vmatmul.mubr.msk.bf16.gmra.mrb[4].mxu0 %vm17134_vm0, %v942_v2  ;;  %17267 = vst [vmem:[#allocation41_spill] sm:$0xff] %v17266_v32  ;;  %17270 = vst [vmem:[#allocation42_spill] sm:$0xff] %v17269_v36  ;;  %v14771_v41 = vld [vmem:[#allocation2 + $0x8f] sm:$0xff]  ;;  %v923_v42 = vsel %vm14760_vm10, %v14758_v35, 0.0  ;;  %v946_v44 = vpack.c.bf16 %v14766_v37, %v921_v40  ;;  %v14778_v48 = vld [vmem:[#allocation2 + $0x97] sm:$0xff]  ;;  %v17272_v49 = vsel %vm14780_vm11, 4294967295, %v17271_v49 }
 0x125   : > { %12010 = vmatprep.mubr.msk.bf16.mxu0 %vm17134_vm0, %v943_v6  ;;  %v947_v47 = vpack.c.bf16 %v14771_v41, %v923_v42  ;;  %17273 = vst [vmem:[#allocation43_spill] sm:$0xff] %v17272_v49  ;;  %v609_v51 = vld [vmem:[%s14574_s27 + $0xf0] sm:$0xff]  ;;  %v14787_v52 = vld [vmem:[#allocation2 + $0x9f] sm:$0xff]  ;;  %v925_v55 = vsel %vm14780_vm11, %v14778_v48, 0.0  ;;  %v1205_v63 = vld [vmem:[#allocation2 + $0x28] sm:$0xff]  ;;  %v676_v6 = vand.u32 15, %v14565_v3 }
 0x126   : > { %641 = vst.msk [vmem:[#allocation2 + $0x108] sm:$0xff] %vm17134_vm0, %v609_v51  ;;  %v948_v59 = vpack.c.bf16 %v14787_v52, %v925_v55  ;;  %v1203_v61 = vld [vmem:[#allocation2 + $0x18] sm:$0xff]  ;;  %v1204_v62 = vld [vmem:[#allocation2 + $0x20] sm:$0xff]  ;;  %v1206_v2 = vld [vmem:[#allocation2 + $0x30] sm:$0xff]  ;;  %v1848_v9 = vsel %vm17136_vm2, %v14689_v58, 0  ;;  %v17274_v12 = vmov 0 }
 0x127   : > { %vm14799_vm12 = vcmp.ge.s32.totalorder %v676_v6, 1  ;;  %v14806_v16 = vpack.c.bf16 %v1204_v62, %v1203_v61  ;;  %v14811_v19 = vpack.c.bf16 %v1206_v2, %v1205_v63  ;;  %v14816_v20 = vld [vmem:[%s17113_s1 + $0xc] sm:$0xf]  ;;  %v1207_v58 = vld [vmem:[#allocation2 + $0x38] sm:$0xff]  ;;  %v1208_v21 = vld [vmem:[#allocation2 + $0x40] sm:$0xff]  ;;  %v2145_v24 = vsel %vm14660_vm5, %v14680_v56, 0.0 }
 0x128   : > { %v17275_v12 = vsel %vm14799_vm12, 4294967295, %v17274_v12  ;;  %v2139_v15 = vsel %vm14799_vm12, %v14646_v38, 0.0  ;;  %v1209_v22 = vld [vmem:[#allocation2 + $0x48] sm:$0xff]  ;;  %v1210_v23 = vld [vmem:[#allocation2 + $0x50] sm:$0xff]  ;;  %v2143_v38 = vsel %vm14637_vm4, %v14658_v45, 0.0  ;;  %v14834_v25 = vpack.c.bf16 %v14696_v60, %v2145_v24  ;;  %v1211_v27 = vld [vmem:[#allocation2 + $0x58] sm:$0xff] }
 0x129   : > { %17276 = vst [vmem:[#allocation44_spill] sm:$0xff] %v17275_v12  ;;  %v14809_v18 = vpack.c.bf16 %v14648_v39, %v2139_v15  ;;  %v14826_v39 = vpack.c.bf16 %v14668_v50, %v2143_v38  ;;  %v14836_v26 = vpack.c.bf16 %v1208_v21, %v1207_v58  ;;  %v14838_v45 = vpack.c.bf16 %v1210_v23, %v1209_v22  ;;  %v1212_v28 = vld [vmem:[#allocation2 + $0x60] sm:$0xff]  ;;  %v1213_v50 = vld [vmem:[#allocation2 + $0x68] sm:$0xff]  ;;  %v1215_v43 = vld [vmem:[#allocation2 + $0x78] sm:$0xff]  ;;  %s17626_s18 = sld [smem:[#allocation61_spill]] }
 0x12a   : > { %v2147_v56 = vsel %vm14682_vm6, %v14705_v7, 0.0  ;;  %v14856_v40 = vpack.c.bf16 %v1212_v28, %v1211_v27  ;;  %v1217_v7 = vld [vmem:[#allocation2 + $0x88] sm:$0xff]  ;;  %v1219_v61 = vld [vmem:[#allocation2 + $0x98] sm:$0xff]  ;;  %v1220_v62 = vld [vmem:[#allocation2 + $0xa0] sm:$0xff]  ;;  %v17301_v13 = vmov 0  ;;  %v671_v32 = vadd.s32 216, %v14565_v3 }
 0x12b   : > { %v14848_v60 = vpack.c.bf16 %v14720_v14, %v2147_v56  ;;  %v2151_v14 = vsel %vm14714_vm8, %v14751_v31, 0.0  ;;  %v2155_v31 = vsel %vm14760_vm10, %v14778_v48, 0.0  ;;  %v14890_v63 = vpack.c.bf16 %v1220_v62, %v1219_v61  ;;  %v1223_v6 = vld [vmem:[#allocation2 + $0xb8] sm:$0xff]  ;;  %v1225_v48 = vld [vmem:[#allocation2 + $0xc8] sm:$0xff]  ;;  %v1226_v15 = vld [vmem:[#allocation2 + $0xd0] sm:$0xff] }
 0x12c   : > { %12011 = vmatmul.mubr.msk.bf16.gmra.mrb[8].mxu0 %vm17134_vm0, %v944_v29  ;;  %v1214_v29 = vld [vmem:[#allocation2 + $0x70] sm:$0xff]  ;;  %v14900_v21 = vpack.c.bf16 %v1226_v15, %v1225_v48  ;;  %v1228_v22 = vld [vmem:[#allocation2 + $0xe0] sm:$0xff]  ;;  %v1229_v23 = vld [vmem:[#allocation2 + $0xe8] sm:$0xff]  ;;  %v14931_v61 = vadd.s32 56, %v14565_v3  ;;  %vm17292_vm10 = vcmask 64512   ;;  %v17307_v8 = vmov 0 }
 0x12d   : > { %12014 = vmatprep.mubr.msk.bf16.mxu0 %vm17134_vm0, %v945_v30  ;;  %v2149_v30 = vsel %vm14707_vm7, %v14712_v10, 0.0  ;;  %v14858_v42 = vpack.c.bf16 %v1214_v29, %v1213_v50  ;;  %v14868_v10 = vpack.c.bf16 %v14766_v37, %v2151_v14  ;;  %v1222_v37 = vld [vmem:[#allocation2 + $0xb0] sm:$0xff]  ;;  %v610_v28 = vld [vmem:[%s14574_s27 + $0xf8] sm:$0xff]  ;;  %v14912_v50 = vadd.s32 24, %v14565_v3  ;;  %vm17298_vm8 = vmmov %vm17292_vm10 }
 0x12e   : > { %v14854_v34 = vpack.c.bf16 %v14727_v17, %v2149_v30  ;;  %v2153_v17 = vsel %vm14753_vm9, %v14758_v35, 0.0  ;;  %v1221_v35 = vld [vmem:[#allocation2 + $0xa8] sm:$0xff]  ;;  %v1230_v38 = vld [vmem:[#allocation2 + $0xf0] sm:$0xff]  ;;  %642 = vst.msk [vmem:[#allocation2 + $0x110] sm:$0xff] %vm17134_vm0, %v610_v28  ;;  %v14916_v29 = vadd.s32 40, %v14565_v3  ;;  %v1231_v56 = vld [vmem:[#allocation2 + $0xf8] sm:$0xff] }
 0x12f   : > { %v14874_v51 = vpack.c.bf16 %v14771_v41, %v2153_v17  ;;  %v14888_v41 = vpack.c.bf16 %v14787_v52, %v2155_v31  ;;  %v14892_v2 = vpack.c.bf16 %v1222_v37, %v1221_v35  ;;  %v1227_v52 = vld [vmem:[#allocation2 + $0xd8] sm:$0xff]  ;;  %v14908_v27 = vpack.c.bf16 %v1230_v38, %v1229_v23  ;;  %17277 = vst [vmem:[#allocation45_spill] sm:$0xff] %v14912_v50  ;;  %v1232_v30 = vld [vmem:[#allocation2 + $0x100] sm:$0xff]  ;;  %v1594_v37 = vld [vmem:[#allocation2 + $0x29] sm:$0xff]  ;;  %s570_s21 = scalar_lea.vmem %s17626_s18, %s17629_s28 }
 0x130   : > { %v14906_v24 = vpack.c.bf16 %v1228_v22, %v1227_v52  ;;  %17278 = vst [vmem:[#allocation46_spill] sm:$0xff] %v14916_v29  ;;  %v1595_v14 = vld [vmem:[#allocation2 + $0x31] sm:$0xff]  ;;  %17281 = vst [vmem:[#allocation47_spill] sm:$0xff] %v14931_v61  ;;  %v1592_v62 = vld [vmem:[#allocation2 + $0x19] sm:$0xff]  ;;  %v653_v35 = vadd.s32 72, %v14565_v3  ;;  %v683_v48 = vand.u32 15, %v14931_v61 }
 0x131   : > { %v1597_v22 = vld [vmem:[#allocation2 + $0x41] sm:$0xff]  ;;  %v1599_v38 = vld [vmem:[#allocation2 + $0x51] sm:$0xff]  ;;  %vm17303_vm7 = vcmask 64512   ;;  %v15052_v11 = vld [vmem:[#allocation2 + $0xb9] sm:$0xff]  ;;  %vm17310_vm5 = vcmask 64512   ;;  %v675_v33 = vadd.s32 248, %v14565_v3 }
 0x132   : > { %v685_v15 = vand.u32 15, %v653_v35  ;;  %v14949_v28 = vld [vmem:[%s17113_s1 + $0x10] sm:$0xf]  ;;  %vm14951_vm15 = vcmp.lt.s32.totalorder %v683_v48, 15  ;;  %v1601_v48 = vld [vmem:[#allocation2 + $0x61] sm:$0xff]  ;;  %vm17304_vm6 = vmmov %vm17303_vm7  ;;  %vm17317_vm12 = vcmask 64512  }
 0x133   : > { %v1757_v35 = vsel %vm14951_vm15, %v1597_v22, 0.0  ;;  %v1603_v0 = vld [vmem:[#allocation2 + $0x71] sm:$0xff]  ;;  %v1600_v22 = vld [vmem:[#allocation2 + $0x59] sm:$0xff]  ;;  %v15042_v4 = vld [vmem:[#allocation2 + $0xc1] sm:$0xff]  ;;  %v670_v49 = vadd.s32 208, %v14565_v3 }
 0x134   : > { %12015 = vmatmul.mubr.msk.bf16.gmra.mrb[12].mxu0 %vm17134_vm0, %v946_v44  ;;  %v1216_v44 = vld [vmem:[#allocation2 + $0x80] sm:$0xff]  ;;  %vm14958_vm3 = vcmp.lt.s32.totalorder %v685_v15, 15  ;;  %v15045_v36 = vld [vmem:[#allocation2 + $0xd1] sm:$0xff]  ;;  %vm17312_vm4 = vmmov %vm17310_vm5 }
 0x135   : > { %12018 = vmatprep.mubr.msk.bf16.mxu0 %vm17134_vm0, %v947_v47  ;;  %v1218_v47 = vld [vmem:[#allocation2 + $0x90] sm:$0xff]  ;;  %v14876_v55 = vpack.c.bf16 %v1216_v44, %v1215_v43  ;;  %v679_v43 = vand.u32 15, %v14912_v50  ;;  %v681_v44 = vand.u32 15, %v14916_v29  ;;  %v667_v50 = vadd.s32 184, %v14565_v3  ;;  %v15024_v29 = vld [vmem:[#allocation2 + $0x99] sm:$0xff]  ;;  %v15070_v46 = vld [vmem:[#allocation2 + $0xe1] sm:$0xff] }
 0x136   : > { %v15073_v54 = vld [vmem:[#allocation2 + $0xf1] sm:$0xff]  ;;  %v15080_v12 = vld [vmem:[#allocation2 + $0xd9] sm:$0xff] }
 0x137   : > { %vm14926_vm13 = vcmp.lt.s32.totalorder %v679_v43, 15  ;;  %vm14933_vm14 = vcmp.lt.s32.totalorder %v681_v44, 15  ;;  %v2237_v43 = vsel %vm17136_vm2, %v14816_v20, 0  ;;  %v1596_v44 = vld [vmem:[#allocation2 + $0x39] sm:$0xff] }
 0x13c   : > { %12019 = vmatmul.mubr.msk.bf16.gmra.mrb[16].mxu0 %vm17134_vm0, %v948_v59  ;;  %v14878_v59 = vpack.c.bf16 %v1218_v47, %v1217_v7  ;;  %v14924_v7 = vpack.c.bf16 %v1232_v30, %v1231_v56  ;;  %v1593_v47 = vld [vmem:[#allocation2 + $0x21] sm:$0xff]  ;;  %v655_v30 = vadd.s32 88, %v14565_v3 }
 0x13d   : > { %12036 = vmatprep.mubr.bf16.mxu0 %v17137_v1 }
 0x144   : > { %12037 = vmatmul.mubr.msk.bf16.vlgmr.msra.gmra.mrb[0].mxu0 %vm17134_vm0, %v14806_v16 }
 0x145   : > { %12040 = vmatprep.mubr.msk.bf16.mxu0 %vm17134_vm0, %v14811_v19  ;;  %12069 = vmatpush3.bf16.msra.mxu0 %v1848_v9  ;;  %v1224_v9 = vld [vmem:[#allocation2 + $0xc0] sm:$0xff] }
 0x146   : > { %12955 = vmatprep.subr.msk.bf16.mxu0 %vm17136_vm2, %v14816_v20  ;;  %v14898_v58 = vpack.c.bf16 %v1224_v9, %v1223_v6  ;;  %v1753_v6 = vsel %vm14926_vm13, %v1593_v47, 0.0  ;;  %v1755_v9 = vsel %vm14933_vm14, %v1595_v14, 0.0  ;;  %v657_v14 = vadd.s32 104, %v14565_v3  ;;  %v13847_v47 = vld [vmem:[#allocation2 + $0x89] sm:$0xff] }
 0x147   : > { %v1783_v52 = vpack.c.bf16 %v1753_v6, %v1592_v62  ;;  %v1784_v23 = vpack.c.bf16 %v1755_v9, %v1594_v37  ;;  %v1598_v62 = vld [vmem:[#allocation2 + $0x49] sm:$0xff]  ;;  %v1759_v37 = vsel %vm14958_vm3, %v1599_v38, 0.0  ;;  %v687_v20 = vand.u32 15, %v655_v30 }
 0x148   : > { %v689_v6 = vand.u32 15, %v657_v14  ;;  %v1785_v9 = vpack.c.bf16 %v1757_v35, %v1596_v44  ;;  %v1786_v15 = vpack.c.bf16 %v1759_v37, %v1598_v62  ;;  %v661_v38 = vadd.s32 136, %v14565_v3  ;;  %v1602_v30 = vld [vmem:[#allocation2 + $0x69] sm:$0xff] }
 0x149   : > { %vm14971_vm1 = vcmp.lt.s32.totalorder %v687_v20, 15  ;;  %v14987_v20 = vld [vmem:[#allocation2 + $0x81] sm:$0xff] }
 0x14a   : > { %v1761_v44 = vsel %vm14971_vm1, %v1601_v48, 0.0  ;;  %v693_v35 = vand.u32 15, %v661_v38  ;;  %v13855_v48 = vld [vmem:[#allocation2 + $0xc9] sm:$0xff] }
 0x14b   : > { %v1787_v37 = vpack.c.bf16 %v1761_v44, %v1600_v22 }
 0x14c   : > { %12041 = vmatmul.mubr.msk.bf16.gmra.mrb[4].mxu0 %vm17134_vm0, %v14836_v26 }
 0x14d   : > { %12044 = vmatprep.mubr.msk.bf16.mxu0 %vm17134_vm0, %v14838_v45 }
 0x154   : > { %12045 = vmatmul.mubr.msk.bf16.gmra.mrb[8].mxu0 %vm17134_vm0, %v14856_v40 }
 0x155   : > { %12048 = vmatprep.mubr.msk.bf16.mxu0 %vm17134_vm0, %v14858_v42 }
 0x15c   : > { %12049 = vmatmul.mubr.msk.bf16.gmra.mrb[12].mxu0 %vm17134_vm0, %v14876_v55 }
 0x15d   : > { %12052 = vmatprep.mubr.msk.bf16.mxu0 %vm17134_vm0, %v14878_v59 }
 0x164   : > { %12053 = vmatmul.mubr.msk.bf16.gmra.mrb[16].mxu0 %vm17134_vm0, %v14890_v63 }
 0x165   : > { %12056 = vmatprep.mubr.msk.bf16.mxu0 %vm17134_vm0, %v14892_v2 }
 0x16c   : > { %12057 = vmatmul.mubr.msk.bf16.gmra.mrb[20].mxu0 %vm17134_vm0, %v14898_v58 }
 0x16d   : > { %12060 = vmatprep.mubr.msk.bf16.mxu0 %vm17134_vm0, %v14900_v21 }
 0x174   : > { %12061 = vmatmul.mubr.msk.bf16.gmra.mrb[24].mxu0 %vm17134_vm0, %v14906_v24 }
 0x175   : > { %12064 = vmatprep.mubr.msk.bf16.mxu0 %vm17134_vm0, %v14908_v27 }
 0x17c   : > { %12065 = vmatmul.mubr.msk.bf16.gmra.mrb[28].mxu0 %vm17134_vm0, %v14924_v7 }
 0x17d   : > { %12070 = vmatprep.mubr.bf16.mxu0 %v17137_v1  ;;  %v14989_v1 = vld [vmem:[#allocation2 + $0x91] sm:$0xff] }
 0x184   : > { %12071 = vmatmul.mubr.msk.bf16.vlgmr.msra.gmra.mrb[0].mxu0 %vm17134_vm0, %v1783_v52 }
 0x185   : > { %12074 = vmatprep.mubr.msk.bf16.mxu0 %vm17134_vm0, %v1784_v23  ;;  %12103 = vmatpush3.bf16.msra.mxu0 %v2237_v43  ;;  %v659_v23 = vadd.s32 120, %v14565_v3  ;;  %vm14976_vm0 = vcmp.lt.s32.totalorder %v689_v6, 15  ;;  %v13851_v43 = vld [vmem:[#allocation2 + $0xa9] sm:$0xff] }
 0x186   : > { %12956 = vmatprep.subr.msk.bf16.mxu0 %vm17136_vm2, %v14949_v28  ;;  %vm17293_vm2 = vmmov %vm17292_vm10  ;;  %v1763_v14 = vsel %vm14976_vm0, %v1603_v0, 0.0  ;;  %v665_v0 = vadd.s32 168, %v14565_v3 }
 0x187   : > { %v691_v62 = vand.u32 15, %v659_v23  ;;  %v1788_v6 = vpack.c.bf16 %v1763_v14, %v1602_v30  ;;  %v15004_v23 = vld [vmem:[#allocation2 + $0x89] sm:$0xff] }
 0x188   : > { %v697_v44 = vand.u32 15, %v665_v0  ;;  %v15032_v0 = vld [vmem:[#allocation2 + $0xa9] sm:$0xff] }
 0x189   : > { %vm14991_vm9 = vcmp.lt.s32.totalorder %v691_v62, 15  ;;  %v15014_v62 = vld [vmem:[#allocation2 + $0xa1] sm:$0xff] }
 0x18a   : > { %v1765_v22 = vsel %vm14991_vm9, %v14987_v20, 0.0 }
 0x18c   : > { %12075 = vmatmul.mubr.msk.bf16.gmra.mrb[4].mxu0 %vm17292_vm10, %v1785_v9  ;;  %v663_v9 = vadd.s32 152, %v14565_v3 }
 0x18d   : > { %12078 = vmatprep.mubr.msk.bf16.mxu0 %vm17293_vm2, %v1786_v15  ;;  %v14996_v15 = vld [vmem:[#allocation2 + $0x79] sm:$0xff]  ;;  %vm14998_vm2 = vcmp.lt.s32.totalorder %v693_v35, 15 }
 0x18e   : > { %v1767_v38 = vsel %vm14998_vm2, %v14989_v1, 0.0  ;;  %v695_v30 = vand.u32 15, %v663_v9  ;;  %v1789_v14 = vpack.c.bf16 %v1765_v22, %v14996_v15  ;;  %v669_v9 = vadd.s32 200, %v14565_v3 }
 0x18f   : > { %v1790_v35 = vpack.c.bf16 %v1767_v38, %v15004_v23 }
 0x194   : > { %12079 = vmatmul.mubr.msk.bf16.gmra.mrb[8].mxu0 %vm17292_vm10, %v1787_v37  ;;  %v15017_v37 = vld [vmem:[#allocation2 + $0xb1] sm:$0xff]  ;;  %vm15019_vm10 = vcmp.lt.s32.totalorder %v695_v30, 15  ;;  %v699_v30 = vand.u32 15, %v667_v50  ;;  %v673_v50 = vadd.s32 232, %v14565_v3 }
 0x195   : > { %12082 = vmatprep.mubr.msk.bf16.mxu0 %vm17298_vm8, %v1788_v6  ;;  %vm15026_vm8 = vcmp.lt.s32.totalorder %v697_v44, 15  ;;  %v1769_v22 = vsel %vm15019_vm10, %v15014_v62, 0.0  ;;  %v701_v44 = vand.u32 15, %v669_v9  ;;  %v15060_v9 = vld [vmem:[#allocation2 + $0xc9] sm:$0xff] }
 0x196   : > { %v17302_v13 = vsel %vm15026_vm8, 4294967295, %v17301_v13  ;;  %v1771_v38 = vsel %vm15026_vm8, %v15017_v37, 0.0  ;;  %v1791_v5 = vpack.c.bf16 %v1769_v22, %v15024_v29  ;;  %17311 = vst [vmem:[#allocation49_spill] sm:$0xff] %v15060_v9 }
 0x19c   : > { %12083 = vmatmul.mubr.msk.bf16.gmra.mrb[12].mxu0 %vm17303_vm7, %v1789_v14  ;;  %v1792_v14 = vpack.c.bf16 %v1771_v38, %v15032_v0  ;;  %vm15047_vm7 = vcmp.lt.s32.totalorder %v699_v30, 15  ;;  %v703_v30 = vand.u32 15, %v671_v32  ;;  %v15087_v32 = vld [vmem:[#allocation2 + $0xe9] sm:$0xff] }
 0x19d   : > { %12086 = vmatprep.mubr.msk.bf16.mxu0 %vm17304_vm6, %v1790_v35  ;;  %v17305_v35 = vmov 0  ;;  %vm15054_vm6 = vcmp.lt.s32.totalorder %v701_v44, 15  ;;  %v1773_v22 = vsel %vm15047_vm7, %v15042_v4, 0.0  ;;  %v705_v44 = vand.u32 15, %v673_v50 }
 0x19e   : > { %v17306_v35 = vsel %vm15047_vm7, 4294967295, %v17305_v35  ;;  %v17308_v8 = vsel %vm15054_vm6, 4294967295, %v17307_v8  ;;  %v1775_v38 = vsel %vm15054_vm6, %v15045_v36, 0.0  ;;  %v1793_v57 = vpack.c.bf16 %v1773_v22, %v15052_v11  ;;  %vm17318_vm6 = vmmov %vm17317_vm12 }
 0x19f   : > { %17309 = vst [vmem:[#allocation48_spill] sm:$0xff] %v17308_v8  ;;  %v17315_v8 = vmov 0  ;;  %vm17322_vm7 = vmmov %vm17318_vm6 }
 0x1a4   : > { %12087 = vmatmul.mubr.msk.bf16.gmra.mrb[16].mxu0 %vm17310_vm5, %v1791_v5  ;;  %v1794_v5 = vpack.c.bf16 %v1775_v38, %v15060_v9  ;;  %vm15075_vm5 = vcmp.lt.s32.totalorder %v703_v30, 15  ;;  %v707_v38 = vand.u32 15, %v675_v33 }
 0x1a5   : > { %12090 = vmatprep.mubr.msk.bf16.mxu0 %vm17312_vm4, %v1792_v14  ;;  %v17313_v14 = vmov 0  ;;  %vm15082_vm4 = vcmp.lt.s32.totalorder %v705_v44, 15  ;;  %v1777_v50 = vsel %vm15075_vm5, %v15070_v46, 0.0  ;;  %v15097_v44 = vld [vmem:[#allocation2 + $0x101] sm:$0xff] }
 0x1a6   : > { %v17314_v14 = vsel %vm15075_vm5, 4294967295, %v17313_v14  ;;  %v17316_v8 = vsel %vm15082_vm4, 4294967295, %v17315_v8  ;;  %v1779_v22 = vsel %vm15082_vm4, %v15073_v54, 0.0  ;;  %v1795_v30 = vpack.c.bf16 %v1777_v50, %v15080_v12  ;;  %vm17324_vm4 = vmmov %vm17318_vm6 }
 0x1a7   : > { %v1796_v9 = vpack.c.bf16 %v1779_v22, %v15087_v32  ;;  %vm17325_vm5 = vmmov %vm17324_vm4  ;;  %v15118_v22 = vld [vmem:[%s17113_s1 + $0x14] sm:$0xf] }
 0x1a8   : > { %vm17330_vm8 = vmmov %vm17325_vm5 }
 0x1ac   : > { %12091 = vmatmul.mubr.msk.bf16.gmra.mrb[20].mxu0 %vm17317_vm12, %v1793_v57  ;;  %vm15100_vm12 = vcmp.lt.s32.totalorder %v707_v38, 15  ;;  %v17319_v57 = vmov 0  ;;  %v666_v38 = vadd.s32 176, %v14565_v3 }
 0x1ad   : > { %12094 = vmatprep.mubr.msk.bf16.mxu0 %vm17318_vm6, %v1794_v5  ;;  %v17320_v57 = vsel %vm15100_vm12, 4294967295, %v17319_v57  ;;  %v15106_v5 = vld [vmem:[#allocation2 + $0xf9] sm:$0xff]  ;;  %v1781_v33 = vsel %vm15100_vm12, %v15097_v44, 0.0  ;;  %vm17328_vm12 = vmmov %vm17324_vm4 }
 0x1ae   : > { %17321 = vst [vmem:[#allocation50_spill] sm:$0xff] %v17320_v57  ;;  %17323 = vst [vmem:[#allocation51_spill] sm:$0xff] %v15106_v5  ;;  %v1797_v50 = vpack.c.bf16 %v1781_v33, %v15106_v5  ;;  %v15165_v57 = vld [vmem:[#allocation2 + $0xd7] sm:$0xff] }
 0x1af   : > { %v15194_v5 = vld [vmem:[#allocation2 + $0xf7] sm:$0xff] }
 0x1b4   : > { %12095 = vmatmul.mubr.msk.bf16.gmra.mrb[24].mxu0 %vm17318_vm6, %v1795_v30  ;;  %vm17327_vm6 = vmmov %vm17324_vm4  ;;  %v15142_v30 = vld [vmem:[#allocation2 + $0xaf] sm:$0xff] }
 0x1b5   : > { %12098 = vmatprep.mubr.msk.bf16.mxu0 %vm17322_vm7, %v1796_v9  ;;  %vm17326_vm7 = vcmask 1043456   ;;  %17335 = vst [vmem:[#allocation54_spill] sm:$0xff] %v15142_v30 }
 0x1b6   : > { %v2530_v9 = vsel %vm17326_vm7, %v14949_v28, 0  ;;  %v15139_v28 = vld [vmem:[#allocation2 + $0xb7] sm:$0xff] }
 0x1b7   : > { %17334 = vst [vmem:[#allocation53_spill] sm:$0xff] %v15139_v28 }
 0x1bc   : > { %12099 = vmatmul.mubr.msk.bf16.gmra.mrb[28].mxu0 %vm17324_vm4, %v1797_v50  ;;  %vm17329_vm4 = vmmov %vm17326_vm7  ;;  %v698_v50 = vand.u32 15, %v666_v38  ;;  %v672_v38 = vadd.s32 224, %v14565_v3 }
 0x1bd   : > { %12104 = vmatprep.mubr.msk.bf16.mxu0 %vm17325_vm5, %v14809_v18  ;;  %v664_v18 = vadd.s32 160, %v14565_v3  ;;  %vm17331_vm7 = vmmov %vm17325_vm5 }
 0x1c4   : > { %12105 = vmatmul.mubr.msk.bf16.vlgmr.msra.gmra.mrb[0].mxu0 %vm17327_vm6, %v14675_v53  ;;  %vm17332_vm6 = vmmov %vm17325_vm5  ;;  %v696_v53 = vand.u32 15, %v664_v18 }
 0x1c5   : > { %12108 = vmatprep.mubr.msk.bf16.mxu0 %vm17328_vm12, %v14826_v39  ;;  %12137 = vmatpush3.bf16.msra.mxu0 %v2530_v9  ;;  %v15137_v39 = vld [vmem:[#allocation2 + $0xa7] sm:$0xff] }
 0x1c6   : > { %12957 = vmatprep.subr.msk.bf16.mxu0 %vm17329_vm4, %v15118_v22  ;;  %17333 = vst [vmem:[#allocation52_spill] sm:$0xff] %v15137_v39  ;;  %vm15144_vm12 = vcmp.ge.s32.totalorder %v696_v53, 1  ;;  %vm17341_vm4 = vmmov %vm17325_vm5  ;;  %v15162_v53 = vld [vmem:[#allocation2 + $0xc7] sm:$0xff] }
 0x1c7   : > { %v2159_v33 = vsel %vm15144_vm12, %v15139_v28, 0.0 }
 0x1cc   : > { %12109 = vmatmul.mubr.msk.bf16.gmra.mrb[4].mxu0 %vm17325_vm5, %v14834_v25  ;;  %v17336_v25 = vmov 0 }
 0x1cd   : > { %12112 = vmatprep.mubr.msk.bf16.mxu0 %vm17330_vm8, %v14848_v60  ;;  %v17337_v25 = vsel %vm15144_vm12, 4294967295, %v17336_v25  ;;  %v668_v60 = vadd.s32 192, %v14565_v3  ;;  %vm17339_vm8 = vmmov %vm17325_vm5  ;;  %vm15167_vm5 = vcmp.ge.s32.totalorder %v698_v50, 1  ;;  %v702_v50 = vand.u32 15, %v670_v49 }
 0x1ce   : > { %17338 = vst [vmem:[#allocation55_spill] sm:$0xff] %v17337_v25  ;;  %v17345_v25 = vmov 0  ;;  %vm17361_vm12 = vcmask 1043456  }
 0x1cf   : > { %v700_v9 = vand.u32 15, %v668_v60  ;;  %v15180_v60 = vld [vmem:[#allocation2 + $0xdf] sm:$0xff] }
 0x1d4   : > { %12113 = vmatmul.mubr.msk.bf16.gmra.mrb[8].mxu0 %vm17331_vm7, %v14854_v34  ;;  %v15151_v34 = vld [vmem:[#allocation2 + $0xbf] sm:$0xff]  ;;  %vm15174_vm7 = vcmp.ge.s32.totalorder %v700_v9, 1  ;;  %v704_v9 = vand.u32 15, %v672_v38 }
 0x1d5   : > { %12116 = vmatprep.mubr.msk.bf16.mxu0 %vm17332_vm6, %v14868_v10  ;;  %17340 = vst [vmem:[#allocation56_spill] sm:$0xff] %v15151_v34  ;;  %v2157_v10 = vsel %vm14780_vm11, %v15137_v39, 0.0  ;;  %v15172_v39 = vld [vmem:[#allocation2 + $0xcf] sm:$0xff]  ;;  %v17346_v25 = vsel %vm15174_vm7, 4294967295, %v17345_v25  ;;  %vm17348_vm6 = vmmov %vm17341_vm4  ;;  %v15207_v38 = vld [vmem:[#allocation2 + $0xff] sm:$0xff] }
 0x1d6   : > { %v2180_v18 = vpack.c.bf16 %v15142_v30, %v2157_v10  ;;  %17347 = vst [vmem:[#allocation58_spill] sm:$0xff] %v17346_v25  ;;  %v2161_v10 = vsel %vm15167_vm5, %v15162_v53, 0.0  ;;  %v15191_v30 = vld [vmem:[#allocation2 + $0xe7] sm:$0xff]  ;;  %v17352_v25 = vmov 0 }
 0x1d7   : > { %v2182_v28 = vpack.c.bf16 %v15172_v39, %v2161_v10 }
 0x1dc   : > { %12117 = vmatmul.mubr.msk.bf16.gmra.mrb[12].mxu0 %vm17339_vm8, %v14874_v51  ;;  %v2181_v51 = vpack.c.bf16 %v15151_v34, %v2159_v33  ;;  %vm17349_vm8 = vmmov %vm17341_vm4  ;;  %v2163_v33 = vsel %vm15174_vm7, %v15165_v57, 0.0  ;;  %v674_v34 = vadd.s32 240, %v14565_v3 }
 0x1dd   : > { %12120 = vmatprep.mubr.msk.bf16.mxu0 %vm17341_vm4, %v14888_v41  ;;  %v17342_v41 = vmov 0  ;;  %vm15196_vm4 = vcmp.ge.s32.totalorder %v702_v50, 1  ;;  %vm17355_vm7 = vmmov %vm17349_vm8  ;;  %v17356_v50 = vmov 0 }
 0x1de   : > { %v17343_v41 = vsel %vm15167_vm5, 4294967295, %v17342_v41  ;;  %v706_v49 = vand.u32 15, %v674_v34  ;;  %v2165_v10 = vsel %vm15196_vm4, %v15191_v30, 0.0 }
 0x1df   : > { %17344 = vst [vmem:[#allocation57_spill] sm:$0xff] %v17343_v41  ;;  %v15200_v41 = vld [vmem:[#allocation2 + $0xef] sm:$0xff] }
 0x1e0   : > { %vm15216_vm5 = vcmp.ge.s32.totalorder %v706_v49, 1  ;;  %v2184_v34 = vpack.c.bf16 %v15200_v41, %v2165_v10  ;;  %v2919_v10 = vsel %vm17361_vm12, %v15118_v22, 0 }
 0x1e1   : > { %v17357_v50 = vsel %vm15216_vm5, 4294967295, %v17356_v50 }
 0x1e4   : > { %12121 = vmatmul.mubr.msk.bf16.gmra.mrb[16].mxu0 %vm17348_vm6, %v2180_v18  ;;  %v2183_v18 = vpack.c.bf16 %v15180_v60, %v2163_v33  ;;  %vm15202_vm6 = vcmp.ge.s32.totalorder %v704_v9, 1  ;;  %v15221_v9 = vld [vmem:[#allocation2 + $0x107] sm:$0xff] }
 0x1e5   : > { %12124 = vmatprep.mubr.msk.bf16.mxu0 %vm17349_vm8, %v2181_v51  ;;  %v17350_v51 = vmov 0  ;;  %v17353_v25 = vsel %vm15202_vm6, 4294967295, %v17352_v25  ;;  %v2167_v33 = vsel %vm15202_vm6, %v15194_v5, 0.0  ;;  %vm17359_vm6 = vmmov %vm17355_vm7 }
 0x1e6   : > { %v17351_v51 = vsel %vm15196_vm4, 4294967295, %v17350_v51  ;;  %17354 = vst [vmem:[#allocation59_spill] sm:$0xff] %v17353_v25  ;;  %v2169_v25 = vsel %vm15216_vm5, %v15221_v9, 0.0  ;;  %vm17360_vm4 = vmmov %vm17359_vm6 }
 0x1e7   : > { %vm17364_vm5 = vmmov %vm17361_vm12 }
 0x1e8   : > { %vm17366_vm12 = vmmov %vm17360_vm4 }
 0x1e9   : > { %vm17367_vm11 = vmmov %vm17360_vm4 }
 0x1ec   : > { %12125 = vmatmul.mubr.msk.bf16.gmra.mrb[20].mxu0 %vm17349_vm8, %v2182_v28  ;;  %v2185_v28 = vpack.c.bf16 %v15207_v38, %v2167_v33  ;;  %vm17358_vm8 = vmmov %vm17355_vm7  ;;  %v3322_v33 = vld [vmem:[%s17113_s1 + $0x18] sm:$0xf] }
 0x1ed   : > { %12128 = vmatprep.mubr.msk.bf16.mxu0 %vm17355_vm7, %v2183_v18  ;;  %v15226_v18 = vld [vmem:[#allocation2 + $0x10f] sm:$0xff] }
 0x1ee   : > { %v2186_v49 = vpack.c.bf16 %v15226_v18, %v2169_v25  ;;  %v15291_v25 = vld [vmem:[#allocation2 + $0x39] sm:$0xff] }
 0x1f4   : > { %12129 = vmatmul.mubr.msk.bf16.gmra.mrb[24].mxu0 %vm17358_vm8, %v2184_v34  ;;  %vm17362_vm8 = vmmov %vm17360_vm4 }
 0x1f5   : > { %12132 = vmatprep.mubr.msk.bf16.mxu0 %vm17355_vm7, %v2185_v28  ;;  %vm17363_vm7 = vmmov %vm17360_vm4 }
 0x1fc   : > { %12133 = vmatmul.mubr.msk.bf16.gmra.mrb[28].mxu0 %vm17359_vm6, %v2186_v49  ;;  %vm17365_vm6 = vmmov %vm17360_vm4  ;;  %v3711_v49 = vld [vmem:[%s17113_s1 + $0x1c] sm:$0xf] }
 0x1fd   : > { %12138 = vmatprep.mubr.msk.bf16.mxu0 %vm17360_vm4, %v14806_v16  ;;  %v15262_v16 = vadd.s32 8, %v14565_v3 }
 0x1ff   : > { %17372 = vst [vmem:[#allocation60_spill] sm:$0xff] %v15262_v16 }
 0x204   : > { %12139 = vmatmul.mubr.msk.bf16.vlgmr.msra.gmra.mrb[0].mxu0 %vm17362_vm8, %v14811_v19  ;;  %vm17368_vm8 = vmmov %vm17360_vm4  ;;  %v677_v19 = vand.u32 15, %v15262_v16 }
 0x205   : > { %12142 = vmatprep.mubr.msk.bf16.mxu0 %vm17363_vm7, %v14836_v26  ;;  %12171 = vmatpush3.bf16.msra.mxu0 %v2919_v10  ;;  %vm17369_vm7 = vmmov %vm17360_vm4  ;;  %v15300_v10 = vld [vmem:[#allocation2 + $0x51] sm:$0xff] }
 0x206   : > { %12958 = vmatprep.subr.msk.bf16.mxu0 %vm17364_vm5, %v3322_v33  ;;  %vm17370_vm5 = vmmov %vm17360_vm4 }
 0x20c   : > { %12143 = vmatmul.mubr.msk.bf16.gmra.mrb[4].mxu0 %vm17365_vm6, %v14838_v45  ;;  %vm17371_vm6 = vmmov %vm17360_vm4  ;;  %v2462_v45 = vld [vmem:[#allocation2 + $0x108] sm:$0xff] }
 0x20d   : > { %12146 = vmatprep.mubr.msk.bf16.mxu0 %vm17360_vm4, %v14856_v40  ;;  %v2463_v40 = vld [vmem:[#allocation2 + $0x110] sm:$0xff] }
 0x214   : > { %12147 = vmatmul.mubr.msk.bf16.gmra.mrb[8].mxu0 %vm17366_vm12, %v14858_v42  ;;  %vm15269_vm12 = vcmp.lt.s32.totalorder %v677_v19, 15  ;;  %v13832_v42 = vld [vmem:[#allocation2 + $0x21] sm:$0xff]  ;;  %v2828_v19 = vsel %vm14951_vm15, %v15300_v10, 0.0 }
 0x215   : > { %12150 = vmatprep.mubr.msk.bf16.mxu0 %vm17367_vm11, %v14876_v55  ;;  %vm17373_vm11 = vmmov %vm17360_vm4  ;;  %v2822_v55 = vsel %vm15269_vm12, %v13832_v42, 0.0 }
 0x21c   : > { %12151 = vmatmul.mubr.msk.bf16.gmra.mrb[12].mxu0 %vm17368_vm8, %v14878_v59  ;;  %vm17376_vm8 = vmmov %vm17360_vm4  ;;  %v15279_v59 = vpack.c.bf16 %v2463_v40, %v2462_v45  ;;  %v15305_v45 = vld [vmem:[#allocation2 + $0x61] sm:$0xff]  ;;  %v15311_v40 = vld [vmem:[#allocation2 + $0x49] sm:$0xff] }
 0x21d   : > { %12154 = vmatprep.mubr.msk.bf16.mxu0 %vm17369_vm7, %v14890_v63  ;;  %vm17377_vm7 = vmmov %vm17360_vm4  ;;  %v13833_v63 = vld [vmem:[#allocation2 + $0x19] sm:$0xff]  ;;  %v2856_v42 = vpack.c.bf16 %v2828_v19, %v15311_v40  ;;  %v4091_v26 = vsel %vm14951_vm15, %v15305_v45, 0.0 }
 0x224   : > { %12155 = vmatmul.mubr.msk.bf16.gmra.mrb[16].mxu0 %vm17370_vm5, %v14892_v2  ;;  %v2853_v2 = vpack.c.bf16 %v2822_v55, %v13833_v63  ;;  %vm17378_vm5 = vmmov %vm17360_vm4  ;;  %v15314_v55 = vld [vmem:[#allocation2 + $0x59] sm:$0xff] }
 0x225   : > { %12158 = vmatprep.mubr.msk.bf16.mxu0 %vm17371_vm6, %v14898_v58  ;;  %vm17379_vm6 = vmmov %vm17360_vm4  ;;  %v13834_v58 = vld [vmem:[#allocation2 + $0x31] sm:$0xff] }
 0x22c   : > { %12159 = vmatmul.mubr.msk.bf16.gmra.mrb[20].mxu0 %vm17360_vm4, %v14900_v21  ;;  %v2824_v21 = vsel %vm14926_vm13, %v13834_v58, 0.0  ;;  %vm17380_vm4 = vcmask 1043456  }
 0x22d   : > { %12162 = vmatprep.mubr.msk.bf16.mxu0 %vm17373_vm11, %v14906_v24  ;;  %v15286_v24 = vld [vmem:[#allocation2 + $0x41] sm:$0xff]  ;;  %v3372_v28 = vsel %vm17380_vm4, %v3322_v33, 0  ;;  %vm17381_vm11 = vmmov %vm17378_vm5  ;;  %v2830_v33 = vsel %vm14958_vm3, %v15305_v45, 0.0  ;;  %v13846_v45 = vld [vmem:[#allocation2 + $0x79] sm:$0xff] }
 0x22e   : > { %v2857_v63 = vpack.c.bf16 %v2830_v33, %v15314_v55 }
 0x234   : > { %12163 = vmatmul.mubr.msk.bf16.gmra.mrb[24].mxu0 %vm17376_vm8, %v14908_v27  ;;  %v2826_v27 = vsel %vm14933_vm14, %v15286_v24, 0.0  ;;  %vm17382_vm8 = vmmov %vm17378_vm5 }
 0x235   : > { %12166 = vmatprep.mubr.msk.bf16.mxu0 %vm17377_vm7, %v14924_v7  ;;  %v13836_v7 = vld [vmem:[#allocation2 + $0x29] sm:$0xff]  ;;  %v2855_v34 = vpack.c.bf16 %v2826_v27, %v15291_v25  ;;  %vm17383_vm7 = vmmov %vm17380_vm4 }
 0x236   : > { %v2854_v22 = vpack.c.bf16 %v2824_v21, %v13836_v7  ;;  %v2834_v21 = vsel %vm14976_vm0, %v14987_v20, 0.0  ;;  %v15327_v27 = vld [vmem:[#allocation2 + $0x69] sm:$0xff]  ;;  %vm17385_vm4 = vmmov %vm17378_vm5 }
 0x23c   : > { %12167 = vmatmul.mubr.msk.bf16.gmra.mrb[28].mxu0 %vm17378_vm5, %v15279_v59 }
 0x23d   : > { %12172 = vmatprep.mubr.msk.bf16.mxu0 %vm17379_vm6, %v2853_v2  ;;  %vm17384_vm6 = vmmov %vm17378_vm5  ;;  %v15319_v2 = vld [vmem:[#allocation2 + $0x71] sm:$0xff] }
 0x23e   : > { %v2832_v58 = vsel %vm14971_vm1, %v15319_v2, 0.0  ;;  %v4093_v17 = vsel %vm14958_vm3, %v15319_v2, 0.0 }
 0x23f   : > { %v2858_v7 = vpack.c.bf16 %v2832_v58, %v15327_v27  ;;  %v17399_v58 = vld [vmem:[#allocation51_spill] sm:$0xff]  ;;  %v4120_v31 = vpack.c.bf16 %v4093_v17, %v15327_v27 }
 0x244   : > { %12173 = vmatmul.mubr.msk.bf16.vlgmr.msra.gmra.mrb[0].mxu0 %vm17381_vm11, %v2854_v22  ;;  %v2859_v22 = vpack.c.bf16 %v2834_v21, %v14996_v15  ;;  %vm17386_vm11 = vmmov %vm17385_vm4  ;;  %v2840_v15 = vsel %vm15019_vm10, %v15017_v37, 0.0  ;;  %v15371_v21 = vld [vmem:[#allocation2 + $0x111] sm:$0xff] }
 0x245   : > { %12176 = vmatprep.mubr.msk.bf16.mxu0 %vm17382_vm8, %v2855_v34  ;;  %12205 = vmatpush3.bf16.msra.mxu0 %v3372_v28  ;;  %v2836_v34 = vsel %vm14991_vm9, %v14989_v1, 0.0  ;;  %v2838_v28 = vsel %vm14998_vm2, %v15014_v62, 0.0  ;;  %vm17387_vm8 = vmmov %vm17385_vm4  ;;  %v2862_v33 = vpack.c.bf16 %v2840_v15, %v15032_v0  ;;  %v3119_v15 = vld [vmem:[#allocation2 + $0x4f] sm:$0xff] }
 0x246   : > { %12959 = vmatprep.subr.msk.bf16.mxu0 %vm17383_vm7, %v3711_v49  ;;  %v2860_v20 = vpack.c.bf16 %v2836_v34, %v15004_v23  ;;  %v2861_v19 = vpack.c.bf16 %v2838_v28, %v15024_v29  ;;  %vm17388_vm7 = vmmov %vm17385_vm4  ;;  %v17392_v23 = vld [vmem:[#allocation48_spill] sm:$0xff] }
 0x247   : > { %v3115_v34 = vld [vmem:[#allocation2 + $0x2f] sm:$0xff] }
 0x248   : > { %v17404_v28 = vld [vmem:[#allocation44_spill] sm:$0xff] }
 0x24c   : > { %12177 = vmatmul.mubr.msk.bf16.gmra.mrb[4].mxu0 %vm17378_vm5, %v2856_v42  ;;  %vm17389_vm5 = vnez %v17302_v13  ;;  %v17394_v42 = vld [vmem:[#allocation49_spill] sm:$0xff] }
 0x24d   : > { %12180 = vmatprep.mubr.msk.bf16.mxu0 %vm17384_vm6, %v2857_v63  ;;  %v2842_v1 = vsel %vm17389_vm5, %v15042_v4, 0.0  ;;  %vm17390_vm6 = vmmov %vm17385_vm4 }
 0x24e   : > { %v2863_v62 = vpack.c.bf16 %v2842_v1, %v15052_v11  ;;  %vm17396_vm5 = vmmov %vm17385_vm4  ;;  %v17408_v1 = vld [vmem:[#allocation35_spill] sm:$0xff] }
 0x254   : > { %12181 = vmatmul.mubr.msk.bf16.gmra.mrb[8].mxu0 %vm17385_vm4, %v2858_v7  ;;  %v3114_v7 = vld [vmem:[#allocation2 + $0x27] sm:$0xff] }
 0x255   : > { %12184 = vmatprep.mubr.msk.bf16.mxu0 %vm17386_vm11, %v2859_v22  ;;  %vm17391_vm11 = vnez %v17306_v35  ;;  %v17402_v22 = vld [vmem:[#allocation50_spill] sm:$0xff] }
 0x256   : > { %v2844_v29 = vsel %vm17391_vm11, %v15045_v36, 0.0 }
 0x257   : > { %v2864_v63 = vpack.c.bf16 %v2844_v29, %v17394_v42  ;;  %v3120_v29 = vld [vmem:[#allocation2 + $0x57] sm:$0xff]  ;;  %v3122_v42 = vld [vmem:[#allocation2 + $0x67] sm:$0xff] }
 0x25c   : > { %12185 = vmatmul.mubr.msk.bf16.gmra.mrb[12].mxu0 %vm17387_vm8, %v2860_v20  ;;  %vm17393_vm8 = vnez %v17392_v23 }
 0x25d   : > { %12188 = vmatprep.mubr.msk.bf16.mxu0 %vm17388_vm7, %v2861_v19  ;;  %v2846_v37 = vsel %vm17393_vm8, %v15070_v46, 0.0  ;;  %vm17395_vm7 = vmmov %vm17385_vm4  ;;  %v3118_v19 = vld [vmem:[#allocation2 + $0x47] sm:$0xff] }
 0x25e   : > { %v2865_v4 = vpack.c.bf16 %v2846_v37, %v15080_v12  ;;  %vm17400_vm8 = vmmov %vm17396_vm5  ;;  %v15375_v12 = vld [vmem:[#allocation2 + $0x109] sm:$0xff] }
 0x264   : > { %12189 = vmatmul.mubr.msk.bf16.gmra.mrb[16].mxu0 %vm17390_vm6, %v2862_v33  ;;  %vm17397_vm6 = vnez %v17314_v14 }
 0x265   : > { %12192 = vmatprep.mubr.msk.bf16.mxu0 %vm17385_vm4, %v2863_v62  ;;  %v2848_v11 = vsel %vm17397_vm6, %v15073_v54, 0.0  ;;  %vm17398_vm4 = vnez %v17316_v8 }
 0x266   : > { %v2850_v36 = vsel %vm17398_vm4, %v15097_v44, 0.0  ;;  %v2866_v0 = vpack.c.bf16 %v2848_v11, %v15087_v32  ;;  %vm17405_vm4 = vnez %v17404_v28  ;;  %v3121_v11 = vld [vmem:[#allocation2 + $0x5f] sm:$0xff] }
 0x267   : > { %v2867_v46 = vpack.c.bf16 %v2850_v36, %v17399_v58  ;;  %v3274_v44 = vsel %vm17405_vm4, %v3114_v7, 0.0  ;;  %v17414_v36 = vld [vmem:[#allocation36_spill] sm:$0xff]  ;;  %v3125_v28 = vld [vmem:[#allocation2 + $0x7f] sm:$0xff] }
 0x268   : > { %v3306_v20 = vpack.c.bf16 %v3115_v34, %v3274_v44  ;;  %v3123_v58 = vld [vmem:[#allocation2 + $0x6f] sm:$0xff]  ;;  %v3126_v34 = vld [vmem:[#allocation2 + $0x87] sm:$0xff] }
 0x269   : > { %v17420_v44 = vld [vmem:[#allocation39_spill] sm:$0xff] }
 0x26c   : > { %12193 = vmatmul.mubr.msk.bf16.gmra.mrb[20].mxu0 %vm17395_vm7, %v2864_v63  ;;  %vm17401_vm7 = vmmov %vm17396_vm5  ;;  %v15391_v63 = vld [vmem:[%s17113_s1 + $0x20] sm:$0xf] }
 0x26d   : > { %12196 = vmatprep.mubr.msk.bf16.mxu0 %vm17396_vm5, %v2865_v4  ;;  %vm17403_vm5 = vnez %v17402_v22  ;;  %vm17406_vm6 = vmmov %vm17401_vm7  ;;  %v17411_v4 = vld [vmem:[#allocation37_spill] sm:$0xff] }
 0x26e   : > { %v2852_v54 = vsel %vm17403_vm5, %v15371_v21, 0.0  ;;  %vm17407_vm11 = vmmov %vm17406_vm6 }
 0x26f   : > { %v2868_v32 = vpack.c.bf16 %v2852_v54, %v15375_v12  ;;  %vm17412_vm4 = vmmov %vm17406_vm6  ;;  %v3124_v54 = vld [vmem:[#allocation2 + $0x77] sm:$0xff] }
 0x274   : > { %12197 = vmatmul.mubr.msk.bf16.gmra.mrb[24].mxu0 %vm17400_vm8, %v2866_v0  ;;  %vm17409_vm8 = vnez %v17408_v1 }
 0x275   : > { %12200 = vmatprep.mubr.msk.bf16.mxu0 %vm17401_vm7, %v2867_v46  ;;  %v3278_v33 = vsel %vm17409_vm8, %v3118_v19, 0.0  ;;  %vm17410_vm7 = vcmask 1043456   ;;  %v17416_v46 = vld [vmem:[#allocation38_spill] sm:$0xff]  ;;  %v17422_v19 = vld [vmem:[#allocation40_spill] sm:$0xff] }
 0x276   : > { %v3308_v62 = vpack.c.bf16 %v3119_v15, %v3278_v33  ;;  %v3761_v37 = vsel %vm17410_vm7, %v3711_v49, 0  ;;  %vm17417_vm5 = vnez %v17416_v46  ;;  %vm17418_vm8 = vmmov %vm17410_vm7 }
 0x277   : > { %v3282_v49 = vsel %vm17417_vm5, %v3122_v42, 0.0  ;;  %vm17419_vm7 = vmmov %vm17412_vm4 }
 0x278   : > { %v3310_v22 = vpack.c.bf16 %v3123_v58, %v3282_v49  ;;  %vm17424_vm5 = vmmov %vm17412_vm4  ;;  %v17431_v58 = vld [vmem:[#allocation54_spill] sm:$0xff]  ;;  %v17434_v49 = vld [vmem:[#allocation53_spill] sm:$0xff] }
 0x27c   : > { %12201 = vmatmul.mubr.msk.bf16.gmra.mrb[28].mxu0 %vm17406_vm6, %v2868_v32  ;;  %vm17413_vm6 = vmmov %vm17412_vm4 }
 0x27d   : > { %12206 = vmatprep.mubr.msk.bf16.mxu0 %vm17407_vm11, %v3306_v20  ;;  %vm17415_vm11 = vnez %v17414_v36  ;;  %v3127_v20 = vld [vmem:[#allocation2 + $0x8f] sm:$0xff] }
 0x27e   : > { %v3280_v0 = vsel %vm17415_vm11, %v3120_v29, 0.0  ;;  %vm17423_vm11 = vnez %v17422_v19  ;;  %v3129_v29 = vld [vmem:[#allocation2 + $0x9f] sm:$0xff] }
 0x27f   : > { %v3309_v7 = vpack.c.bf16 %v3121_v11, %v3280_v0  ;;  %v3286_v15 = vsel %vm17423_vm11, %v3126_v34, 0.0  ;;  %v17429_v11 = vld [vmem:[#allocation42_spill] sm:$0xff]  ;;  %vm17433_vm11 = vmmov %vm17424_vm5 }
 0x280   : > { %v3312_v33 = vpack.c.bf16 %v3127_v20, %v3286_v15  ;;  %v17441_v15 = vld [vmem:[#allocation57_spill] sm:$0xff] }
 0x284   : > { %12207 = vmatmul.mubr.msk.bf16.vlgmr.msra.gmra.mrb[0].mxu0 %vm17412_vm4, %v17411_v4  ;;  %v17428_v4 = vld [vmem:[#allocation52_spill] sm:$0xff] }
 0x285   : > { %12210 = vmatprep.mubr.msk.bf16.mxu0 %vm17413_vm6, %v3308_v62  ;;  %12239 = vmatpush3.bf16.msra.mxu0 %v3761_v37  ;;  %vm17421_vm6 = vnez %v17420_v44  ;;  %v3128_v62 = vld [vmem:[#allocation2 + $0x97] sm:$0xff] }
 0x286   : > { %12960 = vmatprep.subr.msk.bf16.mxu0 %vm17418_vm8, %v15391_v63  ;;  %v3284_v32 = vsel %vm17421_vm6, %v3124_v54, 0.0  ;;  %vm17425_vm8 = vmmov %vm17412_vm4  ;;  %v17426_v37 = vld [vmem:[#allocation41_spill] sm:$0xff]  ;;  %v17437_v54 = vld [vmem:[#allocation55_spill] sm:$0xff] }
 0x287   : > { %v3311_v1 = vpack.c.bf16 %v3125_v28, %v3284_v32  ;;  %vm17432_vm6 = vmmov %vm17424_vm5  ;;  %v17439_v28 = vld [vmem:[#allocation56_spill] sm:$0xff] }
 0x28c   : > { %12211 = vmatmul.mubr.msk.bf16.gmra.mrb[4].mxu0 %vm17419_vm7, %v3309_v7  ;;  %vm17427_vm7 = vnez %v17426_v37  ;;  %v17435_v7 = vld [vmem:[#allocation43_spill] sm:$0xff] }
 0x28d   : > { %12214 = vmatprep.mubr.msk.bf16.mxu0 %vm17412_vm4, %v3310_v22  ;;  %v3288_v42 = vsel %vm17427_vm7, %v3128_v62, 0.0  ;;  %vm17430_vm4 = vnez %v17429_v11  ;;  %vm17440_vm7 = vmmov %vm17432_vm6 }
 0x28e   : > { %v3290_v36 = vsel %vm17430_vm4, %v17428_v4, 0.0  ;;  %v3313_v0 = vpack.c.bf16 %v3129_v29, %v3288_v42  ;;  %vm17442_vm4 = vnez %v17441_v15  ;;  %v17443_v29 = vld [vmem:[#allocation58_spill] sm:$0xff]  ;;  %v3576_v15 = vld [vmem:[#allocation2 + $0x70] sm:$0xff] }
 0x28f   : > { %v3314_v46 = vpack.c.bf16 %v17431_v58, %v3290_v36 }
 0x294   : > { %12215 = vmatmul.mubr.msk.bf16.gmra.mrb[8].mxu0 %vm17424_vm5, %v3311_v1  ;;  %vm17436_vm5 = vnez %v17435_v7  ;;  %v929_v1 = vsel %vm17442_vm4, %v17434_v49, 0.0 }
 0x295   : > { %12218 = vmatprep.mubr.msk.bf16.mxu0 %vm17425_vm8, %v3312_v33  ;;  %v3292_v22 = vsel %vm17436_vm5, %v17434_v49, 0.0  ;;  %vm17438_vm8 = vnez %v17437_v54  ;;  %v3296_v33 = vsel %vm17442_vm4, %v15165_v57, 0.0  ;;  %v950_v62 = vpack.c.bf16 %v17439_v28, %v929_v1  ;;  %vm17445_vm5 = vmmov %vm17432_vm6  ;;  %v17450_v49 = vld [vmem:[#allocation59_spill] sm:$0xff] }
 0x296   : > { %v3294_v34 = vsel %vm17438_vm8, %v15162_v53, 0.0  ;;  %v3315_v44 = vpack.c.bf16 %v17439_v28, %v3292_v22  ;;  %v927_v20 = vsel %vm17438_vm8, %v17428_v4, 0.0  ;;  %vm17446_vm8 = vmmov %vm17445_vm5  ;;  %v3317_v42 = vpack.c.bf16 %v15180_v60, %v3296_v33  ;;  %v3567_v22 = vld [vmem:[#allocation2 + $0x28] sm:$0xff]  ;;  %v3568_v54 = vld [vmem:[#allocation2 + $0x30] sm:$0xff] }
 0x297   : > { %v3316_v32 = vpack.c.bf16 %v15172_v39, %v3294_v34  ;;  %v949_v19 = vpack.c.bf16 %v17431_v58, %v927_v20  ;;  %vm17448_vm4 = vnez %v17351_v51  ;;  %v3570_v34 = vld [vmem:[#allocation2 + $0x40] sm:$0xff]  ;;  %v3571_v28 = vld [vmem:[#allocation2 + $0x48] sm:$0xff] }
 0x298   : > { %v3300_v58 = vsel %vm17448_vm4, %v15194_v5, 0.0  ;;  %v3574_v20 = vld [vmem:[#allocation2 + $0x60] sm:$0xff] }
 0x299   : > { %12022 = vmatprep.mubr.msk.bf16.mxu1 %vm17445_vm5, %v949_v19  ;;  %v3575_v19 = vld [vmem:[#allocation2 + $0x68] sm:$0xff] }
 0x29a   : > { %12023 = vmatmul.mubr.msk.bf16.vlgmr.msra.gmra.mrb[0].mxu1 %vm17446_vm8, %v950_v62  ;;  %v3699_v33 = vpack.c.bf16 %v3576_v15, %v3575_v19  ;;  %v3577_v62 = vld [vmem:[#allocation2 + $0x78] sm:$0xff]  ;;  %v4087_v19 = vsel %vm14926_vm13, %v15286_v24, 0.0  ;;  %v4089_v15 = vsel %vm14933_vm14, %v15300_v10, 0.0  ;;  %v4119_v24 = vpack.c.bf16 %v4091_v26, %v15314_v55  ;;  %v13848_v55 = vld [vmem:[#allocation2 + $0xa1] sm:$0xff] }
 0x29b   : > { %v4099_v27 = vsel %vm14991_vm9, %v13848_v55, 0.0 }
 0x29c   : > { %12219 = vmatmul.mubr.msk.bf16.gmra.mrb[12].mxu0 %vm17432_vm6, %v3313_v0  ;;  %v933_v0 = vsel %vm17448_vm4, %v15165_v57, 0.0  ;;  %vm17455_vm4 = vnez %v17357_v50  ;;  %v3572_v50 = vld [vmem:[#allocation2 + $0x50] sm:$0xff] }
 0x29d   : > { %12222 = vmatprep.mubr.msk.bf16.mxu0 %vm17433_vm11, %v3314_v46  ;;  %vm17444_vm11 = vnez %v17443_v29  ;;  %v952_v46 = vpack.c.bf16 %v15180_v60, %v933_v0  ;;  %v937_v51 = vsel %vm17455_vm4, %v15194_v5, 0.0  ;;  %v3578_v29 = vld [vmem:[#allocation2 + $0x80] sm:$0xff]  ;;  %v3583_v0 = vld [vmem:[#allocation2 + $0xa8] sm:$0xff] }
 0x29e   : > { %v3298_v37 = vsel %vm17444_vm11, %v15191_v30, 0.0  ;;  %v931_v11 = vsel %vm17444_vm11, %v15162_v53, 0.0 }
 0x29f   : > { %v3318_v4 = vpack.c.bf16 %v15200_v41, %v3298_v37  ;;  %v951_v36 = vpack.c.bf16 %v15172_v39, %v931_v11  ;;  %v3319_v39 = vpack.c.bf16 %v15207_v38, %v3300_v58  ;;  %v3579_v37 = vld [vmem:[#allocation2 + $0x88] sm:$0xff]  ;;  %v3581_v11 = vld [vmem:[#allocation2 + $0x98] sm:$0xff]  ;;  %v3584_v58 = vld [vmem:[#allocation2 + $0xb0] sm:$0xff] }
 0x2a4   : > { %12223 = vmatmul.mubr.msk.bf16.gmra.mrb[16].mxu0 %vm17440_vm7, %v3315_v44  ;;  %vm17447_vm7 = vmmov %vm17445_vm5  ;;  %v3697_v44 = vpack.c.bf16 %v3572_v50, %v3571_v28  ;;  %v3593_v28 = vld [vmem:[#allocation2 + $0xf8] sm:$0xff]  ;;  %v3594_v50 = vld [vmem:[#allocation2 + $0x100] sm:$0xff] }
 0x2a5   : > { %12226 = vmatprep.mubr.msk.bf16.mxu0 %vm17432_vm6, %v3316_v32  ;;  %vm17449_vm6 = vmmov %vm17445_vm5  ;;  %vm17451_vm5 = vnez %v17450_v49  ;;  %v3573_v32 = vld [vmem:[#allocation2 + $0x58] sm:$0xff]  ;;  %v3703_v49 = vpack.c.bf16 %v3584_v58, %v3583_v0 }
 0x2a6   : > { %v3302_v53 = vsel %vm17451_vm5, %v15221_v9, 0.0  ;;  %vm17452_vm11 = vmmov %vm17449_vm6  ;;  %v935_v7 = vsel %vm17451_vm5, %v15191_v30, 0.0  ;;  %v954_v9 = vpack.c.bf16 %v15207_v38, %v937_v51  ;;  %v17458_v30 = vmov 0.0|0.0  }
 0x2a7   : > { %12026 = vmatprep.mubr.msk.bf16.mxu1 %vm17452_vm11, %v951_v36  ;;  %vm17453_vm8 = vmmov %vm17449_vm6  ;;  %v3320_v57 = vpack.c.bf16 %v15226_v18, %v3302_v53  ;;  %v953_v60 = vpack.c.bf16 %v15200_v41, %v935_v7  ;;  %v3695_v18 = vpack.c.bf16 %v3568_v54, %v3567_v22  ;;  %v3569_v41 = vld [vmem:[#allocation2 + $0x38] sm:$0xff]  ;;  %v3698_v1 = vpack.c.bf16 %v3574_v20, %v3573_v32  ;;  %v3582_v36 = vld [vmem:[#allocation2 + $0xa0] sm:$0xff] }
 0x2a8   : > { %12027 = vmatmul.mubr.msk.bf16.gmra.mrb[4].mxu1 %vm17453_vm8, %v952_v46  ;;  %vm17456_vm11 = vmmov %vm17449_vm6  ;;  %v3696_v5 = vpack.c.bf16 %v3570_v34, %v3569_v41  ;;  %v3702_v46 = vpack.c.bf16 %v3582_v36, %v3581_v11  ;;  %v3585_v53 = vld [vmem:[#allocation2 + $0xb8] sm:$0xff]  ;;  %v3588_v7 = vld [vmem:[#allocation2 + $0xd0] sm:$0xff] }
 0x2a9   : > { %12030 = vmatprep.mubr.msk.bf16.mxu1 %vm17456_vm11, %v953_v60  ;;  %vm17457_vm8 = vmmov %vm17449_vm6  ;;  %v3590_v22 = vld [vmem:[#allocation2 + $0xe0] sm:$0xff]  ;;  %v3591_v54 = vld [vmem:[#allocation2 + $0xe8] sm:$0xff] }
 0x2aa   : > { %vm17459_vm5 = vmmov %vm17449_vm6  ;;  %v13853_v11 = vld [vmem:[#allocation2 + $0xd1] sm:$0xff]  ;;  %v13854_v36 = vld [vmem:[#allocation2 + $0xb9] sm:$0xff] }
 0x2ab   : > { %vm17461_vm4 = vmmov %vm17459_vm5 }
 0x2ac   : > { %12227 = vmatmul.mubr.msk.bf16.gmra.mrb[20].mxu0 %vm17447_vm7, %v3317_v42  ;;  %vm17454_vm7 = vmmov %vm17449_vm6  ;;  %v3580_v42 = vld [vmem:[#allocation2 + $0x90] sm:$0xff] }
 0x2ad   : > { %12230 = vmatprep.mubr.msk.bf16.mxu0 %vm17449_vm6, %v3318_v4  ;;  %vm17463_vm11 = vmmov %vm17461_vm4  ;;  %v3701_v4 = vpack.c.bf16 %v3580_v42, %v3579_v37 }
 0x2ae   : > { %vm17476_vm13 = vmmov %vm17461_vm4 }
 0x2af   : > { %vm17477_vm14 = vmmov %vm17461_vm4 }
 0x2b0   : > { %12031 = vmatmul.mubr.msk.bf16.gmra.mrb[8].mxu1 %vm17457_vm8, %v954_v9  ;;  %vm17464_vm8 = vmmov %vm17461_vm4  ;;  %v3589_v9 = vld [vmem:[#allocation2 + $0xd8] sm:$0xff] }
 0x2b1   : > { %v3706_v41 = vpack.c.bf16 %v3590_v22, %v3589_v9  ;;  %vm17478_vm15 = vmmov %vm17461_vm4  ;;  %v13861_v9 = vld [vmem:[#allocation2 + $0xf9] sm:$0xff] }
 0x2b2   : > { %vm17479_vm3 = vmmov %vm17461_vm4 }
 0x2b4   : > { %12231 = vmatmul.mubr.msk.bf16.gmra.mrb[24].mxu0 %vm17454_vm7, %v3319_v39  ;;  %vm17460_vm7 = vcmask 1043456   ;;  %v3586_v39 = vld [vmem:[#allocation2 + $0xc0] sm:$0xff] }
 0x2b5   : > { %12234 = vmatprep.mubr.msk.bf16.mxu0 %vm17449_vm6, %v3320_v57  ;;  %v4182_v38 = vsel %vm17460_vm7, %v15391_v63, 0  ;;  %vm17462_vm6 = vmmov %vm17461_vm4  ;;  %v3700_v63 = vpack.c.bf16 %v3578_v29, %v3577_v62  ;;  %v3587_v57 = vld [vmem:[#allocation2 + $0xc8] sm:$0xff]  ;;  %v3704_v60 = vpack.c.bf16 %v3586_v39, %v3585_v53  ;;  %v13849_v62 = vld [vmem:[#allocation2 + $0xb1] sm:$0xff] }
 0x2b6   : > { %vm17466_vm7 = vmmov %vm17461_vm4  ;;  %v3705_v51 = vpack.c.bf16 %v3588_v7, %v3587_v57  ;;  %v4101_v52 = vsel %vm14998_vm2, %v13849_v62, 0.0  ;;  %v13850_v29 = vld [vmem:[#allocation2 + $0x99] sm:$0xff]  ;;  %v13857_v53 = vld [vmem:[#allocation2 + $0xf1] sm:$0xff] }
 0x2b7   : > { %v4123_v37 = vpack.c.bf16 %v4099_v27, %v13850_v29  ;;  %v4124_v42 = vpack.c.bf16 %v4101_v52, %v13851_v43  ;;  %v13858_v39 = vld [vmem:[#allocation2 + $0xd9] sm:$0xff] }
 0x2bc   : > { %12235 = vmatmul.mubr.bf16.gmra.mrb[28].mxu0 %v17458_v30 }
 0x2bd   : > { %12240 = vmatprep.mubr.msk.bf16.mxu0 %vm17459_vm5, %v3695_v18  ;;  %vm17465_vm5 = vmmov %vm17461_vm4  ;;  %v3592_v18 = vld [vmem:[#allocation2 + $0xf0] sm:$0xff] }
 0x2be   : > { %v3707_v34 = vpack.c.bf16 %v3592_v18, %v3591_v54 }
 0x2c4   : > { %12241 = vmatmul.mubr.msk.bf16.vlgmr.msra.gmra.mrb[0].mxu0 %vm17461_vm4, %v3696_v5  ;;  %v3708_v5 = vpack.c.bf16 %v3594_v50, %v3593_v28 }
 0x2c5   : > { %12244 = vmatprep.mubr.msk.bf16.mxu0 %vm17462_vm6, %v3697_v44  ;;  %12273 = vmatpush3.bf16.msra.mxu0 %v4182_v38  ;;  %vm17467_vm6 = vmmov %vm17461_vm4  ;;  %v3957_v44 = vld [vmem:[#allocation2 + $0x31] sm:$0xff]  ;;  %v3956_v38 = vld [vmem:[#allocation2 + $0x29] sm:$0xff] }
 0x2c6   : > { %v4085_v32 = vsel %vm15269_vm12, %v3957_v44, 0.0  ;;  %vm17475_vm12 = vmmov %vm17461_vm4  ;;  %v4484_v44 = vshra.s32 %v14565_v3, 3 }
 0x2c7   : > { %v4116_v20 = vpack.c.bf16 %v4085_v32, %v3956_v38  ;;  %v15580_v38 = vand.u32 7, %v14565_v3 }
 0x2c8   : > { %v4492_v32 = vmul.u32 2, %v4484_v44 }
 0x2c9   : > { %17493 = vst [vmem:[#allocation48_spill] sm:$0xff] %v15580_v38 }
 0x2cc   : > { %12245 = vmatmul.mubr.msk.bf16.gmra.mrb[4].mxu0 %vm17463_vm11, %v3698_v1  ;;  %vm17468_vm11 = vmmov %vm17461_vm4  ;;  %v4117_v1 = vpack.c.bf16 %v4087_v19, %v15291_v25  ;;  %v13844_v25 = vld [vmem:[#allocation2 + $0x81] sm:$0xff] }
 0x2cd   : > { %12248 = vmatprep.mubr.msk.bf16.mxu0 %vm17464_vm8, %v3699_v33  ;;  %vm17469_vm8 = vmmov %vm17461_vm4  ;;  %v4095_v10 = vsel %vm14971_vm1, %v13844_v25, 0.0  ;;  %v17211_v25 = vmov 0.25  }
 0x2ce   : > { %v4121_v33 = vpack.c.bf16 %v4095_v10, %v13846_v45  ;;  %v17495_v10 = vmov 0 }
 0x2d4   : > { %12249 = vmatmul.mubr.msk.bf16.gmra.mrb[8].mxu0 %vm17465_vm5, %v3700_v63  ;;  %vm17470_vm5 = vmmov %vm17461_vm4  ;;  %v13852_v63 = vld [vmem:[#allocation2 + $0xc1] sm:$0xff] }
 0x2d5   : > { %12252 = vmatprep.mubr.msk.bf16.mxu0 %vm17466_vm7, %v3701_v4  ;;  %vm17471_vm7 = vmmov %vm17461_vm4  ;;  %v4103_v4 = vsel %vm15019_vm10, %v13852_v63, 0.0 }
 0x2d6   : > { %v4125_v0 = vpack.c.bf16 %v4103_v4, %v13854_v36 }
 0x2dc   : > { %12253 = vmatmul.mubr.msk.bf16.gmra.mrb[12].mxu0 %vm17461_vm4, %v3702_v46  ;;  %v13856_v46 = vld [vmem:[#allocation2 + $0xe1] sm:$0xff] }
 0x2dd   : > { %12256 = vmatprep.mubr.msk.bf16.mxu0 %vm17467_vm6, %v3703_v49  ;;  %vm17472_vm6 = vmmov %vm17461_vm4 }
 0x2e4   : > { %12257 = vmatmul.mubr.msk.bf16.gmra.mrb[16].mxu0 %vm17468_vm11, %v3704_v60  ;;  %vm17473_vm11 = vmmov %vm17461_vm4  ;;  %v13860_v60 = vld [vmem:[#allocation2 + $0x101] sm:$0xff] }
 0x2e5   : > { %12260 = vmatprep.mubr.msk.bf16.mxu0 %vm17469_vm8, %v3705_v51  ;;  %vm17474_vm8 = vmmov %vm17461_vm4 }
 0x2ec   : > { %12261 = vmatmul.mubr.msk.bf16.gmra.mrb[20].mxu0 %vm17470_vm5, %v3706_v41  ;;  %vm17482_vm5 = vnez %v17302_v13  ;;  %v13859_v13 = vld [vmem:[#allocation2 + $0xe9] sm:$0xff] }
 0x2ed   : > { %12264 = vmatprep.mubr.msk.bf16.mxu0 %vm17471_vm7, %v3707_v34  ;;  %v4105_v61 = vsel %vm17482_vm5, %v13853_v11, 0.0  ;;  %vm17485_vm7 = vnez %v17306_v35 }
 0x2ee   : > { %v4126_v58 = vpack.c.bf16 %v4105_v61, %v13855_v48  ;;  %v4107_v49 = vsel %vm17485_vm7, %v13856_v46, 0.0 }
 0x2ef   : > { %v4127_v57 = vpack.c.bf16 %v4107_v49, %v13858_v39 }
 0x2f4   : > { %12265 = vmatmul.mubr.msk.bf16.gmra.mrb[24].mxu0 %vm17461_vm4, %v3708_v5  ;;  %vm17486_vm4 = vnez %v17392_v23 }
 0x2f5   : > { %12268 = vmatprep.mubr.msk.bf16.mxu0 %vm17472_vm6, %v15279_v59  ;;  %v4118_v59 = vpack.c.bf16 %v4089_v15, %v15311_v40  ;;  %v13845_v40 = vld [vmem:[#allocation2 + $0x91] sm:$0xff]  ;;  %v4109_v6 = vsel %vm17486_vm4, %v13857_v53, 0.0  ;;  %v4500_v15 = vmul.u32 16, %v4492_v32 }
 0x2f6   : > { %v4097_v56 = vsel %vm14976_vm0, %v13845_v40, 0.0  ;;  %vm17480_vm0 = vmmov %vm17479_vm3  ;;  %v4128_v7 = vpack.c.bf16 %v4109_v6, %v13859_v13  ;;  %v15602_v40 = vld [vmem:[#allocation15] ss:$0 sm:$0xff] }
 0x2f7   : > { %v4122_v2 = vpack.c.bf16 %v4097_v56, %v13847_v47  ;;  %vm17481_vm1 = vmmov %vm17480_vm0 }
 0x2f8   : > { %vm17483_vm9 = vmmov %vm17480_vm0 }
 0x2f9   : > { %vm17484_vm2 = vmmov %vm17480_vm0 }
 0x2fa   : > { %vm17487_vm10 = vmmov %vm17480_vm0 }
 0x2fb   : > { %vm17488_vm6 = vmmov %vm17480_vm0 }
 0x2fc   : > { %12269 = vmatmul.mubr.bf16.gmra.mrb[28].mxu0 %v17458_v30 }
 0x2fd   : > { %12274 = vmatprep.mubr.msk.bf16.mxu0 %vm17473_vm11, %v4116_v20  ;;  %vm17489_vm11 = vnez %v17314_v14  ;;  %v17494_v20 = vlaneseq }
 0x2fe   : > { %v4111_v51 = vsel %vm17489_vm11, %v13860_v60, 0.0 }
 0x2ff   : > { %v4129_v22 = vpack.c.bf16 %v4111_v51, %v13861_v9  ;;  %v15583_v19 = vand.u32 127, %v17494_v20 }
 0x301   : > { %v15587_v26 = vadd.s32 128, %v15583_v19 }
 0x304   : > { %12275 = vmatmul.mubr.msk.bf16.vlgmr.msra.gmra.mrb[0].mxu0 %vm17474_vm8, %v4117_v1  ;;  %vm17490_vm8 = vnez %v17316_v8  ;;  %v4508_v1 = vmul.u32 2, %v15580_v38 }
 0x305   : > { %12278 = vmatprep.mubr.msk.bf16.mxu0 %vm17475_vm12, %v4118_v59  ;;  %v4113_v35 = vsel %vm17490_vm8, %v15371_v21, 0.0  ;;  %vm17491_vm12 = vmmov %vm17480_vm0 }
 0x306   : > { %v4130_v23 = vpack.c.bf16 %v4113_v35, %v15375_v12  ;;  %v4516_v59 = vadd.s32 %v4508_v1, %v4500_v15 }
 0x308   : > { %v4540_v17 = vadd.s32 1, %v4516_v59  ;;  %vm4524_vm5 = vcmp.eq.s32.totalorder %v15583_v19, %v4516_v59 }
 0x30c   : > { %12279 = vmatmul.mubr.msk.bf16.gmra.mrb[4].mxu0 %vm17476_vm13, %v4119_v24  ;;  %vm17492_vm13 = vmmov %vm17480_vm0  ;;  %v4580_v24 = vadd.s32 16, %v4516_v59 }
 0x30d   : > { %12282 = vmatprep.mubr.msk.bf16.mxu0 %vm17477_vm14, %v4120_v31  ;;  %vm4525_vm14 = vcmp.eq.s32.totalorder %v15587_v26, %v4516_v59 }
 0x30e   : > { %v4620_v31 = vadd.s32 1, %v4580_v24  ;;  %vm4588_vm7 = vcmp.eq.s32.totalorder %v15583_v19, %v4580_v24 }
 0x310   : > { %vm4628_vm4 = vcmp.eq.s32.totalorder %v15583_v19, %v4620_v31 }
 0x314   : > { %12283 = vmatmul.mubr.msk.bf16.gmra.mrb[8].mxu0 %vm17478_vm15, %v4121_v33  ;;  %vm4549_vm15 = vcmp.eq.s32.totalorder %v15587_v26, %v4540_v17 }
 0x315   : > { %12286 = vmatprep.mubr.msk.bf16.mxu0 %vm17479_vm3, %v4122_v2  ;;  %vm4548_vm3 = vcmp.eq.s32.totalorder %v15583_v19, %v4540_v17 }
 0x31c   : > { %12287 = vmatmul.mubr.msk.bf16.gmra.mrb[12].mxu0 %vm17480_vm0, %v4123_v37  ;;  %vm4565_vm0 = vmor %vm4525_vm14, %vm4549_vm15 }
 0x31d   : > { %12290 = vmatprep.mubr.msk.bf16.mxu0 %vm17481_vm1, %v4124_v42  ;;  %vm4589_vm1 = vcmp.eq.s32.totalorder %v15587_v26, %v4580_v24 }
 0x324   : > { %12291 = vmatmul.mubr.msk.bf16.gmra.mrb[16].mxu0 %vm17483_vm9, %v4125_v0  ;;  %vm4605_vm9 = vmor %vm4565_vm0, %vm4589_vm1 }
 0x325   : > { %12294 = vmatprep.mubr.msk.bf16.mxu0 %vm17484_vm2, %v4126_v58  ;;  %vm4629_vm2 = vcmp.eq.s32.totalorder %v15587_v26, %v4620_v31 }
 0x32c   : > { %12295 = vmatmul.mubr.msk.bf16.gmra.mrb[20].mxu0 %vm17487_vm10, %v4127_v57  ;;  %vm4645_vm10 = vmor %vm4605_vm9, %vm4629_vm2 }
 0x32d   : > { %12298 = vmatprep.mubr.msk.bf16.mxu0 %vm17488_vm6, %v4128_v7  ;;  %vm4564_vm6 = vmor %vm4524_vm5, %vm4548_vm3 }
 0x32e   : > { %vm4604_vm11 = vmor %vm4564_vm6, %vm4588_vm7 }
 0x32f   : > { %vm15598_vm8 = vmor %vm4604_vm11, %vm4628_vm4 }
 0x330   : > { %v17496_v10 = vsel %vm15598_vm8, 4294967295, %v17495_v10 }
 0x334   : > { %12299 = vmatmul.mubr.msk.bf16.gmra.mrb[24].mxu0 %vm17491_vm12, %v4129_v22 }
 0x335   : > { %12302 = vmatprep.mubr.msk.bf16.mxu0 %vm17492_vm13, %v4130_v23 }
 0x33c   : > { %12303 = vmatmul.mubr.bf16.gmra.mrb[28].mxu0 %v17458_v30 }
 0x33d   : > { %11037 = vmatprep.mubr.msk.f32.mxu0 %vm4645_vm10, %v17211_v25 }
 0x36d   : > { %v15554_v54 = vpop.f32.mrb[0].mxu1 }
 0x36e   : > { %v15556_v18 = vpop.f32.mrb[1].mxu1 }
 0x36f   : > { %v15558_v14 = vpop.f32.mrb[2].mxu1 }
 0x370   : > { %v15560_v41 = vpop.f32.mrb[3].mxu1 }
 0x37b   : > { %v15562_v8 = vpop.f32.mrb[4].mxu1 }
 0x37c   : > { %v15564_v21 = vpop.f32.mrb[5].mxu1 }
 0x37d   : > { %v15566_v34 = vpop.f32.mrb[6].mxu1 }
 0x37e   : > { %v15568_v12 = vpop.f32.mrb[7].mxu1 }
 0x383   : > { %v15570_v28 = vpop.f32.mrb[8].mxu1 }
 0x384   : > { %v15572_v50 = vpop.f32.mrb[9].mxu1 }
 0x385   : > { %v15574_v30 = vpop.f32.mrb[10].mxu1 }
 0x386   : > { %v15576_v5 = vpop.f32.mrb[11].mxu1 }
 0x3d7   : > { %v12276_v56 = vpop.f32.mrb[0].mxu0 }
 0x3d8   : > { %v12523_v45 = vadd.f32 %v12276_v56, %v15602_v40  ;;  %v4218_v33 = vpop.f32.mrb[1].mxu0 }
 0x3d9   : > { %v12524_v47 = vadd.f32 %v15602_v40, %v4218_v33  ;;  %v12277_v2 = vpop.f32.mrb[2].mxu0 }
 0x3da   : > { %v4411_v55 = vmul.f32 0.1, %v12523_v45  ;;  %v12525_v27 = vadd.f32 %v12277_v2, %v15602_v40  ;;  %v4221_v62 = vpop.f32.mrb[3].mxu0  ;;  %vm4379_vm12 = vcmp.ge.f32.partialorder %v12523_v45, 0.0 }
 0x3db   : > { %v4409_v52 = vmul.f32 0.1, %v12524_v47  ;;  %v12526_v29 = vadd.f32 %v15602_v40, %v4221_v62  ;;  %vm4377_vm13 = vcmp.ge.f32.partialorder %v12524_v47, 0.0 }
 0x3dc   : > { %vm4380_vm14 = vcmp.ge.f32.partialorder %v12525_v27, 0.0  ;;  %v4412_v37 = vmul.f32 0.1, %v12525_v27  ;;  %v15608_v42 = vsel %vm4379_vm12, %v12523_v45, %v4411_v55 }
 0x3dd   : > { %vm4378_vm15 = vcmp.ge.f32.partialorder %v12526_v29, 0.0  ;;  %v4410_v43 = vmul.f32 0.1, %v12526_v29  ;;  %v15612_v4 = vsel %vm4377_vm13, %v12524_v47, %v4409_v52 }
 0x3de   : > { %v15610_v63 = vsel %vm4380_vm14, %v12525_v27, %v4412_v37 }
 0x3df   : > { %v15616_v61 = vsel %vm4378_vm15, %v12526_v29, %v4410_v43  ;;  %v12280_v36 = vpop.f32.mrb[4].mxu0 }
 0x3e0   : > { %v12527_v48 = vadd.f32 %v12280_v36, %v15602_v40  ;;  %v4234_v58 = vpop.f32.mrb[5].mxu0 }
 0x3e1   : > { %v12528_v46 = vadd.f32 %v15602_v40, %v4234_v58  ;;  %v12281_v49 = vpop.f32.mrb[6].mxu0 }
 0x3e2   : > { %v4415_v53 = vmul.f32 0.1, %v12527_v48  ;;  %v12529_v6 = vadd.f32 %v12281_v49, %v15602_v40  ;;  %v4237_v39 = vpop.f32.mrb[7].mxu0  ;;  %vm4383_vm3 = vcmp.ge.f32.partialorder %v12527_v48, 0.0 }
 0x3e3   : > { %v4413_v57 = vmul.f32 0.1, %v12528_v46  ;;  %v12530_v13 = vadd.f32 %v15602_v40, %v4237_v39  ;;  %vm4381_vm0 = vcmp.ge.f32.partialorder %v12528_v46, 0.0  ;;  %v4485_v39 = vshra.s32 %v15262_v16, 3 }
 0x3e4   : > { %vm4384_vm1 = vcmp.ge.f32.partialorder %v12529_v6, 0.0  ;;  %v4416_v7 = vmul.f32 0.1, %v12529_v6  ;;  %v15624_v51 = vsel %vm4383_vm3, %v12527_v48, %v4415_v53 }
 0x3e5   : > { %vm4382_vm5 = vcmp.ge.f32.partialorder %v12530_v13, 0.0  ;;  %v4414_v60 = vmul.f32 0.1, %v12530_v13  ;;  %v15628_v9 = vsel %vm4381_vm0, %v12528_v46, %v4413_v57 }
 0x3e6   : > { %v15626_v35 = vsel %vm4384_vm1, %v12529_v6, %v4416_v7 }
 0x3e7   : > { %v15632_v23 = vsel %vm4382_vm5, %v12530_v13, %v4414_v60  ;;  %v12284_v44 = vpop.f32.mrb[8].mxu0  ;;  %v17497_v60 = vld [vmem:[#allocation32_spill] sm:$0xff] }
 0x3e8   : > { %v12531_v15 = vadd.f32 %v12284_v44, %v15602_v40  ;;  %v4250_v1 = vpop.f32.mrb[9].mxu0  ;;  %v15658_v44 = vand.u32 7, %v17497_v60 }
 0x3e9   : > { %v12532_v59 = vadd.f32 %v15602_v40, %v4250_v1  ;;  %v12285_v17 = vpop.f32.mrb[10].mxu0 }
 0x3ea   : > { %v4419_v24 = vmul.f32 0.1, %v12531_v15  ;;  %v12533_v31 = vadd.f32 %v12285_v17, %v15602_v40  ;;  %v4253_v56 = vpop.f32.mrb[11].mxu0  ;;  %vm4387_vm9 = vcmp.ge.f32.partialorder %v12531_v15, 0.0  ;;  %v15665_v17 = vand.u32 7, %v15262_v16 }
 0x3eb   : > { %v4417_v45 = vmul.f32 0.1, %v12532_v59  ;;  %v12534_v33 = vadd.f32 %v15602_v40, %v4253_v56  ;;  %vm4385_vm2 = vcmp.ge.f32.partialorder %v12532_v59, 0.0 }
 0x3ec   : > { %vm4388_vm7 = vcmp.ge.f32.partialorder %v12533_v31, 0.0  ;;  %v4420_v47 = vmul.f32 0.1, %v12533_v31  ;;  %v15640_v55 = vsel %vm4387_vm9, %v12531_v15, %v4419_v24  ;;  %17498 = vst [vmem:[#allocation49_spill] sm:$0xff] %v15665_v17  ;;  %v4493_v24 = vmul.u32 2, %v4485_v39 }
 0x3ed   : > { %vm4386_vm4 = vcmp.ge.f32.partialorder %v12534_v33, 0.0  ;;  %v4418_v2 = vmul.f32 0.1, %v12534_v33  ;;  %v15644_v62 = vsel %vm4385_vm2, %v12532_v59, %v4417_v45 }
 0x3ee   : > { %v15642_v27 = vsel %vm4388_vm7, %v12533_v31, %v4420_v47  ;;  %v17499_v31 = vld [vmem:[#allocation33_spill] sm:$0xff] }
 0x3ef   : > { %v15648_v29 = vsel %vm4386_vm4, %v12534_v33, %v4418_v2  ;;  %v12288_v37 = vpop.f32.mrb[12].mxu0  ;;  %v15668_v56 = vand.u32 7, %v17499_v31 }
 0x3f0   : > { %v12535_v36 = vadd.f32 %v12288_v37, %v15602_v40  ;;  %v4266_v48 = vpop.f32.mrb[13].mxu0  ;;  %v17500_v37 = vld [vmem:[#allocation34_spill] sm:$0xff] }
 0x3f1   : > { %v12536_v58 = vadd.f32 %v15602_v40, %v4266_v48  ;;  %v12289_v46 = vpop.f32.mrb[14].mxu0  ;;  %v17501_v48 = vld [vmem:[#allocation46_spill] sm:$0xff] }
 0x3f2   : > { %v4423_v49 = vmul.f32 0.1, %v12535_v36  ;;  %v12537_v53 = vadd.f32 %v12289_v46, %v15602_v40  ;;  %v4269_v6 = vpop.f32.mrb[15].mxu0  ;;  %vm4391_vm10 = vcmp.ge.f32.partialorder %v12535_v36, 0.0  ;;  %v15680_v46 = vand.u32 7, %v17501_v48 }
 0x3f3   : > { %v4421_v57 = vmul.f32 0.1, %v12536_v58  ;;  %v12538_v13 = vadd.f32 %v15602_v40, %v4269_v6  ;;  %vm4389_vm6 = vcmp.ge.f32.partialorder %v12536_v58, 0.0 }
 0x3f4   : > { %vm4392_vm11 = vcmp.ge.f32.partialorder %v12537_v53, 0.0  ;;  %v4424_v7 = vmul.f32 0.1, %v12537_v53  ;;  %v15660_v1 = vsel %vm4391_vm10, %v12535_v36, %v4423_v49  ;;  %v15677_v36 = vand.u32 7, %v17500_v37 }
 0x3f5   : > { %vm4390_vm12 = vcmp.ge.f32.partialorder %v12538_v13, 0.0  ;;  %v4422_v15 = vmul.f32 0.1, %v12538_v13  ;;  %v15670_v45 = vsel %vm4389_vm6, %v12536_v58, %v4421_v57  ;;  %v1191_v57 = vadd.f32 %v15554_v54, %v15602_v40 }
 0x3f6   : > { %v15662_v59 = vsel %vm4392_vm11, %v12537_v53, %v4424_v7  ;;  %v1192_v7 = vadd.f32 %v15558_v14, %v15602_v40  ;;  %v4501_v49 = vmul.u32 16, %v4493_v24  ;;  %v1190_v54 = vadd.f32 %v15602_v40, %v15560_v41 }
 0x3f7   : > { %v15674_v47 = vsel %vm4390_vm12, %v12538_v13, %v4422_v15  ;;  %v12292_v2 = vpop.f32.mrb[16].mxu0  ;;  %v1189_v13 = vadd.f32 %v15602_v40, %v15556_v18  ;;  %v1195_v14 = vadd.f32 %v15562_v8, %v15602_v40  ;;  %v1193_v24 = vadd.f32 %v15602_v40, %v15564_v21 }
 0x3f8   : > { %v12539_v53 = vadd.f32 %v12292_v2, %v15602_v40  ;;  %v4282_v6 = vpop.f32.mrb[17].mxu0  ;;  %v4509_v2 = vmul.u32 2, %v15665_v17  ;;  %v1194_v8 = vadd.f32 %v15602_v40, %v15568_v12  ;;  %v15710_v21 = vadd.f32 %v15570_v28, %v15602_v40 }
 0x3f9   : > { %v12540_v58 = vadd.f32 %v15602_v40, %v4282_v6  ;;  %v12293_v39 = vpop.f32.mrb[18].mxu0  ;;  %v15722_v12 = vadd.f32 %v15602_v40, %v15576_v5 }
 0x3fa   : > { %v4427_v15 = vmul.f32 0.1, %v12539_v53  ;;  %v12541_v25 = vadd.f32 %v12293_v39, %v15602_v40  ;;  %v4285_v33 = vpop.f32.mrb[19].mxu0  ;;  %vm4395_vm13 = vcmp.ge.f32.partialorder %v12539_v53, 0.0  ;;  %v4486_v39 = vshra.s32 %v17497_v60, 3 }
 0x3fb   : > { %v4425_v52 = vmul.f32 0.1, %v12540_v58  ;;  %v12542_v6 = vadd.f32 %v15602_v40, %v4285_v33  ;;  %vm4393_vm14 = vcmp.ge.f32.partialorder %v12540_v58, 0.0  ;;  %v1196_v33 = vadd.f32 %v15566_v34, %v15602_v40 }
 0x3fc   : > { %vm4396_vm15 = vcmp.ge.f32.partialorder %v12541_v25, 0.0  ;;  %v4428_v18 = vmul.f32 0.1, %v12541_v25  ;;  %v4459_v22 = vsel %vm4395_vm13, %v12539_v53, %v4427_v15  ;;  %v15704_v11 = vadd.s32 %v4509_v2, %v4501_v49 }
 0x3fd   : > { %vm4394_vm3 = vcmp.ge.f32.partialorder %v12542_v6, 0.0  ;;  %v4426_v43 = vmul.f32 0.1, %v12542_v6  ;;  %v4457_v0 = vsel %vm4393_vm14, %v12540_v58, %v4425_v52  ;;  %v15718_v52 = vadd.f32 %v15574_v30, %v15602_v40 }
 0x3fe   : > { %v4460_v32 = vsel %vm4396_vm15, %v12541_v25, %v4428_v18  ;;  %v15714_v25 = vadd.f32 %v15602_v40, %v15572_v50  ;;  %v15725_v28 = vadd.s32 1, %v15704_v11  ;;  %v17502_v50 = vld [vmem:[#allocation45_spill] sm:$0xff]  ;;  %v17503_v30 = vpack.c.bf16 %v15616_v61, %v15612_v4 }
 0x3ff   : > { %v12296_v41 = vpop.f32.mrb[20].mxu0  ;;  %v4458_v20 = vsel %vm4394_vm3, %v12542_v6, %v4426_v43  ;;  %v12473_v16 = vpack.c.bf16 %v4460_v32, %v4459_v22  ;;  %v4494_v22 = vmul.u32 2, %v4486_v39  ;;  %v4487_v43 = vshra.s32 %v17502_v50, 3 }
 0x400   : > { %v12544_v3 = vadd.f32 %v12296_v41, %v1191_v57  ;;  %v4298_v38 = vpop.f32.mrb[21].mxu0  ;;  %v12469_v17 = vpack.c.bf16 %v4458_v20, %v4457_v0  ;;  %v15732_v5 = vadd.s32 16, %v15704_v11  ;;  %vm4527_vm2 = vcmp.eq.s32.totalorder %v15587_v26, %v15704_v11 }
 0x401   : > { %v12546_v34 = vadd.f32 %v4298_v38, %v1189_v13  ;;  %v12297_v60 = vpop.f32.mrb[22].mxu0  ;;  %v4502_v58 = vmul.u32 16, %v4494_v22  ;;  %v15738_v57 = vand.u32 7, %v17502_v50  ;;  %v4495_v13 = vmul.u32 2, %v4487_v43 }
 0x402   : > { %v4431_v20 = vmul.f32 0.1, %v12544_v3  ;;  %v12548_v0 = vadd.f32 %v12297_v60, %v1192_v7  ;;  %v4301_v32 = vpop.f32.mrb[23].mxu0  ;;  %12470 = vmatprep.subr.bf16.mxu0 %v12469_v17  ;;  %vm4399_vm0 = vcmp.ge.f32.partialorder %v12544_v3, 0.0  ;;  %v4510_v17 = vmul.u32 2, %v15658_v44 }
 0x403   : > { %v4429_v38 = vmul.f32 0.1, %v12546_v34  ;;  %v12550_v49 = vadd.f32 %v4301_v32, %v1190_v54  ;;  %12472 = vmatpush3.bf16.msra.mxu0 %v17503_v30  ;;  %vm4397_vm1 = vcmp.ge.f32.partialorder %v12546_v34, 0.0  ;;  %v4488_v7 = vshra.s32 %v17499_v31, 3 }
 0x404   : > { %vm4400_vm5 = vcmp.ge.f32.partialorder %v12548_v0, 0.0  ;;  %v4432_v40 = vmul.f32 0.1, %v12548_v0  ;;  %12474 = vmatprep.subr.bf16.mxu0 %v12473_v16  ;;  %v4463_v4 = vsel %vm4399_vm0, %v12544_v3, %v4431_v20  ;;  %v17504_v16 = vpack.c.bf16 %v15610_v63, %v15608_v42 }
 0x405   : > { %vm4398_vm9 = vcmp.ge.f32.partialorder %v12550_v49, 0.0  ;;  %v4430_v53 = vmul.f32 0.1, %v12550_v49  ;;  %v4461_v2 = vsel %vm4397_vm1, %v12546_v34, %v4429_v38  ;;  %vm4551_vm7 = vcmp.eq.s32.totalorder %v15587_v26, %v15725_v28 }
 0x406   : > { %v4464_v61 = vsel %vm4400_vm5, %v12548_v0, %v4432_v40  ;;  %vm4591_vm4 = vcmp.eq.s32.totalorder %v15587_v26, %v15732_v5  ;;  %v15750_v3 = vadd.s32 1, %v15732_v5  ;;  %vm4526_vm10 = vcmp.eq.s32.totalorder %v15583_v19, %v15704_v11  ;;  %vm15786_vm0 = vmor %vm4527_vm2, %vm4551_vm7 }
 0x407   : > { %v12300_v15 = vpop.f32.mrb[24].mxu0  ;;  %12476 = vmatpush3.bf16.msra.mxu0 %v17504_v16  ;;  %v4462_v6 = vsel %vm4398_vm9, %v12550_v49, %v4430_v53  ;;  %v12481_v54 = vpack.c.bf16 %v4464_v61, %v4463_v4  ;;  %v15754_v42 = vadd.s32 %v4510_v17, %v4502_v58  ;;  %v4511_v63 = vmul.u32 2, %v15738_v57 }
 0x408   : > { %v12552_v18 = vadd.f32 %v12300_v15, %v1195_v14  ;;  %v4314_v39 = vpop.f32.mrb[25].mxu0  ;;  %v12477_v41 = vpack.c.bf16 %v4462_v6, %v4461_v2  ;;  %v4503_v20 = vmul.u32 16, %v4495_v13  ;;  %v4496_v0 = vmul.u32 2, %v4488_v7 }
 0x409   : > { %v12554_v31 = vadd.f32 %v4314_v39, %v1193_v24  ;;  %v12301_v60 = vpop.f32.mrb[26].mxu0  ;;  %v17505_v24 = vpack.c.bf16 %v15632_v23, %v15628_v9  ;;  %vm4550_vm11 = vcmp.eq.s32.totalorder %v15583_v19, %v15725_v28  ;;  %vm4590_vm14 = vcmp.eq.s32.totalorder %v15583_v19, %v15732_v5 }
 0x40a   : > { %v4435_v34 = vmul.f32 0.1, %v12552_v18  ;;  %v12556_v22 = vadd.f32 %v12301_v60, %v1196_v33  ;;  %v4317_v14 = vpop.f32.mrb[27].mxu0  ;;  %12478 = vmatprep.subr.bf16.mxu0 %v12477_v41  ;;  %vm4403_vm6 = vcmp.ge.f32.partialorder %v12552_v18, 0.0  ;;  %vm4631_vm3 = vcmp.eq.s32.totalorder %v15587_v26, %v15750_v3  ;;  %vm15828_vm1 = vmor %vm4526_vm10, %vm4550_vm11 }
 0x40b   : > { %v4433_v32 = vmul.f32 0.1, %v12554_v31  ;;  %v12558_v50 = vadd.f32 %v4317_v14, %v1194_v8  ;;  %12480 = vmatpush3.bf16.msra.mxu0 %v17505_v24  ;;  %vm4401_vm12 = vcmp.ge.f32.partialorder %v12554_v31, 0.0  ;;  %v15767_v8 = vadd.s32 1, %v15754_v42 }
 0x40c   : > { %vm4404_vm13 = vcmp.ge.f32.partialorder %v12556_v22, 0.0  ;;  %v4436_v43 = vmul.f32 0.1, %v12556_v22  ;;  %12482 = vmatprep.subr.bf16.mxu0 %v12481_v54  ;;  %v15770_v9 = vadd.s32 16, %v15754_v42  ;;  %v4467_v23 = vsel %vm4403_vm6, %v12552_v18, %v4435_v34 }
 0x40d   : > { %vm4402_vm15 = vcmp.ge.f32.partialorder %v12558_v50, 0.0  ;;  %v4434_v33 = vmul.f32 0.1, %v12558_v50  ;;  %v15772_v49 = vadd.s32 %v4511_v63, %v4503_v20  ;;  %v4504_v30 = vmul.u32 16, %v4496_v0  ;;  %v13083_v63 = vld [vmem:[#allocation8 + $0x18] sm:$0xff]  }
 0x40e   : > { %v4468_v38 = vsel %vm4404_vm13, %v12556_v22, %v4436_v43  ;;  %v17506_v17 = vpack.c.bf16 %v15626_v35, %v15624_v51  ;;  %v4465_v53 = vsel %vm4401_vm12, %v12554_v31, %v4433_v32  ;;  %v4512_v61 = vmul.u32 2, %v15668_v56  ;;  %vm15816_vm12 = vmor %vm15786_vm0, %vm4591_vm4 }
 0x40f   : > { %v12304_v40 = vpop.f32.mrb[28].mxu0  ;;  %v4466_v58 = vsel %vm4402_vm15, %v12558_v50, %v4434_v33  ;;  %v12489_v4 = vpack.c.bf16 %v4468_v38, %v4467_v23  ;;  %vm4529_vm5 = vcmp.eq.s32.totalorder %v15587_v26, %v15754_v42  ;;  %v4489_v51 = vshra.s32 %v17501_v48, 3  ;;  %v16062_v33 = vld [vmem:[#allocation6] sm:$0xff] }
 0x410   : > { %12484 = vmatpush3.bf16.msra.mxu0 %v17506_v17  ;;  %v12560_v13 = vadd.f32 %v12304_v40, %v15710_v21  ;;  %v4330_v7 = vpop.f32.mrb[29].mxu0  ;;  %v12485_v15 = vpack.c.bf16 %v4466_v58, %v4465_v53  ;;  %vm4553_vm9 = vcmp.eq.s32.totalorder %v15587_v26, %v15767_v8  ;;  %vm4593_vm2 = vcmp.eq.s32.totalorder %v15587_v26, %v15770_v9 }
 0x411   : > { %v12562_v35 = vadd.f32 %v4330_v7, %v15714_v25  ;;  %v12305_v21 = vpop.f32.mrb[30].mxu0  ;;  %vm4528_vm7 = vcmp.eq.s32.totalorder %v15583_v19, %v15754_v42  ;;  %v15804_v18 = vadd.s32 1, %v15770_v9  ;;  %v4543_v48 = vadd.s32 1, %v15772_v49  ;;  %vm15838_vm0 = vmor %vm4529_vm5, %vm4553_vm9 }
 0x412   : > { %v4439_v2 = vmul.f32 0.1, %v12560_v13  ;;  %v12564_v6 = vadd.f32 %v12305_v21, %v15718_v52  ;;  %v4333_v54 = vpop.f32.mrb[31].mxu0  ;;  %12486 = vmatprep.subr.bf16.mxu0 %v12485_v15  ;;  %vm4407_vm6 = vcmp.ge.f32.partialorder %v12560_v13, 0.0  ;;  %v17509_v41 = vpack.c.bf16 %v15648_v29, %v15644_v62  ;;  %vm15858_vm5 = vmor %vm15828_vm1, %vm4590_vm14 }
 0x413   : > { %v4437_v25 = vmul.f32 0.1, %v12562_v35  ;;  %v12566_v39 = vadd.f32 %v4333_v54, %v15722_v12  ;;  %v15820_v31 = vadd.s32 %v4512_v61, %v4504_v30  ;;  %vm4405_vm13 = vcmp.ge.f32.partialorder %v12562_v35, 0.0  ;;  %vm15877_vm14 = vmor %vm15838_vm0, %vm4593_vm2 }
 0x414   : > { %12488 = vmatpush3.bf16.msra.mxu0 %v17509_v41  ;;  %vm4408_vm15 = vcmp.ge.f32.partialorder %v12564_v6, 0.0  ;;  %v4440_v60 = vmul.f32 0.1, %v12564_v6  ;;  %v4497_v29 = vmul.u32 2, %v4489_v51  ;;  %v4583_v28 = vadd.s32 16, %v15772_v49 }
 0x415   : > { %12490 = vmatprep.subr.bf16.mxu0 %v12489_v4  ;;  %vm4406_vm4 = vcmp.ge.f32.partialorder %v12566_v39, 0.0  ;;  %v4438_v12 = vmul.f32 0.1, %v12566_v39  ;;  %v4490_v11 = vshra.s32 %v17500_v37, 3  ;;  %v4471_v34 = vsel %vm4407_vm6, %v12560_v13, %v4439_v2  ;;  %vm15868_vm6 = vmor %vm15816_vm12, %vm4631_vm3 }
 0x416   : > { %v4472_v22 = vsel %vm4408_vm15, %v12564_v6, %v4440_v60  ;;  %vm4552_vm10 = vcmp.eq.s32.totalorder %v15583_v19, %v15767_v8  ;;  %vm4531_vm11 = vcmp.eq.s32.totalorder %v15587_v26, %v15772_v49  ;;  %v17516_v14 = vpack.c.bf16 %v15642_v27, %v15640_v55  ;;  %v17527_v8 = vld [vmem:[#allocation47_spill] sm:$0xff] }
 0x417   : > { %v4469_v20 = vsel %vm4405_vm13, %v12562_v35, %v4437_v25  ;;  %v4470_v0 = vsel %vm4406_vm4, %v12566_v39, %v4438_v12  ;;  %v12497_v32 = vpack.c.bf16 %v4472_v22, %v4471_v34  ;;  %vm4555_vm9 = vcmp.eq.s32.totalorder %v15587_v26, %v4543_v48  ;;  %vm15891_vm1 = vmor %vm4528_vm7, %vm4552_vm10  ;;  %v13082_v12 = vld [vmem:[#allocation8 + $0x10] sm:$0xff]  }
 0x418   : > { %12492 = vmatpush3.bf16.msra.mxu0 %v17516_v14  ;;  %v12493_v50 = vpack.c.bf16 %v4470_v0, %v4469_v20  ;;  %v17519_v55 = vmov 0  ;;  %v4544_v5 = vadd.s32 1, %v15820_v31  ;;  %v4505_v24 = vmul.u32 16, %v4497_v29  ;;  %vm15900_vm12 = vmor %vm4531_vm11, %vm4555_vm9  ;;  %v13081_v29 = vld [vmem:[#allocation8 + $0x8] sm:$0xff]  }
 0x419   : > { %v17520_v55 = vsel %vm15868_vm6, 4294967295, %v17519_v55  ;;  %v4513_v43 = vmul.u32 2, %v15680_v46  ;;  %vm4633_vm3 = vcmp.eq.s32.totalorder %v15587_v26, %v15804_v18  ;;  %vm4592_vm2 = vcmp.eq.s32.totalorder %v15583_v19, %v15770_v9 }
 0x41a   : > { %v4623_v23 = vadd.s32 1, %v4583_v28  ;;  %v4498_v38 = vmul.u32 2, %v4490_v11  ;;  %12494 = vmatprep.subr.bf16.mxu0 %v12493_v50  ;;  %vm4595_vm13 = vcmp.eq.s32.totalorder %v15587_v26, %v4583_v28  ;;  %v4584_v42 = vadd.s32 16, %v15820_v31  ;;  %vm15927_vm10 = vmor %vm15877_vm14, %vm4633_vm3  ;;  %v17563_v50 = vld [vmem:[#allocation49_spill] sm:$0xff] }
 0x41b   : > { %v4491_v40 = vshra.s32 %v17527_v8, 3  ;;  %v17528_v17 = vpack.c.bf16 %v15674_v47, %v15670_v45  ;;  %vm17529_vm7 = vcmp.eq.s32.totalorder %v15583_v19, %v15750_v3  ;;  %v17530_v9 = vmov 0  ;;  %vm15933_vm11 = vmor %vm15891_vm1, %vm4592_vm2 }
 0x41c   : > { %vm15915_vm15 = vmor %vm15858_vm5, %vm17529_vm7  ;;  %vm4530_vm4 = vcmp.eq.s32.totalorder %v15583_v19, %v15772_v49  ;;  %vm4554_vm0 = vcmp.eq.s32.totalorder %v15583_v19, %v4543_v48  ;;  %v17532_v45 = vmov 0  ;;  %vm4632_vm5 = vcmp.eq.s32.totalorder %v15583_v19, %v15804_v18 }
 0x41d   : > { %12496 = vmatpush3.bf16.msra.mxu0 %v17528_v17  ;;  %v17531_v9 = vsel %vm15915_vm15, 4294967295, %v17530_v9  ;;  %v17533_v45 = vsel %vm15927_vm10, 4294967295, %v17532_v45  ;;  %vm4533_vm9 = vcmp.eq.s32.totalorder %v15587_v26, %v15820_v31  ;;  %vm4557_vm7 = vcmp.eq.s32.totalorder %v15587_v26, %v4544_v5  ;;  %vm4611_vm14 = vmor %vm15900_vm12, %vm4595_vm13 }
 0x41e   : > { %12498 = vmatprep.subr.bf16.mxu0 %v12497_v32  ;;  %v4521_v3 = vadd.s32 %v4513_v43, %v4505_v24  ;;  %vm4635_vm3 = vcmp.eq.s32.totalorder %v15587_v26, %v4623_v23  ;;  %v4506_v49 = vmul.u32 16, %v4498_v38  ;;  %v4514_v53 = vmul.u32 2, %v15677_v36  ;;  %vm4570_vm1 = vmor %vm4530_vm4, %vm4554_vm0 }
 0x41f   : > { %v15947_v58 = vand.u32 7, %v17527_v8  ;;  %vm4594_vm2 = vcmp.eq.s32.totalorder %v15583_v19, %v4583_v28  ;;  %v4624_v4 = vadd.s32 1, %v4584_v42  ;;  %v4499_v61 = vmul.u32 2, %v4491_v40  ;;  %vm15955_vm12 = vmor %vm15933_vm11, %vm4632_vm5  ;;  %v13084_v28 = vld [vmem:[#allocation8 + $0x20] sm:$0xff]  }
 0x420   : > { %v17536_v13 = vpack.c.bf16 %v15662_v59, %v15660_v1  ;;  %vm4573_vm13 = vmor %vm4533_vm9, %vm4557_vm7  ;;  %vm4597_vm10 = vcmp.eq.s32.totalorder %v15587_v26, %v4584_v42  ;;  %v17539_v15 = vmov 0  ;;  %vm4532_vm4 = vcmp.eq.s32.totalorder %v15583_v19, %v15820_v31 }
 0x421   : > { %vm15960_vm15 = vmor %vm4611_vm14, %vm4635_vm3  ;;  %vm4556_vm0 = vcmp.eq.s32.totalorder %v15583_v19, %v4544_v5  ;;  %v4545_v1 = vadd.s32 1, %v4521_v3  ;;  %vm4634_vm8 = vcmp.eq.s32.totalorder %v15583_v19, %v4623_v23  ;;  %v4522_v59 = vadd.s32 %v4514_v53, %v4506_v49 }
 0x422   : > { %12500 = vmatpush3.bf16.msra.mxu0 %v17536_v13  ;;  %v17540_v15 = vsel %vm15960_vm15, 4294967295, %v17539_v15  ;;  %vm4610_vm6 = vmor %vm4570_vm1, %vm4594_vm2  ;;  %v17541_v16 = vmov 0.25   ;;  %vm17542_vm11 = vnez %v17496_v10  ;;  %vm4637_vm9 = vcmp.eq.s32.totalorder %v15587_v26, %v4624_v4 }
 0x423   : > { %vm4613_vm5 = vmor %vm4573_vm13, %vm4597_vm10  ;;  %v4585_v51 = vadd.s32 16, %v4521_v3  ;;  %v4507_v35 = vmul.u32 16, %v4499_v61  ;;  %v4515_v21 = vmul.u32 2, %v15947_v58  ;;  %vm17543_vm7 = vnez %v17520_v55 }
 0x424   : > { %vm4572_vm14 = vmor %vm4532_vm4, %vm4556_vm0  ;;  %vm4596_vm3 = vcmp.eq.s32.totalorder %v15583_v19, %v4584_v42  ;;  %v17544_v2 = vmov 0  ;;  %vm4535_vm2 = vcmp.eq.s32.totalorder %v15587_v26, %v4521_v3  ;;  %vm4559_vm10 = vcmp.eq.s32.totalorder %v15587_v26, %v4545_v1 }
 0x425   : > { %11038 = vmatmul.mubr.msk.f32.vlgmr.msra.gmra.mrb[32].mxu0 %vm17542_vm11, %v17541_v16  ;;  %vm15977_vm1 = vmor %vm4610_vm6, %vm4634_vm8  ;;  %v17546_v10 = vmov 0  ;;  %vm4534_vm11 = vcmp.eq.s32.totalorder %v15583_v19, %v4521_v3  ;;  %vm4558_vm15 = vcmp.eq.s32.totalorder %v15583_v19, %v4545_v1  ;;  %v4546_v6 = vadd.s32 1, %v4522_v59  ;;  %v17568_v3 = vld [vmem:[#allocation48_spill] sm:$0xff] }
 0x426   : > { %11039 = vmatprep.mubr.msk.f32.mxu0 %vm17543_vm7, %v17541_v16  ;;  %v17545_v2 = vsel %vm15977_vm1, 4294967295, %v17544_v2  ;;  %vm15983_vm13 = vmor %vm4613_vm5, %vm4637_vm9  ;;  %vm17548_vm4 = vnez %v17531_v9  ;;  %vm4636_vm6 = vcmp.eq.s32.totalorder %v15583_v19, %v4624_v4  ;;  %v4625_v54 = vadd.s32 1, %v4585_v51  ;;  %v13085_v4 = vld [vmem:[#allocation8 + $0x28] sm:$0xff]  }
 0x427   : > { %v17547_v10 = vsel %vm15983_vm13, 4294967295, %v17546_v10  ;;  %vm4612_vm8 = vmor %vm4572_vm14, %vm4596_vm3  ;;  %v4523_v18 = vadd.s32 %v4515_v21, %v4507_v35  ;;  %vm17549_vm0 = vnez %v17533_v45  ;;  %vm4599_vm9 = vcmp.eq.s32.totalorder %v15587_v26, %v4585_v51  ;;  %v13086_v21 = vld [vmem:[#allocation8 + $0x30] sm:$0xff]  }
 0x428   : > { %vm4575_vm5 = vmor %vm4535_vm2, %vm4559_vm10  ;;  %v4586_v48 = vadd.s32 16, %v4522_v59  ;;  %vm4598_vm13 = vcmp.eq.s32.totalorder %v15583_v19, %v4585_v51  ;;  %vm4537_vm14 = vcmp.eq.s32.totalorder %v15587_v26, %v4522_v59  ;;  %vm4561_vm3 = vcmp.eq.s32.totalorder %v15587_v26, %v4546_v6 }
 0x429   : > { %11040 = vmatmul.mubr.msk.f32.gmra.mrb[34].mxu0 %vm17548_vm4, %v17541_v16  ;;  %vm4574_vm7 = vmor %vm4534_vm11, %vm4558_vm15  ;;  %vm4639_vm2 = vcmp.eq.s32.totalorder %v15587_v26, %v4625_v54  ;;  %v4547_v39 = vadd.s32 1, %v4523_v18  ;;  %vm17552_vm15 = vnez %v17540_v15  ;;  %vm4638_vm11 = vcmp.eq.s32.totalorder %v15583_v19, %v4625_v54 }
 0x42a   : > { %11041 = vmatprep.mubr.msk.f32.mxu0 %vm17549_vm0, %v17541_v16  ;;  %vm15998_vm1 = vmor %vm4612_vm8, %vm4636_vm6  ;;  %v4626_v41 = vadd.s32 1, %v4586_v48  ;;  %vm4601_vm6 = vcmp.eq.s32.totalorder %v15587_v26, %v4586_v48  ;;  %v4587_v52 = vadd.s32 16, %v4523_v18  ;;  %v17553_v31 = vmov 0 }
 0x42b   : > { %vm4615_vm4 = vmor %vm4575_vm5, %vm4599_vm9  ;;  %vm4560_vm5 = vcmp.eq.s32.totalorder %v15583_v19, %v4546_v6  ;;  %vm17555_vm9 = vnez %v17545_v2  ;;  %v17556_v60 = vmov 0 }
 0x42c   : > { %vm4614_vm10 = vmor %vm4574_vm7, %vm4598_vm13  ;;  %vm4539_vm7 = vcmp.eq.s32.totalorder %v15587_v26, %v4523_v18  ;;  %v4627_v62 = vadd.s32 1, %v4587_v52 }
 0x42d   : > { %11042 = vmatmul.mubr.msk.f32.gmra.mrb[36].mxu0 %vm15955_vm12, %v17541_v16  ;;  %vm4577_vm8 = vmor %vm4537_vm14, %vm4561_vm3  ;;  %vm4536_vm12 = vcmp.eq.s32.totalorder %v15583_v19, %v4522_v59  ;;  %vm4563_vm14 = vcmp.eq.s32.totalorder %v15587_v26, %v4547_v39  ;;  %vm17558_vm3 = vnez %v17547_v10 }
 0x42e   : > { %11043 = vmatprep.mubr.msk.f32.mxu0 %vm17552_vm15, %v17541_v16  ;;  %vm16013_vm0 = vmor %vm4615_vm4, %vm4639_vm2  ;;  %vm4641_vm2 = vcmp.eq.s32.totalorder %v15587_v26, %v4626_v41 }
 0x42f   : > { %v17554_v31 = vsel %vm16013_vm0, 4294967295, %v17553_v31  ;;  %vm16022_vm13 = vmor %vm4614_vm10, %vm4638_vm11  ;;  %vm4600_vm0 = vcmp.eq.s32.totalorder %v15583_v19, %v4586_v48  ;;  %vm4603_vm10 = vcmp.eq.s32.totalorder %v15587_v26, %v4587_v52 }
 0x430   : > { %v17557_v60 = vsel %vm16022_vm13, 4294967295, %v17556_v60  ;;  %vm4617_vm4 = vmor %vm4577_vm8, %vm4601_vm6  ;;  %vm4538_vm13 = vcmp.eq.s32.totalorder %v15583_v19, %v4523_v18  ;;  %vm17559_vm8 = vnez %v17554_v31 }
 0x431   : > { %11044 = vmatmul.mubr.msk.f32.gmra.mrb[38].mxu0 %vm17555_vm9, %v17541_v16  ;;  %vm4576_vm15 = vmor %vm4536_vm12, %vm4560_vm5  ;;  %vm4640_vm12 = vcmp.eq.s32.totalorder %v15583_v19, %v4626_v41 }
 0x432   : > { %11045 = vmatprep.mubr.msk.f32.mxu0 %vm17558_vm3, %v17541_v16  ;;  %vm4579_vm9 = vmor %vm4539_vm7, %vm4563_vm14  ;;  %vm4562_vm3 = vcmp.eq.s32.totalorder %v15583_v19, %v4547_v39  ;;  %vm4643_vm7 = vcmp.eq.s32.totalorder %v15587_v26, %v4627_v62  ;;  %v13080_v26 = vld [vmem:[#allocation8] sm:$0xff]  }
 0x433   : > { %vm4657_vm11 = vmor %vm4617_vm4, %vm4641_vm2  ;;  %vm17560_vm4 = vnez %v17557_v60  ;;  %12306 = vmatprep.subr.bf16.mxu1 %v13080_v26  ;;  %v13087_v60 = vld [vmem:[#allocation8 + $0x38] sm:$0xff]  }
 0x434   : > { %vm4616_vm6 = vmor %vm4576_vm15, %vm4600_vm0  ;;  %vm4642_vm15 = vcmp.eq.s32.totalorder %v15583_v19, %v4627_v62  ;;  %12307 = vmatpush3.bf16.msra.mxu1 %v13080_v26 }
 0x435   : > { %11046 = vmatmul.mubr.msk.f32.gmra.mrb[40].mxu0 %vm15998_vm1, %v17541_v16  ;;  %vm4619_vm5 = vmor %vm4579_vm9, %vm4603_vm10  ;;  %vm4602_vm1 = vcmp.eq.s32.totalorder %v15583_v19, %v4587_v52  ;;  %12308 = vmatprep.subr.bf16.mxu1 %v13081_v29 }
 0x436   : > { %11047 = vmatprep.mubr.msk.f32.mxu0 %vm17559_vm8, %v17541_v16  ;;  %vm4578_vm14 = vmor %vm4538_vm13, %vm4562_vm3  ;;  %vm17561_vm13 = vcmask 523264  }
 0x437   : > { %vm4656_vm2 = vmor %vm4616_vm6, %vm4640_vm12 }
 0x438   : > { %vm4659_vm8 = vmor %vm4619_vm5, %vm4643_vm7  ;;  %12309 = vmatpush3.bf16.msra.mxu1 %v13081_v29  ;;  %vm4819_vm5 = vcmp.ge.s32.totalorder %v15658_v44, 1  ;;  %vm4820_vm7 = vcmp.ge.s32.totalorder %v15738_v57, 1 }
 0x439   : > { %11048 = vmatmul.mubr.msk.f32.gmra.mrb[42].mxu0 %vm17560_vm4, %v17541_v16  ;;  %vm4618_vm0 = vmor %vm4578_vm14, %vm4602_vm1  ;;  %12310 = vmatprep.subr.bf16.mxu1 %v13082_v12  ;;  %vm4817_vm1 = vcmp.ge.s32.totalorder %v17568_v3, 1 }
 0x43a   : > { %11049 = vmatprep.mubr.msk.f32.mxu0 %vm4657_vm11, %v17541_v16  ;;  %vm4658_vm9 = vmor %vm4618_vm0, %vm4642_vm15  ;;  %vm4818_vm11 = vcmp.ge.s32.totalorder %v17563_v50, 1  ;;  %vm4821_vm0 = vcmp.ge.s32.totalorder %v15668_v56, 1  ;;  %vm4822_vm15 = vcmp.ge.s32.totalorder %v15680_v46, 1 }
 0x43b   : > { %vm17562_vm10 = vmmov %vm17561_vm13 }
 0x43c   : > { %12311 = vmatpush3.bf16.msra.mxu1 %v13082_v12  ;;  %vm17564_vm3 = vmmov %vm17562_vm10 }
 0x43d   : > { %11050 = vmatmul.mubr.msk.f32.gmra.mrb[44].mxu0 %vm4656_vm2, %v17541_v16  ;;  %12312 = vmatprep.subr.bf16.mxu1 %v13083_v63  ;;  %vm17565_vm6 = vmmov %vm17564_vm3 }
 0x43e   : > { %11051 = vmatprep.mubr.msk.f32.mxu0 %vm4659_vm8, %v17541_v16  ;;  %vm17566_vm12 = vmmov %vm17564_vm3  ;;  %vm5140_vm8 = vcmp.lt.s32.totalorder %v17563_v50, 7 }
 0x43f   : > { %vm17567_vm14 = vmmov %vm17564_vm3 }
 0x440   : > { %12313 = vmatpush3.bf16.msra.mxu1 %v13083_v63  ;;  %vm17569_vm4 = vmmov %vm17564_vm3 }
 0x441   : > { %11052 = vmatmul.mubr.msk.f32.gmra.mrb[46].mxu0 %vm4658_vm9, %v17541_v16  ;;  %12322 = vmatprep.subr.bf16.mxu1 %v13084_v28  ;;  %vm17570_vm2 = vmmov %vm17564_vm3  ;;  %vm5139_vm9 = vcmp.lt.s32.totalorder %v17568_v3, 7 }
 0x4f8   : > { %v11872_v11 = vpop.f32.mrb[32].mxu0 }
 0x4f9   : > { %v11873_v34 = vpop.f32.mrb[33].mxu0 }
 0x4fa   : > { %v11874_v22 = vadd.f32 %v11873_v34, %v11872_v11  ;;  %v13088_v34 = vld [vmem:[#allocation8 + $0x40] sm:$0xff]  }
 0x4fc   : > { %4786 = vst.msk [vmem:[#allocation3 + $0x10] sm:$0xff] %vm17561_vm13, %v11874_v22  ;;  %v11875_v14 = vpop.f32.mrb[34].mxu0  ;;  %vm17571_vm13 = vmmov %vm17570_vm2 }
 0x4fd   : > { %v11876_v20 = vpop.f32.mrb[35].mxu0 }
 0x4fe   : > { %v11877_v0 = vadd.f32 %v11876_v20, %v11875_v14 }
 0x500   : > { %4787 = vst.msk [vmem:[#allocation3 + $0x18] sm:$0xff] %vm17562_vm10, %v11877_v0  ;;  %v11878_v32 = vpop.f32.mrb[36].mxu0  ;;  %vm5141_vm10 = vcmp.lt.s32.totalorder %v15658_v44, 7 }
 0x501   : > { %v11879_v37 = vpop.f32.mrb[37].mxu0 }
 0x502   : > { %v11880_v55 = vadd.f32 %v11879_v37, %v11878_v32 }
 0x503   : > { %v16056_v27 = vld [vmem:[#allocation3 + $0xf] sm:$0xff] }
 0x504   : > { %4788 = vst.msk [vmem:[#allocation3 + $0x20] sm:$0xff] %vm17564_vm3, %v11880_v55  ;;  %v11881_v5 = vpop.f32.mrb[38].mxu0  ;;  %v4850_v24 = vsel %vm4818_vm11, %v16056_v27, 0.0  ;;  %vm17572_vm3 = vmmov %vm17570_vm2  ;;  %v16167_v0 = vld [vmem:[#allocation3 + $0x10] sm:$0xff] }
 0x505   : > { %v11882_v43 = vpop.f32.mrb[39].mxu0  ;;  %v4857_v23 = vpack.c.bf16 %v4850_v24, %v16062_v33 }
 0x506   : > { %v11883_v38 = vadd.f32 %v11882_v43, %v11881_v5 }
 0x507   : > { %12314 = vmatprep.mubr.msk.bf16.mxu1 %vm17565_vm6, %v4857_v23  ;;  %v16067_v8 = vld [vmem:[#allocation3 + $0x17] sm:$0xff]  ;;  %vm17573_vm6 = vmmov %vm17570_vm2 }
 0x508   : > { %4789 = vst.msk [vmem:[#allocation3 + $0x28] sm:$0xff] %vm17566_vm12, %v11883_v38  ;;  %v11884_v30 = vpop.f32.mrb[40].mxu0  ;;  %v4851_v45 = vsel %vm4819_vm5, %v16067_v8, 0.0  ;;  %v16084_v61 = vsel %vm4817_vm1, %v16067_v8, 0.0  ;;  %vm4823_vm12 = vcmp.ge.s32.totalorder %v15677_v36, 1  ;;  %v5010_v38 = vpack.c.bf16 %v16167_v0, %v16062_v33 }
 0x509   : > { %v11885_v42 = vpop.f32.mrb[41].mxu0 }
 0x50a   : > { %v11886_v40 = vadd.f32 %v11885_v42, %v11884_v30 }
 0x50b   : > { %v16071_v17 = vld [vmem:[#allocation3 + $0x1f] sm:$0xff] }
 0x50c   : > { %4790 = vst.msk [vmem:[#allocation3 + $0x30] sm:$0xff] %vm17567_vm14, %v11886_v40  ;;  %v11887_v9 = vpop.f32.mrb[42].mxu0  ;;  %v4852_v47 = vsel %vm4820_vm7, %v16071_v17, 0.0  ;;  %v16089_v13 = vsel %vm4818_vm11, %v16071_v17, 0.0  ;;  %v16096_v59 = vld [vmem:[#allocation3 + $0x19] sm:$0xff]  ;;  %vm4824_vm14 = vcmp.ge.s32.totalorder %v15947_v58, 1 }
 0x50d   : > { %v11888_v49 = vpop.f32.mrb[43].mxu0  ;;  %v4858_v53 = vpack.c.bf16 %v4852_v47, %v4851_v45  ;;  %v5783_v15 = vpack.c.bf16 %v16089_v13, %v16084_v61  ;;  %v16113_v6 = vsel %vm5139_vm9, %v16096_v59, 0.0  ;;  %v16199_v40 = vld [vmem:[#allocation3 + $0x20] sm:$0xff] }
 0x50e   : > { %v11889_v7 = vadd.f32 %v11888_v49, %v11887_v9  ;;  %v16210_v49 = vld [vmem:[#allocation3 + $0x18] sm:$0xff] }
 0x50f   : > { %12315 = vmatmul.mubr.msk.bf16.vlgmr.msra.gmra.mrb[12].mxu1 %vm17569_vm4, %v4858_v53  ;;  %v16094_v1 = vld [vmem:[#allocation3 + $0x27] sm:$0xff]  ;;  %vm17221_vm4 = vcmp.lt.s32.totalorder %v15738_v57, 7  ;;  %v16214_v53 = vpack.c.bf16 %v16199_v40, %v16210_v49 }
 0x510   : > { %v16098_v16 = vld [vmem:[#allocation3 + $0x21] sm:$0xff]  ;;  %4791 = vst.msk [vmem:[#allocation3 + $0x38] sm:$0xff] %vm17570_vm2, %v11889_v7  ;;  %v11890_v51 = vpop.f32.mrb[44].mxu0  ;;  %12323 = vmatpush3.bf16.msra.mxu1 %v13084_v28  ;;  %v16108_v2 = vsel %vm4819_vm5, %v16094_v1, 0.0  ;;  %v4853_v39 = vsel %vm4821_vm0, %v16094_v1, 0.0  ;;  %vm5143_vm2 = vcmp.lt.s32.totalorder %v15668_v56, 7 }
 0x511   : > { %v11891_v35 = vpop.f32.mrb[45].mxu0  ;;  %12324 = vmatprep.subr.bf16.mxu1 %v13085_v4  ;;  %v16118_v54 = vsel %vm5140_vm8, %v16098_v16, 0.0  ;;  %v13089_v7 = vld [vmem:[#allocation8 + $0x48] sm:$0xff]   ;;  %v5608_v3 = vsel %vm5141_vm10, %v16098_v16, 0.0 }
 0x512   : > { %v11892_v10 = vadd.f32 %v11891_v35, %v11890_v51  ;;  %v6097_v25 = vpack.c.bf16 %v16118_v54, %v16113_v6  ;;  %v16226_v35 = vld [vmem:[#allocation3 + $0x11] sm:$0xff]  ;;  %v17604_v6 = vld [vmem:[#allocation31_spill] sm:$0xff] }
 0x513   : > { %v16120_v18 = vld [vmem:[#allocation3 + $0x2f] sm:$0xff]  ;;  %v6244_v54 = vshra.s32 %v17604_v6, 2 }
 0x514   : > { %v16122_v48 = vld [vmem:[#allocation3 + $0x29] sm:$0xff]  ;;  %4792 = vst.msk [vmem:[#allocation3 + $0x40] sm:$0xff] %vm17571_vm13, %v11892_v10  ;;  %12325 = vmatpush3.bf16.msra.mxu1 %v13085_v4  ;;  %v4854_v41 = vsel %vm4822_vm15, %v16120_v18, 0.0  ;;  %v11893_v52 = vpop.f32.mrb[46].mxu0  ;;  %v16137_v26 = vsel %vm4820_vm7, %v16120_v18, 0.0  ;;  %vm17574_vm13 = vmmov %vm17572_vm3 }
 0x515   : > { %v4859_v31 = vpack.c.bf16 %v4854_v41, %v4853_v39  ;;  %12326 = vmatprep.subr.bf16.mxu1 %v13086_v21  ;;  %v11894_v62 = vpop.f32.mrb[47].mxu0  ;;  %v16142_v29 = vsel %vm5141_vm10, %v16122_v48, 0.0  ;;  %v5784_v63 = vpack.c.bf16 %v16137_v26, %v16108_v2  ;;  %v16206_v45 = vld [vmem:[#allocation3 + $0x30] sm:$0xff]  ;;  %v16216_v4 = vld [vmem:[#allocation3 + $0x28] sm:$0xff]  ;;  %v5172_v39 = vsel %vm5140_vm8, %v16226_v35, 0.0  ;;  %v13113_v26 = vld [vmem:[#allocation8 + $0x108] sm:$0xff]  }
 0x516   : > { %v11895_v12 = vadd.f32 %v11894_v62, %v11893_v52  ;;  %v16220_v51 = vpack.c.bf16 %v16206_v45, %v16216_v4  ;;  %v13092_v62 = vld [vmem:[#allocation8 + $0x60] sm:$0xff]  }
 0x517   : > { %12318 = vmatprep.mubr.msk.bf16.mxu1 %vm17572_vm3, %v4859_v31  ;;  %v16147_v28 = vld [vmem:[#allocation3 + $0x37] sm:$0xff]  ;;  %v13091_v31 = vld [vmem:[#allocation8 + $0x58] sm:$0xff]  }
 0x518   : > { %v16149_v11 = vld [vmem:[#allocation3 + $0x31] sm:$0xff]  ;;  %12327 = vmatpush3.bf16.msra.mxu1 %v13086_v21  ;;  %4793 = vst.msk [vmem:[#allocation3 + $0x48] sm:$0xff] %vm17573_vm6, %v11895_v12  ;;  %v16158_v22 = vsel %vm4821_vm0, %v16147_v28, 0.0  ;;  %v4855_v55 = vsel %vm4823_vm12, %v16147_v28, 0.0  ;;  %vm17222_vm6 = vcmp.lt.s32.totalorder %v15680_v46, 7  ;;  %v13090_v21 = vld [vmem:[#allocation8 + $0x50] sm:$0xff]  }
 0x519   : > { %12328 = vmatprep.subr.bf16.mxu1 %v13087_v60  ;;  %v16163_v14 = vsel %vm17221_vm4, %v16149_v11, 0.0  ;;  %v16233_v41 = vld [vmem:[#allocation3 + $0x38] sm:$0xff]  ;;  %v5174_v12 = vsel %vm17221_vm4, %v16098_v16, 0.0  ;;  %v13112_v2 = vld [vmem:[#allocation8 + $0x100] sm:$0xff]  }
 0x51a   : > { %v6098_v37 = vpack.c.bf16 %v16163_v14, %v16142_v29  ;;  %v6246_v29 = vmul.u32 2, %v6244_v54  ;;  %v13119_v54 = vld [vmem:[%s17115_s3 + $0x10] ss:$8 sps:$4 sm:$0xff]  }
 0x51b   : > { %v16165_v20 = vld [vmem:[#allocation3 + $0x3f] sm:$0xff] }
 0x51c   : > { %v16169_v32 = vld [vmem:[#allocation3 + $0x39] sm:$0xff]  ;;  %v4856_v5 = vsel %vm4824_vm14, %v16165_v20, 0.0  ;;  %12329 = vmatpush3.bf16.msra.mxu1 %v13087_v60  ;;  %v16183_v43 = vsel %vm4822_vm15, %v16165_v20, 0.0  ;;  %v5179_v60 = vpack.c.bf16 %v5172_v39, %v16062_v33  ;;  %v6248_v14 = vmul.u32 8, %v6246_v29 }
 0x51d   : > { %v4860_v24 = vpack.c.bf16 %v4856_v5, %v4855_v55  ;;  %12338 = vmatprep.subr.bf16.mxu1 %v13088_v34  ;;  %v16188_v23 = vsel %vm5143_vm2, %v16169_v32, 0.0  ;;  %v5785_v30 = vpack.c.bf16 %v16183_v43, %v16158_v22  ;;  %v16228_v10 = vld [vmem:[#allocation3 + $0x40] sm:$0xff]  ;;  %v5173_v55 = vsel %vm5141_vm10, %v16096_v59, 0.0  ;;  %v13115_v43 = vld [vmem:[#allocation8 + $0x118] sm:$0xff]   ;;  %v13122_v29 = vld [vmem:[%s17115_s3 + $0x20] ss:$8 sps:$4 sm:$0xff]  }
 0x51e   : > { %v16237_v52 = vpack.c.bf16 %v16228_v10, %v16233_v41  ;;  %v5180_v5 = vpack.c.bf16 %v5174_v12, %v5173_v55 }
 0x51f   : > { %12319 = vmatmul.mubr.msk.bf16.gmra.mrb[16].mxu1 %vm17574_vm13, %v4860_v24  ;;  %v16195_v42 = vld [vmem:[#allocation3 + $0x41] sm:$0xff]  ;;  %vm17575_vm13 = vmmov %vm17572_vm3  ;;  %v5175_v24 = vsel %vm5143_vm2, %v16122_v48, 0.0 }
 0x520   : > { %12330 = vmatprep.mubr.msk.bf16.mxu1 %vm17572_vm3, %v5010_v38  ;;  %v16204_v9 = vsel %vm17222_vm6, %v16195_v42, 0.0  ;;  %v13093_v38 = vld [vmem:[#allocation8 + $0x68] sm:$0xff]  }
 0x521   : > { %v6099_v47 = vpack.c.bf16 %v16204_v9, %v16188_v23 }
 0x527   : > { %12331 = vmatmul.mubr.msk.bf16.vlgmr.msra.gmra.mrb[12].mxu1 %vm17575_vm13, %v16214_v53  ;;  %vm17576_vm13 = vmmov %vm17572_vm3 }
 0x528   : > { %12339 = vmatpush3.bf16.msra.mxu1 %v13088_v34  ;;  %12334 = vmatprep.mubr.msk.bf16.mxu1 %vm17572_vm3, %v16220_v51  ;;  %v5176_v34 = vsel %vm17222_vm6, %v16149_v11, 0.0  ;;  %vm5145_vm6 = vcmp.lt.s32.totalorder %v15677_v36, 7 }
 0x529   : > { %12340 = vmatprep.subr.bf16.mxu1 %v13089_v7  ;;  %v5612_v44 = vsel %vm5145_vm6, %v16195_v42, 0.0 }
 0x52c   : > { %12341 = vmatpush3.bf16.msra.mxu1 %v13089_v7  ;;  %v5181_v7 = vpack.c.bf16 %v5176_v34, %v5175_v24  ;;  %v13095_v34 = vld [vmem:[#allocation8 + $0x78] sm:$0xff]   ;;  %v5329_v24 = vsel %vm4822_vm15, %v16147_v28, 0.0  ;;  %v13098_v28 = vld [vmem:[#allocation8 + $0x90] sm:$0xff]  }
 0x52d   : > { %12342 = vmatprep.subr.bf16.mxu1 %v13090_v21 }
 0x52f   : > { %12335 = vmatmul.mubr.msk.bf16.gmra.mrb[16].mxu1 %vm17576_vm13, %v16237_v52  ;;  %vm17577_vm13 = vmmov %vm17572_vm3 }
 0x530   : > { %12343 = vmatpush3.bf16.msra.mxu1 %v13090_v21  ;;  %12346 = vmatprep.mubr.msk.bf16.mxu1 %vm17572_vm3, %v5179_v60  ;;  %vm5146_vm3 = vcmp.lt.s32.totalorder %v15947_v58, 7  ;;  %vm17578_vm4 = vmmov %vm17577_vm13  ;;  %v13094_v21 = vld [vmem:[#allocation8 + $0x70] sm:$0xff]   ;;  %v5177_v60 = vsel %vm5145_vm6, %v16169_v32, 0.0 }
 0x531   : > { %12344 = vmatprep.subr.bf16.mxu1 %v13091_v31  ;;  %v5178_v39 = vsel %vm5146_vm3, %v16195_v42, 0.0  ;;  %v13110_v58 = vld [vmem:[#allocation8 + $0xf0] sm:$0xff]  }
 0x532   : > { %v5182_v12 = vpack.c.bf16 %v5178_v39, %v5177_v60  ;;  %v13099_v60 = vld [vmem:[#allocation8 + $0x98] sm:$0xff]  }
 0x534   : > { %12345 = vmatpush3.bf16.msra.mxu1 %v13091_v31  ;;  %v5325_v31 = vsel %vm4818_vm11, %v16067_v8, 0.0  ;;  %v13096_v8 = vld [vmem:[#allocation8 + $0x80] sm:$0xff]   ;;  %vm17580_vm11 = vmmov %vm17578_vm4 }
 0x535   : > { %12354 = vmatprep.subr.bf16.mxu1 %v13092_v62 }
 0x537   : > { %12347 = vmatmul.mubr.msk.bf16.vlgmr.msra.gmra.mrb[12].mxu1 %vm17577_vm13, %v5180_v5  ;;  %vm17579_vm13 = vmmov %vm17578_vm4  ;;  %v5327_v5 = vsel %vm4820_vm7, %v16094_v1, 0.0  ;;  %v16286_v1 = vld [vmem:[#allocation3 + $0x47] sm:$0xff] }
 0x538   : > { %12350 = vmatprep.mubr.msk.bf16.mxu1 %vm17578_vm4, %v5181_v7  ;;  %12355 = vmatpush3.bf16.msra.mxu1 %v13092_v62  ;;  %v5324_v62 = vsel %vm4817_vm1, %v16056_v27, 0.0  ;;  %v5326_v27 = vsel %vm4819_vm5, %v16071_v17, 0.0  ;;  %v5328_v7 = vsel %vm4821_vm0, %v16120_v18, 0.0  ;;  %vm17581_vm7 = vmmov %vm17578_vm4  ;;  %v5331_v17 = vsel %vm4824_vm14, %v16286_v1, 0.0 }
 0x539   : > { %12356 = vmatprep.subr.bf16.mxu1 %v13093_v38  ;;  %v5332_v55 = vpack.c.bf16 %v5325_v31, %v5324_v62  ;;  %v5334_v39 = vpack.c.bf16 %v5329_v24, %v5328_v7  ;;  %v5330_v18 = vsel %vm4823_vm12, %v16165_v20, 0.0  ;;  %vm17582_vm5 = vmmov %vm17578_vm4  ;;  %v13100_v62 = vld [vmem:[#allocation8 + $0xa0] sm:$0xff]   ;;  %v5463_v20 = vpack.c.bf16 %v16233_v41, %v16206_v45  ;;  %v13105_v24 = vld [vmem:[#allocation8 + $0xc8] sm:$0xff]  }
 0x53a   : > { %v5335_v31 = vpack.c.bf16 %v5331_v17, %v5330_v18  ;;  %vm17583_vm1 = vmmov %vm17578_vm4  ;;  %v5606_v45 = vsel %vm5139_vm9, %v16226_v35, 0.0  ;;  %v5781_v61 = vsel %vm4823_vm12, %v16286_v1, 0.0 }
 0x53b   : > { %vm17584_vm0 = vmmov %vm17583_vm1  ;;  %v5786_v13 = vpack.c.bf16 %v16062_v33, %v5781_v61 }
 0x53c   : > { %12357 = vmatpush3.bf16.msra.mxu1 %v13093_v38  ;;  %v5333_v38 = vpack.c.bf16 %v5327_v5, %v5326_v27  ;;  %vm17585_vm15 = vmmov %vm17584_vm0  ;;  %v13104_v5 = vld [vmem:[#allocation8 + $0xc0] sm:$0xff]  }
 0x53d   : > { %12358 = vmatprep.subr.bf16.mxu1 %v13094_v21  ;;  %vm17586_vm14 = vmmov %vm17584_vm0 }
 0x53e   : > { %vm17590_vm9 = vmmov %vm17584_vm0 }
 0x53f   : > { %12351 = vmatmul.mubr.msk.bf16.gmra.mrb[16].mxu1 %vm17578_vm4, %v5182_v12  ;;  %v5461_v12 = vpack.c.bf16 %v16210_v49, %v16167_v0  ;;  %v13102_v0 = vld [vmem:[#allocation8 + $0xb0] sm:$0xff]   ;;  %v16305_v49 = vld [vmem:[#allocation3 + $0x48] sm:$0xff]  ;;  %vm17587_vm4 = vmmov %vm17584_vm0 }
 0x540   : > { %12359 = vmatpush3.bf16.msra.mxu1 %v13094_v21  ;;  %12362 = vmatprep.mubr.msk.bf16.mxu1 %vm17579_vm13, %v5332_v55  ;;  %v13097_v21 = vld [vmem:[#allocation8 + $0x88] sm:$0xff]   ;;  %vm17589_vm13 = vcmp.lt.s32.totalorder %v15680_v46, 7  ;;  %v13106_v46 = vld [vmem:[#allocation8 + $0xd0] sm:$0xff]   ;;  %vm17592_vm10 = vmmov %vm17584_vm0  ;;  %v5939_v22 = vpack.c.bf16 %v16062_v33, %v16305_v49 }
 0x541   : > { %12360 = vmatprep.subr.bf16.mxu1 %v13095_v34  ;;  %v13101_v55 = vld [vmem:[#allocation8 + $0xa8] sm:$0xff]   ;;  %vm17598_vm12 = vmmov %vm17584_vm0 }
 0x544   : > { %12361 = vmatpush3.bf16.msra.mxu1 %v13095_v34  ;;  %v5462_v34 = vpack.c.bf16 %v16216_v4, %v16199_v40  ;;  %v5464_v40 = vpack.c.bf16 %v16305_v49, %v16228_v10  ;;  %v13103_v4 = vld [vmem:[#allocation8 + $0xb8] sm:$0xff]   ;;  %v5610_v10 = vsel %vm5143_vm2, %v16149_v11, 0.0  ;;  %vm17593_vm2 = vmmov %vm17584_vm0  ;;  %v13108_v11 = vld [vmem:[#allocation8 + $0xe0] sm:$0xff]  }
 0x545   : > { %12370 = vmatprep.subr.bf16.mxu1 %v13096_v8 }
 0x547   : > { %12363 = vmatmul.mubr.msk.bf16.vlgmr.msra.gmra.mrb[12].mxu1 %vm17580_vm11, %v5333_v38  ;;  %vm17591_vm11 = vmmov %vm17584_vm0 }
 0x548   : > { %12366 = vmatprep.mubr.msk.bf16.mxu1 %vm17581_vm7, %v5334_v39  ;;  %12371 = vmatpush3.bf16.msra.mxu1 %v13096_v8  ;;  %v5607_v8 = vsel %vm5140_vm8, %v16096_v59, 0.0  ;;  %vm17588_vm8 = vcmp.lt.s32.totalorder %v15738_v57, 7  ;;  %v5611_v59 = vsel %vm17589_vm13, %v16169_v32, 0.0  ;;  %v5589_v57 = vld [vmem:[#allocation3 + $0x49] sm:$0xff]  ;;  %v13109_v32 = vld [vmem:[#allocation8 + $0xe8] sm:$0xff]   ;;  %vm17595_vm7 = vmmov %vm17584_vm0 }
 0x549   : > { %12372 = vmatprep.subr.bf16.mxu1 %v13097_v21  ;;  %v5614_v41 = vpack.c.bf16 %v5607_v8, %v5606_v45  ;;  %v5609_v50 = vsel %vm17588_vm8, %v16122_v48, 0.0  ;;  %v5616_v27 = vpack.c.bf16 %v5611_v59, %v5610_v10  ;;  %v5613_v16 = vsel %vm5146_vm3, %v5589_v57, 0.0  ;;  %v13107_v48 = vld [vmem:[#allocation8 + $0xd8] sm:$0xff]   ;;  %vm17594_vm3 = vmmov %vm17584_vm0 }
 0x54a   : > { %v5615_v35 = vpack.c.bf16 %v5609_v50, %v5608_v3  ;;  %v5617_v56 = vpack.c.bf16 %v5613_v16, %v5612_v44  ;;  %vm17602_vm8 = vmmov %vm17584_vm0 }
 0x54b   : > { %vm17603_vm13 = vmmov %vm17584_vm0 }
 0x54c   : > { %12373 = vmatpush3.bf16.msra.mxu1 %v13097_v21  ;;  %v11053_v21 = vld [vmem:[#allocation16] ss:$0 sm:$0xff] }
 0x54d   : > { %12374 = vmatprep.subr.bf16.mxu1 %v13098_v28 }
 0x54f   : > { %12367 = vmatmul.mubr.msk.bf16.gmra.mrb[16].mxu1 %vm17582_vm5, %v5335_v31  ;;  %vm17596_vm5 = vmmov %vm17584_vm0 }
 0x550   : > { %12375 = vmatpush3.bf16.msra.mxu1 %v13098_v28  ;;  %12378 = vmatprep.mubr.msk.bf16.mxu1 %vm17583_vm1, %v5461_v12  ;;  %vm17597_vm1 = vmmov %vm17584_vm0 }
 0x551   : > { %12376 = vmatprep.subr.bf16.mxu1 %v13099_v60 }
 0x554   : > { %12377 = vmatpush3.bf16.msra.mxu1 %v13099_v60 }
 0x555   : > { %12386 = vmatprep.subr.bf16.mxu1 %v13100_v62 }
 0x557   : > { %12379 = vmatmul.mubr.msk.bf16.vlgmr.msra.gmra.mrb[12].mxu1 %vm17584_vm0, %v5462_v34 }
 0x558   : > { %12382 = vmatprep.mubr.msk.bf16.mxu1 %vm17585_vm15, %v5463_v20  ;;  %12387 = vmatpush3.bf16.msra.mxu1 %v13100_v62  ;;  %vm17599_vm15 = vmmov %vm17584_vm0 }
 0x559   : > { %12388 = vmatprep.subr.bf16.mxu1 %v13101_v55 }
 0x55c   : > { %12389 = vmatpush3.bf16.msra.mxu1 %v13101_v55 }
 0x55d   : > { %12390 = vmatprep.subr.bf16.mxu1 %v13102_v0 }
 0x55f   : > { %12383 = vmatmul.mubr.msk.bf16.gmra.mrb[16].mxu1 %vm17586_vm14, %v5464_v40  ;;  %vm17600_vm14 = vmmov %vm17584_vm0 }
 0x560   : > { %12391 = vmatpush3.bf16.msra.mxu1 %v13102_v0  ;;  %12394 = vmatprep.mubr.msk.bf16.mxu1 %vm17587_vm4, %v5614_v41  ;;  %vm17601_vm4 = vmmov %vm17584_vm0 }
 0x561   : > { %12392 = vmatprep.subr.bf16.mxu1 %v13103_v4 }
 0x564   : > { %12393 = vmatpush3.bf16.msra.mxu1 %v13103_v4 }
 0x565   : > { %12402 = vmatprep.subr.bf16.mxu1 %v13104_v5 }
 0x567   : > { %12395 = vmatmul.mubr.msk.bf16.vlgmr.msra.gmra.mrb[12].mxu1 %vm17590_vm9, %v5615_v35 }
 0x568   : > { %12398 = vmatprep.mubr.msk.bf16.mxu1 %vm17591_vm11, %v5616_v27  ;;  %12403 = vmatpush3.bf16.msra.mxu1 %v13104_v5 }
 0x569   : > { %12404 = vmatprep.subr.bf16.mxu1 %v13105_v24 }
 0x56c   : > { %12405 = vmatpush3.bf16.msra.mxu1 %v13105_v24 }
 0x56d   : > { %12406 = vmatprep.subr.bf16.mxu1 %v13106_v46 }
 0x56f   : > { %12399 = vmatmul.mubr.msk.bf16.gmra.mrb[16].mxu1 %vm17592_vm10, %v5617_v56 }
 0x570   : > { %12407 = vmatpush3.bf16.msra.mxu1 %v13106_v46  ;;  %12410 = vmatprep.mubr.msk.bf16.mxu1 %vm17593_vm2, %v5783_v15  ;;  %v13111_v15 = vld [vmem:[#allocation8 + $0xf8] sm:$0xff]  }
 0x571   : > { %12408 = vmatprep.subr.bf16.mxu1 %v13107_v48 }
 0x574   : > { %12409 = vmatpush3.bf16.msra.mxu1 %v13107_v48 }
 0x575   : > { %12418 = vmatprep.subr.bf16.mxu1 %v13108_v11 }
 0x577   : > { %12411 = vmatmul.mubr.msk.bf16.vlgmr.msra.gmra.mrb[12].mxu1 %vm17594_vm3, %v5784_v63  ;;  %v13114_v63 = vld [vmem:[#allocation8 + $0x110] sm:$0xff]  }
 0x578   : > { %12414 = vmatprep.mubr.msk.bf16.mxu1 %vm17595_vm7, %v5785_v30  ;;  %12419 = vmatpush3.bf16.msra.mxu1 %v13108_v11  ;;  %v6095_v30 = vsel %vm5145_vm6, %v5589_v57, 0.0 }
 0x579   : > { %12420 = vmatprep.subr.bf16.mxu1 %v13109_v32  ;;  %v6100_v42 = vpack.c.bf16 %v16062_v33, %v6095_v30  ;;  %v13116_v30 = vld [vmem:[%s17115_s3] ss:$8 sps:$4 sm:$0xff]  }
 0x57c   : > { %12421 = vmatpush3.bf16.msra.mxu1 %v13109_v32 }
 0x57d   : > { %12422 = vmatprep.subr.bf16.mxu1 %v13110_v58 }
 0x57f   : > { %12415 = vmatmul.mubr.msk.bf16.gmra.mrb[16].mxu1 %vm17596_vm5, %v5786_v13  ;;  %vm17605_vm5 = vmmov %vm17584_vm0 }
 0x580   : > { %12423 = vmatpush3.bf16.msra.mxu1 %v13110_v58  ;;  %12426 = vmatprep.mubr.msk.bf16.mxu1 %vm17597_vm1, %v16214_v53 }
 0x581   : > { %12424 = vmatprep.subr.bf16.mxu1 %v13111_v15 }
 0x584   : > { %12425 = vmatpush3.bf16.msra.mxu1 %v13111_v15 }
 0x585   : > { %12434 = vmatprep.subr.bf16.mxu1 %v13112_v2 }
 0x587   : > { %12427 = vmatmul.mubr.msk.bf16.vlgmr.msra.gmra.mrb[12].mxu1 %vm17584_vm0, %v16220_v51  ;;  %v17606_v51 = vld [vmem:[#allocation60_spill] sm:$0xff] }
 0x588   : > { %12430 = vmatprep.mubr.msk.bf16.mxu1 %vm17598_vm12, %v16237_v52  ;;  %12435 = vmatpush3.bf16.msra.mxu1 %v13112_v2  ;;  %v6245_v52 = vshra.s32 %v17606_v51, 2  ;;  %v16392_v38 = vand.u32 3, %v17606_v51 }
 0x589   : > { %12436 = vmatprep.subr.bf16.mxu1 %v13113_v26 }
 0x58a   : > { %v6247_v7 = vmul.u32 2, %v6245_v52  ;;  %v6251_v28 = vmul.u32 2, %v16392_v38  ;;  %v13136_v52 = vld [vmem:[%s17115_s3 + $0x64] ss:$8 sps:$4 sm:$0xff]  }
 0x58c   : > { %12437 = vmatpush3.bf16.msra.mxu1 %v13113_v26  ;;  %v6249_v1 = vmul.u32 8, %v6247_v7  ;;  %v13139_v7 = vld [vmem:[%s17115_s3 + $0x74] ss:$8 sps:$4 sm:$0xff]  }
 0x58d   : > { %12438 = vmatprep.subr.bf16.mxu1 %v13114_v63 }
 0x58e   : > { %v6253_v0 = vadd.s32 %v6251_v28, %v6249_v1  ;;  %v13142_v1 = vld [vmem:[%s17115_s3 + $0x84] ss:$8 sps:$4 sm:$0xff]  }
 0x58f   : > { %12431 = vmatmul.mubr.msk.bf16.gmra.mrb[16].mxu1 %vm17599_vm15, %v5939_v22  ;;  %v13118_v22 = vld [vmem:[%s17115_s3 + $0x4] ss:$8 sps:$4 sm:$0xff]  }
 0x590   : > { %12439 = vmatpush3.bf16.msra.mxu1 %v13114_v63  ;;  %12442 = vmatprep.mubr.msk.bf16.mxu1 %vm17600_vm14, %v6097_v25  ;;  %v16381_v25 = vand.u32 3, %v17604_v6  ;;  %v6257_v59 = vadd.s32 1, %v6253_v0  ;;  %v6263_v57 = vadd.s32 8, %v6253_v0  ;;  %vm6255_vm14 = vcmp.eq.s32.totalorder %v15583_v19, %v6253_v0  ;;  %v13146_v0 = vld [vmem:[%s17115_s3 + $0xa0] ss:$8 sps:$4 sm:$0xff]  }
 0x591   : > { %12440 = vmatprep.subr.bf16.mxu1 %v13115_v43 }
 0x592   : > { %v6269_v58 = vadd.s32 1, %v6263_v57 }
 0x594   : > { %12441 = vmatpush3.bf16.msra.mxu1 %v13115_v43 }
 0x597   : > { %12443 = vmatmul.mubr.msk.bf16.vlgmr.msra.gmra.mrb[12].mxu1 %vm17601_vm4, %v6098_v37  ;;  %v6250_v37 = vmul.u32 2, %v16381_v25 }
 0x598   : > { %12446 = vmatprep.mubr.msk.bf16.mxu1 %vm17602_vm8, %v6099_v47  ;;  %vm6259_vm8 = vcmp.eq.s32.totalorder %v15583_v19, %v6257_v59  ;;  %v13163_v59 = vld [vmem:[%s17115_s3 + $0xf4] ss:$8 sps:$4 sm:$0xff]  }
 0x599   : > { %v6252_v53 = vadd.s32 %v6250_v37, %v6248_v14  ;;  %v13127_v14 = vld [vmem:[%s17115_s3 + $0x34] ss:$8 sps:$4 sm:$0xff]   ;;  %v13125_v37 = vld [vmem:[%s17115_s3 + $0x30] ss:$8 sps:$4 sm:$0xff]  }
 0x59b   : > { %v6256_v23 = vadd.s32 1, %v6252_v53  ;;  %v6262_v9 = vadd.s32 8, %v6252_v53  ;;  %vm6254_vm9 = vcmp.eq.s32.totalorder %v15583_v19, %v6252_v53  ;;  %v13130_v53 = vld [vmem:[%s17115_s3 + $0x44] ss:$8 sps:$4 sm:$0xff]  }
 0x59d   : > { %vm6258_vm6 = vcmp.eq.s32.totalorder %v15583_v19, %v6256_v23  ;;  %v6268_v36 = vadd.s32 1, %v6262_v9  ;;  %vm6264_vm10 = vcmp.eq.s32.totalorder %v15583_v19, %v6262_v9  ;;  %v13128_v23 = vld [vmem:[%s17115_s3 + $0x40] ss:$8 sps:$4 sm:$0xff]   ;;  %v13133_v9 = vld [vmem:[%s17115_s3 + $0x54] ss:$8 sps:$4 sm:$0xff]  }
 0x59e   : > { %vm6260_vm11 = vmor %vm6254_vm9, %vm6258_vm6 }
 0x59f   : > { %12447 = vmatmul.mubr.msk.bf16.gmra.mrb[16].mxu1 %vm17603_vm13, %v6100_v42  ;;  %vm6266_vm2 = vmor %vm6260_vm11, %vm6264_vm10  ;;  %vm6270_vm3 = vcmp.eq.s32.totalorder %v15583_v19, %v6268_v36  ;;  %vm6265_vm10 = vcmp.eq.s32.totalorder %v15583_v19, %v6263_v57  ;;  %v13121_v42 = vld [vmem:[%s17115_s3 + $0x14] ss:$8 sps:$4 sm:$0xff]   ;;  %v13131_v36 = vld [vmem:[%s17115_s3 + $0x50] ss:$8 sps:$4 sm:$0xff]  }
 0x5a0   : > { %vm6272_vm7 = vmor %vm6266_vm2, %vm6270_vm3  ;;  %vm6271_vm3 = vcmp.eq.s32.totalorder %v15583_v19, %v6269_v58  ;;  %v13176_v58 = vld [vmem:[%s17115_s3 + $0x140] ss:$8 sps:$4 sm:$0xff]  }
 0x5a1   : > { %v6274_v47 = vsel %vm6272_vm7, 0.25, %v16062_v33  ;;  %vm6261_vm11 = vmor %vm6255_vm14, %vm6259_vm8 }
 0x5a2   : > { %12466 = vmatprep.mubr.msk.f32.mxu1 %vm17605_vm5, %v6274_v47  ;;  %vm6267_vm2 = vmor %vm6261_vm11, %vm6265_vm10  ;;  %v13134_v47 = vld [vmem:[%s17115_s3 + $0x60] ss:$8 sps:$4 sm:$0xff]  }
 0x5a3   : > { %vm6273_vm7 = vmor %vm6267_vm2, %vm6271_vm3  ;;  %vm7292_vm3 = vcmp.lt.s32.totalorder %v17606_v51, 12  ;;  %v13346_v51 = vld [vmem:[#allocation10 + $0x24] ss:$8 sps:$4 sm:$0xff]  }
 0x5a4   : > { %v6275_v43 = vsel %vm6273_vm7, 0.25, %v16062_v33  ;;  %v13124_v33 = vld [vmem:[%s17115_s3 + $0x24] ss:$8 sps:$4 sm:$0xff]  }
 0x66a   : > { %v12444_v39 = vpop.f32.mrb[12].mxu1 }
 0x66b   : > { %v12567_v17 = vadd.f32 %v12444_v39, %v11053_v21  ;;  %v6179_v18 = vpop.f32.mrb[13].mxu1  ;;  %v13137_v39 = vld [vmem:[%s17115_s3 + $0x70] ss:$8 sps:$4 sm:$0xff]  }
 0x66c   : > { %v12568_v31 = vadd.f32 %v11053_v21, %v6179_v18  ;;  %v12445_v60 = vpop.f32.mrb[14].mxu1 }
 0x66d   : > { %v6228_v12 = vmul.f32 0.1, %v12567_v17  ;;  %v12569_v62 = vadd.f32 %v12445_v60, %v11053_v21  ;;  %v6182_v34 = vpop.f32.mrb[15].mxu1  ;;  %vm6220_vm1 = vcmp.ge.f32.partialorder %v12567_v17, 0.0 }
 0x66e   : > { %v6226_v55 = vmul.f32 0.1, %v12568_v31  ;;  %v12570_v20 = vadd.f32 %v11053_v21, %v6182_v34  ;;  %vm6218_vm0 = vcmp.ge.f32.partialorder %v12568_v31, 0.0  ;;  %v13145_v34 = vld [vmem:[%s17115_s3 + $0x94] ss:$8 sps:$4 sm:$0xff]  }
 0x66f   : > { %vm6221_vm12 = vcmp.ge.f32.partialorder %v12569_v62, 0.0  ;;  %v6229_v49 = vmul.f32 0.1, %v12569_v62  ;;  %v6236_v40 = vsel %vm6220_vm1, %v12567_v17, %v6228_v12  ;;  %vm6375_vm1 = vcmp.ge.s32.totalorder %v17604_v6, 4 }
 0x670   : > { %vm6219_vm15 = vcmp.ge.f32.partialorder %v12570_v20, 0.0  ;;  %v6227_v8 = vmul.f32 0.1, %v12570_v20  ;;  %v6234_v41 = vsel %vm6218_vm0, %v12568_v31, %v6226_v55  ;;  %vm6377_vm0 = vcmp.ge.s32.totalorder %v16381_v25, 1  ;;  %v13140_v31 = vld [vmem:[%s17115_s3 + $0x80] ss:$8 sps:$4 sm:$0xff]  }
 0x671   : > { %v6237_v45 = vsel %vm6221_vm12, %v12569_v62, %v6229_v49  ;;  %vm6378_vm12 = vcmp.ge.s32.totalorder %v16392_v38, 1  ;;  %v13143_v55 = vld [vmem:[%s17115_s3 + $0x90] ss:$8 sps:$4 sm:$0xff]   ;;  %v13151_v49 = vld [vmem:[%s17115_s3 + $0xb4] ss:$8 sps:$4 sm:$0xff]  }
 0x672   : > { %v12448_v4 = vpop.f32.mrb[16].mxu1  ;;  %v6235_v5 = vsel %vm6219_vm15, %v12570_v20, %v6227_v8  ;;  %v12505_v50 = vpack.c.bf16 %v6237_v45, %v6236_v40  ;;  %vm6379_vm15 = vmand %vm6375_vm1, %vm6377_vm0  ;;  %v13148_v20 = vld [vmem:[%s17115_s3 + $0xa4] ss:$8 sps:$4 sm:$0xff]   ;;  %v13149_v8 = vld [vmem:[%s17115_s3 + $0xb0] ss:$8 sps:$4 sm:$0xff]  }
 0x673   : > { %v12571_v3 = vadd.f32 %v12448_v4, %v11053_v21  ;;  %v6195_v35 = vpop.f32.mrb[17].mxu1  ;;  %v12501_v10 = vpack.c.bf16 %v6235_v5, %v6234_v41  ;;  %vm11144_vm14 = vmpackc.low %vm6378_vm12, %vm6379_vm15  ;;  %v13154_v40 = vld [vmem:[%s17115_s3 + $0xc4] ss:$8 sps:$4 sm:$0xff]   ;;  %v13152_v45 = vld [vmem:[%s17115_s3 + $0xc0] ss:$8 sps:$4 sm:$0xff]  }
 0x674   : > { %v12572_v24 = vadd.f32 %v11053_v21, %v6195_v35  ;;  %v12449_v27 = vpop.f32.mrb[18].mxu1  ;;  %v13157_v4 = vld [vmem:[%s17115_s3 + $0xd4] ss:$8 sps:$4 sm:$0xff]   ;;  %v13155_v41 = vld [vmem:[%s17115_s3 + $0xd0] ss:$8 sps:$4 sm:$0xff]   ;;  %vm11201_vm10 = vmpackc.low %vm6378_vm12, %vm6377_vm0 }
 0x675   : > { %v6232_v46 = vmul.f32 0.1, %v12571_v3  ;;  %v12573_v44 = vadd.f32 %v12449_v27, %v11053_v21  ;;  %v6198_v16 = vpop.f32.mrb[19].mxu1  ;;  %12502 = vmatprep.subr.bf16.mxu1 %v12501_v10  ;;  %vm6224_vm4 = vcmp.ge.f32.partialorder %v12571_v3, 0.0  ;;  %v13160_v5 = vld [vmem:[%s17115_s3 + $0xe4] ss:$8 sps:$4 sm:$0xff]   ;;  %vm7294_vm7 = vmand %vm7292_vm3, %vm6378_vm12 }
 0x676   : > { %v6230_v56 = vmul.f32 0.1, %v12572_v24  ;;  %v12574_v48 = vadd.f32 %v11053_v21, %v6198_v16  ;;  %12504 = vmatpush3.bf16.msra.mxu1 %v12501_v10  ;;  %vm6222_vm13 = vcmp.ge.f32.partialorder %v12572_v24, 0.0  ;;  %v14194_v21 = vmov 0   ;;  %v13166_v35 = vld [vmem:[%s17115_s3 + $0x104] ss:$8 sps:$4 sm:$0xff]  }
 0x677   : > { %vm6225_vm9 = vcmp.ge.f32.partialorder %v12573_v44, 0.0  ;;  %v6233_v11 = vmul.f32 0.1, %v12573_v44  ;;  %12506 = vmatprep.subr.bf16.mxu1 %v12505_v50  ;;  %v6240_v61 = vsel %vm6224_vm4, %v12571_v3, %v6232_v46  ;;  %v13161_v3 = vld [vmem:[%s17115_s3 + $0xf0] ss:$8 sps:$4 sm:$0xff]   ;;  %vm14195_vm4 = vmmov 1  }
 0x678   : > { %vm6223_vm6 = vcmp.ge.f32.partialorder %v12574_v48, 0.0  ;;  %v6231_v32 = vmul.f32 0.1, %v12574_v48  ;;  %v6238_v15 = vsel %vm6222_vm13, %v12572_v24, %v6230_v56  ;;  %vm11163_vm8 = vmpackc.low %vm14195_vm4, %vm6375_vm1  ;;  %v13164_v27 = vld [vmem:[%s17115_s3 + $0x100] ss:$8 sps:$4 sm:$0xff]   ;;  %vm6685_vm13 = vcmp.lt.s32.totalorder %v16381_v25, 3 }
 0x679   : > { %v6241_v13 = vsel %vm6225_vm9, %v12573_v44, %v6233_v11  ;;  %v13169_v46 = vld [vmem:[%s17115_s3 + $0x114] ss:$8 sps:$4 sm:$0xff]   ;;  %v13167_v44 = vld [vmem:[%s17115_s3 + $0x110] ss:$8 sps:$4 sm:$0xff]   ;;  %v13172_v16 = vld [vmem:[%s17115_s3 + $0x124] ss:$8 sps:$4 sm:$0xff]  }
 0x67a   : > { %12508 = vmatpush3.bf16.msra.mxu1 %v12505_v50  ;;  %v6239_v2 = vsel %vm6223_vm6, %v12574_v48, %v6231_v32  ;;  %v12513_v26 = vpack.c.bf16 %v6241_v13, %v6240_v61  ;;  %v13158_v50 = vld [vmem:[%s17115_s3 + $0xe0] ss:$8 sps:$4 sm:$0xff]   ;;  %v13175_v48 = vld [vmem:[%s17115_s3 + $0x134] ss:$8 sps:$4 sm:$0xff]   ;;  %v13173_v11 = vld [vmem:[%s17115_s3 + $0x130] ss:$8 sps:$4 sm:$0xff]  }
 0x67b   : > { %v12509_v63 = vpack.c.bf16 %v6239_v2, %v6238_v15  ;;  %v13170_v56 = vld [vmem:[%s17115_s3 + $0x120] ss:$8 sps:$4 sm:$0xff]   ;;  %v13178_v32 = vld [vmem:[%s17115_s3 + $0x144] ss:$8 sps:$4 sm:$0xff]   ;;  %v13181_v61 = vld [vmem:[%s17115_s3 + $0x154] ss:$8 sps:$4 sm:$0xff]  }
 0x67c   : > { %v13179_v13 = vld [vmem:[%s17115_s3 + $0x150] ss:$8 sps:$4 sm:$0xff]   ;;  %v13184_v15 = vld [vmem:[%s17115_s3 + $0x164] ss:$8 sps:$4 sm:$0xff]   ;;  %v13182_v2 = vld [vmem:[%s17115_s3 + $0x160] ss:$8 sps:$4 sm:$0xff]  }
 0x67d   : > { %12510 = vmatprep.subr.bf16.mxu1 %v12509_v63  ;;  %vm6686_vm9 = vcmp.lt.s32.totalorder %v16392_v38, 3  ;;  %vm6687_vm6 = vmand %vm6375_vm1, %vm6685_vm13  ;;  %v13338_v38 = vld [vmem:[#allocation10 + $0x10] ss:$8 sps:$4 sm:$0xff]   ;;  %v13352_v25 = vld [vmem:[#allocation10 + $0x34] ss:$8 sps:$4 sm:$0xff]  }
 0x67e   : > { %12512 = vmatpush3.bf16.msra.mxu1 %v12509_v63  ;;  %v13185_v63 = vld [vmem:[%s17115_s3 + $0x170] ss:$8 sps:$4 sm:$0xff]   ;;  %vm11182_vm11 = vmpackc.low %vm6686_vm9, %vm6687_vm6 }
 0x67f   : > { %12514 = vmatprep.subr.bf16.mxu1 %v12513_v26  ;;  %vm11236_vm2 = vmpackc.low %vm6686_vm9, %vm6685_vm13 }
 0x680   : > { %vm11274_vm1 = vmpackc.low %vm7292_vm3, %vm14195_vm4 }
 0x682   : > { %12516 = vmatpush3.bf16.msra.mxu1 %v12513_v26  ;;  %v13187_v26 = vld [vmem:[%s17115_s3 + $0x174] ss:$8 sps:$4 sm:$0xff]  }
 0x683   : > { %6484 = vmatprep.subr.bf16.mxu1 %v13118_v22  ;;  %v13190_v22 = vld [vmem:[%s17115_s3 + $0x184] ss:$8 sps:$4 sm:$0xff]  }
 0x685   : > { %12467 = vmatmul.mubr.msk.f32.vlgmr.msra.gmra.mrb[20].mxu1 %vm17605_vm5, %v6275_v43  ;;  %vm11255_vm5 = vmpackc.low %vm7294_vm7, %vm6377_vm0  ;;  %vm7780_vm7 = vcmask 130048  }
 0x686   : > { %6485 = vmatpush1.bf16.msra.mxu1 %v13116_v30  ;;  %6516 = vmatprep.mubr.bf16.mxu1 %v14194_v21  ;;  %vm7600_vm0 = vmand %vm7292_vm3, %vm6686_vm9 }
 0x687   : > { %6486 = vmatprep.subr.bf16.mxu1 %v13121_v42  ;;  %v13188_v42 = vld [vmem:[%s17115_s3 + $0x180] ss:$8 sps:$4 sm:$0xff]   ;;  %vm11293_vm12 = vmpackc.low %vm7600_vm0, %vm6685_vm13  ;;  %vm7888_vm0 = vcmask 1042432  }
 0x68a   : > { %6487 = vmatpush1.bf16.msra.mxu1 %v13119_v54 }
 0x68b   : > { %6488 = vmatprep.subr.bf16.mxu1 %v13124_v33  ;;  %v13193_v33 = vld [vmem:[%s17115_s3 + $0x194] ss:$8 sps:$4 sm:$0xff]  }
 0x68e   : > { %6489 = vmatpush1.bf16.msra.mxu1 %v13122_v29  ;;  %v13191_v29 = vld [vmem:[%s17115_s3 + $0x190] ss:$8 sps:$4 sm:$0xff]  }
 0x68f   : > { %6490 = vmatprep.subr.bf16.mxu1 %v13127_v14  ;;  %v13196_v14 = vld [vmem:[%s17115_s3 + $0x1a4] ss:$8 sps:$4 sm:$0xff]  }
 0x692   : > { %6491 = vmatpush1.bf16.msra.mxu1 %v13125_v37  ;;  %v13194_v37 = vld [vmem:[%s17115_s3 + $0x1a0] ss:$8 sps:$4 sm:$0xff]  }
 0x693   : > { %6492 = vmatprep.subr.bf16.mxu1 %v13130_v53  ;;  %v13199_v53 = vld [vmem:[%s17115_s3 + $0x1b4] ss:$8 sps:$4 sm:$0xff]  }
 0x696   : > { %6493 = vmatpush1.bf16.msra.mxu1 %v13128_v23  ;;  %v13197_v23 = vld [vmem:[%s17115_s3 + $0x1b0] ss:$8 sps:$4 sm:$0xff]  }
 0x697   : > { %6494 = vmatprep.subr.bf16.mxu1 %v13133_v9  ;;  %v13202_v9 = vld [vmem:[%s17115_s3 + $0x1c4] ss:$8 sps:$4 sm:$0xff]  }
 0x69a   : > { %6495 = vmatpush1.bf16.msra.mxu1 %v13131_v36  ;;  %v13200_v36 = vld [vmem:[%s17115_s3 + $0x1c0] ss:$8 sps:$4 sm:$0xff]  }
 0x69b   : > { %6496 = vmatprep.subr.bf16.mxu1 %v13136_v52  ;;  %v13203_v52 = vld [vmem:[%s17115_s3 + $0x1d0] ss:$8 sps:$4 sm:$0xff]  }
 0x69e   : > { %6497 = vmatpush1.bf16.msra.mxu1 %v13134_v47  ;;  %v13205_v47 = vld [vmem:[%s17115_s3 + $0x1d4] ss:$8 sps:$4 sm:$0xff]  }
 0x69f   : > { %6498 = vmatprep.subr.bf16.mxu1 %v13139_v7  ;;  %v13208_v7 = vld [vmem:[%s17115_s3 + $0x1e4] ss:$8 sps:$4 sm:$0xff]  }
 0x6a2   : > { %6499 = vmatpush1.bf16.msra.mxu1 %v13137_v39  ;;  %v13206_v39 = vld [vmem:[%s17115_s3 + $0x1e0] ss:$8 sps:$4 sm:$0xff]  }
 0x6a3   : > { %6636 = vmatprep.subr.bf16.mxu1 %v13142_v1  ;;  %v13211_v1 = vld [vmem:[%s17115_s3 + $0x1f4] ss:$8 sps:$4 sm:$0xff]  }
 0x758   : > { %v16455_v28 = vpop.f32.mrb[20].mxu1 }
 0x759   : > { %6360 = vst [vmem:[#allocation4 + $0x10] sm:$0xff] %v16455_v28  ;;  %v16458_v17 = vpop.f32.mrb[21].mxu1 }
 0x75a   : > { %6359 = vst [vmem:[#allocation4 + $0x8] sm:$0xff] %v16458_v17  ;;  %v6993_v18 = vpack.c.bf16 %v16455_v28, %v16458_v17  ;;  %v13247_v28 = vld [vmem:[%s17115_s3 + $0x2b4] ss:$8 sps:$4 sm:$0xff]   ;;  %v13245_v17 = vld [vmem:[%s17115_s3 + $0x2b0] ss:$8 sps:$4 sm:$0xff]  }
 0x761   : > { %v6373_v60 = vld [vmem:[#allocation4 + $0x3] sm:$0xff]  ;;  %v16473_v12 = vld [vmem:[#allocation4 + $0xb] sm:$0xff] }
 0x762   : > { %v11145_v62 = vpack.c.bf16 %v16473_v12, %v6373_v60  ;;  %v6531_v10 = vld [vmem:[#allocation4 + $0x4] sm:$0xff]  ;;  %v16524_v24 = vld [vmem:[#allocation4 + $0xc] sm:$0xff]  ;;  %v13214_v60 = vld [vmem:[%s17115_s3 + $0x204] ss:$8 sps:$4 sm:$0xff]  }
 0x763   : > { %v11164_v57 = vpack.c.bf16 %v16524_v24, %v6531_v10  ;;  %v6683_v43 = vld [vmem:[#allocation4 + $0x5] sm:$0xff]  ;;  %v16585_v30 = vld [vmem:[#allocation4 + $0xd] sm:$0xff] }
 0x764   : > { %11146 = vmatmul.mubr.msk.bf16.vlgmr.msra.gmra.mrb[24].mxu1 %vm11144_vm14, %v11145_v62  ;;  %v11183_v54 = vpack.c.bf16 %v16585_v30, %v6683_v43  ;;  %v6839_v62 = vld [vmem:[#allocation4 + $0x7] sm:$0xff]  ;;  %v13260_v43 = vld [vmem:[%s17115_s3 + $0x300] ss:$8 sps:$4 sm:$0xff]  }
 0x765   : > { %6637 = vmatpush1.bf16.msra.mxu1 %v13140_v31  ;;  %6668 = vmatprep.mubr.bf16.mxu1 %v14194_v21  ;;  %v13209_v31 = vld [vmem:[%s17115_s3 + $0x1f0] ss:$8 sps:$4 sm:$0xff]   ;;  %v13235_v10 = vld [vmem:[%s17115_s3 + $0x274] ss:$8 sps:$4 sm:$0xff]  }
 0x766   : > { %6638 = vmatprep.subr.bf16.mxu1 %v13145_v34  ;;  %v6840_v34 = vld [vmem:[#allocation4 + $0xf] sm:$0xff] }
 0x769   : > { %6639 = vmatpush1.bf16.msra.mxu1 %v13143_v55  ;;  %v13212_v55 = vld [vmem:[%s17115_s3 + $0x200] ss:$8 sps:$4 sm:$0xff]  }
 0x76a   : > { %6640 = vmatprep.subr.bf16.mxu1 %v13148_v20  ;;  %v11202_v20 = vpack.c.bf16 %v6840_v34, %v6839_v62  ;;  %v13284_v62 = vld [vmem:[%s17115_s3 + $0x380] ss:$8 sps:$4 sm:$0xff]  }
 0x76d   : > { %6641 = vmatpush1.bf16.msra.mxu1 %v13146_v0  ;;  %v13217_v0 = vld [vmem:[%s17115_s3 + $0x214] ss:$8 sps:$4 sm:$0xff]  }
 0x76e   : > { %6642 = vmatprep.subr.bf16.mxu1 %v13151_v49  ;;  %v13215_v49 = vld [vmem:[%s17115_s3 + $0x210] ss:$8 sps:$4 sm:$0xff]  }
 0x771   : > { %6643 = vmatpush1.bf16.msra.mxu1 %v13149_v8  ;;  %v13220_v8 = vld [vmem:[%s17115_s3 + $0x224] ss:$8 sps:$4 sm:$0xff]  }
 0x772   : > { %6644 = vmatprep.subr.bf16.mxu1 %v13154_v40  ;;  %v13218_v40 = vld [vmem:[%s17115_s3 + $0x220] ss:$8 sps:$4 sm:$0xff]  }
 0x775   : > { %6645 = vmatpush1.bf16.msra.mxu1 %v13152_v45  ;;  %v13223_v45 = vld [vmem:[%s17115_s3 + $0x234] ss:$8 sps:$4 sm:$0xff]  }
 0x776   : > { %6646 = vmatprep.subr.bf16.mxu1 %v13157_v4  ;;  %v13221_v4 = vld [vmem:[%s17115_s3 + $0x230] ss:$8 sps:$4 sm:$0xff]  }
 0x779   : > { %6647 = vmatpush1.bf16.msra.mxu1 %v13155_v41  ;;  %v13226_v41 = vld [vmem:[%s17115_s3 + $0x244] ss:$8 sps:$4 sm:$0xff]  }
 0x77a   : > { %6648 = vmatprep.subr.bf16.mxu1 %v13160_v5  ;;  %v13224_v5 = vld [vmem:[%s17115_s3 + $0x240] ss:$8 sps:$4 sm:$0xff]  }
 0x77d   : > { %6649 = vmatpush1.bf16.msra.mxu1 %v13158_v50  ;;  %v13229_v50 = vld [vmem:[%s17115_s3 + $0x254] ss:$8 sps:$4 sm:$0xff]  }
 0x77e   : > { %6650 = vmatprep.subr.bf16.mxu1 %v13163_v59  ;;  %v13227_v59 = vld [vmem:[%s17115_s3 + $0x250] ss:$8 sps:$4 sm:$0xff]  }
 0x781   : > { %6651 = vmatpush1.bf16.msra.mxu1 %v13161_v3  ;;  %v13232_v3 = vld [vmem:[%s17115_s3 + $0x264] ss:$8 sps:$4 sm:$0xff]  }
 0x782   : > { %6792 = vmatprep.subr.bf16.mxu1 %v13166_v35  ;;  %v13230_v35 = vld [vmem:[%s17115_s3 + $0x260] ss:$8 sps:$4 sm:$0xff]  }
 0x784   : > { %11165 = vmatmul.mubr.msk.bf16.vlgmr.msra.gmra.mrb[24].mxu1 %vm11163_vm8, %v11164_v57  ;;  %v13238_v57 = vld [vmem:[%s17115_s3 + $0x284] ss:$8 sps:$4 sm:$0xff]  }
 0x785   : > { %6793 = vmatpush1.bf16.msra.mxu1 %v13164_v27  ;;  %6824 = vmatprep.mubr.bf16.mxu1 %v14194_v21  ;;  %v13233_v27 = vld [vmem:[%s17115_s3 + $0x270] ss:$8 sps:$4 sm:$0xff]  }
 0x786   : > { %6794 = vmatprep.subr.bf16.mxu1 %v13169_v46  ;;  %v13236_v46 = vld [vmem:[%s17115_s3 + $0x280] ss:$8 sps:$4 sm:$0xff]  }
 0x789   : > { %6795 = vmatpush1.bf16.msra.mxu1 %v13167_v44  ;;  %v13241_v44 = vld [vmem:[%s17115_s3 + $0x294] ss:$8 sps:$4 sm:$0xff]  }
 0x78a   : > { %6796 = vmatprep.subr.bf16.mxu1 %v13172_v16  ;;  %v13239_v16 = vld [vmem:[%s17115_s3 + $0x290] ss:$8 sps:$4 sm:$0xff]  }
 0x78d   : > { %6797 = vmatpush1.bf16.msra.mxu1 %v13170_v56  ;;  %v13244_v56 = vld [vmem:[%s17115_s3 + $0x2a4] ss:$8 sps:$4 sm:$0xff]  }
 0x78e   : > { %6798 = vmatprep.subr.bf16.mxu1 %v13175_v48  ;;  %v13242_v48 = vld [vmem:[%s17115_s3 + $0x2a0] ss:$8 sps:$4 sm:$0xff]  }
 0x791   : > { %6799 = vmatpush1.bf16.msra.mxu1 %v13173_v11  ;;  %v13248_v11 = vld [vmem:[%s17115_s3 + $0x2c0] ss:$8 sps:$4 sm:$0xff]  }
 0x792   : > { %6800 = vmatprep.subr.bf16.mxu1 %v13178_v32  ;;  %v13253_v32 = vld [vmem:[%s17115_s3 + $0x2d4] ss:$8 sps:$4 sm:$0xff]  }
 0x795   : > { %6801 = vmatpush1.bf16.msra.mxu1 %v13176_v58  ;;  %v13251_v58 = vld [vmem:[%s17115_s3 + $0x2d0] ss:$8 sps:$4 sm:$0xff]  }
 0x796   : > { %6802 = vmatprep.subr.bf16.mxu1 %v13181_v61  ;;  %v13256_v61 = vld [vmem:[%s17115_s3 + $0x2e4] ss:$8 sps:$4 sm:$0xff]  }
 0x799   : > { %6803 = vmatpush1.bf16.msra.mxu1 %v13179_v13  ;;  %v13254_v13 = vld [vmem:[%s17115_s3 + $0x2e0] ss:$8 sps:$4 sm:$0xff]  }
 0x79a   : > { %6804 = vmatprep.subr.bf16.mxu1 %v13184_v15  ;;  %v13259_v15 = vld [vmem:[%s17115_s3 + $0x2f4] ss:$8 sps:$4 sm:$0xff]  }
 0x79d   : > { %6805 = vmatpush1.bf16.msra.mxu1 %v13182_v2  ;;  %v13257_v2 = vld [vmem:[%s17115_s3 + $0x2f0] ss:$8 sps:$4 sm:$0xff]  }
 0x79e   : > { %6806 = vmatprep.subr.bf16.mxu1 %v13187_v26  ;;  %v13262_v26 = vld [vmem:[%s17115_s3 + $0x304] ss:$8 sps:$4 sm:$0xff]  }
 0x7a1   : > { %6807 = vmatpush1.bf16.msra.mxu1 %v13185_v63  ;;  %v7137_v63 = vld [vmem:[#allocation4 + $0x9] sm:$0xff] }
 0x7a2   : > { %6944 = vmatprep.subr.bf16.mxu1 %v13190_v22  ;;  %v7138_v22 = vld [vmem:[#allocation4 + $0x11] sm:$0xff] }
 0x7a4   : > { %11184 = vmatmul.mubr.msk.bf16.vlgmr.msra.gmra.mrb[24].mxu1 %vm11182_vm11, %v11183_v54  ;;  %v13265_v54 = vld [vmem:[%s17115_s3 + $0x314] ss:$8 sps:$4 sm:$0xff]  }
 0x7a5   : > { %6945 = vmatpush1.bf16.msra.mxu1 %v13188_v42  ;;  %6976 = vmatprep.mubr.bf16.mxu1 %v14194_v21  ;;  %v11237_v42 = vpack.c.bf16 %v7138_v22, %v7137_v63  ;;  %v13334_v63 = vld [vmem:[#allocation10 + $0x4] ss:$8 sps:$4 sm:$0xff]   ;;  %v13340_v22 = vld [vmem:[#allocation10 + $0x14] ss:$8 sps:$4 sm:$0xff]  }
 0x7a6   : > { %6946 = vmatprep.subr.bf16.mxu1 %v13193_v33  ;;  %v13263_v33 = vld [vmem:[%s17115_s3 + $0x310] ss:$8 sps:$4 sm:$0xff]   ;;  %8093 = vmatprep.subr.bf16.mxu0 %v13334_v63 }
 0x7a7   : > { %v13341_v63 = vld [vmem:[#allocation10 + $0x310] ss:$8 sps:$4 sm:$0xff]  }
 0x7a9   : > { %6947 = vmatpush1.bf16.msra.mxu1 %v13191_v29  ;;  %v13268_v29 = vld [vmem:[%s17115_s3 + $0x324] ss:$8 sps:$4 sm:$0xff]  }
 0x7aa   : > { %6948 = vmatprep.subr.bf16.mxu1 %v13196_v14  ;;  %v13266_v14 = vld [vmem:[%s17115_s3 + $0x320] ss:$8 sps:$4 sm:$0xff]  }
 0x7ad   : > { %6949 = vmatpush1.bf16.msra.mxu1 %v13194_v37  ;;  %v13271_v37 = vld [vmem:[%s17115_s3 + $0x334] ss:$8 sps:$4 sm:$0xff]  }
 0x7ae   : > { %6950 = vmatprep.subr.bf16.mxu1 %v13199_v53  ;;  %v13269_v53 = vld [vmem:[%s17115_s3 + $0x330] ss:$8 sps:$4 sm:$0xff]  }
 0x7b1   : > { %6951 = vmatpush1.bf16.msra.mxu1 %v13197_v23  ;;  %v13274_v23 = vld [vmem:[%s17115_s3 + $0x344] ss:$8 sps:$4 sm:$0xff]  }
 0x7b2   : > { %6952 = vmatprep.subr.bf16.mxu1 %v13202_v9  ;;  %v13272_v9 = vld [vmem:[%s17115_s3 + $0x340] ss:$8 sps:$4 sm:$0xff]  }
 0x7b5   : > { %6953 = vmatpush1.bf16.msra.mxu1 %v13200_v36  ;;  %v13277_v36 = vld [vmem:[%s17115_s3 + $0x354] ss:$8 sps:$4 sm:$0xff]  }
 0x7b6   : > { %6954 = vmatprep.subr.bf16.mxu1 %v13205_v47  ;;  %v13275_v47 = vld [vmem:[%s17115_s3 + $0x350] ss:$8 sps:$4 sm:$0xff]  }
 0x7b9   : > { %6955 = vmatpush1.bf16.msra.mxu1 %v13203_v52  ;;  %v13280_v52 = vld [vmem:[%s17115_s3 + $0x364] ss:$8 sps:$4 sm:$0xff]  }
 0x7ba   : > { %6956 = vmatprep.subr.bf16.mxu1 %v13208_v7  ;;  %v13278_v7 = vld [vmem:[%s17115_s3 + $0x360] ss:$8 sps:$4 sm:$0xff]  }
 0x7bd   : > { %6957 = vmatpush1.bf16.msra.mxu1 %v13206_v39  ;;  %v13283_v39 = vld [vmem:[%s17115_s3 + $0x374] ss:$8 sps:$4 sm:$0xff]  }
 0x7be   : > { %6958 = vmatprep.subr.bf16.mxu1 %v13211_v1  ;;  %v13281_v1 = vld [vmem:[%s17115_s3 + $0x370] ss:$8 sps:$4 sm:$0xff]  }
 0x7c1   : > { %6959 = vmatpush1.bf16.msra.mxu1 %v13209_v31  ;;  %v13286_v31 = vld [vmem:[%s17115_s3 + $0x384] ss:$8 sps:$4 sm:$0xff]  }
 0x7c2   : > { %7090 = vmatprep.subr.bf16.mxu1 %v13214_v60  ;;  %v7290_v60 = vld [vmem:[#allocation4 + $0x13] sm:$0xff] }
 0x7c3   : > { %v11256_v34 = vpack.c.bf16 %v7290_v60, %v16473_v12  ;;  %v13290_v12 = vld [vmem:[%s17115_s3 + $0x3a0] ss:$8 sps:$4 sm:$0xff]   ;;  %v13406_v60 = vld [vmem:[#allocation10 + $0xc4] ss:$8 sps:$4 sm:$0xff]  }
 0x7c4   : > { %11203 = vmatmul.mubr.msk.bf16.vlgmr.msra.gmra.mrb[24].mxu1 %vm11201_vm10, %v11202_v20  ;;  %v13287_v20 = vld [vmem:[%s17115_s3 + $0x390] ss:$8 sps:$4 sm:$0xff]  }
 0x7c5   : > { %7091 = vmatpush1.bf16.msra.mxu1 %v13212_v55  ;;  %7122 = vmatprep.mubr.bf16.mxu1 %v14194_v21  ;;  %v13289_v55 = vld [vmem:[%s17115_s3 + $0x394] ss:$8 sps:$4 sm:$0xff]  }
 0x7c6   : > { %7092 = vmatprep.subr.bf16.mxu1 %v13217_v0  ;;  %v13292_v0 = vld [vmem:[%s17115_s3 + $0x3a4] ss:$8 sps:$4 sm:$0xff]  }
 0x7c9   : > { %7093 = vmatpush1.bf16.msra.mxu1 %v13215_v49  ;;  %v13295_v49 = vld [vmem:[%s17115_s3 + $0x3b4] ss:$8 sps:$4 sm:$0xff]  }
 0x7ca   : > { %7094 = vmatprep.subr.bf16.mxu1 %v13220_v8  ;;  %v13293_v8 = vld [vmem:[%s17115_s3 + $0x3b0] ss:$8 sps:$4 sm:$0xff]  }
 0x7cd   : > { %7095 = vmatpush1.bf16.msra.mxu1 %v13218_v40  ;;  %v13298_v40 = vld [vmem:[%s17115_s3 + $0x3c4] ss:$8 sps:$4 sm:$0xff]  }
 0x7ce   : > { %7096 = vmatprep.subr.bf16.mxu1 %v13223_v45  ;;  %v13296_v45 = vld [vmem:[%s17115_s3 + $0x3c0] ss:$8 sps:$4 sm:$0xff]  }
 0x7d1   : > { %7097 = vmatpush1.bf16.msra.mxu1 %v13221_v4  ;;  %v13301_v4 = vld [vmem:[%s17115_s3 + $0x3d4] ss:$8 sps:$4 sm:$0xff]  }
 0x7d2   : > { %7098 = vmatprep.subr.bf16.mxu1 %v13226_v41  ;;  %v13299_v41 = vld [vmem:[%s17115_s3 + $0x3d0] ss:$8 sps:$4 sm:$0xff]  }
 0x7d5   : > { %7099 = vmatpush1.bf16.msra.mxu1 %v13224_v5  ;;  %v13304_v5 = vld [vmem:[%s17115_s3 + $0x3e4] ss:$8 sps:$4 sm:$0xff]  }
 0x7d6   : > { %7100 = vmatprep.subr.bf16.mxu1 %v13229_v50  ;;  %v13302_v50 = vld [vmem:[%s17115_s3 + $0x3e0] ss:$8 sps:$4 sm:$0xff]  }
 0x7d9   : > { %7101 = vmatpush1.bf16.msra.mxu1 %v13227_v59  ;;  %v13307_v59 = vld [vmem:[%s17115_s3 + $0x3f4] ss:$8 sps:$4 sm:$0xff]  }
 0x7da   : > { %7102 = vmatprep.subr.bf16.mxu1 %v13232_v3  ;;  %v13305_v3 = vld [vmem:[%s17115_s3 + $0x3f0] ss:$8 sps:$4 sm:$0xff]  }
 0x7dd   : > { %7103 = vmatpush1.bf16.msra.mxu1 %v13230_v35  ;;  %v13310_v35 = vld [vmem:[%s17115_s3 + $0x404] ss:$8 sps:$4 sm:$0xff]  }
 0x7de   : > { %7104 = vmatprep.subr.bf16.mxu1 %v13235_v10  ;;  %v7446_v10 = vld [vmem:[#allocation4 + $0x14] sm:$0xff] }
 0x7e1   : > { %7105 = vmatpush1.bf16.msra.mxu1 %v13233_v27  ;;  %v13308_v27 = vld [vmem:[%s17115_s3 + $0x400] ss:$8 sps:$4 sm:$0xff]  }
 0x7e2   : > { %7242 = vmatprep.subr.bf16.mxu1 %v13238_v57  ;;  %v11275_v57 = vpack.c.bf16 %v7446_v10, %v16524_v24  ;;  %v13314_v24 = vld [vmem:[%s17115_s3 + $0x420] ss:$8 sps:$4 sm:$0xff]  }
 0x7e4   : > { %7123 = vmatmul.mubr.bf16.vlgmr.msra.gmra.mrb[24].mxu1 %v6993_v18  ;;  %v13250_v18 = vld [vmem:[%s17115_s3 + $0x2c4] ss:$8 sps:$4 sm:$0xff]  }
 0x7e5   : > { %7243 = vmatpush1.bf16.msra.mxu1 %v13236_v46  ;;  %7274 = vmatprep.mubr.bf16.mxu1 %v14194_v21  ;;  %v13313_v46 = vld [vmem:[%s17115_s3 + $0x414] ss:$8 sps:$4 sm:$0xff]  }
 0x7e6   : > { %7244 = vmatprep.subr.bf16.mxu1 %v13241_v44  ;;  %v13311_v44 = vld [vmem:[%s17115_s3 + $0x410] ss:$8 sps:$4 sm:$0xff]  }
 0x7e9   : > { %7245 = vmatpush1.bf16.msra.mxu1 %v13239_v16  ;;  %v13316_v16 = vld [vmem:[%s17115_s3 + $0x424] ss:$8 sps:$4 sm:$0xff]  }
 0x7ea   : > { %7246 = vmatprep.subr.bf16.mxu1 %v13244_v56  ;;  %v13319_v56 = vld [vmem:[%s17115_s3 + $0x434] ss:$8 sps:$4 sm:$0xff]  }
 0x7ed   : > { %7247 = vmatpush1.bf16.msra.mxu1 %v13242_v48  ;;  %v13322_v48 = vld [vmem:[%s17115_s3 + $0x444] ss:$8 sps:$4 sm:$0xff]  }
 0x7ee   : > { %7248 = vmatprep.subr.bf16.mxu1 %v13247_v28  ;;  %v13320_v28 = vld [vmem:[%s17115_s3 + $0x440] ss:$8 sps:$4 sm:$0xff]  }
 0x7f1   : > { %7249 = vmatpush1.bf16.msra.mxu1 %v13245_v17  ;;  %v13325_v17 = vld [vmem:[%s17115_s3 + $0x454] ss:$8 sps:$4 sm:$0xff]  }
 0x7f2   : > { %7250 = vmatprep.subr.bf16.mxu1 %v13250_v18  ;;  %v13323_v18 = vld [vmem:[%s17115_s3 + $0x450] ss:$8 sps:$4 sm:$0xff]  }
 0x7f5   : > { %7251 = vmatpush1.bf16.msra.mxu1 %v13248_v11  ;;  %v13328_v11 = vld [vmem:[%s17115_s3 + $0x464] ss:$8 sps:$4 sm:$0xff]  }
 0x7f6   : > { %7252 = vmatprep.subr.bf16.mxu1 %v13253_v32  ;;  %v13326_v32 = vld [vmem:[%s17115_s3 + $0x460] ss:$8 sps:$4 sm:$0xff]  }
 0x7f9   : > { %7253 = vmatpush1.bf16.msra.mxu1 %v13251_v58  ;;  %v13331_v58 = vld [vmem:[%s17115_s3 + $0x474] ss:$8 sps:$4 sm:$0xff]  }
 0x7fa   : > { %7254 = vmatprep.subr.bf16.mxu1 %v13256_v61  ;;  %v13329_v61 = vld [vmem:[%s17115_s3 + $0x470] ss:$8 sps:$4 sm:$0xff]  }
 0x7fd   : > { %7255 = vmatpush1.bf16.msra.mxu1 %v13254_v13  ;;  %v7598_v13 = vld [vmem:[#allocation4 + $0x15] sm:$0xff] }
 0x7fe   : > { %7256 = vmatprep.subr.bf16.mxu1 %v13259_v15  ;;  %v11294_v15 = vpack.c.bf16 %v7598_v13, %v16585_v30  ;;  %v13358_v30 = vld [vmem:[#allocation10 + $0x44] ss:$8 sps:$4 sm:$0xff]  }
 0x801   : > { %7257 = vmatpush1.bf16.msra.mxu1 %v13257_v2  ;;  %v16911_v2 = vld [vmem:[#allocation6] sm:$0xff] }
 0x802   : > { %7398 = vmatprep.subr.bf16.mxu1 %v13262_v26  ;;  %v13332_v26 = vld [vmem:[#allocation10] ss:$8 sps:$4 sm:$0xff]  }
 0x803   : > { %8094 = vmatpush1.bf16.msra.mxu0 %v13332_v26  ;;  %v13343_v26 = vld [vmem:[#allocation10 + $0x314] ss:$8 sps:$4 sm:$0xff]  }
 0x804   : > { %11238 = vmatmul.mubr.msk.bf16.vlgmr.msra.gmra.mrb[24].mxu1 %vm11236_vm2, %v11237_v42  ;;  %8095 = vmatprep.subr.bf16.mxu0 %v13340_v22  ;;  %v13350_v42 = vld [vmem:[#allocation10 + $0x30] ss:$8 sps:$4 sm:$0xff]   ;;  %v13349_v22 = vld [vmem:[#allocation10 + $0x324] ss:$8 sps:$4 sm:$0xff]  }
 0x805   : > { %7399 = vmatpush1.bf16.msra.mxu1 %v13260_v43  ;;  %7430 = vmatprep.mubr.bf16.mxu1 %v14194_v21  ;;  %v13344_v43 = vld [vmem:[#allocation10 + $0x20] ss:$8 sps:$4 sm:$0xff]  }
 0x806   : > { %7400 = vmatprep.subr.bf16.mxu1 %v13265_v54  ;;  %v13356_v54 = vld [vmem:[#allocation10 + $0x40] ss:$8 sps:$4 sm:$0xff]  }
 0x807   : > { %8096 = vmatpush1.bf16.msra.mxu0 %v13338_v38  ;;  %v13347_v38 = vld [vmem:[#allocation10 + $0x320] ss:$8 sps:$4 sm:$0xff]  }
 0x808   : > { %8097 = vmatprep.subr.bf16.mxu0 %v13346_v51  ;;  %v13355_v51 = vld [vmem:[#allocation10 + $0x334] ss:$8 sps:$4 sm:$0xff]  }
 0x809   : > { %7401 = vmatpush1.bf16.msra.mxu1 %v13263_v33  ;;  %v13364_v33 = vld [vmem:[#allocation10 + $0x54] ss:$8 sps:$4 sm:$0xff]  }
 0x80a   : > { %7402 = vmatprep.subr.bf16.mxu1 %v13268_v29  ;;  %v13362_v29 = vld [vmem:[#allocation10 + $0x50] ss:$8 sps:$4 sm:$0xff]  }
 0x80b   : > { %8098 = vmatpush1.bf16.msra.mxu0 %v13344_v43  ;;  %v13353_v43 = vld [vmem:[#allocation10 + $0x330] ss:$8 sps:$4 sm:$0xff]  }
 0x80c   : > { %8099 = vmatprep.subr.bf16.mxu0 %v13352_v25  ;;  %v13361_v25 = vld [vmem:[#allocation10 + $0x344] ss:$8 sps:$4 sm:$0xff]  }
 0x80d   : > { %7403 = vmatpush1.bf16.msra.mxu1 %v13266_v14  ;;  %v13370_v14 = vld [vmem:[#allocation10 + $0x64] ss:$8 sps:$4 sm:$0xff]  }
 0x80e   : > { %7404 = vmatprep.subr.bf16.mxu1 %v13271_v37  ;;  %v13368_v37 = vld [vmem:[#allocation10 + $0x60] ss:$8 sps:$4 sm:$0xff]  }
 0x80f   : > { %8100 = vmatpush1.bf16.msra.mxu0 %v13350_v42  ;;  %v13359_v42 = vld [vmem:[#allocation10 + $0x340] ss:$8 sps:$4 sm:$0xff]  }
 0x810   : > { %8101 = vmatprep.subr.bf16.mxu0 %v13358_v30  ;;  %v13365_v30 = vld [vmem:[#allocation10 + $0x350] ss:$8 sps:$4 sm:$0xff]  }
 0x811   : > { %7405 = vmatpush1.bf16.msra.mxu1 %v13269_v53  ;;  %v13376_v53 = vld [vmem:[#allocation10 + $0x74] ss:$8 sps:$4 sm:$0xff]  }
 0x812   : > { %7406 = vmatprep.subr.bf16.mxu1 %v13274_v23  ;;  %v13374_v23 = vld [vmem:[#allocation10 + $0x70] ss:$8 sps:$4 sm:$0xff]  }
 0x813   : > { %8102 = vmatpush1.bf16.msra.mxu0 %v13356_v54  ;;  %v13373_v54 = vld [vmem:[#allocation10 + $0x364] ss:$8 sps:$4 sm:$0xff]  }
 0x814   : > { %8103 = vmatprep.subr.bf16.mxu0 %v13364_v33  ;;  %v13371_v33 = vld [vmem:[#allocation10 + $0x360] ss:$8 sps:$4 sm:$0xff]  }
 0x815   : > { %7407 = vmatpush1.bf16.msra.mxu1 %v13272_v9  ;;  %v13382_v9 = vld [vmem:[#allocation10 + $0x84] ss:$8 sps:$4 sm:$0xff]  }
 0x816   : > { %7408 = vmatprep.subr.bf16.mxu1 %v13277_v36  ;;  %v13380_v36 = vld [vmem:[#allocation10 + $0x80] ss:$8 sps:$4 sm:$0xff]  }
 0x817   : > { %8104 = vmatpush1.bf16.msra.mxu0 %v13362_v29  ;;  %v13379_v29 = vld [vmem:[#allocation10 + $0x374] ss:$8 sps:$4 sm:$0xff]  }
 0x818   : > { %8105 = vmatprep.subr.bf16.mxu0 %v13370_v14  ;;  %v13377_v14 = vld [vmem:[#allocation10 + $0x370] ss:$8 sps:$4 sm:$0xff]  }
 0x819   : > { %7409 = vmatpush1.bf16.msra.mxu1 %v13275_v47  ;;  %v13388_v47 = vld [vmem:[#allocation10 + $0x94] ss:$8 sps:$4 sm:$0xff]  }
 0x81a   : > { %7410 = vmatprep.subr.bf16.mxu1 %v13280_v52  ;;  %v13386_v52 = vld [vmem:[#allocation10 + $0x90] ss:$8 sps:$4 sm:$0xff]  }
 0x81b   : > { %8106 = vmatpush1.bf16.msra.mxu0 %v13368_v37  ;;  %v13385_v37 = vld [vmem:[#allocation10 + $0x384] ss:$8 sps:$4 sm:$0xff]  }
 0x81c   : > { %8107 = vmatprep.subr.bf16.mxu0 %v13376_v53  ;;  %v13383_v53 = vld [vmem:[#allocation10 + $0x380] ss:$8 sps:$4 sm:$0xff]  }
 0x81d   : > { %7411 = vmatpush1.bf16.msra.mxu1 %v13278_v7  ;;  %v13394_v7 = vld [vmem:[#allocation10 + $0xa4] ss:$8 sps:$4 sm:$0xff]  }
 0x81e   : > { %7412 = vmatprep.subr.bf16.mxu1 %v13283_v39  ;;  %v13392_v39 = vld [vmem:[#allocation10 + $0xa0] ss:$8 sps:$4 sm:$0xff]  }
 0x81f   : > { %8108 = vmatpush1.bf16.msra.mxu0 %v13374_v23  ;;  %v13391_v23 = vld [vmem:[#allocation10 + $0x394] ss:$8 sps:$4 sm:$0xff]  }
 0x820   : > { %8109 = vmatprep.subr.bf16.mxu0 %v13382_v9  ;;  %v13389_v9 = vld [vmem:[#allocation10 + $0x390] ss:$8 sps:$4 sm:$0xff]  }
 0x821   : > { %7413 = vmatpush1.bf16.msra.mxu1 %v13281_v1  ;;  %v13400_v1 = vld [vmem:[#allocation10 + $0xb4] ss:$8 sps:$4 sm:$0xff]  }
 0x822   : > { %7550 = vmatprep.subr.bf16.mxu1 %v13286_v31  ;;  %v13398_v31 = vld [vmem:[#allocation10 + $0xb0] ss:$8 sps:$4 sm:$0xff]  }
 0x823   : > { %8110 = vmatpush1.bf16.msra.mxu0 %v13380_v36  ;;  %v13397_v36 = vld [vmem:[#allocation10 + $0x3a4] ss:$8 sps:$4 sm:$0xff]  }
 0x824   : > { %11257 = vmatmul.mubr.msk.bf16.vlgmr.msra.gmra.mrb[24].mxu1 %vm11255_vm5, %v11256_v34  ;;  %8111 = vmatprep.subr.bf16.mxu0 %v13388_v47  ;;  %v7764_v34 = vshra.s32 %v17604_v6, 1  ;;  %v13395_v47 = vld [vmem:[#allocation10 + $0x3a0] ss:$8 sps:$4 sm:$0xff]   ;;  %vm7879_vm5 = vcmp.ge.s32.totalorder %v17604_v6, 2 }
 0x825   : > { %7551 = vmatpush1.bf16.msra.mxu1 %v13284_v62  ;;  %7582 = vmatprep.mubr.bf16.mxu1 %v14194_v21  ;;  %v13404_v62 = vld [vmem:[#allocation10 + $0xc0] ss:$8 sps:$4 sm:$0xff]  }
 0x826   : > { %7552 = vmatprep.subr.bf16.mxu1 %v13289_v55  ;;  %v16916_v55 = vand.u32 1, %v17604_v6 }
 0x827   : > { %8112 = vmatpush1.bf16.msra.mxu0 %v13386_v52  ;;  %v13403_v52 = vld [vmem:[#allocation10 + $0x3b4] ss:$8 sps:$4 sm:$0xff]  }
 0x828   : > { %8113 = vmatprep.subr.bf16.mxu0 %v13394_v7  ;;  %v13401_v7 = vld [vmem:[#allocation10 + $0x3b0] ss:$8 sps:$4 sm:$0xff]  }
 0x829   : > { %7553 = vmatpush1.bf16.msra.mxu1 %v13287_v20  ;;  %v7765_v20 = vmul.u32 2, %v7764_v34  ;;  %v13415_v34 = vld [vmem:[#allocation10 + $0x3d4] ss:$8 sps:$4 sm:$0xff]  }
 0x82a   : > { %7554 = vmatprep.subr.bf16.mxu1 %v13292_v0 }
 0x82b   : > { %8114 = vmatpush1.bf16.msra.mxu0 %v13392_v39  ;;  %v7766_v0 = vmul.u32 4, %v7765_v20  ;;  %v13409_v39 = vld [vmem:[#allocation10 + $0x3c4] ss:$8 sps:$4 sm:$0xff]  }
 0x82c   : > { %8115 = vmatprep.subr.bf16.mxu0 %v13400_v1  ;;  %v13407_v1 = vld [vmem:[#allocation10 + $0x3c0] ss:$8 sps:$4 sm:$0xff]   ;;  %v13418_v20 = vld [vmem:[#allocation10 + $0xe4] ss:$8 sps:$4 sm:$0xff]  }
 0x82d   : > { %7555 = vmatpush1.bf16.msra.mxu1 %v13290_v12  ;;  %v7767_v12 = vmul.u32 2, %v16916_v55 }
 0x82e   : > { %7556 = vmatprep.subr.bf16.mxu1 %v13295_v49 }
 0x82f   : > { %8116 = vmatpush1.bf16.msra.mxu0 %v13398_v31  ;;  %v7768_v49 = vadd.s32 %v7767_v12, %v7766_v0  ;;  %v13410_v31 = vld [vmem:[#allocation10 + $0xd0] ss:$8 sps:$4 sm:$0xff]   ;;  %v13421_v0 = vld [vmem:[#allocation10 + $0x3e4] ss:$8 sps:$4 sm:$0xff]   ;;  %v13416_v12 = vld [vmem:[#allocation10 + $0xe0] ss:$8 sps:$4 sm:$0xff]  }
 0x830   : > { %8117 = vmatprep.subr.bf16.mxu0 %v13406_v60  ;;  %v13412_v60 = vld [vmem:[#allocation10 + $0xd4] ss:$8 sps:$4 sm:$0xff]  }
 0x831   : > { %7557 = vmatpush1.bf16.msra.mxu1 %v13293_v8  ;;  %v16920_v8 = vsub.s32 0, %v17604_v6  ;;  %vm7769_vm15 = vcmp.eq.s32.totalorder %v15583_v19, %v7768_v49 }
 0x832   : > { %7558 = vmatprep.subr.bf16.mxu1 %v13298_v40  ;;  %v6361_v40 = vld [vmem:[#allocation18] sm:$0x3] }
 0x833   : > { %8118 = vmatpush1.bf16.msra.mxu0 %v13404_v62  ;;  %v13413_v62 = vld [vmem:[#allocation10 + $0x3d0] ss:$8 sps:$4 sm:$0xff]  }
 0x834   : > { %8119 = vmatprep.subr.bf16.mxu0 %v13412_v60  ;;  %v13448_v60 = vld [vmem:[#allocation10 + $0x134] ss:$8 sps:$4 sm:$0xff]  }
 0x835   : > { %7559 = vmatpush1.bf16.msra.mxu1 %v13296_v45  ;;  %v16923_v45 = vsub.s32 1, %v17604_v6 }
 0x836   : > { %7560 = vmatprep.subr.bf16.mxu1 %v13301_v4  ;;  %v7770_v4 = vadd.s32 1, %v7768_v49 }
 0x837   : > { %8120 = vmatpush1.bf16.msra.mxu0 %v13410_v31  ;;  %v13443_v31 = vld [vmem:[#allocation10 + $0x420] ss:$8 sps:$4 sm:$0xff]  }
 0x838   : > { %vm7771_vm14 = vcmp.eq.s32.totalorder %v15583_v19, %v7770_v4  ;;  %8121 = vmatprep.subr.bf16.mxu0 %v13418_v20  ;;  %v13427_v4 = vld [vmem:[#allocation10 + $0x3f4] ss:$8 sps:$4 sm:$0xff]   ;;  %v13449_v20 = vld [vmem:[#allocation10 + $0x430] ss:$8 sps:$4 sm:$0xff]  }
 0x839   : > { %7561 = vmatpush1.bf16.msra.mxu1 %v13299_v41  ;;  %v6366_v41 = vrot.slane %v6361_v40, %v16920_v8  ;;  %vm7772_vm4 = vmor %vm7769_vm15, %vm7771_vm14  ;;  %vm8406_vm15 = vcmask 1040384  }
 0x83a   : > { %7562 = vmatprep.subr.bf16.mxu1 %v13304_v5  ;;  %v6370_v5 = vrot.slane %v6361_v40, %v16923_v45  ;;  %v13424_v40 = vld [vmem:[#allocation10 + $0xf4] ss:$8 sps:$4 sm:$0xff]  }
 0x83b   : > { %8122 = vmatpush1.bf16.msra.mxu0 %v13416_v12  ;;  %v13457_v12 = vld [vmem:[#allocation10 + $0x444] ss:$8 sps:$4 sm:$0xff]  }
 0x83c   : > { %8123 = vmatprep.subr.bf16.mxu0 %v13424_v40  ;;  %v13455_v40 = vld [vmem:[#allocation10 + $0x440] ss:$8 sps:$4 sm:$0xff]  }
 0x83d   : > { %7563 = vmatpush1.bf16.msra.mxu1 %v13302_v50  ;;  %v7773_v50 = vadd.s32 4, %v7768_v49  ;;  %v13419_v49 = vld [vmem:[#allocation10 + $0x3e0] ss:$8 sps:$4 sm:$0xff]  }
 0x83e   : > { %7564 = vmatprep.subr.bf16.mxu1 %v13307_v59 }
 0x83f   : > { %vm7774_vm8 = vcmp.eq.s32.totalorder %v15583_v19, %v7773_v50 }
 0x840   : > { %vm7775_vm10 = vmor %vm7772_vm4, %vm7774_vm8  ;;  %vm8146_vm4 = vcmask 1041408  }
 0x841   : > { %7565 = vmatpush1.bf16.msra.mxu1 %v13305_v3 }
 0x842   : > { %7704 = vmatprep.subr.bf16.mxu1 %v13310_v35 }
 0x844   : > { %11276 = vmatmul.mubr.msk.bf16.vlgmr.msra.gmra.mrb[24].mxu1 %vm11274_vm1, %v11275_v57  ;;  %v7776_v57 = vadd.s32 1, %v7773_v50  ;;  %v13430_v50 = vld [vmem:[#allocation10 + $0x104] ss:$8 sps:$4 sm:$0xff]   ;;  %vm7880_vm1 = vcmp.ge.s32.totalorder %v16916_v55, 1 }
 0x845   : > { %7705 = vmatpush1.bf16.msra.mxu1 %v13308_v27  ;;  %7736 = vmatprep.mubr.bf16.mxu1 %v14194_v21  ;;  %v13317_v21 = vld [vmem:[%s17115_s3 + $0x430] ss:$8 sps:$4 sm:$0xff]   ;;  %vm11443_vm8 = vmpackc.low %vm7880_vm1, %vm7880_vm1 }
 0x846   : > { %7706 = vmatprep.subr.bf16.mxu1 %v13313_v46  ;;  %vm7777_vm2 = vcmp.eq.s32.totalorder %v15583_v19, %v7776_v57  ;;  %v8394_v57 = vld [vmem:[#allocation5] sm:$0x80] }
 0x847   : > { %vm7778_vm3 = vmor %vm7775_vm10, %vm7777_vm2  ;;  %vm9383_vm2 = vcmp.lt.s32.totalorder %v17604_v6, 2 }
 0x848   : > { %v7779_v13 = vsel %vm7778_vm3, 0.25, %v16911_v2  ;;  %vm17016_vm3 = vmand %vm9383_vm2, %vm7880_vm1 }
 0x849   : > { %7707 = vmatpush1.bf16.msra.mxu1 %v13311_v44 }
 0x84a   : > { %7708 = vmatprep.subr.bf16.mxu1 %v13316_v16 }
 0x84d   : > { %7709 = vmatpush1.bf16.msra.mxu1 %v13314_v24 }
 0x84e   : > { %7710 = vmatprep.subr.bf16.mxu1 %v13319_v56 }
 0x851   : > { %7711 = vmatpush1.bf16.msra.mxu1 %v13317_v21 }
 0x852   : > { %7712 = vmatprep.subr.bf16.mxu1 %v13322_v48 }
 0x855   : > { %7713 = vmatpush1.bf16.msra.mxu1 %v13320_v28 }
 0x856   : > { %7714 = vmatprep.subr.bf16.mxu1 %v13325_v17 }
 0x859   : > { %7715 = vmatpush1.bf16.msra.mxu1 %v13323_v18 }
 0x85a   : > { %7716 = vmatprep.subr.bf16.mxu1 %v13328_v11 }
 0x85d   : > { %7717 = vmatpush1.bf16.msra.mxu1 %v13326_v32 }
 0x85e   : > { %7718 = vmatprep.subr.bf16.mxu1 %v13331_v58 }
 0x861   : > { %7719 = vmatpush1.bf16.msra.mxu1 %v13329_v61  ;;  %v13337_v61 = vld [vmem:[#allocation10 + $0x304] ss:$8 sps:$4 sm:$0xff]  }
 0x864   : > { %11295 = vmatmul.mubr.msk.bf16.vlgmr.msra.gmra.mrb[24].mxu1 %vm11293_vm12, %v11294_v15  ;;  %v13335_v15 = vld [vmem:[#allocation10 + $0x300] ss:$8 sps:$4 sm:$0xff]   ;;  %vm16938_vm12 = vmand %vm7879_vm5, %vm7880_vm1 }
 0x865   : > { %7848 = vmatprep.mubr.f32.mxu1 %v16911_v2  ;;  %v13367_v2 = vld [vmem:[#allocation10 + $0x354] ss:$8 sps:$4 sm:$0xff]   ;;  %vm11329_vm14 = vmpackc.low %vm16938_vm12, %vm16938_vm12 }
 0x937   : > { %v7738_v59 = vpop.f32.mrb[24].mxu1 }
 0x938   : > { %v12575_v3 = vadd.f32 %v7738_v59, %v6366_v41  ;;  %v7740_v35 = vpop.f32.mrb[25].mxu1  ;;  %v13433_v59 = vld [vmem:[#allocation10 + $0x404] ss:$8 sps:$4 sm:$0xff]  }
 0x939   : > { %v12576_v10 = vadd.f32 %v7740_v35, %v6370_v5  ;;  %v7742_v27 = vpop.f32.mrb[26].mxu1 }
 0x93a   : > { %v7755_v46 = vmul.f32 0.1, %v12575_v3  ;;  %v12577_v44 = vadd.f32 %v7742_v27, %v6366_v41  ;;  %v7744_v16 = vpop.f32.mrb[27].mxu1  ;;  %vm7751_vm13 = vcmp.ge.f32.partialorder %v12575_v3, 0.0  ;;  %v13422_v41 = vld [vmem:[#allocation10 + $0xf0] ss:$8 sps:$4 sm:$0xff]  }
 0x93b   : > { %v7756_v24 = vmul.f32 0.1, %v12576_v10  ;;  %v12578_v56 = vadd.f32 %v7744_v16, %v6370_v5  ;;  %vm7752_vm9 = vcmp.ge.f32.partialorder %v12576_v10, 0.0  ;;  %v13425_v5 = vld [vmem:[#allocation10 + $0x3f0] ss:$8 sps:$4 sm:$0xff]   ;;  %8124 = vmatpush1.bf16.msra.mxu0 %v13422_v41 }
 0x93c   : > { %vm7753_vm6 = vcmp.ge.f32.partialorder %v12577_v44, 0.0  ;;  %v7757_v21 = vmul.f32 0.1, %v12577_v44  ;;  %v7759_v28 = vsel %vm7751_vm13, %v12575_v3, %v7755_v46  ;;  %8351 = vmatprep.subr.bf16.mxu0 %v13430_v50  ;;  %v7876_v27 = vld [vmem:[#allocation5 + $0x8] sm:$0xe0]  ;;  %vm16972_vm13 = vmpackc.low %vm7879_vm5, %vm7879_vm5 }
 0x93d   : > { %vm7754_vm11 = vcmp.ge.f32.partialorder %v12578_v56, 0.0  ;;  %v7758_v48 = vmul.f32 0.1, %v12578_v56  ;;  %v7760_v11 = vsel %vm7752_vm9, %v12576_v10, %v7756_v24  ;;  %v7875_v10 = vld [vmem:[#allocation5] sm:$0xe0]  ;;  %v7892_v16 = vrot.slane %v7876_v27, 5 }
 0x93e   : > { %v7761_v17 = vsel %vm7753_vm6, %v12577_v44, %v7757_v21  ;;  %v8395_v46 = vld [vmem:[#allocation5 + $0x8] sm:$0x80]  ;;  %v7889_v44 = vrot.slane %v7875_v10, 5  ;;  %v8407_v24 = vrot.slane %v8394_v57, 7  ;;  %v13461_v50 = vld [vmem:[#allocation10 + $0x450] ss:$8 sps:$4 sm:$0xff]  }
 0x93f   : > { %v12519_v18 = vpack.c.bf16 %v7761_v17, %v7759_v28  ;;  %v7762_v32 = vsel %vm7754_vm11, %v12578_v56, %v7758_v48  ;;  %v8137_v56 = vld [vmem:[#allocation5 + $0x8] sm:$0xc0]  ;;  %v8410_v28 = vrot.slane %v8395_v46, 7  ;;  %v13467_v10 = vld [vmem:[#allocation10 + $0x460] ss:$8 sps:$4 sm:$0xff]   ;;  %vm8398_vm9 = vcmp.lt.s32.totalorder %v16916_v55, 1 }
 0x940   : > { %v12517_v58 = vpack.c.bf16 %v7762_v32, %v7760_v11  ;;  %v13463_v41 = vld [vmem:[#allocation10 + $0x454] ss:$8 sps:$4 sm:$0xff]   ;;  %v13470_v46 = vld [vmem:[#allocation10 + $0x170] ss:$8 sps:$4 sm:$0xff]   ;;  %vm16984_vm6 = vmand %vm7879_vm5, %vm8398_vm9 }
 0x941   : > { %v13472_v27 = vld [vmem:[#allocation10 + $0x174] ss:$8 sps:$4 sm:$0xff]   ;;  %vm11405_vm11 = vmpackc.low %vm16984_vm6, %vm16984_vm6  ;;  %v13719_v55 = vld [vmem:[#allocation10 + $0x810] ss:$8 sps:$4 sm:$0xff]  }
 0x942   : > { %12518 = vmatprep.subr.bf16.mxu1 %v12517_v58  ;;  %v13475_v57 = vld [vmem:[#allocation10 + $0x474] ss:$8 sps:$4 sm:$0xff]   ;;  %vm16994_vm10 = vmpackc.low %vm8398_vm9, %vm8398_vm9 }
 0x943   : > { %12520 = vmatpush1.bf16.msra.mxu1 %v12519_v18  ;;  %v13484_v48 = vld [vmem:[#allocation10 + $0x194] ss:$8 sps:$4 sm:$0xff]   ;;  %vm17046_vm5 = vmpackc.low %vm9383_vm2, %vm9383_vm2 }
 0x944   : > { %8852 = vmatprep.subr.bf16.mxu1 %v13337_v61  ;;  %vm17062_vm1 = vmand %vm9383_vm2, %vm8398_vm9  ;;  %vm17621_vm2 = vcmask 1043456  }
 0x946   : > { %11296 = vmatmul.mubr.msk.f32.vlgmr.msra.gmra.mrb[22].mxu1 %vm7780_vm7, %v7779_v13  ;;  %vm11551_vm7 = vmpackc.low %vm17016_vm3, %vm17016_vm3 }
 0x947   : > { %8853 = vmatpush1.bf16.msra.mxu1 %v13335_v15  ;;  %vm17622_vm3 = vmmov %vm17621_vm2 }
 0x948   : > { %8854 = vmatprep.subr.bf16.mxu1 %v13343_v26  ;;  %v8150_v26 = vrot.slane %v8137_v56, 6  ;;  %v13476_v56 = vld [vmem:[#allocation10 + $0x180] ss:$8 sps:$4 sm:$0xff]  }
 0x94b   : > { %8855 = vmatpush1.bf16.msra.mxu1 %v13341_v63 }
 0x94c   : > { %8856 = vmatprep.subr.bf16.mxu1 %v13349_v22 }
 0x94f   : > { %8857 = vmatpush1.bf16.msra.mxu1 %v13347_v38 }
 0x950   : > { %8858 = vmatprep.subr.bf16.mxu1 %v13355_v51 }
 0x953   : > { %8859 = vmatpush1.bf16.msra.mxu1 %v13353_v43 }
 0x954   : > { %8860 = vmatprep.subr.bf16.mxu1 %v13361_v25 }
 0x957   : > { %8861 = vmatpush1.bf16.msra.mxu1 %v13359_v42  ;;  %v13428_v42 = vld [vmem:[#allocation10 + $0x100] ss:$8 sps:$4 sm:$0xff]  }
 0x958   : > { %8862 = vmatprep.subr.bf16.mxu1 %v13367_v2 }
 0x95b   : > { %8863 = vmatpush1.bf16.msra.mxu1 %v13365_v30  ;;  %v13431_v30 = vld [vmem:[#allocation10 + $0x400] ss:$8 sps:$4 sm:$0xff]  }
 0x95c   : > { %8864 = vmatprep.subr.bf16.mxu1 %v13373_v54 }
 0x95f   : > { %8865 = vmatpush1.bf16.msra.mxu1 %v13371_v33 }
 0x960   : > { %8866 = vmatprep.subr.bf16.mxu1 %v13379_v29  ;;  %v13436_v29 = vld [vmem:[#allocation10 + $0x114] ss:$8 sps:$4 sm:$0xff]  }
 0x963   : > { %8867 = vmatpush1.bf16.msra.mxu1 %v13377_v14  ;;  %v13439_v14 = vld [vmem:[#allocation10 + $0x414] ss:$8 sps:$4 sm:$0xff]  }
 0x964   : > { %8868 = vmatprep.subr.bf16.mxu1 %v13385_v37 }
 0x967   : > { %8869 = vmatpush1.bf16.msra.mxu1 %v13383_v53 }
 0x968   : > { %8870 = vmatprep.subr.bf16.mxu1 %v13391_v23  ;;  %v13538_v23 = vld [vmem:[#allocation10 + $0x224] ss:$8 sps:$4 sm:$0xff]  }
 0x96b   : > { %8871 = vmatpush1.bf16.msra.mxu1 %v13389_v9  ;;  %v13434_v9 = vld [vmem:[#allocation10 + $0x110] ss:$8 sps:$4 sm:$0xff]  }
 0x96c   : > { %8872 = vmatprep.subr.bf16.mxu1 %v13397_v36  ;;  %v13437_v36 = vld [vmem:[#allocation10 + $0x410] ss:$8 sps:$4 sm:$0xff]  }
 0x96f   : > { %8873 = vmatpush1.bf16.msra.mxu1 %v13395_v47 }
 0x970   : > { %8874 = vmatprep.subr.bf16.mxu1 %v13403_v52 }
 0x973   : > { %8875 = vmatpush1.bf16.msra.mxu1 %v13401_v7  ;;  %v13442_v7 = vld [vmem:[#allocation10 + $0x124] ss:$8 sps:$4 sm:$0xff]  }
 0x974   : > { %8876 = vmatprep.subr.bf16.mxu1 %v13409_v39  ;;  %v13445_v39 = vld [vmem:[#allocation10 + $0x424] ss:$8 sps:$4 sm:$0xff]  }
 0x977   : > { %8877 = vmatpush1.bf16.msra.mxu1 %v13407_v1  ;;  %v13440_v1 = vld [vmem:[#allocation10 + $0x120] ss:$8 sps:$4 sm:$0xff]  }
 0x978   : > { %8878 = vmatprep.subr.bf16.mxu1 %v13415_v34  ;;  %v13446_v34 = vld [vmem:[#allocation10 + $0x130] ss:$8 sps:$4 sm:$0xff]  }
 0x97b   : > { %8879 = vmatpush1.bf16.msra.mxu1 %v13413_v62  ;;  %v13451_v62 = vld [vmem:[#allocation10 + $0x434] ss:$8 sps:$4 sm:$0xff]  }
 0x97c   : > { %8880 = vmatprep.subr.bf16.mxu1 %v13421_v0  ;;  %v13454_v0 = vld [vmem:[#allocation10 + $0x144] ss:$8 sps:$4 sm:$0xff]  }
 0x97f   : > { %8881 = vmatpush1.bf16.msra.mxu1 %v13419_v49  ;;  %v13452_v49 = vld [vmem:[#allocation10 + $0x140] ss:$8 sps:$4 sm:$0xff]  }
 0x980   : > { %8882 = vmatprep.subr.bf16.mxu1 %v13427_v4  ;;  %v13460_v4 = vld [vmem:[#allocation10 + $0x154] ss:$8 sps:$4 sm:$0xff]  }
 0x983   : > { %8883 = vmatpush1.bf16.msra.mxu1 %v13425_v5  ;;  %v13458_v5 = vld [vmem:[#allocation10 + $0x150] ss:$8 sps:$4 sm:$0xff]  }
 0x984   : > { %9091 = vmatprep.subr.bf16.mxu1 %v13433_v59  ;;  %v13466_v59 = vld [vmem:[#allocation10 + $0x164] ss:$8 sps:$4 sm:$0xff]  }
 0xa19   : > { %v7850_v3 = vpop.f32.mrb[22].mxu1 }
 0xa1a   : > { %7861 = vst [vmem:[#allocation5 + $0x10] sm:$0xf] %v7850_v3  ;;  %v7852_v35 = vpop.f32.mrb[23].mxu1  ;;  %v13469_v3 = vld [vmem:[#allocation10 + $0x464] ss:$8 sps:$4 sm:$0xff]  }
 0xa1b   : > { %7862 = vst [vmem:[#allocation5 + $0x18] sm:$0xf] %v7852_v35  ;;  %v13464_v35 = vld [vmem:[#allocation10 + $0x160] ss:$8 sps:$4 sm:$0xff]  }
 0xa21   : > { %v7877_v21 = vld [vmem:[#allocation5 + $0x10] sm:$0x1] }
 0xa22   : > { %v8396_v17 = vld [vmem:[#allocation5 + $0x10] sm:$0x7]  ;;  %v7878_v18 = vld [vmem:[#allocation5 + $0x18] sm:$0x1]  ;;  %v7890_v11 = vrot.slane %v7877_v21, 5 }
 0xa23   : > { %v8397_v32 = vld [vmem:[#allocation5 + $0x18] sm:$0x7]  ;;  %v8408_v58 = vrot.slane %v8396_v17, 7  ;;  %v7893_v61 = vrot.slane %v7878_v18, 5  ;;  %v13482_v17 = vld [vmem:[#allocation10 + $0x190] ss:$8 sps:$4 sm:$0xff]  }
 0xa24   : > { %v8411_v13 = vrot.slane %v8397_v32, 7  ;;  %v8139_v15 = vld [vmem:[#allocation5 + $0x18] sm:$0x3]  ;;  %v7891_v63 = vsel %vm7888_vm0, %v7889_v44, %v7890_v11  ;;  %v13473_v44 = vld [vmem:[#allocation10 + $0x470] ss:$8 sps:$4 sm:$0xff]  }
 0xa25   : > { %v8409_v22 = vsel %vm8406_vm15, %v8407_v24, %v8408_v58  ;;  %v8151_v38 = vrot.slane %v8139_v15, 6  ;;  %v7894_v51 = vsel %vm7888_vm0, %v7892_v16, %v7893_v61  ;;  %v11333_v54 = vpack.c.bf16 %v7891_v63, %v7891_v63  ;;  %v8896_v37 = vld [vmem:[#allocation5 + $0x18] sm:$0xf]  ;;  %v13478_v16 = vld [vmem:[#allocation10 + $0x184] ss:$8 sps:$4 sm:$0xff]   ;;  %vm11627_vm0 = vmpackc.low %vm17062_vm1, %vm17062_vm1 }
 0xa26   : > { %v8412_v43 = vsel %vm8406_vm15, %v8410_v28, %v8411_v13  ;;  %v11330_v25 = vpack.c.bf16 %v7894_v51, %v7894_v51  ;;  %v16954_v33 = vpack.c.bf16 %v8409_v22, %v8409_v22  ;;  %v8898_v47 = vpack.c.bf16 %v8896_v37, %v8896_v37  ;;  %v13481_v24 = vld [vmem:[#allocation10 + $0x484] ss:$8 sps:$4 sm:$0xff]   ;;  %v13479_v21 = vld [vmem:[#allocation10 + $0x480] ss:$8 sps:$4 sm:$0xff]   ;;  %v13487_v28 = vld [vmem:[#allocation10 + $0x494] ss:$8 sps:$4 sm:$0xff]  }
 0xa27   : > { %v16952_v2 = vpack.c.bf16 %v8412_v43, %v8412_v43  ;;  %v8152_v53 = vsel %vm8146_vm4, %v8150_v26, %v8151_v38  ;;  %v13485_v18 = vld [vmem:[#allocation10 + $0x490] ss:$8 sps:$4 sm:$0xff]   ;;  %v13490_v11 = vld [vmem:[#allocation10 + $0x1a4] ss:$8 sps:$4 sm:$0xff]   ;;  %v13488_v58 = vld [vmem:[#allocation10 + $0x1a0] ss:$8 sps:$4 sm:$0xff]  }
 0xa28   : > { %11331 = vmatprep.mubr.msk.bf16.mxu0 %vm11329_vm14, %v11330_v25  ;;  %v11368_v52 = vpack.c.bf16 %v8152_v53, %v8152_v53  ;;  %v13493_v32 = vld [vmem:[#allocation10 + $0x4a4] ss:$8 sps:$4 sm:$0xff]   ;;  %v13491_v61 = vld [vmem:[#allocation10 + $0x4a0] ss:$8 sps:$4 sm:$0xff]   ;;  %v13496_v13 = vld [vmem:[#allocation10 + $0x1b4] ss:$8 sps:$4 sm:$0xff]  }
 0xa29   : > { %11445 = vmatprep.mubr.msk.bf16.mxu1 %vm11443_vm8, %v16952_v2  ;;  %11334 = vmatmul.mubr.msk.bf16.vlgmr.msra.gmra.mrb[48].mxu0 %vm11329_vm14, %v11333_v54  ;;  %v13499_v15 = vld [vmem:[#allocation10 + $0x4b4] ss:$8 sps:$4 sm:$0xff]   ;;  %v13494_v26 = vld [vmem:[#allocation10 + $0x1b0] ss:$8 sps:$4 sm:$0xff]   ;;  %v13502_v22 = vld [vmem:[#allocation10 + $0x1c4] ss:$8 sps:$4 sm:$0xff]  }
 0xa2a   : > { %11448 = vmatmul.mubr.msk.bf16.vlgmr.msra.gmra.mrb[28].mxu1 %vm11443_vm8, %v16954_v33  ;;  %8352 = vmatpush1.bf16.msra.mxu0 %v13428_v42  ;;  %v13497_v63 = vld [vmem:[#allocation10 + $0x4b0] ss:$8 sps:$4 sm:$0xff]   ;;  %v13505_v38 = vld [vmem:[#allocation10 + $0x4c4] ss:$8 sps:$4 sm:$0xff]   ;;  %v13500_v51 = vld [vmem:[#allocation10 + $0x1c0] ss:$8 sps:$4 sm:$0xff]  }
 0xa2b   : > { %9092 = vmatpush1.bf16.msra.mxu1 %v13431_v30  ;;  %8353 = vmatprep.subr.bf16.mxu0 %v13436_v29  ;;  %v13503_v43 = vld [vmem:[#allocation10 + $0x4c0] ss:$8 sps:$4 sm:$0xff]   ;;  %v13508_v25 = vld [vmem:[#allocation10 + $0x1d4] ss:$8 sps:$4 sm:$0xff]   ;;  %v13506_v30 = vld [vmem:[#allocation10 + $0x1d0] ss:$8 sps:$4 sm:$0xff]  }
 0xa2c   : > { %9093 = vmatprep.subr.bf16.mxu1 %v13439_v14  ;;  %9123 = vmatprep.mubr.bf16.mxu1 %v8898_v47  ;;  %v13511_v42 = vld [vmem:[#allocation10 + $0x4d4] ss:$8 sps:$4 sm:$0xff]   ;;  %v13509_v54 = vld [vmem:[#allocation10 + $0x4d0] ss:$8 sps:$4 sm:$0xff]   ;;  %v13514_v29 = vld [vmem:[#allocation10 + $0x1e4] ss:$8 sps:$4 sm:$0xff]  }
 0xa2d   : > { %11369 = vmatprep.mubr.msk.bf16.mxu0 %vm16972_vm13, %v11368_v52  ;;  %v13517_v14 = vld [vmem:[#allocation10 + $0x4e4] ss:$8 sps:$4 sm:$0xff]   ;;  %v8136_v37 = vld [vmem:[#allocation5] sm:$0xc0]  ;;  %v8138_v53 = vld [vmem:[#allocation5 + $0x10] sm:$0x3] }
 0xa2e   : > { %8354 = vmatpush1.bf16.msra.mxu0 %v13434_v9  ;;  %v13512_v9 = vld [vmem:[#allocation10 + $0x1e0] ss:$8 sps:$4 sm:$0xff]   ;;  %v13520_v47 = vld [vmem:[#allocation10 + $0x1f4] ss:$8 sps:$4 sm:$0xff]  }
 0xa2f   : > { %9094 = vmatpush1.bf16.msra.mxu1 %v13437_v36  ;;  %8355 = vmatprep.subr.bf16.mxu0 %v13442_v7  ;;  %v13515_v36 = vld [vmem:[#allocation10 + $0x4e0] ss:$8 sps:$4 sm:$0xff]   ;;  %v13523_v52 = vld [vmem:[#allocation10 + $0x4f4] ss:$8 sps:$4 sm:$0xff]   ;;  %v8147_v7 = vrot.slane %v8136_v37, 6 }
 0xa30   : > { %9095 = vmatprep.subr.bf16.mxu1 %v13445_v39  ;;  %v8148_v39 = vrot.slane %v8138_v53, 6  ;;  %v13581_v37 = vld [vmem:[#allocation10 + $0x590] ss:$8 sps:$4 sm:$0xff]   ;;  %v13586_v53 = vld [vmem:[#allocation10 + $0x2a4] ss:$8 sps:$4 sm:$0xff]  }
 0xa32   : > { %8356 = vmatpush1.bf16.msra.mxu0 %v13440_v1  ;;  %v13518_v1 = vld [vmem:[#allocation10 + $0x1f0] ss:$8 sps:$4 sm:$0xff]  }
 0xa33   : > { %9096 = vmatpush1.bf16.msra.mxu1 %v13443_v31  ;;  %8357 = vmatprep.subr.bf16.mxu0 %v13448_v60  ;;  %v13521_v31 = vld [vmem:[#allocation10 + $0x4f0] ss:$8 sps:$4 sm:$0xff]   ;;  %v9135_v60 = vld [vmem:[#allocation5 + $0x18] sm:$0x1e] }
 0xa34   : > { %9097 = vmatprep.subr.bf16.mxu1 %v13451_v62  ;;  %v13526_v62 = vld [vmem:[#allocation10 + $0x204] ss:$8 sps:$4 sm:$0xff]  }
 0xa36   : > { %8358 = vmatpush1.bf16.msra.mxu0 %v13446_v34  ;;  %v13529_v34 = vld [vmem:[#allocation10 + $0x504] ss:$8 sps:$4 sm:$0xff]  }
 0xa37   : > { %9098 = vmatpush1.bf16.msra.mxu1 %v13449_v20  ;;  %8359 = vmatprep.subr.bf16.mxu0 %v13454_v0  ;;  %v8149_v20 = vsel %vm8146_vm4, %v8147_v7, %v8148_v39  ;;  %v8895_v0 = vld [vmem:[#allocation5 + $0x10] sm:$0xf]  ;;  %v13595_v7 = vld [vmem:[#allocation10 + $0x5b4] ss:$8 sps:$4 sm:$0xff]   ;;  %v13590_v39 = vld [vmem:[#allocation10 + $0x2b0] ss:$8 sps:$4 sm:$0xff]  }
 0xa38   : > { %9099 = vmatprep.subr.bf16.mxu1 %v13457_v12  ;;  %v13628_v12 = vld [vmem:[#allocation10 + $0x624] ss:$8 sps:$4 sm:$0xff]  }
 0xa3a   : > { %8360 = vmatpush1.bf16.msra.mxu0 %v13452_v49  ;;  %v9141_v49 = vrot.slane %v9135_v60, 1  ;;  %v13601_v60 = vld [vmem:[#allocation10 + $0x5c4] ss:$8 sps:$4 sm:$0xff]  }
 0xa3b   : > { %9100 = vmatpush1.bf16.msra.mxu1 %v13455_v40  ;;  %8361 = vmatprep.subr.bf16.mxu0 %v13460_v4  ;;  %v13524_v40 = vld [vmem:[#allocation10 + $0x200] ss:$8 sps:$4 sm:$0xff]   ;;  %v11371_v4 = vpack.c.bf16 %v8149_v20, %v8149_v20  ;;  %v13604_v20 = vld [vmem:[#allocation10 + $0x2d4] ss:$8 sps:$4 sm:$0xff]  }
 0xa3c   : > { %9101 = vmatprep.subr.bf16.mxu1 %v13463_v41  ;;  %v8897_v41 = vpack.c.bf16 %v8895_v0, %v8895_v0  ;;  %v13607_v0 = vld [vmem:[#allocation10 + $0x5d4] ss:$8 sps:$4 sm:$0xff]  }
 0xa3e   : > { %8362 = vmatpush1.bf16.msra.mxu0 %v13458_v5  ;;  %v13527_v5 = vld [vmem:[#allocation10 + $0x500] ss:$8 sps:$4 sm:$0xff]  }
 0xa3f   : > { %9102 = vmatpush1.bf16.msra.mxu1 %v13461_v50  ;;  %8363 = vmatprep.subr.bf16.mxu0 %v13466_v59  ;;  %v13532_v59 = vld [vmem:[#allocation10 + $0x214] ss:$8 sps:$4 sm:$0xff]  }
 0xa40   : > { %9103 = vmatprep.subr.bf16.mxu1 %v13469_v3  ;;  %v13535_v3 = vld [vmem:[#allocation10 + $0x514] ss:$8 sps:$4 sm:$0xff]  }
 0xa41   : > { %v13631_v50 = vld [vmem:[#allocation10 + $0x634] ss:$8 sps:$4 sm:$0xff]  }
 0xa42   : > { %8364 = vmatpush1.bf16.msra.mxu0 %v13464_v35  ;;  %v17000_v35 = vpack.c.bf16 %v9141_v49, %v9141_v49  ;;  %v13602_v49 = vld [vmem:[#allocation10 + $0x2d0] ss:$8 sps:$4 sm:$0xff]  }
 0xa43   : > { %9104 = vmatpush1.bf16.msra.mxu1 %v13467_v10  ;;  %8365 = vmatprep.subr.bf16.mxu0 %v13472_v27  ;;  %v13530_v10 = vld [vmem:[#allocation10 + $0x210] ss:$8 sps:$4 sm:$0xff]  }
 0xa44   : > { %9105 = vmatprep.subr.bf16.mxu1 %v13475_v57  ;;  %v13533_v27 = vld [vmem:[#allocation10 + $0x510] ss:$8 sps:$4 sm:$0xff]   ;;  %v13541_v57 = vld [vmem:[#allocation10 + $0x524] ss:$8 sps:$4 sm:$0xff]  }
 0xa46   : > { %8366 = vmatpush1.bf16.msra.mxu0 %v13470_v46  ;;  %v13536_v46 = vld [vmem:[#allocation10 + $0x220] ss:$8 sps:$4 sm:$0xff]  }
 0xa47   : > { %9106 = vmatpush1.bf16.msra.mxu1 %v13473_v44  ;;  %8367 = vmatprep.subr.bf16.mxu0 %v13478_v16  ;;  %v13539_v44 = vld [vmem:[#allocation10 + $0x520] ss:$8 sps:$4 sm:$0xff]   ;;  %v13544_v16 = vld [vmem:[#allocation10 + $0x234] ss:$8 sps:$4 sm:$0xff]  }
 0xa48   : > { %9107 = vmatprep.subr.bf16.mxu1 %v13481_v24  ;;  %v13547_v24 = vld [vmem:[#allocation10 + $0x534] ss:$8 sps:$4 sm:$0xff]  }
 0xa4a   : > { %8368 = vmatpush1.bf16.msra.mxu0 %v13476_v56  ;;  %v13545_v56 = vld [vmem:[#allocation10 + $0x530] ss:$8 sps:$4 sm:$0xff]  }
 0xa4b   : > { %9108 = vmatpush1.bf16.msra.mxu1 %v13479_v21  ;;  %8369 = vmatprep.subr.bf16.mxu0 %v13484_v48  ;;  %v13550_v21 = vld [vmem:[#allocation10 + $0x244] ss:$8 sps:$4 sm:$0xff]  }
 0xa4c   : > { %9109 = vmatprep.subr.bf16.mxu1 %v13487_v28  ;;  %v13553_v48 = vld [vmem:[#allocation10 + $0x544] ss:$8 sps:$4 sm:$0xff]   ;;  %v13548_v28 = vld [vmem:[#allocation10 + $0x240] ss:$8 sps:$4 sm:$0xff]  }
 0xa4e   : > { %8370 = vmatpush1.bf16.msra.mxu0 %v13482_v17  ;;  %v13551_v17 = vld [vmem:[#allocation10 + $0x540] ss:$8 sps:$4 sm:$0xff]  }
 0xa4f   : > { %9110 = vmatpush1.bf16.msra.mxu1 %v13485_v18  ;;  %8371 = vmatprep.subr.bf16.mxu0 %v13490_v11  ;;  %v13556_v18 = vld [vmem:[#allocation10 + $0x254] ss:$8 sps:$4 sm:$0xff]  }
 0xa50   : > { %9111 = vmatprep.subr.bf16.mxu1 %v13493_v32  ;;  %v13559_v11 = vld [vmem:[#allocation10 + $0x554] ss:$8 sps:$4 sm:$0xff]   ;;  %v13554_v32 = vld [vmem:[#allocation10 + $0x250] ss:$8 sps:$4 sm:$0xff]  }
 0xa52   : > { %8372 = vmatpush1.bf16.msra.mxu0 %v13488_v58  ;;  %v13557_v58 = vld [vmem:[#allocation10 + $0x550] ss:$8 sps:$4 sm:$0xff]  }
 0xa53   : > { %9112 = vmatpush1.bf16.msra.mxu1 %v13491_v61  ;;  %8373 = vmatprep.subr.bf16.mxu0 %v13496_v13  ;;  %v13562_v61 = vld [vmem:[#allocation10 + $0x264] ss:$8 sps:$4 sm:$0xff]  }
 0xa54   : > { %9113 = vmatprep.subr.bf16.mxu1 %v13499_v15  ;;  %v13565_v13 = vld [vmem:[#allocation10 + $0x564] ss:$8 sps:$4 sm:$0xff]   ;;  %v13560_v15 = vld [vmem:[#allocation10 + $0x260] ss:$8 sps:$4 sm:$0xff]  }
 0xa56   : > { %8374 = vmatpush1.bf16.msra.mxu0 %v13494_v26  ;;  %v13563_v26 = vld [vmem:[#allocation10 + $0x560] ss:$8 sps:$4 sm:$0xff]  }
 0xa57   : > { %9114 = vmatpush1.bf16.msra.mxu1 %v13497_v63  ;;  %8375 = vmatprep.subr.bf16.mxu0 %v13502_v22  ;;  %v13568_v63 = vld [vmem:[#allocation10 + $0x274] ss:$8 sps:$4 sm:$0xff]  }
 0xa58   : > { %9115 = vmatprep.subr.bf16.mxu1 %v13505_v38  ;;  %v13571_v22 = vld [vmem:[#allocation10 + $0x574] ss:$8 sps:$4 sm:$0xff]   ;;  %v13566_v38 = vld [vmem:[#allocation10 + $0x270] ss:$8 sps:$4 sm:$0xff]  }
 0xa5a   : > { %8376 = vmatpush1.bf16.msra.mxu0 %v13500_v51  ;;  %v13569_v51 = vld [vmem:[#allocation10 + $0x570] ss:$8 sps:$4 sm:$0xff]  }
 0xa5b   : > { %9116 = vmatpush1.bf16.msra.mxu1 %v13503_v43  ;;  %8377 = vmatprep.subr.bf16.mxu0 %v13508_v25  ;;  %v13574_v43 = vld [vmem:[#allocation10 + $0x284] ss:$8 sps:$4 sm:$0xff]  }
 0xa5c   : > { %9117 = vmatprep.subr.bf16.mxu1 %v13511_v42  ;;  %v13577_v25 = vld [vmem:[#allocation10 + $0x584] ss:$8 sps:$4 sm:$0xff]   ;;  %v13572_v42 = vld [vmem:[#allocation10 + $0x280] ss:$8 sps:$4 sm:$0xff]  }
 0xa5e   : > { %8378 = vmatpush1.bf16.msra.mxu0 %v13506_v30  ;;  %v13575_v30 = vld [vmem:[#allocation10 + $0x580] ss:$8 sps:$4 sm:$0xff]  }
 0xa5f   : > { %9118 = vmatpush1.bf16.msra.mxu1 %v13509_v54  ;;  %8379 = vmatprep.subr.bf16.mxu0 %v13514_v29  ;;  %v13580_v54 = vld [vmem:[#allocation10 + $0x294] ss:$8 sps:$4 sm:$0xff]  }
 0xa60   : > { %9119 = vmatprep.subr.bf16.mxu1 %v13517_v14  ;;  %v13583_v29 = vld [vmem:[#allocation10 + $0x594] ss:$8 sps:$4 sm:$0xff]   ;;  %v13578_v14 = vld [vmem:[#allocation10 + $0x290] ss:$8 sps:$4 sm:$0xff]  }
 0xa62   : > { %8380 = vmatpush1.bf16.msra.mxu0 %v13512_v9  ;;  %v13589_v9 = vld [vmem:[#allocation10 + $0x5a4] ss:$8 sps:$4 sm:$0xff]  }
 0xa63   : > { %9120 = vmatpush1.bf16.msra.mxu1 %v13515_v36  ;;  %8381 = vmatprep.subr.bf16.mxu0 %v13520_v47  ;;  %v13584_v36 = vld [vmem:[#allocation10 + $0x2a0] ss:$8 sps:$4 sm:$0xff]  }
 0xa64   : > { %9121 = vmatprep.subr.bf16.mxu1 %v13523_v52  ;;  %v13587_v47 = vld [vmem:[#allocation10 + $0x5a0] ss:$8 sps:$4 sm:$0xff]   ;;  %v13592_v52 = vld [vmem:[#allocation10 + $0x2b4] ss:$8 sps:$4 sm:$0xff]  }
 0xa66   : > { %8382 = vmatpush1.bf16.msra.mxu0 %v13518_v1  ;;  %v13593_v1 = vld [vmem:[#allocation10 + $0x5b0] ss:$8 sps:$4 sm:$0xff]  }
 0xa67   : > { %9122 = vmatpush1.bf16.msra.mxu1 %v13521_v31  ;;  %8611 = vmatprep.subr.bf16.mxu0 %v13526_v62  ;;  %v13598_v31 = vld [vmem:[#allocation10 + $0x2c4] ss:$8 sps:$4 sm:$0xff]   ;;  %v13596_v62 = vld [vmem:[#allocation10 + $0x2c0] ss:$8 sps:$4 sm:$0xff]  }
 0xa68   : > { %9340 = vmatprep.subr.bf16.mxu1 %v13529_v34  ;;  %v13599_v34 = vld [vmem:[#allocation10 + $0x5c0] ss:$8 sps:$4 sm:$0xff]  }
 0xa69   : > { %11372 = vmatmul.mubr.msk.bf16.vlgmr.msra.gmra.mrb[48].mxu0 %vm16972_vm13, %v11371_v4  ;;  %v13610_v4 = vld [vmem:[#allocation10 + $0x2e4] ss:$8 sps:$4 sm:$0xff]  }
 0xa6a   : > { %9124 = vmatmul.mubr.bf16.vlgmr.msra.gmra.mrb[28].mxu1 %v8897_v41  ;;  %8612 = vmatpush1.bf16.msra.mxu0 %v13524_v40  ;;  %v13605_v40 = vld [vmem:[#allocation10 + $0x5d0] ss:$8 sps:$4 sm:$0xff]   ;;  %v13613_v41 = vld [vmem:[#allocation10 + $0x5e4] ss:$8 sps:$4 sm:$0xff]  }
 0xa6b   : > { %11407 = vmatprep.mubr.msk.bf16.mxu0 %vm11405_vm11, %v16952_v2  ;;  %9341 = vmatpush1.bf16.msra.mxu1 %v13527_v5  ;;  %v13542_v2 = vld [vmem:[#allocation10 + $0x230] ss:$8 sps:$4 sm:$0xff]   ;;  %v13608_v5 = vld [vmem:[#allocation10 + $0x2e0] ss:$8 sps:$4 sm:$0xff]  }
 0xa6c   : > { %11515 = vmatprep.mubr.msk.bf16.mxu1 %vm16994_vm10, %v17000_v35  ;;  %8613 = vmatprep.subr.bf16.mxu0 %v13532_v59  ;;  %v13611_v59 = vld [vmem:[#allocation10 + $0x5e0] ss:$8 sps:$4 sm:$0xff]  }
 0xa6d   : > { %9342 = vmatprep.subr.bf16.mxu1 %v13535_v3  ;;  %v13616_v3 = vld [vmem:[#allocation10 + $0x2f4] ss:$8 sps:$4 sm:$0xff]  }
 0xa6e   : > { %8614 = vmatpush1.bf16.msra.mxu0 %v13530_v10  ;;  %v13619_v10 = vld [vmem:[#allocation10 + $0x5f4] ss:$8 sps:$4 sm:$0xff]  }
 0xa6f   : > { %9343 = vmatpush1.bf16.msra.mxu1 %v13533_v27  ;;  %8615 = vmatprep.subr.bf16.mxu0 %v13538_v23  ;;  %v9134_v27 = vld [vmem:[#allocation5 + $0x10] sm:$0x1e]  ;;  %v13614_v23 = vld [vmem:[#allocation10 + $0x2f0] ss:$8 sps:$4 sm:$0xff]  }
 0xa70   : > { %9344 = vmatprep.subr.bf16.mxu1 %v13541_v57  ;;  %v13617_v57 = vld [vmem:[#allocation10 + $0x5f0] ss:$8 sps:$4 sm:$0xff]  }
 0xa72   : > { %8616 = vmatpush1.bf16.msra.mxu0 %v13536_v46  ;;  %v9140_v46 = vrot.slane %v9134_v27, 1  ;;  %v13694_v27 = vld [vmem:[#allocation10 + $0x784] ss:$8 sps:$4 sm:$0xff]  }
 0xa73   : > { %9345 = vmatpush1.bf16.msra.mxu1 %v13539_v44  ;;  %8617 = vmatprep.subr.bf16.mxu0 %v13544_v16  ;;  %v13622_v44 = vld [vmem:[#allocation10 + $0x604] ss:$8 sps:$4 sm:$0xff]   ;;  %v13698_v16 = vld [vmem:[#allocation10 + $0x7a0] ss:$8 sps:$4 sm:$0xff]  }
 0xa74   : > { %9346 = vmatprep.subr.bf16.mxu1 %v13547_v24  ;;  %v13620_v24 = vld [vmem:[#allocation10 + $0x600] ss:$8 sps:$4 sm:$0xff]  }
 0xa76   : > { %8618 = vmatpush1.bf16.msra.mxu0 %v13542_v2  ;;  %v17020_v2 = vpack.c.bf16 %v9140_v46, %v9140_v46  ;;  %v13695_v46 = vld [vmem:[#allocation10 + $0x790] ss:$8 sps:$4 sm:$0xff]  }
 0xa77   : > { %9347 = vmatpush1.bf16.msra.mxu1 %v13545_v56  ;;  %8619 = vmatprep.subr.bf16.mxu0 %v13550_v21  ;;  %v13625_v56 = vld [vmem:[#allocation10 + $0x614] ss:$8 sps:$4 sm:$0xff]   ;;  %v17034_v21 = vld [vmem:[#allocation6] sm:$0xff] }
 0xa78   : > { %9348 = vmatprep.subr.bf16.mxu1 %v13553_v48  ;;  %v13623_v48 = vld [vmem:[#allocation10 + $0x610] ss:$8 sps:$4 sm:$0xff]  }
 0xa7a   : > { %8620 = vmatpush1.bf16.msra.mxu0 %v13548_v28  ;;  %v13629_v28 = vld [vmem:[#allocation10 + $0x630] ss:$8 sps:$4 sm:$0xff]  }
 0xa7b   : > { %9349 = vmatpush1.bf16.msra.mxu1 %v13551_v17  ;;  %8621 = vmatprep.subr.bf16.mxu0 %v13556_v18  ;;  %v13634_v17 = vld [vmem:[#allocation10 + $0x644] ss:$8 sps:$4 sm:$0xff]   ;;  %v13632_v18 = vld [vmem:[#allocation10 + $0x640] ss:$8 sps:$4 sm:$0xff]  }
 0xa7c   : > { %9350 = vmatprep.subr.bf16.mxu1 %v13559_v11  ;;  %v13637_v11 = vld [vmem:[#allocation10 + $0x654] ss:$8 sps:$4 sm:$0xff]  }
 0xa7e   : > { %8622 = vmatpush1.bf16.msra.mxu0 %v13554_v32  ;;  %v13635_v32 = vld [vmem:[#allocation10 + $0x650] ss:$8 sps:$4 sm:$0xff]  }
 0xa7f   : > { %9351 = vmatpush1.bf16.msra.mxu1 %v13557_v58  ;;  %8623 = vmatprep.subr.bf16.mxu0 %v13562_v61  ;;  %v13640_v58 = vld [vmem:[#allocation10 + $0x664] ss:$8 sps:$4 sm:$0xff]   ;;  %v13643_v61 = vld [vmem:[#allocation10 + $0x674] ss:$8 sps:$4 sm:$0xff]  }
 0xa80   : > { %9352 = vmatprep.subr.bf16.mxu1 %v13565_v13  ;;  %v13641_v13 = vld [vmem:[#allocation10 + $0x670] ss:$8 sps:$4 sm:$0xff]  }
 0xa82   : > { %8624 = vmatpush1.bf16.msra.mxu0 %v13560_v15  ;;  %v13646_v15 = vld [vmem:[#allocation10 + $0x684] ss:$8 sps:$4 sm:$0xff]  }
 0xa83   : > { %9353 = vmatpush1.bf16.msra.mxu1 %v13563_v26  ;;  %8625 = vmatprep.subr.bf16.mxu0 %v13568_v63  ;;  %v13644_v26 = vld [vmem:[#allocation10 + $0x680] ss:$8 sps:$4 sm:$0xff]   ;;  %v13649_v63 = vld [vmem:[#allocation10 + $0x694] ss:$8 sps:$4 sm:$0xff]  }
 0xa84   : > { %9354 = vmatprep.subr.bf16.mxu1 %v13571_v22  ;;  %v13647_v22 = vld [vmem:[#allocation10 + $0x690] ss:$8 sps:$4 sm:$0xff]  }
 0xa86   : > { %8626 = vmatpush1.bf16.msra.mxu0 %v13566_v38  ;;  %v13652_v38 = vld [vmem:[#allocation10 + $0x6a4] ss:$8 sps:$4 sm:$0xff]  }
 0xa87   : > { %9355 = vmatpush1.bf16.msra.mxu1 %v13569_v51  ;;  %8627 = vmatprep.subr.bf16.mxu0 %v13574_v43  ;;  %v13650_v51 = vld [vmem:[#allocation10 + $0x6a0] ss:$8 sps:$4 sm:$0xff]   ;;  %v13655_v43 = vld [vmem:[#allocation10 + $0x6b4] ss:$8 sps:$4 sm:$0xff]  }
 0xa88   : > { %9356 = vmatprep.subr.bf16.mxu1 %v13577_v25  ;;  %v13653_v25 = vld [vmem:[#allocation10 + $0x6b0] ss:$8 sps:$4 sm:$0xff]  }
 0xa8a   : > { %8628 = vmatpush1.bf16.msra.mxu0 %v13572_v42  ;;  %v13658_v42 = vld [vmem:[#allocation10 + $0x6c4] ss:$8 sps:$4 sm:$0xff]  }
 0xa8b   : > { %9357 = vmatpush1.bf16.msra.mxu1 %v13575_v30  ;;  %8629 = vmatprep.subr.bf16.mxu0 %v13580_v54  ;;  %v13656_v30 = vld [vmem:[#allocation10 + $0x6c0] ss:$8 sps:$4 sm:$0xff]   ;;  %v13661_v54 = vld [vmem:[#allocation10 + $0x6d4] ss:$8 sps:$4 sm:$0xff]  }
 0xa8c   : > { %9358 = vmatprep.subr.bf16.mxu1 %v13583_v29  ;;  %v13659_v29 = vld [vmem:[#allocation10 + $0x6d0] ss:$8 sps:$4 sm:$0xff]  }
 0xa8e   : > { %8630 = vmatpush1.bf16.msra.mxu0 %v13578_v14  ;;  %v13664_v14 = vld [vmem:[#allocation10 + $0x6e4] ss:$8 sps:$4 sm:$0xff]  }
 0xa8f   : > { %9359 = vmatpush1.bf16.msra.mxu1 %v13581_v37  ;;  %8631 = vmatprep.subr.bf16.mxu0 %v13586_v53  ;;  %v13662_v37 = vld [vmem:[#allocation10 + $0x6e0] ss:$8 sps:$4 sm:$0xff]   ;;  %v13667_v53 = vld [vmem:[#allocation10 + $0x6f4] ss:$8 sps:$4 sm:$0xff]  }
 0xa90   : > { %9360 = vmatprep.subr.bf16.mxu1 %v13589_v9  ;;  %v9627_v9 = vld [vmem:[#allocation5 + $0x18] sm:$0x3c] }
 0xa92   : > { %8632 = vmatpush1.bf16.msra.mxu0 %v13584_v36  ;;  %v13665_v36 = vld [vmem:[#allocation10 + $0x6f0] ss:$8 sps:$4 sm:$0xff]  }
 0xa93   : > { %9361 = vmatpush1.bf16.msra.mxu1 %v13587_v47  ;;  %8633 = vmatprep.subr.bf16.mxu0 %v13592_v52  ;;  %v13670_v47 = vld [vmem:[#allocation10 + $0x704] ss:$8 sps:$4 sm:$0xff]   ;;  %v9633_v52 = vrot.slane %v9627_v9, 2  ;;  %v13737_v9 = vld [vmem:[#allocation10 + $0x870] ss:$8 sps:$4 sm:$0xff]  }
 0xa94   : > { %9362 = vmatprep.subr.bf16.mxu1 %v13595_v7  ;;  %v13668_v7 = vld [vmem:[#allocation10 + $0x700] ss:$8 sps:$4 sm:$0xff]  }
 0xa96   : > { %8634 = vmatpush1.bf16.msra.mxu0 %v13590_v39  ;;  %v13748_v39 = vld [vmem:[#allocation10 + $0x8a4] ss:$8 sps:$4 sm:$0xff]  }
 0xa97   : > { %9363 = vmatpush1.bf16.msra.mxu1 %v13593_v1  ;;  %8635 = vmatprep.subr.bf16.mxu0 %v13598_v31  ;;  %v13673_v1 = vld [vmem:[#allocation10 + $0x714] ss:$8 sps:$4 sm:$0xff]   ;;  %v11590_v31 = vpack.c.bf16 %v9633_v52, %v9633_v52 }
 0xa98   : > { %9364 = vmatprep.subr.bf16.mxu1 %v13601_v60  ;;  %v13671_v60 = vld [vmem:[#allocation10 + $0x710] ss:$8 sps:$4 sm:$0xff]   ;;  %v13745_v52 = vld [vmem:[#allocation10 + $0x894] ss:$8 sps:$4 sm:$0xff]  }
 0xa9a   : > { %8636 = vmatpush1.bf16.msra.mxu0 %v13596_v62  ;;  %v13676_v62 = vld [vmem:[#allocation10 + $0x724] ss:$8 sps:$4 sm:$0xff]  }
 0xa9b   : > { %9365 = vmatpush1.bf16.msra.mxu1 %v13599_v34  ;;  %8637 = vmatprep.subr.bf16.mxu0 %v13604_v20  ;;  %v13674_v34 = vld [vmem:[#allocation10 + $0x720] ss:$8 sps:$4 sm:$0xff]   ;;  %v13679_v20 = vld [vmem:[#allocation10 + $0x734] ss:$8 sps:$4 sm:$0xff]  }
 0xa9c   : > { %9366 = vmatprep.subr.bf16.mxu1 %v13607_v0  ;;  %v13677_v0 = vld [vmem:[#allocation10 + $0x730] ss:$8 sps:$4 sm:$0xff]  }
 0xa9e   : > { %8638 = vmatpush1.bf16.msra.mxu0 %v13602_v49  ;;  %v13682_v49 = vld [vmem:[#allocation10 + $0x744] ss:$8 sps:$4 sm:$0xff]  }
 0xa9f   : > { %9367 = vmatpush1.bf16.msra.mxu1 %v13605_v40  ;;  %8639 = vmatprep.subr.bf16.mxu0 %v13610_v4  ;;  %v13680_v40 = vld [vmem:[#allocation10 + $0x740] ss:$8 sps:$4 sm:$0xff]   ;;  %v13685_v4 = vld [vmem:[#allocation10 + $0x754] ss:$8 sps:$4 sm:$0xff]  }
 0xaa0   : > { %9368 = vmatprep.subr.bf16.mxu1 %v13613_v41  ;;  %v13683_v41 = vld [vmem:[#allocation10 + $0x750] ss:$8 sps:$4 sm:$0xff]  }
 0xaa2   : > { %8640 = vmatpush1.bf16.msra.mxu0 %v13608_v5  ;;  %v13688_v5 = vld [vmem:[#allocation10 + $0x764] ss:$8 sps:$4 sm:$0xff]  }
 0xaa3   : > { %9369 = vmatpush1.bf16.msra.mxu1 %v13611_v59  ;;  %8641 = vmatprep.subr.bf16.mxu0 %v13616_v3  ;;  %v13686_v59 = vld [vmem:[#allocation10 + $0x760] ss:$8 sps:$4 sm:$0xff]   ;;  %v13691_v3 = vld [vmem:[#allocation10 + $0x774] ss:$8 sps:$4 sm:$0xff]  }
 0xaa4   : > { %9370 = vmatprep.subr.bf16.mxu1 %v13619_v10  ;;  %v13689_v10 = vld [vmem:[#allocation10 + $0x770] ss:$8 sps:$4 sm:$0xff]  }
 0xaa6   : > { %8642 = vmatpush1.bf16.msra.mxu0 %v13614_v23  ;;  %v13692_v23 = vld [vmem:[#allocation10 + $0x780] ss:$8 sps:$4 sm:$0xff]  }
 0xaa7   : > { %9371 = vmatpush1.bf16.msra.mxu1 %v13617_v57  ;;  %v13697_v57 = vld [vmem:[#allocation10 + $0x794] ss:$8 sps:$4 sm:$0xff]  }
 0xaa8   : > { %9583 = vmatprep.subr.bf16.mxu1 %v13622_v44  ;;  %v13700_v44 = vld [vmem:[#allocation10 + $0x7a4] ss:$8 sps:$4 sm:$0xff]  }
 0xaa9   : > { %11410 = vmatmul.mubr.msk.bf16.vlgmr.msra.gmra.mrb[48].mxu0 %vm11405_vm11, %v16954_v33  ;;  %v13626_v33 = vld [vmem:[#allocation10 + $0x620] ss:$8 sps:$4 sm:$0xff]  }
 0xaaa   : > { %11518 = vmatmul.mubr.msk.bf16.vlgmr.msra.gmra.mrb[28].mxu1 %vm16994_vm10, %v17020_v2  ;;  %10218 = vmatprep.mubr.f32.mxu0 %v17034_v21  ;;  %vm10144_vm10 = vcmask 31744  }
 0xaab   : > { %9584 = vmatpush1.bf16.msra.mxu1 %v13620_v24  ;;  %11553 = vmatprep.mubr.msk.bf16.mxu1 %vm11551_vm7, %v17000_v35  ;;  %v13638_v35 = vld [vmem:[#allocation10 + $0x660] ss:$8 sps:$4 sm:$0xff]   ;;  %v13703_v24 = vld [vmem:[#allocation10 + $0x7b4] ss:$8 sps:$4 sm:$0xff]  }
 0xaac   : > { %9585 = vmatprep.subr.bf16.mxu1 %v13625_v56  ;;  %v13706_v56 = vld [vmem:[#allocation10 + $0x7c4] ss:$8 sps:$4 sm:$0xff]  }
 0xaaf   : > { %9586 = vmatpush1.bf16.msra.mxu1 %v13623_v48  ;;  %v13704_v48 = vld [vmem:[#allocation10 + $0x7c0] ss:$8 sps:$4 sm:$0xff]  }
 0xab0   : > { %9587 = vmatprep.subr.bf16.mxu1 %v13628_v12  ;;  %v13709_v12 = vld [vmem:[#allocation10 + $0x7d4] ss:$8 sps:$4 sm:$0xff]  }
 0xab3   : > { %9588 = vmatpush1.bf16.msra.mxu1 %v13626_v33  ;;  %v13707_v33 = vld [vmem:[#allocation10 + $0x7d0] ss:$8 sps:$4 sm:$0xff]  }
 0xab4   : > { %9589 = vmatprep.subr.bf16.mxu1 %v13631_v50  ;;  %v13712_v50 = vld [vmem:[#allocation10 + $0x7e4] ss:$8 sps:$4 sm:$0xff]  }
 0xab7   : > { %9590 = vmatpush1.bf16.msra.mxu1 %v13629_v28  ;;  %v13710_v28 = vld [vmem:[#allocation10 + $0x7e0] ss:$8 sps:$4 sm:$0xff]  }
 0xab8   : > { %9591 = vmatprep.subr.bf16.mxu1 %v13634_v17  ;;  %v13715_v17 = vld [vmem:[#allocation10 + $0x7f4] ss:$8 sps:$4 sm:$0xff]  }
 0xabb   : > { %9592 = vmatpush1.bf16.msra.mxu1 %v13632_v18  ;;  %v9626_v18 = vld [vmem:[#allocation5 + $0x10] sm:$0x3c] }
 0xabc   : > { %9593 = vmatprep.subr.bf16.mxu1 %v13637_v11  ;;  %v9876_v11 = vld [vmem:[#allocation5 + $0x18] sm:$0x78] }
 0xabf   : > { %9594 = vmatpush1.bf16.msra.mxu1 %v13635_v32  ;;  %v13713_v32 = vld [vmem:[#allocation10 + $0x7f0] ss:$8 sps:$4 sm:$0xff]  }
 0xac0   : > { %9595 = vmatprep.subr.bf16.mxu1 %v13640_v58  ;;  %v9632_v58 = vrot.slane %v9626_v18, 2 }
 0xac3   : > { %9596 = vmatpush1.bf16.msra.mxu1 %v13638_v35  ;;  %v13718_v35 = vld [vmem:[#allocation10 + $0x804] ss:$8 sps:$4 sm:$0xff]  }
 0xac4   : > { %9597 = vmatprep.subr.bf16.mxu1 %v13643_v61 }
 0xac7   : > { %9598 = vmatpush1.bf16.msra.mxu1 %v13641_v13  ;;  %v9883_v13 = vrot.slane %v9876_v11, 3 }
 0xac8   : > { %9599 = vmatprep.subr.bf16.mxu1 %v13646_v15  ;;  %v13716_v15 = vld [vmem:[#allocation10 + $0x800] ss:$8 sps:$4 sm:$0xff]  }
 0xacb   : > { %9600 = vmatpush1.bf16.msra.mxu1 %v13644_v26  ;;  %v11593_v26 = vpack.c.bf16 %v9632_v58, %v9632_v58 }
 0xacc   : > { %9601 = vmatprep.subr.bf16.mxu1 %v13649_v63  ;;  %v13721_v63 = vld [vmem:[#allocation10 + $0x814] ss:$8 sps:$4 sm:$0xff]  }
 0xacf   : > { %9602 = vmatpush1.bf16.msra.mxu1 %v13647_v22  ;;  %v11628_v22 = vpack.c.bf16 %v9883_v13, %v9883_v13  ;;  %v13766_v13 = vld [vmem:[#allocation12 + $0x404] ss:$8 sps:$4 sm:$0xff]  }
 0xad0   : > { %9603 = vmatprep.subr.bf16.mxu1 %v13652_v38  ;;  %v13724_v38 = vld [vmem:[#allocation10 + $0x824] ss:$8 sps:$4 sm:$0xff]  }
 0xad3   : > { %9604 = vmatpush1.bf16.msra.mxu1 %v13650_v51  ;;  %v13722_v51 = vld [vmem:[#allocation10 + $0x820] ss:$8 sps:$4 sm:$0xff]  }
 0xad4   : > { %9605 = vmatprep.subr.bf16.mxu1 %v13655_v43  ;;  %v13727_v43 = vld [vmem:[#allocation10 + $0x834] ss:$8 sps:$4 sm:$0xff]  }
 0xad7   : > { %9606 = vmatpush1.bf16.msra.mxu1 %v13653_v25  ;;  %v13725_v25 = vld [vmem:[#allocation10 + $0x830] ss:$8 sps:$4 sm:$0xff]  }
 0xad8   : > { %9607 = vmatprep.subr.bf16.mxu1 %v13658_v42  ;;  %v13730_v42 = vld [vmem:[#allocation10 + $0x844] ss:$8 sps:$4 sm:$0xff]  }
 0xadb   : > { %9608 = vmatpush1.bf16.msra.mxu1 %v13656_v30  ;;  %v13728_v30 = vld [vmem:[#allocation10 + $0x840] ss:$8 sps:$4 sm:$0xff]  }
 0xadc   : > { %9609 = vmatprep.subr.bf16.mxu1 %v13661_v54  ;;  %v13733_v54 = vld [vmem:[#allocation10 + $0x854] ss:$8 sps:$4 sm:$0xff]  }
 0xadf   : > { %9610 = vmatpush1.bf16.msra.mxu1 %v13659_v29  ;;  %v13731_v29 = vld [vmem:[#allocation10 + $0x850] ss:$8 sps:$4 sm:$0xff]  }
 0xae0   : > { %9611 = vmatprep.subr.bf16.mxu1 %v13664_v14  ;;  %v13736_v14 = vld [vmem:[#allocation10 + $0x864] ss:$8 sps:$4 sm:$0xff]  }
 0xae3   : > { %9612 = vmatpush1.bf16.msra.mxu1 %v13662_v37  ;;  %v13734_v37 = vld [vmem:[#allocation10 + $0x860] ss:$8 sps:$4 sm:$0xff]  }
 0xae4   : > { %9613 = vmatprep.subr.bf16.mxu1 %v13667_v53  ;;  %v13739_v53 = vld [vmem:[#allocation10 + $0x874] ss:$8 sps:$4 sm:$0xff]  }
 0xae7   : > { %9614 = vmatpush1.bf16.msra.mxu1 %v13665_v36  ;;  %v13742_v36 = vld [vmem:[#allocation10 + $0x884] ss:$8 sps:$4 sm:$0xff]  }
 0xae8   : > { %9832 = vmatprep.subr.bf16.mxu1 %v13670_v47  ;;  %v13740_v47 = vld [vmem:[#allocation10 + $0x880] ss:$8 sps:$4 sm:$0xff]  }
 0xaea   : > { %11556 = vmatmul.mubr.msk.bf16.vlgmr.msra.gmra.mrb[28].mxu1 %vm11551_vm7, %v17020_v2  ;;  %v13701_v2 = vld [vmem:[#allocation10 + $0x7b0] ss:$8 sps:$4 sm:$0xff]  }
 0xaeb   : > { %9833 = vmatpush1.bf16.msra.mxu1 %v13668_v7  ;;  %11591 = vmatprep.mubr.msk.bf16.mxu1 %vm17046_vm5, %v11590_v31  ;;  %v13743_v7 = vld [vmem:[#allocation10 + $0x890] ss:$8 sps:$4 sm:$0xff]   ;;  %v13751_v31 = vld [vmem:[#allocation10 + $0x8b4] ss:$8 sps:$4 sm:$0xff]  }
 0xaec   : > { %9834 = vmatprep.subr.bf16.mxu1 %v13673_v1  ;;  %v13746_v1 = vld [vmem:[#allocation10 + $0x8a0] ss:$8 sps:$4 sm:$0xff]  }
 0xaef   : > { %9835 = vmatpush1.bf16.msra.mxu1 %v13671_v60  ;;  %v13749_v60 = vld [vmem:[#allocation10 + $0x8b0] ss:$8 sps:$4 sm:$0xff]  }
 0xaf0   : > { %9836 = vmatprep.subr.bf16.mxu1 %v13676_v62  ;;  %v13754_v62 = vld [vmem:[#allocation10 + $0x8c4] ss:$8 sps:$4 sm:$0xff]  }
 0xaf3   : > { %9837 = vmatpush1.bf16.msra.mxu1 %v13674_v34  ;;  %v13752_v34 = vld [vmem:[#allocation10 + $0x8c0] ss:$8 sps:$4 sm:$0xff]  }
 0xaf4   : > { %9838 = vmatprep.subr.bf16.mxu1 %v13679_v20  ;;  %v13757_v20 = vld [vmem:[#allocation10 + $0x8d4] ss:$8 sps:$4 sm:$0xff]  }
 0xaf7   : > { %9839 = vmatpush1.bf16.msra.mxu1 %v13677_v0  ;;  %v13755_v0 = vld [vmem:[#allocation10 + $0x8d0] ss:$8 sps:$4 sm:$0xff]  }
 0xaf8   : > { %9840 = vmatprep.subr.bf16.mxu1 %v13682_v49  ;;  %v13760_v49 = vld [vmem:[#allocation10 + $0x8e4] ss:$8 sps:$4 sm:$0xff]  }
 0xafb   : > { %9841 = vmatpush1.bf16.msra.mxu1 %v13680_v40  ;;  %v13758_v40 = vld [vmem:[#allocation10 + $0x8e0] ss:$8 sps:$4 sm:$0xff]  }
 0xafc   : > { %9842 = vmatprep.subr.bf16.mxu1 %v13685_v4  ;;  %v13763_v4 = vld [vmem:[#allocation10 + $0x8f4] ss:$8 sps:$4 sm:$0xff]  }
 0xaff   : > { %9843 = vmatpush1.bf16.msra.mxu1 %v13683_v41  ;;  %v9875_v41 = vld [vmem:[#allocation5 + $0x10] sm:$0x78] }
 0xb00   : > { %9844 = vmatprep.subr.bf16.mxu1 %v13688_v5  ;;  %v13761_v5 = vld [vmem:[#allocation10 + $0x8f0] ss:$8 sps:$4 sm:$0xff]  }
 0xb03   : > { %9845 = vmatpush1.bf16.msra.mxu1 %v13686_v59  ;;  %v9882_v59 = vrot.slane %v9875_v41, 3  ;;  %v13812_v41 = vld [vmem:[#allocation13 + $0x240] sm:$0xff]  }
 0xb04   : > { %9846 = vmatprep.subr.bf16.mxu1 %v13691_v3 }
 0xb05   : > { %v11631_v3 = vpack.c.bf16 %v9882_v59, %v9882_v59 }
 0xb07   : > { %9847 = vmatpush1.bf16.msra.mxu1 %v13689_v10 }
 0xb08   : > { %9848 = vmatprep.subr.bf16.mxu1 %v13694_v27 }
 0xb0b   : > { %9849 = vmatpush1.bf16.msra.mxu1 %v13692_v23 }
 0xb0c   : > { %9850 = vmatprep.subr.bf16.mxu1 %v13697_v57 }
 0xb0f   : > { %9851 = vmatpush1.bf16.msra.mxu1 %v13695_v46  ;;  %v10131_v46 = vmul.u32 2, %v17604_v6 }
 0xb10   : > { %9852 = vmatprep.subr.bf16.mxu1 %v13700_v44 }
 0xb11   : > { %v10132_v44 = vmul.u32 2, %v10131_v46 }
 0xb13   : > { %9853 = vmatpush1.bf16.msra.mxu1 %v13698_v16  ;;  %v10134_v16 = vadd.s32 1, %v10132_v44  ;;  %vm10133_vm12 = vcmp.eq.s32.totalorder %v15583_v19, %v10132_v44 }
 0xb14   : > { %9854 = vmatprep.subr.bf16.mxu1 %v13703_v24  ;;  %v7863_v24 = vld [vmem:[#allocation19] sm:$0x3] }
 0xb15   : > { %vm10135_vm15 = vcmp.eq.s32.totalorder %v15583_v19, %v10134_v16 }
 0xb16   : > { %vm10136_vm14 = vmor %vm10133_vm12, %vm10135_vm15 }
 0xb17   : > { %9855 = vmatpush1.bf16.msra.mxu1 %v13701_v2  ;;  %v10137_v2 = vadd.s32 2, %v10132_v44  ;;  %v17623_v44 = vlaneseq }
 0xb18   : > { %9856 = vmatprep.subr.bf16.mxu1 %v13706_v56  ;;  %v7868_v56 = vrot.slane %v7863_v24, %v16920_v8 }
 0xb19   : > { %vm10138_vm4 = vcmp.eq.s32.totalorder %v15583_v19, %v10137_v2  ;;  %vm17093_vm7 = vcmp.lt.s32.totalorder %v17623_v44, 256 }
 0xb1a   : > { %vm10139_vm8 = vmor %vm10136_vm14, %vm10138_vm4 }
 0xb1b   : > { %9857 = vmatpush1.bf16.msra.mxu1 %v13704_v48  ;;  %v7872_v48 = vrot.slane %v7863_v24, %v16923_v45 }
 0xb1c   : > { %9858 = vmatprep.subr.bf16.mxu1 %v13709_v12  ;;  %v10140_v12 = vadd.s32 1, %v10137_v2 }
 0xb1e   : > { %vm10141_vm13 = vcmp.eq.s32.totalorder %v15583_v19, %v10140_v12  ;;  %v13769_v19 = vld [vmem:[#allocation12 + $0x414] ss:$8 sps:$4 sm:$0xff]  }
 0xb1f   : > { %9859 = vmatpush1.bf16.msra.mxu1 %v13707_v33  ;;  %vm10142_vm9 = vmor %vm10139_vm8, %vm10141_vm13 }
 0xb20   : > { %9860 = vmatprep.subr.bf16.mxu1 %v13712_v50 }
 0xb23   : > { %9861 = vmatpush1.bf16.msra.mxu1 %v13710_v28 }
 0xb24   : > { %9862 = vmatprep.subr.bf16.mxu1 %v13715_v17 }
 0xb27   : > { %9863 = vmatpush1.bf16.msra.mxu1 %v13713_v32 }
 0xb28   : > { %10082 = vmatprep.subr.bf16.mxu1 %v13718_v35 }
 0xb2a   : > { %11594 = vmatmul.mubr.msk.bf16.vlgmr.msra.gmra.mrb[28].mxu1 %vm17046_vm5, %v11593_v26  ;;  %v10143_v26 = vsel %vm10142_vm9, 0.25, %v17034_v21  ;;  %v13773_v21 = vld [vmem:[#allocation12 + $0x430] ss:$8 sps:$4 sm:$0xff]  }
 0xb2b   : > { %10083 = vmatpush1.bf16.msra.mxu1 %v13716_v15  ;;  %11629 = vmatprep.mubr.msk.bf16.mxu1 %vm11627_vm0, %v11628_v22 }
 0xb2c   : > { %10084 = vmatprep.subr.bf16.mxu1 %v13721_v63  ;;  %v13764_v63 = vld [vmem:[#allocation12 + $0x400] ss:$8 sps:$4 sm:$0xff]  }
 0xb2f   : > { %10085 = vmatpush1.bf16.msra.mxu1 %v13719_v55  ;;  %v13767_v55 = vld [vmem:[#allocation12 + $0x410] ss:$8 sps:$4 sm:$0xff]  }
 0xb30   : > { %10086 = vmatprep.subr.bf16.mxu1 %v13724_v38  ;;  %v13772_v38 = vld [vmem:[#allocation12 + $0x424] ss:$8 sps:$4 sm:$0xff]  }
 0xb33   : > { %10087 = vmatpush1.bf16.msra.mxu1 %v13722_v51  ;;  %v13770_v51 = vld [vmem:[#allocation12 + $0x420] ss:$8 sps:$4 sm:$0xff]  }
 0xb34   : > { %10088 = vmatprep.subr.bf16.mxu1 %v13727_v43  ;;  %v13775_v43 = vld [vmem:[#allocation12 + $0x434] ss:$8 sps:$4 sm:$0xff]  }
 0xb37   : > { %10089 = vmatpush1.bf16.msra.mxu1 %v13725_v25  ;;  %v13778_v25 = vld [vmem:[#allocation12 + $0x444] ss:$8 sps:$4 sm:$0xff]  }
 0xb38   : > { %10090 = vmatprep.subr.bf16.mxu1 %v13730_v42  ;;  %v13776_v42 = vld [vmem:[#allocation12 + $0x440] ss:$8 sps:$4 sm:$0xff]  }
 0xb3b   : > { %10091 = vmatpush1.bf16.msra.mxu1 %v13728_v30  ;;  %v13781_v30 = vld [vmem:[#allocation12 + $0x454] ss:$8 sps:$4 sm:$0xff]  }
 0xb3c   : > { %10092 = vmatprep.subr.bf16.mxu1 %v13733_v54  ;;  %v13779_v54 = vld [vmem:[#allocation12 + $0x450] ss:$8 sps:$4 sm:$0xff]  }
 0xb3f   : > { %10093 = vmatpush1.bf16.msra.mxu1 %v13731_v29  ;;  %v13784_v29 = vld [vmem:[#allocation12 + $0x464] ss:$8 sps:$4 sm:$0xff]  }
 0xb40   : > { %10094 = vmatprep.subr.bf16.mxu1 %v13736_v14  ;;  %v13782_v14 = vld [vmem:[#allocation12 + $0x460] ss:$8 sps:$4 sm:$0xff]  }
 0xb43   : > { %10095 = vmatpush1.bf16.msra.mxu1 %v13734_v37  ;;  %v13787_v37 = vld [vmem:[#allocation12 + $0x474] ss:$8 sps:$4 sm:$0xff]  }
 0xb44   : > { %10096 = vmatprep.subr.bf16.mxu1 %v13739_v53  ;;  %v13785_v53 = vld [vmem:[#allocation12 + $0x470] ss:$8 sps:$4 sm:$0xff]  }
 0xb47   : > { %10097 = vmatpush1.bf16.msra.mxu1 %v13737_v9  ;;  %v13790_v9 = vld [vmem:[#allocation12 + $0x484] ss:$8 sps:$4 sm:$0xff]  }
 0xb48   : > { %10098 = vmatprep.subr.bf16.mxu1 %v13742_v36  ;;  %v13788_v36 = vld [vmem:[#allocation12 + $0x480] ss:$8 sps:$4 sm:$0xff]  }
 0xb4b   : > { %10099 = vmatpush1.bf16.msra.mxu1 %v13740_v47  ;;  %v13793_v47 = vld [vmem:[#allocation12 + $0x494] ss:$8 sps:$4 sm:$0xff]  }
 0xb4c   : > { %10100 = vmatprep.subr.bf16.mxu1 %v13745_v52  ;;  %v13791_v52 = vld [vmem:[#allocation12 + $0x490] ss:$8 sps:$4 sm:$0xff]  }
 0xb4f   : > { %10101 = vmatpush1.bf16.msra.mxu1 %v13743_v7  ;;  %v13796_v7 = vld [vmem:[#allocation12 + $0x4a4] ss:$8 sps:$4 sm:$0xff]  }
 0xb50   : > { %10102 = vmatprep.subr.bf16.mxu1 %v13748_v39  ;;  %v13794_v39 = vld [vmem:[#allocation12 + $0x4a0] ss:$8 sps:$4 sm:$0xff]  }
 0xb53   : > { %10103 = vmatpush1.bf16.msra.mxu1 %v13746_v1  ;;  %v13799_v1 = vld [vmem:[#allocation12 + $0x4b4] ss:$8 sps:$4 sm:$0xff]  }
 0xb54   : > { %10104 = vmatprep.subr.bf16.mxu1 %v13751_v31  ;;  %v13797_v31 = vld [vmem:[#allocation12 + $0x4b0] ss:$8 sps:$4 sm:$0xff]  }
 0xb57   : > { %10105 = vmatpush1.bf16.msra.mxu1 %v13749_v60  ;;  %v13800_v60 = vld [vmem:[#allocation12 + $0x4c0] ss:$8 sps:$4 sm:$0xff]  }
 0xb58   : > { %10106 = vmatprep.subr.bf16.mxu1 %v13754_v62  ;;  %v13802_v62 = vld [vmem:[#allocation12 + $0x4c4] ss:$8 sps:$4 sm:$0xff]  }
 0xb5b   : > { %10107 = vmatpush1.bf16.msra.mxu1 %v13752_v34  ;;  %v13805_v34 = vld [vmem:[#allocation12 + $0x4d4] ss:$8 sps:$4 sm:$0xff]  }
 0xb5c   : > { %10108 = vmatprep.subr.bf16.mxu1 %v13757_v20  ;;  %v13803_v20 = vld [vmem:[#allocation12 + $0x4d0] ss:$8 sps:$4 sm:$0xff]  }
 0xb5f   : > { %10109 = vmatpush1.bf16.msra.mxu1 %v13755_v0  ;;  %v13808_v0 = vld [vmem:[#allocation12 + $0x4e4] ss:$8 sps:$4 sm:$0xff]  }
 0xb60   : > { %10110 = vmatprep.subr.bf16.mxu1 %v13760_v49  ;;  %v13806_v49 = vld [vmem:[#allocation12 + $0x4e0] ss:$8 sps:$4 sm:$0xff]  }
 0xb63   : > { %10111 = vmatpush1.bf16.msra.mxu1 %v13758_v40  ;;  %v13811_v40 = vld [vmem:[#allocation12 + $0x4f4] ss:$8 sps:$4 sm:$0xff]  }
 0xb64   : > { %10112 = vmatprep.subr.bf16.mxu1 %v13763_v4  ;;  %v13809_v4 = vld [vmem:[#allocation12 + $0x4f0] ss:$8 sps:$4 sm:$0xff]  }
 0xb67   : > { %10113 = vmatpush1.bf16.msra.mxu1 %v13761_v5  ;;  %v14196_v5 = vmov 1966171168  }
 0xb68   : > { %v10235_v59 = vunpack.c.l.s4 %v14196_v5 }
 0xb6a   : > { %11632 = vmatmul.mubr.msk.bf16.vlgmr.msra.gmra.mrb[28].mxu1 %vm11627_vm0, %v11631_v3  ;;  %v10236_v3 = vunpack.c.0.s8 %v10235_v59 }
 0xb7c   : > { %v8645_v10 = vpop.f32.mrb[48].mxu0 }
 0xb7d   : > { %v8647_v27 = vpop.f32.mrb[49].mxu0  ;;  %v12579_v33 = vadd.f32 %v8645_v10, %v7868_v56 }
 0xb7e   : > { %v8649_v23 = vpop.f32.mrb[50].mxu0  ;;  %v12581_v50 = vadd.f32 %v8647_v27, %v7872_v48  ;;  %v10239_v27 = vsub.s32 %v10236_v3, %v17604_v6  ;;  %v13813_v6 = vld [vmem:[#allocation13 + $0x200] sm:$0xff]  }
 0xb7f   : > { %v8650_v57 = vpop.f32.mrb[51].mxu0 }
 0xc3d   : > { %v10116_v28 = vpop.f32.mrb[28].mxu1 }
 0xc3e   : > { %v12580_v17 = vadd.f32 %v12579_v33, %v10116_v28  ;;  %v10118_v18 = vpop.f32.mrb[29].mxu1  ;;  %v13815_v28 = vld [vmem:[#allocation13 + $0x208] sm:$0xff]  }
 0xc3f   : > { %v12582_v11 = vadd.f32 %v12581_v50, %v10118_v18  ;;  %v10120_v32 = vpop.f32.mrb[30].mxu1  ;;  %v13814_v50 = vld [vmem:[#allocation13 + $0x248] sm:$0xff]   ;;  %v13817_v18 = vld [vmem:[#allocation13 + $0x210] sm:$0xff]  }
 0xc40   : > { %v10127_v58 = vmul.f32 0.1, %v12580_v17  ;;  %v10121_v35 = vpop.f32.mrb[31].mxu1  ;;  %vm10125_vm6 = vcmp.ge.f32.partialorder %v12580_v17, 0.0  ;;  %v13819_v32 = vld [vmem:[#allocation13 + $0x218] sm:$0xff]  }
 0xc41   : > { %vm10126_vm11 = vcmp.ge.f32.partialorder %v12582_v11, 0.0  ;;  %v10128_v61 = vmul.f32 0.1, %v12582_v11  ;;  %v13821_v35 = vld [vmem:[#allocation13 + $0x220] sm:$0xff]  }
 0xc42   : > { %v10129_v22 = vsel %vm10125_vm6, %v12580_v17, %v10127_v58  ;;  %v13816_v17 = vld [vmem:[#allocation13 + $0x250] sm:$0xff]   ;;  %v13820_v58 = vld [vmem:[#allocation13 + $0x260] sm:$0xff]  }
 0xc43   : > { %v10130_v15 = vsel %vm10126_vm11, %v12582_v11, %v10128_v61  ;;  %v13818_v11 = vld [vmem:[#allocation13 + $0x258] sm:$0xff]   ;;  %v13822_v61 = vld [vmem:[#allocation13 + $0x268] sm:$0xff]  }
 0xc44   : > { %11633 = vmatprep.subr.msk.mxu0 %vm17621_vm2, %v10130_v15  ;;  %v13824_v15 = vld [vmem:[#allocation13 + $0x270] sm:$0xff]  }
 0xc45   : > { %11634 = vmatpush1.msk.msra.mxu0 %vm17622_vm3, %v10129_v22  ;;  %v13827_v22 = vld [vmem:[#allocation13 + $0x238] sm:$0xff]  }
 0xc46   : > { %11635 = vmatmul.mubr.msk.f32.vlgmr.msra.gmra.mrb[52].mxu0 %vm10144_vm10, %v10143_v26  ;;  %10463 = vmatprep.subr.bf16.mxu0 %v13766_v13  ;;  %v13823_v13 = vld [vmem:[#allocation13 + $0x228] sm:$0xff]   ;;  %v13825_v26 = vld [vmem:[#allocation13 + $0x230] sm:$0xff]  }
 0xc47   : > { %10464 = vmatpush1.bf16.msra.mxu0 %v13764_v63  ;;  %v13826_v63 = vld [vmem:[#allocation13 + $0x278] sm:$0xff]  }
 0xc48   : > { %10465 = vmatprep.subr.bf16.mxu0 %v13769_v19 }
 0xc4b   : > { %10466 = vmatpush1.bf16.msra.mxu0 %v13767_v55 }
 0xc4c   : > { %10467 = vmatprep.subr.bf16.mxu0 %v13772_v38 }
 0xc4f   : > { %10468 = vmatpush1.bf16.msra.mxu0 %v13770_v51 }
 0xc50   : > { %10469 = vmatprep.subr.bf16.mxu0 %v13775_v43 }
 0xc53   : > { %10470 = vmatpush1.bf16.msra.mxu0 %v13773_v21 }
 0xc54   : > { %10471 = vmatprep.subr.bf16.mxu0 %v13778_v25  ;;  %v10256_v25 = vld [vmem:[#allocation21] sm:$0x3] }
 0xc57   : > { %10472 = vmatpush1.bf16.msra.mxu0 %v13776_v42 }
 0xc58   : > { %10473 = vmatprep.subr.bf16.mxu0 %v13781_v30 }
 0xc5b   : > { %10474 = vmatpush1.bf16.msra.mxu0 %v13779_v54 }
 0xc5c   : > { %10475 = vmatprep.subr.bf16.mxu0 %v13784_v29 }
 0xc5f   : > { %10476 = vmatpush1.bf16.msra.mxu0 %v13782_v14 }
 0xc60   : > { %10477 = vmatprep.subr.bf16.mxu0 %v13787_v37 }
 0xc63   : > { %10478 = vmatpush1.bf16.msra.mxu0 %v13785_v53 }
 0xc64   : > { %10479 = vmatprep.subr.bf16.mxu0 %v13790_v9 }
 0xc67   : > { %10480 = vmatpush1.bf16.msra.mxu0 %v13788_v36 }
 0xc68   : > { %10481 = vmatprep.subr.bf16.mxu0 %v13793_v47 }
 0xc6b   : > { %10482 = vmatpush1.bf16.msra.mxu0 %v13791_v52  ;;  %v10535_v52 = vld [vmem:[#allocation22] sm:$0x1] }
 0xc6c   : > { %10483 = vmatprep.subr.bf16.mxu0 %v13796_v7 }
 0xc6f   : > { %10484 = vmatpush1.bf16.msra.mxu0 %v13794_v39 }
 0xc70   : > { %10485 = vmatprep.subr.bf16.mxu0 %v13799_v1 }
 0xc73   : > { %10486 = vmatpush1.bf16.msra.mxu0 %v13797_v31 }
 0xc74   : > { %10487 = vmatprep.subr.bf16.mxu0 %v13802_v62 }
 0xc77   : > { %10488 = vmatpush1.bf16.msra.mxu0 %v13800_v60 }
 0xc78   : > { %10489 = vmatprep.subr.bf16.mxu0 %v13805_v34 }
 0xc7b   : > { %10490 = vmatpush1.bf16.msra.mxu0 %v13803_v20 }
 0xc7c   : > { %10491 = vmatprep.subr.bf16.mxu0 %v13808_v0 }
 0xc7f   : > { %10492 = vmatpush1.bf16.msra.mxu0 %v13806_v49 }
 0xc80   : > { %10493 = vmatprep.subr.bf16.mxu0 %v13811_v40 }
 0xc83   : > { %10494 = vmatpush1.bf16.msra.mxu0 %v13809_v4 }
 0xc84   : > { %11978 = vmatprep.subr.bf16.mxu0 %v13812_v41 }
 0xd19   : > { %v10220_v10 = vpop.f32.mrb[52].mxu0 }
 0xd1a   : > { %v10222_v23 = vpop.f32.mrb[53].mxu0 }
 0xd1b   : > { %v10233_v57 = vcombine.low %v10220_v10, %v10222_v23 }
 0xd1d   : > { %v10240_v46 = vrot.slane %v10233_v57, %v10239_v27 }
 0xd1f   : > { %v10247_v24 = vrot.slane %v10240_v46, %v10239_v27 }
 0xd21   : > { %10254 = vst.msk [vmem:[#allocation6 + $0x10] ss:$8 sm:$0x3] %vm17093_vm7, %v10247_v24 }
 0xd28   : > { %v10257_v2 = vld [vmem:[#allocation6 + $0x10] ss:$8 sm:$0x3] }
 0xd29   : > { %v10262_v56 = vrot.slane %v10257_v2, %v16920_v8  ;;  %v10266_v48 = vrot.slane %v10257_v2, %v16923_v45 }
 0xd2b   : > { %v10269_v12 = vpack.c.bf16 %v10262_v56, %v10262_v56  ;;  %v10270_v33 = vpack.c.bf16 %v10266_v48, %v10266_v48 }
 0xd2d   : > { %10495 = vmatprep.mubr.bf16.mxu0 %v10270_v33 }
 0xd2e   : > { %10496 = vmatmul.mubr.bf16.vlgmr.msra.gmra.mrb[56].mxu0 %v10269_v12 }
 0xd2f   : > { %11979 = vmatpush3.bf16.msra.mxu0 %v13813_v6 }
 0xd30   : > { %11980 = vmatprep.subr.bf16.mxu0 %v13814_v50 }
 0xd33   : > { %11981 = vmatpush3.bf16.msra.mxu0 %v13815_v28 }
 0xd34   : > { %11982 = vmatprep.subr.bf16.mxu0 %v13816_v17 }
 0xd37   : > { %11983 = vmatpush3.bf16.msra.mxu0 %v13817_v18 }
 0xd38   : > { %11984 = vmatprep.subr.bf16.mxu0 %v13818_v11 }
 0xd3b   : > { %11985 = vmatpush3.bf16.msra.mxu0 %v13819_v32 }
 0xd3c   : > { %11986 = vmatprep.subr.bf16.mxu0 %v13820_v58 }
 0xd3f   : > { %11987 = vmatpush3.bf16.msra.mxu0 %v13821_v35 }
 0xd40   : > { %11988 = vmatprep.subr.bf16.mxu0 %v13822_v61 }
 0xd43   : > { %11989 = vmatpush3.bf16.msra.mxu0 %v13823_v13 }
 0xd44   : > { %11990 = vmatprep.subr.bf16.mxu0 %v13824_v15 }
 0xd47   : > { %11991 = vmatpush3.bf16.msra.mxu0 %v13825_v26 }
 0xd48   : > { %11992 = vmatprep.subr.bf16.mxu0 %v13826_v63 }
 0xd4b   : > { %11993 = vmatpush3.bf16.msra.mxu0 %v13827_v22 }
 0xe01   : > { %v10497_v19 = vpop.f32.mrb[56].mxu0 }
 0xe02   : > { %v10499_v55 = vpop.f32.mrb[57].mxu0 }
 0xe03   : > { %v10506_v38 = vcombine.low %v10497_v19, %v10499_v55  ;;  %v10501_v51 = vpop.f32.mrb[58].mxu0 }
 0xe04   : > { %v10502_v43 = vpop.f32.mrb[59].mxu0 }
 0xe05   : > { %v10513_v21 = vrot.slane %v10506_v38, %v10239_v27 }
 0xe07   : > { %v10520_v42 = vrot.slane %v10513_v21, %v10239_v27 }
 0xe09   : > { %v10522_v30 = vadd.f32 %v10520_v42, %v10256_v25 }
 0xe0b   : > { %vm10523_vm5 = vcmp.ge.f32.partialorder %v10522_v30, 0.0  ;;  %v10524_v54 = vmul.f32 0.1, %v10522_v30 }
 0xe0d   : > { %v10525_v29 = vsel %vm10523_vm5, %v10522_v30, %v10524_v54 }
 0xe0e   : > { %10533 = vst.msk [vmem:[#allocation7 + $0x10] ss:$8 sm:$0x3] %vm17093_vm7, %v10525_v29 }
 0xe15   : > { %v10536_v14 = vld [vmem:[#allocation7 + $0x10] ss:$8 sm:$0x3] }
 0xe16   : > { %v10541_v37 = vrot.slane %v10536_v14, %v16920_v8  ;;  %v10545_v53 = vrot.slane %v10536_v14, %v16923_v45 }
 0xe18   : > { %v10548_v9 = vpack.c.bf16 %v10541_v37, %v10541_v37  ;;  %v10549_v36 = vpack.c.bf16 %v10545_v53, %v10545_v53 }
 0xe1a   : > { %10710 = vmatprep.mubr.bf16.mxu0 %v10549_v36 }
 0xe1b   : > { %10711 = vmatmul.mubr.bf16.vlgmr.msra.gmra.mrb[60].mxu0 %v10548_v9 }
 0xeee   : > { %v11994_v47 = vpop.f32.mrb[60].mxu0 }
 0xeef   : > { %v11995_v7 = vpop.f32.mrb[61].mxu0 }
 0xef0   : > { %v11996_v39 = vadd.f32 %v11995_v7, %v11994_v47  ;;  %v11997_v1 = vpop.f32.mrb[62].mxu0 }
 0xef1   : > { %v11998_v31 = vpop.f32.mrb[63].mxu0 }
 0xef2   : > { %v10718_v60 = vadd.f32 %v11996_v39, %v10535_v52 }
 0xef4   : > { %v10719_v62 = vsub.f32 0.0, %v10718_v60 }
 0xef6   : > { %v10720_v34 = vmul.f32 1.442695, %v10719_v62 }
 0xef8   : > { %13828 = vpow2.f32 %v10720_v34 }
 0xf02   : > { %v13829_v20 = vpop.eup %13828 }
 0xf03   : > { %v10722_v0 = vadd.f32 1.0, %v13829_v20 }
 0xf05   : > { %13830 = vrcp.f32 %v10722_v0 }
 0xf0f   : > { %v13831_v8 = vpop.eup %13830 }
 0xf10   : > { %10725 = vst [vmem:[%s570_s21] sm:$0x1] %v13831_v8 }
 0xf11 PF: > { %s17627_s15 = sld [smem:[#allocation30_spill]] }
 0xf17   : > { %s29_s25 = sadd.s32 1, %s17627_s15  }
 0xf18   : > { %p26_p13 = scmp.ge.s32.totalorder %s29_s25, 4  }
 0xf1a   :  { %28 = sbr.rel (!%p26_p13) target bundleno = 8 (0x8), region = 145 }
 0xf21   :  { %10743 = vsyncpa [#allocation9], 1 }
 0xf22   :  { %10745 = vsyncpa [#allocation9 + $0x1], 1 }
 0xf23   :  { %10746 = vsyncpa [#allocation11], 1 }
 0xf24   :  { %10747 = vsyncpa [#allocation14], 1 }
 0xf25   :  { %10748 = vsyncpa [#allocation17], 1 }
 0xf26   :  { %10749 = vsyncpa [#allocation20], 1 }
 0xf27   :  { %10750 = vsyncpa [#allocation23], 1 }

</bundles_post_ra>
